<compile_context>
chip_gen: v5e
topology: v5e:2x2
jax: 0.10.0
libtpu: 0.0.40
codegen_flags: <defaults>
</compile_context>

<pallas_src>
import functools

import jax
import jax.numpy as jnp
from jax.experimental import pallas as pl
from jax.experimental.pallas import tpu as pltpu


def linear_relu_kernel(x_ref, w_ref, b_ref, o_ref, *, kt):
    # grid = (n_split [parallel over N], kt [arbitrary / K reduction]).
    k = pl.program_id(1)
    # bf16 x bf16 MXU matmul with f32 accumulation (x tile cast is (1, tk) -> tiny).
    acc = jnp.dot(
        x_ref[...].astype(jnp.bfloat16),
        w_ref[0],
        preferred_element_type=jnp.float32,
    )

    if kt == 1:
        o_ref[...] = jnp.maximum(acc + b_ref[...], 0.0)
    else:
        @pl.when(k == 0)
        def _():
            # First K step: write directly, skip zero-init + read-modify-write.
            o_ref[...] = acc

        @pl.when((k > 0) & (k < kt - 1))
        def _():
            o_ref[...] += acc

        @pl.when(k == kt - 1)
        def _():
            # Last K step: fused accumulate + bias + ReLU in one pass.
            o_ref[...] = jnp.maximum(o_ref[...] + acc + b_ref[...], 0.0)


def _pick_n_split(N):
    """Split N two ways only on chips with two TensorCores (v7x-like)."""
    n_split = 2
    try:
        info = pltpu.get_tpu_info()
        vmem_bytes = getattr(info, "vmem_capacity_bytes", None)
        if vmem_bytes is not None and vmem_bytes >= 100 * 1024 * 1024:
            n_split = 1  # v5e / v6e: single TensorCore -> no point splitting N.
    except Exception:
        pass  # unknown chip: 2-way split is correct and nearly free.
    if N % n_split != 0 or (N // n_split) % 128 != 0:
        n_split = 1
    return n_split


def linear_relu(x, w_split, b):
    """y = relu(x @ W^T + b).

    x:       (M, K)                      float32
    w_split: (n_split, K, N // n_split)  bfloat16 (pre-transposed, pre-split W)
    b:       (1, N)                      float32
    """
    M, K = x.shape
    n_split, K2, tn = w_split.shape
    N = n_split * tn
    assert K == K2 and b.shape == (1, N)

    # ~8 MiB bf16 weight blocks; guards only matter for non-4096 shapes.
    tk = min(1024, K)
    while K % tk != 0 or tk % 8 != 0:
        tk //= 2
        if tk < 8:
            tk = K  # single full-extent K block (always legal)
            break
    kt = K // tk

    cost = pl.CostEstimate(
        flops=2 * M * K * N,
        transcendentals=0,
        bytes_accessed=K * N * 2 + (M * K + N + M * N) * 4,
    )

    kernel = functools.partial(linear_relu_kernel, kt=kt)

    return pl.pallas_call(
        kernel,
        out_shape=jax.ShapeDtypeStruct((M, N), jnp.float32),
        grid_spec=pltpu.PrefetchScalarGridSpec(
            num_scalar_prefetch=0,
            grid=(n_split, kt),
            in_specs=[
                pl.BlockSpec((M, tk), lambda j, k: (0, k)),         # x, streamed over K
                pl.BlockSpec((1, tk, tn), lambda j, k: (j, k, 0)),  # contiguous W blocks
                pl.BlockSpec((1, tn), lambda j, k: (0, j)),         # bias, const over k
            ],
            out_specs=pl.BlockSpec((M, tn), lambda j, k: (0, j)),   # resident over k
        ),
        compiler_params=pltpu.CompilerParams(
            # TODO(synk): on v7x, confirm both TensorCores stream (trace); if a
            # single TC is seen, switch axis 0 to pltpu.CORE_PARALLEL.
            dimension_semantics=("parallel", "arbitrary"),
            vmem_limit_bytes=40 * 1024 * 1024,
        ),
        cost_estimate=cost,
    )(x, w_split, b)


class LinearReLU:
    """JAX/Pallas equivalent of the PyTorch module M: Linear(4096, 4096) + ReLU."""

    def __init__(self, key, in_features=4096, out_features=4096):
        kw, kb = jax.random.split(key)
        bound = 1.0 / (in_features ** 0.5)
        # PyTorch convention: weight stored (out, in); f32 master copy kept for reference.
        self.weight = jax.random.uniform(
            kw, (out_features, in_features), jnp.float32, -bound, bound
        )
        self.bias = jax.random.uniform(
            kb, (out_features,), jnp.float32, -bound, bound
        )

        K, N = in_features, out_features
        n_split = _pick_n_split(N)
        tn = N // n_split
        # Done ONCE at construction: transpose -> bf16 -> split along N so every
        # block the kernel streams is contiguous in HBM.
        self.w_t_bf16 = jnp.asarray(self.weight.T, dtype=jnp.bfloat16)       # (K, N)
        self.w_split = self.w_t_bf16.reshape(K, n_split, tn).transpose(1, 0, 2)  # (n_split, K, tn)
        self.b2d = self.bias.reshape(1, -1)                                   # (1, N)
        self._apply = jax.jit(linear_relu)

    def __call__(self, x):
        return self._apply(x, self.w_split, self.b2d)


if __name__ == "__main__":
    key = jax.random.PRNGKey(0)
    k_param, k_x = jax.random.split(key)

    # Shapes implied by the module's forward: x42 is (1, 4096), Linear(4096, 4096).
    model = LinearReLU(k_param, in_features=4096, out_features=4096)
    x42 = jax.random.normal(k_x, (1, 4096), dtype=jnp.float32)

    y = jax.block_until_ready(model(x42))
    assert y.shape == (1, 4096)

    # Tight check against the same math the kernel does (bf16 weights, f32 accumulation).
    ref_bf16 = jnp.maximum(
        jnp.dot(
            x42.astype(jnp.bfloat16), model.w_t_bf16,
            preferred_element_type=jnp.float32,
        )
        + model.b2d,
        0.0,
    )
    assert jnp.allclose(y, ref_bf16, atol=2e-3, rtol=2e-3), "mismatch vs bf16 reference"

    # Loose sanity check vs the original f32 PyTorch-style math (bf16 weight
    # quantization introduces ~1e-2 relative error over a 4096-deep reduction).
    ref_f32 = jnp.maximum(x42 @ model.weight.T + model.bias, 0.0)
    assert jnp.allclose(y, ref_f32, atol=5e-2, rtol=5e-2), "mismatch vs f32 reference"

    print("KERNEL_OK")
</pallas_src>

<mosaic_0001>
module attributes {stable_mosaic.version = 11 : i64} {
  func.func @linear_relu_kernel(%arg0: i32, %arg1: i32, %arg2: memref<1x1024xf32, #tpu.memory_space<vmem>>, %arg3: memref<1x1024x2048xbf16, #tpu.memory_space<vmem>>, %arg4: memref<1x2048xf32, #tpu.memory_space<vmem>>, %arg5: memref<1x2048xf32, #tpu.memory_space<vmem>>) attributes {dimension_semantics = [#tpu.dimension_semantics<parallel>, #tpu.dimension_semantics<arbitrary>], iteration_bounds = array<i64: 2, 4>, scalar_prefetch = 0 : i64, scratch_operands = 0 : i64, tpu.core_type = #tpu.core_type<tc>, window_params = [{transform_indices = @transform_0, window_bounds = array<i64: 1, 1024>}, {transform_indices = @transform_1, window_bounds = array<i64: 1, 1024, 2048>}, {transform_indices = @transform_2, window_bounds = array<i64: 1, 2048>}, {transform_indices = @transform_3, window_bounds = array<i64: 1, 2048>}]} {
    %c0 = arith.constant 0 : index
    %c0_0 = arith.constant 0 : index
    %0 = vector.load %arg2[%c0, %c0_0] : memref<1x1024xf32, #tpu.memory_space<vmem>>, vector<1x1024xf32>
    %1 = arith.truncf %0 : vector<1x1024xf32> to vector<1x1024xbf16>
    %c0_1 = arith.constant 0 : index
    %c0_2 = arith.constant 0 : index
    %c0_3 = arith.constant 0 : index
    %2 = vector.load %arg3[%c0_1, %c0_2, %c0_3] : memref<1x1024x2048xbf16, #tpu.memory_space<vmem>>, vector<1x1024x2048xbf16>
    %3 = vector.shape_cast %2 : vector<1x1024x2048xbf16> to vector<1024x2048xbf16>
    %cst = arith.constant dense<0.000000e+00> : vector<1x2048xf32>
    %4 = tpu.matmul %1, %3, %cst {dimension_numbers = #tpu.dot_dimension_numbers<[1], [0], [0], [1], [0, 0, 1, 1], [], []>} : vector<1x1024xbf16>, vector<1024x2048xbf16>, vector<1x2048xf32> -> vector<1x2048xf32>
    %c0_i32 = arith.constant 0 : i32
    %5 = arith.cmpi eq, %arg1, %c0_i32 : i32
    %6 = arith.extui %5 : i1 to i32
    %c0_i32_4 = arith.constant 0 : i32
    %7 = arith.cmpi ne, %6, %c0_i32_4 : i32
    scf.if %7 {
      %c0_9 = arith.constant 0 : index
      %c0_10 = arith.constant 0 : index
      %16 = vector.load %arg5[%c0_9, %c0_10] : memref<1x2048xf32, #tpu.memory_space<vmem>>, vector<1x2048xf32>
      tpu.vector_store %arg5[%c0_9, %c0_10], %4 {strides = array<i32>} : memref<1x2048xf32, #tpu.memory_space<vmem>>, vector<1x2048xf32>,
    } else {
    }
    %c0_i32_5 = arith.constant 0 : i32
    %8 = arith.cmpi sgt, %arg1, %c0_i32_5 : i32
    %c3_i32 = arith.constant 3 : i32
    %9 = arith.cmpi slt, %arg1, %c3_i32 : i32
    %10 = arith.andi %8, %9 : i1
    %11 = arith.extui %10 : i1 to i32
    %c0_i32_6 = arith.constant 0 : i32
    %12 = arith.cmpi ne, %11, %c0_i32_6 : i32
    scf.if %12 {
      %c0_9 = arith.constant 0 : index
      %c0_10 = arith.constant 0 : index
      %16 = vector.load %arg5[%c0_9, %c0_10] : memref<1x2048xf32, #tpu.memory_space<vmem>>, vector<1x2048xf32>
      %17 = arith.addf %16, %4 : vector<1x2048xf32>
      %c0_11 = arith.constant 0 : index
      %c0_12 = arith.constant 0 : index
      %18 = vector.load %arg5[%c0_11, %c0_12] : memref<1x2048xf32, #tpu.memory_space<vmem>>, vector<1x2048xf32>
      tpu.vector_store %arg5[%c0_11, %c0_12], %17 {strides = array<i32>} : memref<1x2048xf32, #tpu.memory_space<vmem>>, vector<1x2048xf32>,
    } else {
    }
    %c3_i32_7 = arith.constant 3 : i32
    %13 = arith.cmpi eq, %arg1, %c3_i32_7 : i32
    %14 = arith.extui %13 : i1 to i32
    %c0_i32_8 = arith.constant 0 : i32
    %15 = arith.cmpi ne, %14, %c0_i32_8 : i32
    scf.if %15 {
      %c0_9 = arith.constant 0 : index
      %c0_10 = arith.constant 0 : index
      %16 = vector.load %arg5[%c0_9, %c0_10] : memref<1x2048xf32, #tpu.memory_space<vmem>>, vector<1x2048xf32>
      %17 = arith.addf %16, %4 : vector<1x2048xf32>
      %c0_11 = arith.constant 0 : index
      %c0_12 = arith.constant 0 : index
      %18 = vector.load %arg4[%c0_11, %c0_12] : memref<1x2048xf32, #tpu.memory_space<vmem>>, vector<1x2048xf32>
      %19 = arith.addf %17, %18 : vector<1x2048xf32>
      %cst_13 = arith.constant 0.000000e+00 : f32
      %20 = vector.broadcast %cst_13 : f32 to vector<1x2048xf32>
      %21 = arith.maximumf %19, %20 : vector<1x2048xf32>
      %c0_14 = arith.constant 0 : index
      %c0_15 = arith.constant 0 : index
      %22 = vector.load %arg5[%c0_14, %c0_15] : memref<1x2048xf32, #tpu.memory_space<vmem>>, vector<1x2048xf32>
      tpu.vector_store %arg5[%c0_14, %c0_15], %21 {strides = array<i32>} : memref<1x2048xf32, #tpu.memory_space<vmem>>, vector<1x2048xf32>,
    } else {
    }
    return
  }
  func.func @transform_0(%arg0: i32, %arg1: i32) -> (i32, i32) {
    %c0_i32 = arith.constant 0 : i32
    %c0_i32_0 = arith.constant 0 : i32
    return %c0_i32, %arg1 : i32, i32
  }
  func.func @transform_1(%arg0: i32, %arg1: i32) -> (i32, i32, i32) {
    %c0_i32 = arith.constant 0 : i32
    %c0_i32_0 = arith.constant 0 : i32
    return %arg0, %arg1, %c0_i32 : i32, i32, i32
  }
  func.func @transform_2(%arg0: i32, %arg1: i32) -> (i32, i32) {
    %c0_i32 = arith.constant 0 : i32
    %c0_i32_0 = arith.constant 0 : i32
    return %c0_i32, %arg0 : i32, i32
  }
  func.func @transform_3(%arg0: i32, %arg1: i32) -> (i32, i32) {
    %c0_i32 = arith.constant 0 : i32
    %c0_i32_0 = arith.constant 0 : i32
    return %c0_i32, %arg0 : i32, i32
  }
}

</mosaic_0001>

<bundles_post_ra>
// kernel: linear_relu.1
= control target key start
LH: loop header
LB: loop body
LE: loop exit
PB: predicated region body
PF: predicated region fallthrough
CT: control target
= control target key end

     0   :  { %s16698_s0 = inlined_call_operand.hbm [shape: f32[1,4096], index: 0, kind: input, shape index: {}]   ;;  %s16699_s1 = inlined_call_operand.hbm [shape: bf16[2,4096,2048], index: 1, kind: input, shape index: {}]   ;;  %s16700_s2 = inlined_call_operand.hbm [shape: f32[1,4096], index: 2, kind: input, shape index: {}]   ;;  %s16701_s3 = inlined_call_operand.hbm [shape: f32[1,4096], index: 3, kind: output, shape index: {}]  }
   0x1   :  { %16707 = sst [smem:[#allocation19_spill]] %s16698_s0 }
   0x2   :  { %16708 = sst [smem:[#allocation20_spill]] %s16699_s1 }
   0x3   :  { %16709 = sst [smem:[#allocation21_spill]] %s16700_s2 }
   0x4   :  { %16710 = sst [smem:[#allocation22_spill]] %s16701_s3 }
   0x5   :  { %8 = vsyncpa [#allocation3], 0 }
   0x6   :  { %10 = vsyncpa [#allocation3 + $0x1], 0 }
   0x7   :  { %11 = vsyncpa [#allocation6], 0 }
   0x8   :  { %13 = vsyncpa [#allocation6 + $0x1], 0 }
   0x9   :  { %14 = vsyncpa [#allocation4], 0 }
   0xa   :  { %16 = vsyncpa [#allocation4 + $0x1], 0  ;;  %s14008_s12 = smov 0   ;;  %s14010_s13 = smov 0  }
   0xb   :  { %s14012_s14 = smov 0   ;;  %s14014_s15 = smov 0  }
   0xc   :  { %s14016_s16 = smov 0   ;;  %s14018_s17 = smov 0  }
   0xd   :  { %s14020_s18 = smov 0   ;;  %s14022_s19 = smov 0  }
   0xe   :  { %s14024_s20 = smov 0   ;;  %s14026_s21 = smov 0  }
   0xf   :  { %s14028_s22 = smov 0   ;;  %s14030_s23 = smov 0  }
  0x10   :  { %s14032_s24 = smov 0   ;;  %s14034_s25 = smov 0  }
  0x11 LB: > { %16711 = sst [smem:[#allocation13_spill]] %s13968_s21  ;;  %s31_s26 = sadd.s32 1, %s13976_s23  ;;  %s13984_s25 = sphi %s14034_s25, %s22_s25   ;;  %s13980_s24 = sphi %s14032_s24, %s16750_s24   ;;  %s13976_s23 = sphi %s14030_s23, %s16749_s23   ;;  %s13972_s22 = sphi %s14028_s22, %s16748_s22   ;;  %s13968_s21 = sphi %s14026_s21, %s16736_s21   ;;  %s13964_s20 = sphi %s14024_s20, %s16747_s20   ;;  %s13960_s19 = sphi %s14022_s19, %s16746_s19   ;;  %s13956_s18 = sphi %s14020_s18, %s16745_s18   ;;  %s13952_s17 = sphi %s14018_s17, %s16744_s17   ;;  %s13948_s16 = sphi %s14016_s16, %s16743_s16   ;;  %s13944_s15 = sphi %s14014_s15, %s16742_s15   ;;  %s13940_s14 = sphi %s14012_s14, %s16741_s14   ;;  %s13936_s13 = sphi %s14010_s13, %s16740_s13   ;;  %s13932_s12 = sphi %s14008_s12, %s16739_s12  }
  0x12   : > { %16712 = sst [smem:[#allocation14_spill]] %s13972_s22  ;;  %s34_s27 = sadd.s32 1, %s13980_s24 }
  0x13   : > { %16713 = sst [smem:[#allocation15_spill]] %s13976_s23  ;;  %p32_p0 = scmp.ge.s32.totalorder %s31_s26, 4 }
  0x14   : > { %p49_p1 = scmp.eq.s32.totalorder %s13984_s25, 0  ;;  %s69_s28 = sadd.s32 1, %s13952_s17 }
  0x15   : > { %p76_p2 = scmp.ne.s32.totalorder %s13952_s17, %s13948_s16  ;;  %s16752_s26 = smov (%p32_p0, %s31_s26), 0 }
  0x16   : > { %16714 = sst [smem:[#allocation16_spill]] %s16752_s26  ;;  %s16754_s27 = smov (!%p32_p0, %s34_s27), %s13980_s24 }
  0x17   : > { %s14089_s29 = ssub.s32 %s13976_s23, %s16752_s26  ;;  %p14093_p3 = por %p76_p2, %p49_p1 }
  0x18   : > { %p36_p4 = scmp.ge.s32.totalorder %s16754_s27, 2  ;;  %p82_p5 = scmp.ne.s32.totalorder %s13948_s16, %s13944_s15 }
  0x19   : > { %p13624_p6 = scmp.lt.s32.totalorder %s13984_s25, 8  ;;  %s177_s4 = sand.u32 1, %s13984_s25  }
  0x1a   : > { %s16756_s27 = smov (%p36_p4, %s16754_s27), 0  ;;  %s179_s5 = sand.u32 1, %s13952_s17  }
  0x1b   : > { %16716 = sst [smem:[#allocation17_spill]] %s16756_s27  ;;  %s14106_s6 = ssub.s32 %s13980_s24, %s16756_s27 }
  0x1c   : > { %s66_s7 = sor.u32 %s14106_s6, %s14089_s29  ;;  %s8463_s8 = sshll.u32 %s179_s5, 13 }
  0x1d   : > { %p67_p7 = scmp.eq.s32.totalorder %s66_s7, 0  ;;  %s12577_s9 = sshll.u32 %s13976_s23, 11 }
  0x1e   : > { %s8466_s10 = sshll.u32 %s13980_s24, 13  ;;  %s181_s3 = scalar_lea.vmem [#allocation5], %s8463_s8 }
  0x1f   : > { %s14113_s11 = scalar_select %p67_p7, %s13952_s17, %s69_s28  }
  0x20   : > { %s187_s26 = sadd.s32 %s12577_s9, %s8466_s10  ;;  %s192_s22 = sshll.u32 %s181_s3, 4  ;;  %s193_s22 = int_to_ptr.vmem [resolvable:$true] %s192_s22 }
  0x21   : > { %s8467_s21 = sshll.u32 %s187_s26, 2  ;;  %s16717_s1 = sld [smem:[#allocation20_spill]] }
  0x22   : > { %p13614_p8 = pnand %p13624_p6, %p14093_p3  ;;  %p8470_p9 = scmp.ge.s32.totalorder %s13984_s25, 1 }
  0x23   : > { %s14123_s3 = scalar_lea.sflag [#allocation6], %s177_s4  ;;  %s13986_s26 = smov 1024  }
  0x24   : > { %s13987_s7 = smov 64   ;;  %p219_p10 = scmp.lt.s32.totalorder %s13984_s25, 9 }
  0x25   : > { %p39_p12 = scmp.eq.s32.totalorder %s14089_s29, 0  ;;  %s41_s27 = sadd.s32 1, %s13964_s20 }
  0x26   : > { %p14127_p11 = pnand %p8470_p9, %p219_p10  ;;  %p48_p13 = scmp.ne.s32.totalorder %s13964_s20, %s13960_s19 }
  0x27   : > { %s189_s5 = scalar_lea.hbm %s16717_s1, %s8467_s21  ;;  %s14132_s21 = sadd.s32 4294967295, %s13984_s25  }
  0x28   : > { %s190_s28 = sshll.u32 %s189_s5, 4  ;;  %p14143_p0 = por %p49_p1, %p48_p13  ;;  %s191_s28 = int_to_ptr.hbm [resolvable:$true] %s190_s28 }
  0x29   : > { %13616 = dma.hbm_to_vmem [thread:$0]  (!%p13614_p8), %s191_s28, 131072, %s193_s22, %s14123_s3, %s13986_s26, %s13986_s26, %s13987_s7  }
  0x2a   : > { %s14139_s30 = scalar_select %p39_p12, %s13964_s20, %s41_s27  }
  0x2b   : > { %p54_p2 = scmp.ne.s32.totalorder %s13960_s19, %s13956_s18  ;;  %p55_p3 = scmp.eq.s32.totalorder %s14132_s21, 0 }
  0x2c   : > { %16719 = sst [smem:[#allocation18_spill]] %s14139_s30  ;;  %s158_s22 = sand.u32 1, %s13964_s20  }
  0x2d   : > { %s8461_s8 = sshll.u32 %s158_s22, 3  ;;  %p14153_p4 = por %p55_p3, %p54_p2 }
  0x2e   : > { %p14162_p7 = por %p82_p5, %p55_p3  ;;  %s8462_s18 = sshll.u32 %s13976_s23, 3 }
  0x2f   : > { %s16723_s0 = sld [smem:[#allocation19_spill]]  ;;  %s162_s26 = scalar_lea.vmem [#allocation2], %s8461_s8 }
  0x30   : > { %s170_s7 = sshll.u32 %s162_s26, 4  ;;  %p13611_p5 = pnand %p13624_p6, %p14143_p0  ;;  %s171_s7 = int_to_ptr.vmem [resolvable:$true] %s170_s7 }
  0x31   : > { %s159_s15 = scalar_lea.sflag [#allocation3], %s158_s22  ;;  %s8458_s1 = sadd.s32 4294967294, %s13984_s25  }
  0x32   : > { %p93_p8 = scmp.eq.s32.totalorder %s14106_s6, 0  ;;  %s95_s23 = sadd.s32 1, %s13940_s14 }
  0x33   : > { %p102_p9 = scmp.ne.s32.totalorder %s13940_s14, %s13936_s13  ;;  %p108_p10 = scmp.ne.s32.totalorder %s13936_s13, %s13932_s12 }
  0x34   : > { %p132_p0 = scmp.eq.s32.totalorder %s14132_s21, 7  ;;  %p138_p2 = scmp.eq.s32.totalorder %s8458_s1, 7 }
  0x35   : > { %s166_s28 = scalar_lea.hbm %s16723_s0, %s8462_s18  ;;  %p14186_p12 = por %p102_p9, %p49_p1 }
  0x36   : > { %s168_s27 = sshll.u32 %s166_s28, 4  ;;  %p14192_p13 = por %p108_p10, %p55_p3  ;;  %s169_s27 = int_to_ptr.hbm [resolvable:$true] %s168_s27 }
  0x37   : > { %13613 = dma.hbm_to_vmem [thread:$0]  (!%p13611_p5), %s169_s27, 128, %s171_s7, %s159_s15  }
  0x38   : > { %s14182_s18 = scalar_select %p93_p8, %s13940_s14, %s95_s23  }
  0x39   : > { %s204_s6 = sand.u32 1, %s13940_s14   ;;  %s8469_s22 = sshll.u32 %s13980_s24, 4 }
  0x3a   : > { %p14199_p5 = por %p132_p0, %p102_p9  ;;  %p14203_p8 = por %p138_p2, %p108_p10 }
  0x3b   : > { %s8468_s5 = sshll.u32 %s204_s6, 4  ;;  %s16728_s7 = sld [smem:[#allocation21_spill]] }
  0x3c   : > { %s206_s0 = scalar_lea.vmem [#allocation7], %s8468_s5  ;;  %p13617_p1 = pnand %p13624_p6, %p14186_p12 }
  0x3d   : > { %s214_s30 = sshll.u32 %s206_s0, 4  ;;  %s225_s1 = sand.u32 (!%p14127_p11), 1, %s13960_s19   ;;  %s215_s30 = int_to_ptr.vmem [resolvable:$true] %s214_s30 }
  0x3e   : > { %s14218_s6 = sshll.u32 (!%p14127_p11), %s225_s1, 3  ;;  %s226_s28 = scalar_lea.sflag (!%p14127_p11), [#allocation3], %s225_s1 }
  0x3f   : > { %223 = sbr.rel (%p14127_p11) target bundleno = 1869 (0x74d), region = 32 }
  0x41   : > { %s210_s27 = scalar_lea.hbm %s16728_s7, %s8469_s22  ;;  %s229_s22 = scalar_lea.vmem (!%p14127_p11), [#allocation2], %s14218_s6 }
  0x42   : > { %s212_s15 = sshll.u32 %s210_s27, 4  ;;  %s213_s15 = int_to_ptr.hbm [resolvable:$true] %s212_s15 }
  0x43   : > { %13619 = dma.hbm_to_vmem [thread:$0]  (!%p13617_p1), %s213_s15, 256, %s215_s30, %s14123_s3  }
  0x44   : > { %13915 = dma.done.wait (%p14153_p4), %s226_s28, 128  }
  0x45   : > { %13917 = vsyncadd (%p14153_p4), %s226_s28, 4294967168  ;;  %s235_s0 = sand.u32 1, %s14132_s21   ;;  %s237_s3 = sand.u32 1, %s13948_s16  }
  0x46   : > { %s8472_s2 = sshll.u32 %s237_s3, 13  ;;  %s236_s30 = scalar_lea.sflag [#allocation6], %s235_s0 }
  0x47   : > { %s14227_s8 = scalar_lea.vmem [#allocation5], %s8472_s2 }
  0x48   : > { %13919 = dma.done.wait (%p14162_p7), %s236_s30, 131072  }
  0x49   : > { %13921 = vsyncadd (%p14162_p7), %s236_s30, 4294836224  ;;  %s247_s5 = sand.u32 1, %s13936_s13  }
  0x4a   : > { %s14236_s29 = sshll.u32 %s247_s5, 4 }
  0x4b   : > { %s249_s26 = scalar_lea.vmem [#allocation7], %s14236_s29 }
  0x4c   : > { %13923 = dma.done.wait (%p14192_p13), %s236_s30, 256  }
  0x4d   : > { %13925 = vsyncadd (%p14192_p13), %s236_s30, 4294967040  ;;  %v8925_v0 = vld [vmem:[%s14227_s8 + $0x380] sm:$0xf]  ;;  %s16519_s21 = scalar_lea.vmem [#allocation8], %s14236_s29  ;;  %s16729_s9 = sld [smem:[#allocation13_spill]] }
  0x4e   : > { %v12698_v1 = vld [vmem:[%s14227_s8 + $0x3bc] sm:$0xf0] }
  0x4f   : > { %v9437_v2 = vld [vmem:[%s14227_s8 + $0x780] sm:$0xf]  ;;  %v8926_v3 = vor.u32 %v12698_v1, %v8925_v0 }
  0x50   : > { %v12826_v4 = vld [vmem:[%s14227_s8 + $0x7bc] sm:$0xf0] }
  0x51   : > { %v9949_v5 = vld [vmem:[%s14227_s8 + $0xb80] sm:$0xf]  ;;  %v9438_v7 = vor.u32 %v12826_v4, %v9437_v2  ;;  %6457 = vmatpush.bf16.msra.mxu0 %v8926_v3 }
  0x52   : > { %v12954_v6 = vld [vmem:[%s14227_s8 + $0xbbc] sm:$0xf0] }
  0x53   : > { %v9950_v8 = vor.u32 %v12954_v6, %v9949_v5  ;;  %v10461_v9 = vld [vmem:[%s14227_s8 + $0xf80] sm:$0xf]  ;;  %6470 = vmatpush.bf16.msra.mxu1 %v9438_v7  ;;  %p12571_p6 = scmp.ne.s32.totalorder %s16729_s9, 0 }
  0x54   : > { %v13082_v10 = vld [vmem:[%s14227_s8 + $0xfbc] sm:$0xf0] }
  0x55   : > { %v8861_v11 = vld [vmem:[%s14227_s8 + $0x300] sm:$0xf]  ;;  %v10462_v12 = vor.u32 %v13082_v10, %v10461_v9  ;;  %6483 = vmatpush.bf16.msra.mxu2 %v9950_v8 }
  0x56   : > { %v12682_v13 = vld [vmem:[%s14227_s8 + $0x33c] sm:$0xf0] }
  0x57   : > { %v9373_v14 = vld [vmem:[%s14227_s8 + $0x700] sm:$0xf]  ;;  %v8862_v16 = vor.u32 %v12682_v13, %v8861_v11  ;;  %6496 = vmatpush.bf16.msra.mxu3 %v10462_v12 }
  0x58   : > { %v12810_v15 = vld [vmem:[%s14227_s8 + $0x73c] sm:$0xf0] }
  0x59   : > { %v9374_v17 = vor.u32 %v12810_v15, %v9373_v14  ;;  %v9885_v18 = vld [vmem:[%s14227_s8 + $0xb00] sm:$0xf]  ;;  %6458 = vmatpush.bf16.msra.mxu0 %v8862_v16 }
  0x5a   : > { %v12938_v19 = vld [vmem:[%s14227_s8 + $0xb3c] sm:$0xf0] }
  0x5b   : > { %v10397_v20 = vld [vmem:[%s14227_s8 + $0xf00] sm:$0xf]  ;;  %v9886_v21 = vor.u32 %v12938_v19, %v9885_v18  ;;  %6471 = vmatpush.bf16.msra.mxu1 %v9374_v17 }
  0x5c   : > { %v13066_v22 = vld [vmem:[%s14227_s8 + $0xf3c] sm:$0xf0] }
  0x5d   : > { %v8797_v23 = vld [vmem:[%s14227_s8 + $0x280] sm:$0xf]  ;;  %v10398_v25 = vor.u32 %v13066_v22, %v10397_v20  ;;  %6484 = vmatpush.bf16.msra.mxu2 %v9886_v21 }
  0x5e   : > { %v12666_v24 = vld [vmem:[%s14227_s8 + $0x2bc] sm:$0xf0] }
  0x5f   : > { %v9309_v26 = vld [vmem:[%s14227_s8 + $0x680] sm:$0xf]  ;;  %v8798_v29 = vor.u32 %v12666_v24, %v8797_v23  ;;  %6497 = vmatpush.bf16.msra.mxu3 %v10398_v25 }
  0x60   : > { %v12794_v27 = vld [vmem:[%s14227_s8 + $0x6bc] sm:$0xf0] }
  0x61   : > { %v9821_v28 = vld [vmem:[%s14227_s8 + $0xa80] sm:$0xf]  ;;  %v9310_v33 = vor.u32 %v12794_v27, %v9309_v26  ;;  %6459 = vmatpush.bf16.msra.mxu0 %v8798_v29 }
  0x62   : > { %v12922_v30 = vld [vmem:[%s14227_s8 + $0xabc] sm:$0xf0] }
  0x63   : > { %v10333_v31 = vld [vmem:[%s14227_s8 + $0xe80] sm:$0xf]  ;;  %v9822_v34 = vor.u32 %v12922_v30, %v9821_v28  ;;  %6472 = vmatpush.bf16.msra.mxu1 %v9310_v33 }
  0x64   : > { %v13050_v32 = vld [vmem:[%s14227_s8 + $0xebc] sm:$0xf0] }
  0x65   : > { %v8733_v35 = vld [vmem:[%s14227_s8 + $0x200] sm:$0xf]  ;;  %v10334_v38 = vor.u32 %v13050_v32, %v10333_v31  ;;  %6485 = vmatpush.bf16.msra.mxu2 %v9822_v34 }
  0x66   : > { %v12650_v36 = vld [vmem:[%s14227_s8 + $0x23c] sm:$0xf0] }
  0x67   : > { %v9245_v37 = vld [vmem:[%s14227_s8 + $0x600] sm:$0xf]  ;;  %v8734_v44 = vor.u32 %v12650_v36, %v8733_v35  ;;  %6498 = vmatpush.bf16.msra.mxu3 %v10334_v38 }
  0x68   : > { %v12778_v39 = vld [vmem:[%s14227_s8 + $0x63c] sm:$0xf0] }
  0x69   : > { %v9757_v40 = vld [vmem:[%s14227_s8 + $0xa00] sm:$0xf]  ;;  %v9246_v45 = vor.u32 %v12778_v39, %v9245_v37  ;;  %6460 = vmatpush.bf16.msra.mxu0 %v8734_v44 }
  0x6a   : > { %v12906_v41 = vld [vmem:[%s14227_s8 + $0xa3c] sm:$0xf0] }
  0x6b   : > { %v10269_v42 = vld [vmem:[%s14227_s8 + $0xe00] sm:$0xf]  ;;  %v9758_v46 = vor.u32 %v12906_v41, %v9757_v40  ;;  %6473 = vmatpush.bf16.msra.mxu1 %v9246_v45 }
  0x6c   : > { %v13034_v43 = vld [vmem:[%s14227_s8 + $0xe3c] sm:$0xf0] }
  0x6d   : > { %v8669_v47 = vld [vmem:[%s14227_s8 + $0x180] sm:$0xf]  ;;  %v10270_v50 = vor.u32 %v13034_v43, %v10269_v42  ;;  %6486 = vmatpush.bf16.msra.mxu2 %v9758_v46 }
  0x6e   : > { %v12634_v48 = vld [vmem:[%s14227_s8 + $0x1bc] sm:$0xf0] }
  0x6f   : > { %v9181_v49 = vld [vmem:[%s14227_s8 + $0x580] sm:$0xf]  ;;  %v8670_v56 = vor.u32 %v12634_v48, %v8669_v47  ;;  %6499 = vmatpush.bf16.msra.mxu3 %v10270_v50 }
  0x70   : > { %v12762_v51 = vld [vmem:[%s14227_s8 + $0x5bc] sm:$0xf0] }
  0x71   : > { %v9693_v52 = vld [vmem:[%s14227_s8 + $0x980] sm:$0xf]  ;;  %v9182_v57 = vor.u32 %v12762_v51, %v9181_v49  ;;  %6461 = vmatpush.bf16.msra.mxu0 %v8670_v56 }
  0x72   : > { %v12890_v53 = vld [vmem:[%s14227_s8 + $0x9bc] sm:$0xf0] }
  0x73   : > { %v10205_v54 = vld [vmem:[%s14227_s8 + $0xd80] sm:$0xf]  ;;  %v9694_v58 = vor.u32 %v12890_v53, %v9693_v52  ;;  %6474 = vmatpush.bf16.msra.mxu1 %v9182_v57 }
  0x74   : > { %v13018_v55 = vld [vmem:[%s14227_s8 + $0xdbc] sm:$0xf0] }
  0x75   : > { %v8605_v59 = vld [vmem:[%s14227_s8 + $0x100] sm:$0xf]  ;;  %v10206_v62 = vor.u32 %v13018_v55, %v10205_v54  ;;  %6487 = vmatpush.bf16.msra.mxu2 %v9694_v58 }
  0x76   : > { %v12618_v60 = vld [vmem:[%s14227_s8 + $0x13c] sm:$0xf0] }
  0x77   : > { %v9117_v61 = vld [vmem:[%s14227_s8 + $0x500] sm:$0xf]  ;;  %v8606_v4 = vor.u32 %v12618_v60, %v8605_v59  ;;  %6500 = vmatpush.bf16.msra.mxu3 %v10206_v62  ;;  %v14329_v59 = vld [vmem:[%s229_s22] sm:$0xff] }
  0x78   : > { %v12746_v63 = vld [vmem:[%s14227_s8 + $0x53c] sm:$0xf0] }
  0x79   : > { %v9629_v0 = vld [vmem:[%s14227_s8 + $0x900] sm:$0xf]  ;;  %v9118_v5 = vor.u32 %v12746_v63, %v9117_v61  ;;  %6462 = vmatpush.bf16.msra.mxu0 %v8606_v4  ;;  %v291_v63 = vperm.slane %v14329_v59, 2 }
  0x7a   : > { %v12874_v1 = vld [vmem:[%s14227_s8 + $0x93c] sm:$0xf0] }
  0x7b   : > { %v10141_v2 = vld [vmem:[%s14227_s8 + $0xd00] sm:$0xf]  ;;  %v9630_v6 = vor.u32 %v12874_v1, %v9629_v0  ;;  %6475 = vmatpush.bf16.msra.mxu1 %v9118_v5  ;;  %v289_v0 = vperm.slane %v14329_v59, 0  ;;  %v14338_v5 = vpack.c.bf16 %v291_v63, %v291_v63 }
  0x7c   : > { %v13002_v3 = vld [vmem:[%s14227_s8 + $0xd3c] sm:$0xf0] }
  0x7d   : > { %v8541_v7 = vld [vmem:[%s14227_s8 + $0x80] sm:$0xf]  ;;  %v10142_v10 = vor.u32 %v13002_v3, %v10141_v2  ;;  %6488 = vmatpush.bf16.msra.mxu2 %v9630_v6  ;;  %v14340_v6 = vpack.c.bf16 %v289_v0, %v289_v0 }
  0x7e   : > { %v12602_v8 = vld [vmem:[%s14227_s8 + $0xbc] sm:$0xf0] }
  0x7f   : > { %v9053_v9 = vld [vmem:[%s14227_s8 + $0x480] sm:$0xf]  ;;  %v8542_v16 = vor.u32 %v12602_v8, %v8541_v7  ;;  %6501 = vmatpush.bf16.msra.mxu3 %v10142_v10 }
  0x80   : > { %v12730_v11 = vld [vmem:[%s14227_s8 + $0x4bc] sm:$0xf0] }
  0x81   : > { %v9565_v12 = vld [vmem:[%s14227_s8 + $0x880] sm:$0xf]  ;;  %v9054_v19 = vor.u32 %v12730_v11, %v9053_v9  ;;  %6463 = vmatpush.bf16.msra.mxu0 %v8542_v16  ;;  %v292_v11 = vperm.slane %v14329_v59, 3 }
  0x82   : > { %v12858_v13 = vld [vmem:[%s14227_s8 + $0x8bc] sm:$0xf0] }
  0x83   : > { %v10077_v14 = vld [vmem:[%s14227_s8 + $0xc80] sm:$0xf]  ;;  %v9566_v20 = vor.u32 %v12858_v13, %v9565_v12  ;;  %6476 = vmatpush.bf16.msra.mxu1 %v9054_v19  ;;  %v290_v12 = vperm.slane %v14329_v59, 1  ;;  %v14353_v19 = vpack.c.bf16 %v292_v11, %v292_v11  ;;  %v9439_v11 = vld [vmem:[%s14227_s8 + $0x7c0] sm:$0xf0] }
  0x84   : > { %v12986_v15 = vld [vmem:[%s14227_s8 + $0xcbc] sm:$0xf0] }
  0x85   : > { %v8477_v17 = vld [vmem:[%s14227_s8] sm:$0xf]  ;;  %v10078_v24 = vor.u32 %v12986_v15, %v10077_v14  ;;  %6489 = vmatpush.bf16.msra.mxu2 %v9566_v20  ;;  %v14355_v20 = vpack.c.bf16 %v290_v12, %v290_v12 }
  0x86   : > { %v12586_v18 = vld [vmem:[%s14227_s8 + $0x3c] sm:$0xf0] }
  0x87   : > { %v8989_v21 = vld [vmem:[%s14227_s8 + $0x400] sm:$0xf]  ;;  %v8478_v31 = vor.u32 %v12586_v18, %v8477_v17  ;;  %6502 = vmatpush.bf16.msra.mxu3 %v10078_v24 }
  0x88   : > { %v12714_v22 = vld [vmem:[%s14227_s8 + $0x43c] sm:$0xf0] }
  0x89   : > { %v9501_v23 = vld [vmem:[%s14227_s8 + $0x800] sm:$0xf]  ;;  %v8990_v35 = vor.u32 %v12714_v22, %v8989_v21  ;;  %6464 = vmatpush.bf16.msra.mxu0 %v8478_v31 }
  0x8a   : > { %v12842_v25 = vld [vmem:[%s14227_s8 + $0x83c] sm:$0xf0] }
  0x8b   : > { %v10013_v26 = vld [vmem:[%s14227_s8 + $0xc00] sm:$0xf]  ;;  %v9502_v36 = vor.u32 %v12842_v25, %v9501_v23  ;;  %6477 = vmatpush.bf16.msra.mxu1 %v8990_v35 }
  0x8c   : > { %v12970_v27 = vld [vmem:[%s14227_s8 + $0xc3c] sm:$0xf0]  ;;  %6465 = vmatmul.bf16.vlgmr.msra.gmra.mxu0 %v14340_v6 }
  0x8d   : > { %v10973_v28 = vld [vmem:[%s14227_s8 + $0x1380] sm:$0xf]  ;;  %v10014_v39 = vor.u32 %v12970_v27, %v10013_v26  ;;  %6490 = vmatpush.bf16.msra.mxu2 %v9502_v36 }
  0x8e   : > { %v13210_v29 = vld [vmem:[%s14227_s8 + $0x13bc] sm:$0xf0]  ;;  %6478 = vmatmul.bf16.vlgmr.msra.gmra.mxu1 %v14355_v20 }
  0x8f   : > { %v11485_v30 = vld [vmem:[%s14227_s8 + $0x1780] sm:$0xf]  ;;  %v10974_v40 = vor.u32 %v13210_v29, %v10973_v28  ;;  %6503 = vmatpush.bf16.msra.mxu3 %v10014_v39 }
  0x90   : > { %v13338_v32 = vld [vmem:[%s14227_s8 + $0x17bc] sm:$0xf0]  ;;  %6491 = vmatmul.bf16.vlgmr.msra.gmra.mxu2 %v14338_v5 }
  0x91   : > { %v11997_v33 = vld [vmem:[%s14227_s8 + $0x1b80] sm:$0xf]  ;;  %v11486_v41 = vor.u32 %v13338_v32, %v11485_v30  ;;  %6509 = vmatpush.bf16.msrb.mxu0 %v10974_v40 }
  0x92   : > { %v13466_v34 = vld [vmem:[%s14227_s8 + $0x1bbc] sm:$0xf0]  ;;  %6504 = vmatmul.bf16.vlgmr.msra.gmra.mxu3 %v14353_v19 }
  0x93   : > { %v12509_v37 = vld [vmem:[%s14227_s8 + $0x1f80] sm:$0xf]  ;;  %v11998_v42 = vor.u32 %v13466_v34, %v11997_v33  ;;  %6522 = vmatpush.bf16.msrb.mxu1 %v11486_v41 }
  0x94   : > { %v13594_v38 = vld [vmem:[%s14227_s8 + $0x1fbc] sm:$0xf0] }
  0x95   : > { %v10909_v43 = vld [vmem:[%s14227_s8 + $0x1300] sm:$0xf]  ;;  %v12510_v46 = vor.u32 %v13594_v38, %v12509_v37  ;;  %6535 = vmatpush.bf16.msrb.mxu2 %v11998_v42 }
  0x96   : > { %v13194_v44 = vld [vmem:[%s14227_s8 + $0x133c] sm:$0xf0] }
  0x97   : > { %v11421_v45 = vld [vmem:[%s14227_s8 + $0x1700] sm:$0xf]  ;;  %v10910_v52 = vor.u32 %v13194_v44, %v10909_v43  ;;  %6548 = vmatpush.bf16.msrb.mxu3 %v12510_v46 }
  0x98   : > { %v13322_v47 = vld [vmem:[%s14227_s8 + $0x173c] sm:$0xf0] }
  0x99   : > { %v11933_v48 = vld [vmem:[%s14227_s8 + $0x1b00] sm:$0xf]  ;;  %v11422_v55 = vor.u32 %v13322_v47, %v11421_v45  ;;  %6510 = vmatpush.bf16.msrb.mxu0 %v10910_v52 }
  0x9a   : > { %v13450_v49 = vld [vmem:[%s14227_s8 + $0x1b3c] sm:$0xf0] }
  0x9b   : > { %v12445_v50 = vld [vmem:[%s14227_s8 + $0x1f00] sm:$0xf]  ;;  %v11934_v56 = vor.u32 %v13450_v49, %v11933_v48  ;;  %6523 = vmatpush.bf16.msrb.mxu1 %v11422_v55 }
  0x9c   : > { %v13578_v51 = vld [vmem:[%s14227_s8 + $0x1f3c] sm:$0xf0] }
  0x9d   : > { %v10845_v53 = vld [vmem:[%s14227_s8 + $0x1280] sm:$0xf]  ;;  %v12446_v60 = vor.u32 %v13578_v51, %v12445_v50  ;;  %6536 = vmatpush.bf16.msrb.mxu2 %v11934_v56 }
  0x9e   : > { %v13178_v54 = vld [vmem:[%s14227_s8 + $0x12bc] sm:$0xf0] }
  0x9f   : > { %v11357_v57 = vld [vmem:[%s14227_s8 + $0x1680] sm:$0xf]  ;;  %v10846_v3 = vor.u32 %v13178_v54, %v10845_v53  ;;  %6549 = vmatpush.bf16.msrb.mxu3 %v12446_v60 }
  0xa0   : > { %v13306_v58 = vld [vmem:[%s14227_s8 + $0x16bc] sm:$0xf0] }
  0xa1   : > { %v11869_v61 = vld [vmem:[%s14227_s8 + $0x1a80] sm:$0xf]  ;;  %v11358_v7 = vor.u32 %v13306_v58, %v11357_v57  ;;  %6511 = vmatpush.bf16.msrb.mxu0 %v10846_v3 }
  0xa2   : > { %v13434_v62 = vld [vmem:[%s14227_s8 + $0x1abc] sm:$0xf0] }
  0xa3   : > { %v12381_v1 = vld [vmem:[%s14227_s8 + $0x1e80] sm:$0xf]  ;;  %v11870_v8 = vor.u32 %v13434_v62, %v11869_v61  ;;  %6524 = vmatpush.bf16.msrb.mxu1 %v11358_v7 }
  0xa4   : > { %v13562_v2 = vld [vmem:[%s14227_s8 + $0x1ebc] sm:$0xf0] }
  0xa5   : > { %v10781_v4 = vld [vmem:[%s14227_s8 + $0x1200] sm:$0xf]  ;;  %v12382_v13 = vor.u32 %v13562_v2, %v12381_v1  ;;  %6537 = vmatpush.bf16.msrb.mxu2 %v11870_v8  ;;  %v12690_v8 = vld [vmem:[%s14227_s8 + $0x384] sm:$0xf] }
  0xa6   : > { %v13162_v9 = vld [vmem:[%s14227_s8 + $0x123c] sm:$0xf0] }
  0xa7   : > { %v11293_v10 = vld [vmem:[%s14227_s8 + $0x1600] sm:$0xf]  ;;  %v10782_v21 = vor.u32 %v13162_v9, %v10781_v4  ;;  %6550 = vmatpush.bf16.msrb.mxu3 %v12382_v13  ;;  %v8927_v9 = vld [vmem:[%s14227_s8 + $0x3c0] sm:$0xf0] }
  0xa8   : > { %v13290_v14 = vld [vmem:[%s14227_s8 + $0x163c] sm:$0xf0]  ;;  %v12946_v13 = vld [vmem:[%s14227_s8 + $0xb84] sm:$0xf] }
  0xa9   : > { %v11805_v15 = vld [vmem:[%s14227_s8 + $0x1a00] sm:$0xf]  ;;  %v11294_v22 = vor.u32 %v13290_v14, %v11293_v10  ;;  %6512 = vmatpush.bf16.msrb.mxu0 %v10782_v21  ;;  %v12818_v10 = vld [vmem:[%s14227_s8 + $0x784] sm:$0xf] }
  0xaa   : > { %v13418_v16 = vld [vmem:[%s14227_s8 + $0x1a3c] sm:$0xf0]  ;;  %v9951_v14 = vld [vmem:[%s14227_s8 + $0xbc0] sm:$0xf0] }
  0xab   : > { %v12317_v17 = vld [vmem:[%s14227_s8 + $0x1e00] sm:$0xf]  ;;  %v11806_v23 = vor.u32 %v13418_v16, %v11805_v15  ;;  %6525 = vmatpush.bf16.msrb.mxu1 %v11294_v22  ;;  %v295_v15 = vperm.slane %v14329_v59, 6  ;;  %v10463_v21 = vld [vmem:[%s14227_s8 + $0xfc0] sm:$0xf0]  ;;  %v293_v22 = vperm.slane %v14329_v59, 4 }
  0xac   : > { %v13546_v18 = vld [vmem:[%s14227_s8 + $0x1e3c] sm:$0xf0] }
  0xad   : > { %v10717_v24 = vld [vmem:[%s14227_s8 + $0x1180] sm:$0xf]  ;;  %v12318_v27 = vor.u32 %v13546_v18, %v12317_v17  ;;  %6538 = vmatpush.bf16.msrb.mxu2 %v11806_v23  ;;  %v13074_v18 = vld [vmem:[%s14227_s8 + $0xf84] sm:$0xf]  ;;  %v296_v23 = vperm.slane %v14329_v59, 7 }
  0xae   : > { %v13146_v25 = vld [vmem:[%s14227_s8 + $0x11bc] sm:$0xf0] }
  0xaf   : > { %v11229_v26 = vld [vmem:[%s14227_s8 + $0x1580] sm:$0xf]  ;;  %v10718_v33 = vor.u32 %v13146_v25, %v10717_v24  ;;  %6551 = vmatpush.bf16.msrb.mxu3 %v12318_v27  ;;  %v8930_v25 = vor.u32 %v12690_v8, %v8927_v9  ;;  %v9442_v27 = vor.u32 %v12818_v10, %v9439_v11  ;;  %v8671_v8 = vld [vmem:[%s14227_s8 + $0x1c0] sm:$0xf0] }
  0xb0   : > { %v13274_v28 = vld [vmem:[%s14227_s8 + $0x15bc] sm:$0xf0]  ;;  %v12754_v9 = vld [vmem:[%s14227_s8 + $0x584] sm:$0xf] }
  0xb1   : > { %v11741_v29 = vld [vmem:[%s14227_s8 + $0x1980] sm:$0xf]  ;;  %v11230_v34 = vor.u32 %v13274_v28, %v11229_v26  ;;  %6513 = vmatpush.bf16.msrb.mxu0 %v10718_v33  ;;  %v294_v26 = vperm.slane %v14329_v59, 5  ;;  %v9954_v28 = vor.u32 %v12946_v13, %v9951_v14  ;;  %v9375_v33 = vld [vmem:[%s14227_s8 + $0x740] sm:$0xf0]  ;;  %v14413_v59 = vpack.c.bf16 %v293_v22, %v293_v22 }
  0xb2   : > { %v13402_v30 = vld [vmem:[%s14227_s8 + $0x19bc] sm:$0xf0]  ;;  %v9183_v11 = vld [vmem:[%s14227_s8 + $0x5c0] sm:$0xf0] }
  0xb3   : > { %v12253_v31 = vld [vmem:[%s14227_s8 + $0x1d80] sm:$0xf]  ;;  %v11742_v35 = vor.u32 %v13402_v30, %v11741_v29  ;;  %6526 = vmatpush.bf16.msrb.mxu1 %v11230_v34  ;;  %v12674_v29 = vld [vmem:[%s14227_s8 + $0x304] sm:$0xf] }
  0xb4   : > { %v13530_v32 = vld [vmem:[%s14227_s8 + $0x1dbc] sm:$0xf0]  ;;  %v8863_v30 = vld [vmem:[%s14227_s8 + $0x340] sm:$0xf0] }
  0xb5   : > { %v10653_v36 = vld [vmem:[%s14227_s8 + $0x1100] sm:$0xf]  ;;  %v12254_v39 = vor.u32 %v13530_v32, %v12253_v31  ;;  %6539 = vmatpush.bf16.msrb.mxu2 %v11742_v35  ;;  %v12802_v31 = vld [vmem:[%s14227_s8 + $0x704] sm:$0xf]  ;;  %v10466_v32 = vor.u32 %v13074_v18, %v10463_v21 }
  0xb6   : > { %v13130_v37 = vld [vmem:[%s14227_s8 + $0x113c] sm:$0xf0]  ;;  %v12930_v34 = vld [vmem:[%s14227_s8 + $0xb04] sm:$0xf] }
  0xb7   : > { %v11165_v38 = vld [vmem:[%s14227_s8 + $0x1500] sm:$0xf]  ;;  %v10654_v45 = vor.u32 %v13130_v37, %v10653_v36  ;;  %6552 = vmatpush.bf16.msrb.mxu3 %v12254_v39  ;;  %v9887_v35 = vld [vmem:[%s14227_s8 + $0xb40] sm:$0xf0]  ;;  %v14409_v36 = vpack.c.bf16 %v295_v15, %v295_v15  ;;  %v14415_v39 = vpack.c.bf16 %v296_v23, %v296_v23 }
  0xb8   : > { %v13258_v40 = vld [vmem:[%s14227_s8 + $0x153c] sm:$0xf0]  ;;  %v13058_v37 = vld [vmem:[%s14227_s8 + $0xf04] sm:$0xf] }
  0xb9   : > { %v11677_v41 = vld [vmem:[%s14227_s8 + $0x1900] sm:$0xf]  ;;  %v11166_v46 = vor.u32 %v13258_v40, %v11165_v38  ;;  %6514 = vmatpush.bf16.msrb.mxu0 %v10654_v45  ;;  %v10399_v38 = vld [vmem:[%s14227_s8 + $0xf40] sm:$0xf0]  ;;  %v8866_v40 = vor.u32 %v12674_v29, %v8863_v30 }
  0xba   : > { %v13386_v42 = vld [vmem:[%s14227_s8 + $0x193c] sm:$0xf0]  ;;  %v8799_v45 = vld [vmem:[%s14227_s8 + $0x2c0] sm:$0xf0] }
  0xbb   : > { %v12189_v43 = vld [vmem:[%s14227_s8 + $0x1d00] sm:$0xf]  ;;  %v11678_v47 = vor.u32 %v13386_v42, %v11677_v41  ;;  %6527 = vmatpush.bf16.msrb.mxu1 %v11166_v46  ;;  %v14417_v41 = vpack.c.bf16 %v294_v26, %v294_v26  ;;  %v9378_v42 = vor.u32 %v12802_v31, %v9375_v33  ;;  %v12786_v46 = vld [vmem:[%s14227_s8 + $0x684] sm:$0xf] }
  0xbc   : > { %v13514_v44 = vld [vmem:[%s14227_s8 + $0x1d3c] sm:$0xf0]  ;;  %v9695_v13 = vld [vmem:[%s14227_s8 + $0x9c0] sm:$0xf0] }
  0xbd   : > { %v10589_v48 = vld [vmem:[%s14227_s8 + $0x1080] sm:$0xf]  ;;  %v12190_v51 = vor.u32 %v13514_v44, %v12189_v43  ;;  %6540 = vmatpush.bf16.msrb.mxu2 %v11678_v47  ;;  %v9890_v43 = vor.u32 %v12930_v34, %v9887_v35  ;;  %v12658_v44 = vld [vmem:[%s14227_s8 + $0x284] sm:$0xf]  ;;  %v10402_v47 = vor.u32 %v13058_v37, %v10399_v38 }
  0xbe   : > { %v13114_v49 = vld [vmem:[%s14227_s8 + $0x10bc] sm:$0xf0]  ;;  %v13010_v14 = vld [vmem:[%s14227_s8 + $0xd84] sm:$0xf] }
  0xbf   : > { %v11101_v50 = vld [vmem:[%s14227_s8 + $0x1480] sm:$0xf]  ;;  %v10590_v57 = vor.u32 %v13114_v49, %v10589_v48  ;;  %6553 = vmatpush.bf16.msrb.mxu3 %v12190_v51  ;;  %v9311_v48 = vld [vmem:[%s14227_s8 + $0x6c0] sm:$0xf0] }
  0xc0   : > { %v13242_v52 = vld [vmem:[%s14227_s8 + $0x14bc] sm:$0xf0]  ;;  %v12914_v49 = vld [vmem:[%s14227_s8 + $0xa84] sm:$0xf] }
  0xc1   : > { %v11613_v53 = vld [vmem:[%s14227_s8 + $0x1880] sm:$0xf]  ;;  %v11102_v62 = vor.u32 %v13242_v52, %v11101_v50  ;;  %6515 = vmatpush.bf16.msrb.mxu0 %v10590_v57  ;;  %v9823_v50 = vld [vmem:[%s14227_s8 + $0xac0] sm:$0xf0] }
  0xc2   : > { %v13370_v54 = vld [vmem:[%s14227_s8 + $0x18bc] sm:$0xf0]  ;;  %v13042_v51 = vld [vmem:[%s14227_s8 + $0xe84] sm:$0xf] }
  0xc3   : > { %v12125_v55 = vld [vmem:[%s14227_s8 + $0x1c80] sm:$0xf]  ;;  %v11614_v63 = vor.u32 %v13370_v54, %v11613_v53  ;;  %6528 = vmatpush.bf16.msrb.mxu1 %v11102_v62  ;;  %v10335_v52 = vld [vmem:[%s14227_s8 + $0xec0] sm:$0xf0]  ;;  %v8802_v53 = vor.u32 %v12658_v44, %v8799_v45  ;;  %v9314_v54 = vor.u32 %v12786_v46, %v9311_v48 }
  0xc4   : > { %v13498_v56 = vld [vmem:[%s14227_s8 + $0x1cbc] sm:$0xf0]  ;;  %v8735_v57 = vld [vmem:[%s14227_s8 + $0x240] sm:$0xf0] }
  0xc5   : > { %v10525_v58 = vld [vmem:[%s14227_s8 + $0x1000] sm:$0xf]  ;;  %v12126_v3 = vor.u32 %v13498_v56, %v12125_v55  ;;  %6541 = vmatpush.bf16.msrb.mxu2 %v11614_v63  ;;  %v9826_v55 = vor.u32 %v12914_v49, %v9823_v50  ;;  %v12642_v56 = vld [vmem:[%s14227_s8 + $0x204] sm:$0xf] }
  0xc6   : > { %v13098_v60 = vld [vmem:[%s14227_s8 + $0x103c] sm:$0xf0]  ;;  %v12898_v62 = vld [vmem:[%s14227_s8 + $0xa04] sm:$0xf] }
  0xc7   : > { %v11037_v61 = vld [vmem:[%s14227_s8 + $0x1400] sm:$0xf]  ;;  %v10526_v12 = vor.u32 %v13098_v60, %v10525_v58  ;;  %6554 = vmatpush.bf16.msrb.mxu3 %v12126_v3  ;;  %v12770_v58 = vld [vmem:[%s14227_s8 + $0x604] sm:$0xf]  ;;  %v10338_v60 = vor.u32 %v13042_v51, %v10335_v52 }
  0xc8   : > { %v13226_v0 = vld [vmem:[%s14227_s8 + $0x143c] sm:$0xf0]  ;;  %v9759_v63 = vld [vmem:[%s14227_s8 + $0xa40] sm:$0xf0] }
  0xc9   : > { %v11549_v1 = vld [vmem:[%s14227_s8 + $0x1800] sm:$0xf]  ;;  %v11038_v16 = vor.u32 %v13226_v0, %v11037_v61  ;;  %6516 = vmatpush.bf16.msrb.mxu0 %v10526_v12  ;;  %v9247_v61 = vld [vmem:[%s14227_s8 + $0x640] sm:$0xf0] }
  0xca   : > { %v13354_v2 = vld [vmem:[%s14227_s8 + $0x183c] sm:$0xf0]  ;;  %v13026_v0 = vld [vmem:[%s14227_s8 + $0xe04] sm:$0xf]  ;;  %v9250_v3 = vor.u32 %v12770_v58, %v9247_v61 }
  0xcb   : > { %v12061_v4 = vld [vmem:[%s14227_s8 + $0x1c00] sm:$0xf]  ;;  %v11550_v17 = vor.u32 %v13354_v2, %v11549_v1  ;;  %6529 = vmatpush.bf16.msrb.mxu1 %v11038_v16  ;;  %v10271_v1 = vld [vmem:[%s14227_s8 + $0xe40] sm:$0xf0]  ;;  %v8738_v2 = vor.u32 %v12642_v56, %v8735_v57 }
  0xcc   : > { %v13482_v7 = vld [vmem:[%s14227_s8 + $0x1c3c] sm:$0xf0]  ;;  %6517 = vmatmul.bf16.vlgmr.msrb.gmra.mxu0 %v14413_v59  ;;  %v10274_v10 = vor.u32 %v13026_v0, %v10271_v1  ;;  %v12882_v12 = vld [vmem:[%s14227_s8 + $0x984] sm:$0xf] }
  0xcd   : > { %v12062_v24 = vor.u32 %v13482_v7, %v12061_v4  ;;  %6542 = vmatpush.bf16.msrb.mxu2 %v11550_v17  ;;  %6561 = vmatpush.bf16.msra.mxu0 %v8930_v25  ;;  %v9762_v4 = vor.u32 %v12898_v62, %v9759_v63  ;;  %v12626_v7 = vld [vmem:[%s14227_s8 + $0x184] sm:$0xf]  ;;  %v9186_v17 = vor.u32 %v12754_v9, %v9183_v11 }
  0xce   : > { %6530 = vmatmul.bf16.vlgmr.msrb.gmra.mxu1 %v14417_v41  ;;  %v10207_v15 = vld [vmem:[%s14227_s8 + $0xdc0] sm:$0xf0]  ;;  %v8674_v16 = vor.u32 %v12626_v7, %v8671_v8  ;;  %v9698_v18 = vor.u32 %v12882_v12, %v9695_v13 }
  0xcf   : > { %6555 = vmatpush.bf16.msrb.mxu3 %v12062_v24  ;;  %6574 = vmatpush.bf16.msra.mxu1 %v9442_v27  ;;  %v12610_v21 = vld [vmem:[%s14227_s8 + $0x104] sm:$0xf]  ;;  %v10210_v24 = vor.u32 %v13010_v14, %v10207_v15 }
  0xd0   : > { %6543 = vmatmul.bf16.vlgmr.msrb.gmra.mxu2 %v14409_v36  ;;  %v8607_v22 = vld [vmem:[%s14227_s8 + $0x140] sm:$0xf0] }
  0xd1   : > { %6587 = vmatpush.bf16.msra.mxu2 %v9954_v28  ;;  %6562 = vmatpush.bf16.msra.mxu0 %v8866_v40  ;;  %v12738_v23 = vld [vmem:[%s14227_s8 + $0x504] sm:$0xf]  ;;  %v8610_v30 = vor.u32 %v12610_v21, %v8607_v22 }
  0xd2   : > { %6556 = vmatmul.bf16.vlgmr.msrb.gmra.mxu3 %v14415_v39  ;;  %v9119_v25 = vld [vmem:[%s14227_s8 + $0x540] sm:$0xf0] }
  0xd3   : > { %6600 = vmatpush.bf16.msra.mxu3 %v10466_v32  ;;  %6575 = vmatpush.bf16.msra.mxu1 %v9378_v42  ;;  %v12866_v26 = vld [vmem:[%s14227_s8 + $0x904] sm:$0xf]  ;;  %v9122_v31 = vor.u32 %v12738_v23, %v9119_v25 }
  0xd4   : > { %v9631_v27 = vld [vmem:[%s14227_s8 + $0x940] sm:$0xf0] }
  0xd5   : > { %6588 = vmatpush.bf16.msra.mxu2 %v9890_v43  ;;  %6563 = vmatpush.bf16.msra.mxu0 %v8802_v53  ;;  %v12994_v28 = vld [vmem:[%s14227_s8 + $0xd04] sm:$0xf]  ;;  %v9634_v32 = vor.u32 %v12866_v26, %v9631_v27 }
  0xd6   : > { %v10143_v29 = vld [vmem:[%s14227_s8 + $0xd40] sm:$0xf0] }
  0xd7   : > { %6601 = vmatpush.bf16.msra.mxu3 %v10402_v47  ;;  %6576 = vmatpush.bf16.msra.mxu1 %v9314_v54  ;;  %v12594_v33 = vld [vmem:[%s14227_s8 + $0x84] sm:$0xf]  ;;  %v10146_v37 = vor.u32 %v12994_v28, %v10143_v29 }
  0xd8   : > { %v8543_v34 = vld [vmem:[%s14227_s8 + $0xc0] sm:$0xf0] }
  0xd9   : > { %6589 = vmatpush.bf16.msra.mxu2 %v9826_v55  ;;  %6564 = vmatpush.bf16.msra.mxu0 %v8738_v2  ;;  %v12722_v35 = vld [vmem:[%s14227_s8 + $0x484] sm:$0xf]  ;;  %v8546_v45 = vor.u32 %v12594_v33, %v8543_v34 }
  0xda   : > { %v9055_v38 = vld [vmem:[%s14227_s8 + $0x4c0] sm:$0xf0] }
  0xdb   : > { %6602 = vmatpush.bf16.msra.mxu3 %v10338_v60  ;;  %6577 = vmatpush.bf16.msra.mxu1 %v9250_v3  ;;  %v12850_v40 = vld [vmem:[%s14227_s8 + $0x884] sm:$0xf]  ;;  %v9058_v48 = vor.u32 %v12722_v35, %v9055_v38 }
  0xdc   : > { %v9567_v42 = vld [vmem:[%s14227_s8 + $0x8c0] sm:$0xf0] }
  0xdd   : > { %6590 = vmatpush.bf16.msra.mxu2 %v9762_v4  ;;  %6565 = vmatpush.bf16.msra.mxu0 %v8674_v16  ;;  %v12978_v43 = vld [vmem:[%s14227_s8 + $0xc84] sm:$0xf]  ;;  %v9570_v49 = vor.u32 %v12850_v40, %v9567_v42 }
  0xde   : > { %v10079_v44 = vld [vmem:[%s14227_s8 + $0xcc0] sm:$0xf0] }
  0xdf   : > { %6603 = vmatpush.bf16.msra.mxu3 %v10274_v10  ;;  %6578 = vmatpush.bf16.msra.mxu1 %v9186_v17  ;;  %v12578_v46 = vld [vmem:[%s14227_s8 + $0x4] sm:$0xf]  ;;  %v10082_v53 = vor.u32 %v12978_v43, %v10079_v44 }
  0xe0   : > { %v8479_v47 = vld [vmem:[%s14227_s8 + $0x40] sm:$0xf0] }
  0xe1   : > { %6591 = vmatpush.bf16.msra.mxu2 %v9698_v18  ;;  %6566 = vmatpush.bf16.msra.mxu0 %v8610_v30  ;;  %v12706_v50 = vld [vmem:[%s14227_s8 + $0x404] sm:$0xf]  ;;  %v8482_v61 = vor.u32 %v12578_v46, %v8479_v47 }
  0xe2   : > { %v8991_v51 = vld [vmem:[%s14227_s8 + $0x440] sm:$0xf0] }
  0xe3   : > { %6604 = vmatpush.bf16.msra.mxu3 %v10210_v24  ;;  %6579 = vmatpush.bf16.msra.mxu1 %v9122_v31  ;;  %v12834_v52 = vld [vmem:[%s14227_s8 + $0x804] sm:$0xf]  ;;  %v8994_v1 = vor.u32 %v12706_v50, %v8991_v51 }
  0xe4   : > { %v9503_v54 = vld [vmem:[%s14227_s8 + $0x840] sm:$0xf0] }
  0xe5   : > { %6592 = vmatpush.bf16.msra.mxu2 %v9634_v32  ;;  %v12962_v55 = vld [vmem:[%s14227_s8 + $0xc04] sm:$0xf]  ;;  %6567 = vmatpush.bf16.msra.mxu0 %v8546_v45  ;;  %v9506_v2 = vor.u32 %v12834_v52, %v9503_v54 }
  0xe6   : > { %v10015_v56 = vld [vmem:[%s14227_s8 + $0xc40] sm:$0xf0] }
  0xe7   : > { %6605 = vmatpush.bf16.msra.mxu3 %v10146_v37  ;;  %v13202_v57 = vld [vmem:[%s14227_s8 + $0x1384] sm:$0xf]  ;;  %6580 = vmatpush.bf16.msra.mxu1 %v9058_v48  ;;  %v10018_v7 = vor.u32 %v12962_v55, %v10015_v56 }
  0xe8   : > { %v10975_v58 = vld [vmem:[%s14227_s8 + $0x13c0] sm:$0xf0] }
  0xe9   : > { %v13330_v60 = vld [vmem:[%s14227_s8 + $0x1784] sm:$0xf]  ;;  %6593 = vmatpush.bf16.msra.mxu2 %v9570_v49  ;;  %v10978_v8 = vor.u32 %v13202_v57, %v10975_v58  ;;  %6568 = vmatpush.bf16.msra.mxu0 %v8482_v61 }
  0xea   : > { %v11487_v62 = vld [vmem:[%s14227_s8 + $0x17c0] sm:$0xf0] }
  0xeb   : > { %v13458_v63 = vld [vmem:[%s14227_s8 + $0x1b84] sm:$0xf]  ;;  %6606 = vmatpush.bf16.msra.mxu3 %v10082_v53  ;;  %v11490_v9 = vor.u32 %v13330_v60, %v11487_v62  ;;  %6581 = vmatpush.bf16.msra.mxu1 %v8994_v1 }
  0xec   : > { %v11999_v0 = vld [vmem:[%s14227_s8 + $0x1bc0] sm:$0xf0]  ;;  %6569 = vmatmul.bf16.vlgmr.msra.gmra.mxu0 %v14340_v6 }
  0xed   : > { %v13586_v3 = vld [vmem:[%s14227_s8 + $0x1f84] sm:$0xf]  ;;  %v12002_v10 = vor.u32 %v13458_v63, %v11999_v0  ;;  %6594 = vmatpush.bf16.msra.mxu2 %v9506_v2  ;;  %6613 = vmatpush.bf16.msrb.mxu0 %v10978_v8 }
  0xee   : > { %v12511_v4 = vld [vmem:[%s14227_s8 + $0x1fc0] sm:$0xf0]  ;;  %6582 = vmatmul.bf16.vlgmr.msra.gmra.mxu1 %v14355_v20 }
  0xef   : > { %v13186_v11 = vld [vmem:[%s14227_s8 + $0x1304] sm:$0xf]  ;;  %v12514_v14 = vor.u32 %v13586_v3, %v12511_v4  ;;  %6607 = vmatpush.bf16.msra.mxu3 %v10018_v7  ;;  %6626 = vmatpush.bf16.msrb.mxu1 %v11490_v9 }
  0xf0   : > { %v10911_v12 = vld [vmem:[%s14227_s8 + $0x1340] sm:$0xf0]  ;;  %6595 = vmatmul.bf16.vlgmr.msra.gmra.mxu2 %v14338_v5 }
  0xf1   : > { %v13314_v13 = vld [vmem:[%s14227_s8 + $0x1704] sm:$0xf]  ;;  %v10914_v22 = vor.u32 %v13186_v11, %v10911_v12  ;;  %6639 = vmatpush.bf16.msrb.mxu2 %v12002_v10 }
  0xf2   : > { %v11423_v15 = vld [vmem:[%s14227_s8 + $0x1740] sm:$0xf0]  ;;  %6608 = vmatmul.bf16.vlgmr.msra.gmra.mxu3 %v14353_v19 }
  0xf3   : > { %v13442_v16 = vld [vmem:[%s14227_s8 + $0x1b04] sm:$0xf]  ;;  %v11426_v23 = vor.u32 %v13314_v13, %v11423_v15  ;;  %6652 = vmatpush.bf16.msrb.mxu3 %v12514_v14  ;;  %6614 = vmatpush.bf16.msrb.mxu0 %v10914_v22 }
  0xf4   : > { %v11935_v17 = vld [vmem:[%s14227_s8 + $0x1b40] sm:$0xf0] }
  0xf5   : > { %v13570_v18 = vld [vmem:[%s14227_s8 + $0x1f04] sm:$0xf]  ;;  %v11938_v24 = vor.u32 %v13442_v16, %v11935_v17  ;;  %6627 = vmatpush.bf16.msrb.mxu1 %v11426_v23 }
  0xf6   : > { %v12447_v21 = vld [vmem:[%s14227_s8 + $0x1f40] sm:$0xf0] }
  0xf7   : > { %v13170_v25 = vld [vmem:[%s14227_s8 + $0x1284] sm:$0xf]  ;;  %v12450_v28 = vor.u32 %v13570_v18, %v12447_v21  ;;  %6640 = vmatpush.bf16.msrb.mxu2 %v11938_v24 }
  0xf8   : > { %v10847_v26 = vld [vmem:[%s14227_s8 + $0x12c0] sm:$0xf0] }
  0xf9   : > { %v13298_v27 = vld [vmem:[%s14227_s8 + $0x1684] sm:$0xf]  ;;  %v10850_v34 = vor.u32 %v13170_v25, %v10847_v26  ;;  %6653 = vmatpush.bf16.msrb.mxu3 %v12450_v28 }
  0xfa   : > { %v11359_v29 = vld [vmem:[%s14227_s8 + $0x16c0] sm:$0xf0] }
  0xfb   : > { %v13426_v30 = vld [vmem:[%s14227_s8 + $0x1a84] sm:$0xf]  ;;  %v11362_v35 = vor.u32 %v13298_v27, %v11359_v29  ;;  %6615 = vmatpush.bf16.msrb.mxu0 %v10850_v34 }
  0xfc   : > { %v11871_v31 = vld [vmem:[%s14227_s8 + $0x1ac0] sm:$0xf0] }
  0xfd   : > { %v13554_v32 = vld [vmem:[%s14227_s8 + $0x1e84] sm:$0xf]  ;;  %v11874_v37 = vor.u32 %v13426_v30, %v11871_v31  ;;  %6628 = vmatpush.bf16.msrb.mxu1 %v11362_v35 }
  0xfe   : > { %v12383_v33 = vld [vmem:[%s14227_s8 + $0x1ec0] sm:$0xf0] }
  0xff   : > { %v13154_v38 = vld [vmem:[%s14227_s8 + $0x1204] sm:$0xf]  ;;  %v12386_v43 = vor.u32 %v13554_v32, %v12383_v33  ;;  %6641 = vmatpush.bf16.msrb.mxu2 %v11874_v37 }
 0x100   : > { %v10783_v40 = vld [vmem:[%s14227_s8 + $0x1240] sm:$0xf0] }
 0x101   : > { %v13282_v42 = vld [vmem:[%s14227_s8 + $0x1604] sm:$0xf]  ;;  %v10786_v49 = vor.u32 %v13154_v38, %v10783_v40  ;;  %6654 = vmatpush.bf16.msrb.mxu3 %v12386_v43  ;;  %v8933_v40 = vld [vmem:[%s14227_s8 + $0x388] sm:$0xf] }
 0x102   : > { %v11295_v44 = vld [vmem:[%s14227_s8 + $0x1640] sm:$0xf0]  ;;  %v9445_v43 = vld [vmem:[%s14227_s8 + $0x788] sm:$0xf] }
 0x103   : > { %v13410_v45 = vld [vmem:[%s14227_s8 + $0x1a04] sm:$0xf]  ;;  %v11298_v50 = vor.u32 %v13282_v42, %v11295_v44  ;;  %6616 = vmatpush.bf16.msrb.mxu0 %v10786_v49  ;;  %v12699_v42 = vld [vmem:[%s14227_s8 + $0x3c4] sm:$0xf0] }
 0x104   : > { %v11807_v46 = vld [vmem:[%s14227_s8 + $0x1a40] sm:$0xf0] }
 0x105   : > { %v13538_v47 = vld [vmem:[%s14227_s8 + $0x1e04] sm:$0xf]  ;;  %v11810_v51 = vor.u32 %v13410_v45, %v11807_v46  ;;  %6629 = vmatpush.bf16.msrb.mxu1 %v11298_v50  ;;  %v12827_v45 = vld [vmem:[%s14227_s8 + $0x7c4] sm:$0xf0] }
 0x106   : > { %v12319_v48 = vld [vmem:[%s14227_s8 + $0x1e40] sm:$0xf0]  ;;  %v9957_v46 = vld [vmem:[%s14227_s8 + $0xb88] sm:$0xf] }
 0x107   : > { %v13138_v52 = vld [vmem:[%s14227_s8 + $0x1184] sm:$0xf]  ;;  %v12322_v55 = vor.u32 %v13538_v47, %v12319_v48  ;;  %6642 = vmatpush.bf16.msrb.mxu2 %v11810_v51  ;;  %v12955_v47 = vld [vmem:[%s14227_s8 + $0xbc4] sm:$0xf0] }
 0x108   : > { %v10719_v53 = vld [vmem:[%s14227_s8 + $0x11c0] sm:$0xf0]  ;;  %v10469_v50 = vld [vmem:[%s14227_s8 + $0xf88] sm:$0xf] }
 0x109   : > { %v13266_v54 = vld [vmem:[%s14227_s8 + $0x1584] sm:$0xf]  ;;  %v10722_v62 = vor.u32 %v13138_v52, %v10719_v53  ;;  %6655 = vmatpush.bf16.msrb.mxu3 %v12322_v55  ;;  %v13083_v51 = vld [vmem:[%s14227_s8 + $0xfc4] sm:$0xf0]  ;;  %v8934_v53 = vor.u32 %v12699_v42, %v8933_v40  ;;  %v9958_v55 = vor.u32 %v12955_v47, %v9957_v46 }
 0x10a   : > { %v11231_v56 = vld [vmem:[%s14227_s8 + $0x15c0] sm:$0xf0]  ;;  %v9701_v40 = vld [vmem:[%s14227_s8 + $0x988] sm:$0xf] }
 0x10b   : > { %v13394_v57 = vld [vmem:[%s14227_s8 + $0x1984] sm:$0xf]  ;;  %v11234_v63 = vor.u32 %v13266_v54, %v11231_v56  ;;  %6617 = vmatpush.bf16.msrb.mxu0 %v10722_v62  ;;  %v9446_v54 = vor.u32 %v12827_v45, %v9445_v43  ;;  %v8869_v56 = vld [vmem:[%s14227_s8 + $0x308] sm:$0xf] }
 0x10c   : > { %v11743_v58 = vld [vmem:[%s14227_s8 + $0x19c0] sm:$0xf0]  ;;  %v9893_v62 = vld [vmem:[%s14227_s8 + $0xb08] sm:$0xf] }
 0x10d   : > { %v13522_v60 = vld [vmem:[%s14227_s8 + $0x1d84] sm:$0xf]  ;;  %v11746_v0 = vor.u32 %v13394_v57, %v11743_v58  ;;  %6630 = vmatpush.bf16.msrb.mxu1 %v11234_v63  ;;  %v12683_v57 = vld [vmem:[%s14227_s8 + $0x344] sm:$0xf0] }
 0x10e   : > { %v12255_v61 = vld [vmem:[%s14227_s8 + $0x1dc0] sm:$0xf0]  ;;  %v9381_v58 = vld [vmem:[%s14227_s8 + $0x708] sm:$0xf] }
 0x10f   : > { %v13122_v1 = vld [vmem:[%s14227_s8 + $0x1104] sm:$0xf]  ;;  %v12258_v4 = vor.u32 %v13522_v60, %v12255_v61  ;;  %6643 = vmatpush.bf16.msrb.mxu2 %v11746_v0  ;;  %v10470_v60 = vor.u32 %v13083_v51, %v10469_v50  ;;  %v12811_v61 = vld [vmem:[%s14227_s8 + $0x744] sm:$0xf0] }
 0x110   : > { %v10655_v2 = vld [vmem:[%s14227_s8 + $0x1140] sm:$0xf0]  ;;  %v12939_v63 = vld [vmem:[%s14227_s8 + $0xb44] sm:$0xf0] }
 0x111   : > { %v13250_v3 = vld [vmem:[%s14227_s8 + $0x1504] sm:$0xf]  ;;  %v10658_v12 = vor.u32 %v13122_v1, %v10655_v2  ;;  %6656 = vmatpush.bf16.msrb.mxu3 %v12258_v4  ;;  %v10405_v0 = vld [vmem:[%s14227_s8 + $0xf08] sm:$0xf]  ;;  %v8870_v2 = vor.u32 %v12683_v57, %v8869_v56  ;;  %v9894_v4 = vor.u32 %v12939_v63, %v9893_v62 }
 0x112   : > { %v11167_v7 = vld [vmem:[%s14227_s8 + $0x1540] sm:$0xf0]  ;;  %v13067_v1 = vld [vmem:[%s14227_s8 + $0xf44] sm:$0xf0] }
 0x113   : > { %v13378_v8 = vld [vmem:[%s14227_s8 + $0x1904] sm:$0xf]  ;;  %v11170_v13 = vor.u32 %v13250_v3, %v11167_v7  ;;  %6618 = vmatpush.bf16.msrb.mxu0 %v10658_v12  ;;  %v9382_v3 = vor.u32 %v12811_v61, %v9381_v58  ;;  %v8805_v7 = vld [vmem:[%s14227_s8 + $0x288] sm:$0xf] }
 0x114   : > { %v11679_v9 = vld [vmem:[%s14227_s8 + $0x1940] sm:$0xf0]  ;;  %v9829_v12 = vld [vmem:[%s14227_s8 + $0xa88] sm:$0xf] }
 0x115   : > { %v13506_v10 = vld [vmem:[%s14227_s8 + $0x1d04] sm:$0xf]  ;;  %v11682_v14 = vor.u32 %v13378_v8, %v11679_v9  ;;  %6631 = vmatpush.bf16.msrb.mxu1 %v11170_v13  ;;  %v12667_v8 = vld [vmem:[%s14227_s8 + $0x2c4] sm:$0xf0] }
 0x116   : > { %v12191_v11 = vld [vmem:[%s14227_s8 + $0x1d40] sm:$0xf0]  ;;  %v9317_v9 = vld [vmem:[%s14227_s8 + $0x688] sm:$0xf] }
 0x117   : > { %v13106_v15 = vld [vmem:[%s14227_s8 + $0x1084] sm:$0xf]  ;;  %v12194_v18 = vor.u32 %v13506_v10, %v12191_v11  ;;  %6644 = vmatpush.bf16.msrb.mxu2 %v11682_v14  ;;  %v10406_v10 = vor.u32 %v13067_v1, %v10405_v0  ;;  %v12795_v11 = vld [vmem:[%s14227_s8 + $0x6c4] sm:$0xf0] }
 0x118   : > { %v10591_v16 = vld [vmem:[%s14227_s8 + $0x10c0] sm:$0xf0]  ;;  %v12923_v13 = vld [vmem:[%s14227_s8 + $0xac4] sm:$0xf0] }
 0x119   : > { %v13234_v17 = vld [vmem:[%s14227_s8 + $0x1484] sm:$0xf]  ;;  %v10594_v26 = vor.u32 %v13106_v15, %v10591_v16  ;;  %6657 = vmatpush.bf16.msrb.mxu3 %v12194_v18  ;;  %v10341_v14 = vld [vmem:[%s14227_s8 + $0xe88] sm:$0xf]  ;;  %v8806_v16 = vor.u32 %v12667_v8, %v8805_v7  ;;  %v9830_v18 = vor.u32 %v12923_v13, %v9829_v12 }
 0x11a   : > { %v11103_v21 = vld [vmem:[%s14227_s8 + $0x14c0] sm:$0xf0]  ;;  %v13051_v15 = vld [vmem:[%s14227_s8 + $0xec4] sm:$0xf0] }
 0x11b   : > { %v13362_v22 = vld [vmem:[%s14227_s8 + $0x1884] sm:$0xf]  ;;  %v11106_v29 = vor.u32 %v13234_v17, %v11103_v21  ;;  %6619 = vmatpush.bf16.msrb.mxu0 %v10594_v26  ;;  %v9318_v17 = vor.u32 %v12795_v11, %v9317_v9  ;;  %v8741_v21 = vld [vmem:[%s14227_s8 + $0x208] sm:$0xf] }
 0x11c   : > { %v11615_v23 = vld [vmem:[%s14227_s8 + $0x18c0] sm:$0xf0]  ;;  %v9765_v26 = vld [vmem:[%s14227_s8 + $0xa08] sm:$0xf] }
 0x11d   : > { %v13490_v24 = vld [vmem:[%s14227_s8 + $0x1c84] sm:$0xf]  ;;  %v11618_v30 = vor.u32 %v13362_v22, %v11615_v23  ;;  %6632 = vmatpush.bf16.msrb.mxu1 %v11106_v29  ;;  %v12651_v22 = vld [vmem:[%s14227_s8 + $0x244] sm:$0xf0] }
 0x11e   : > { %v12127_v25 = vld [vmem:[%s14227_s8 + $0x1cc0] sm:$0xf0]  ;;  %v9253_v23 = vld [vmem:[%s14227_s8 + $0x608] sm:$0xf] }
 0x11f   : > { %v13090_v27 = vld [vmem:[%s14227_s8 + $0x1004] sm:$0xf]  ;;  %v12130_v34 = vor.u32 %v13490_v24, %v12127_v25  ;;  %6645 = vmatpush.bf16.msrb.mxu2 %v11618_v30  ;;  %v10342_v24 = vor.u32 %v13051_v15, %v10341_v14  ;;  %v12779_v25 = vld [vmem:[%s14227_s8 + $0x644] sm:$0xf0]  ;;  %v8742_v30 = vor.u32 %v12651_v22, %v8741_v21 }
 0x120   : > { %v10527_v28 = vld [vmem:[%s14227_s8 + $0x1040] sm:$0xf0]  ;;  %v13035_v29 = vld [vmem:[%s14227_s8 + $0xe44] sm:$0xf0] }
 0x121   : > { %v13218_v31 = vld [vmem:[%s14227_s8 + $0x1404] sm:$0xf]  ;;  %v10530_v44 = vor.u32 %v13090_v27, %v10527_v28  ;;  %6658 = vmatpush.bf16.msrb.mxu3 %v12130_v34  ;;  %v12907_v27 = vld [vmem:[%s14227_s8 + $0xa44] sm:$0xf0] }
 0x122   : > { %v11039_v32 = vld [vmem:[%s14227_s8 + $0x1440] sm:$0xf0]  ;;  %v10277_v28 = vld [vmem:[%s14227_s8 + $0xe08] sm:$0xf] }
 0x123   : > { %v13346_v33 = vld [vmem:[%s14227_s8 + $0x1804] sm:$0xf]  ;;  %v11042_v48 = vor.u32 %v13218_v31, %v11039_v32  ;;  %6620 = vmatpush.bf16.msrb.mxu0 %v10530_v44  ;;  %v9254_v31 = vor.u32 %v12779_v25, %v9253_v23  ;;  %v9766_v32 = vor.u32 %v12907_v27, %v9765_v26  ;;  %v12635_v34 = vld [vmem:[%s14227_s8 + $0x1c4] sm:$0xf0] }
 0x124   : > { %v11551_v35 = vld [vmem:[%s14227_s8 + $0x1840] sm:$0xf0]  ;;  %v12891_v42 = vld [vmem:[%s14227_s8 + $0x9c4] sm:$0xf0] }
 0x125   : > { %v13474_v37 = vld [vmem:[%s14227_s8 + $0x1c04] sm:$0xf]  ;;  %v11554_v49 = vor.u32 %v13346_v33, %v11551_v35  ;;  %6633 = vmatpush.bf16.msrb.mxu1 %v11042_v48  ;;  %v8677_v33 = vld [vmem:[%s14227_s8 + $0x188] sm:$0xf]  ;;  %v9702_v47 = vor.u32 %v12891_v42, %v9701_v40 }
 0x126   : > { %v12063_v38 = vld [vmem:[%s14227_s8 + $0x1c40] sm:$0xf0]  ;;  %6621 = vmatmul.bf16.vlgmr.msrb.gmra.mxu0 %v14413_v59  ;;  %v9189_v35 = vld [vmem:[%s14227_s8 + $0x588] sm:$0xf]  ;;  %v8678_v45 = vor.u32 %v12635_v34, %v8677_v33 }
 0x127   : > { %v12066_v52 = vor.u32 %v13474_v37, %v12063_v38  ;;  %6646 = vmatpush.bf16.msrb.mxu2 %v11554_v49  ;;  %6665 = vmatpush.bf16.msra.mxu0 %v8934_v53  ;;  %v10278_v37 = vor.u32 %v13035_v29, %v10277_v28  ;;  %v12763_v38 = vld [vmem:[%s14227_s8 + $0x5c4] sm:$0xf0] }
 0x128   : > { %6634 = vmatmul.bf16.vlgmr.msrb.gmra.mxu1 %v14417_v41  ;;  %v10213_v43 = vld [vmem:[%s14227_s8 + $0xd88] sm:$0xf]  ;;  %v9190_v46 = vor.u32 %v12763_v38, %v9189_v35 }
 0x129   : > { %6659 = vmatpush.bf16.msrb.mxu3 %v12066_v52  ;;  %6678 = vmatpush.bf16.msra.mxu1 %v9446_v54  ;;  %v13019_v44 = vld [vmem:[%s14227_s8 + $0xdc4] sm:$0xf0] }
 0x12a   : > { %6647 = vmatmul.bf16.vlgmr.msrb.gmra.mxu2 %v14409_v36  ;;  %v8613_v48 = vld [vmem:[%s14227_s8 + $0x108] sm:$0xf]  ;;  %v10214_v51 = vor.u32 %v13019_v44, %v10213_v43 }
 0x12b   : > { %6691 = vmatpush.bf16.msra.mxu2 %v9958_v55  ;;  %6666 = vmatpush.bf16.msra.mxu0 %v8870_v2  ;;  %v12619_v49 = vld [vmem:[%s14227_s8 + $0x144] sm:$0xf0] }
 0x12c   : > { %6660 = vmatmul.bf16.vlgmr.msrb.gmra.mxu3 %v14415_v39  ;;  %v9125_v50 = vld [vmem:[%s14227_s8 + $0x508] sm:$0xf]  ;;  %v8614_v57 = vor.u32 %v12619_v49, %v8613_v48 }
 0x12d   : > { %6704 = vmatpush.bf16.msra.mxu3 %v10470_v60  ;;  %6679 = vmatpush.bf16.msra.mxu1 %v9382_v3  ;;  %v12747_v52 = vld [vmem:[%s14227_s8 + $0x544] sm:$0xf0] }
 0x12e   : > { %v9637_v53 = vld [vmem:[%s14227_s8 + $0x908] sm:$0xf]  ;;  %v9126_v58 = vor.u32 %v12747_v52, %v9125_v50 }
 0x12f   : > { %6692 = vmatpush.bf16.msra.mxu2 %v9894_v4  ;;  %6667 = vmatpush.bf16.msra.mxu0 %v8806_v16  ;;  %v12875_v54 = vld [vmem:[%s14227_s8 + $0x944] sm:$0xf0] }
 0x130   : > { %v10149_v55 = vld [vmem:[%s14227_s8 + $0xd08] sm:$0xf]  ;;  %v9638_v60 = vor.u32 %v12875_v54, %v9637_v53 }
 0x131   : > { %6705 = vmatpush.bf16.msra.mxu3 %v10406_v10  ;;  %6680 = vmatpush.bf16.msra.mxu1 %v9318_v17  ;;  %v13003_v56 = vld [vmem:[%s14227_s8 + $0xd44] sm:$0xf0] }
 0x132   : > { %v8549_v61 = vld [vmem:[%s14227_s8 + $0x88] sm:$0xf]  ;;  %v10150_v0 = vor.u32 %v13003_v56, %v10149_v55 }
 0x133   : > { %6693 = vmatpush.bf16.msra.mxu2 %v9830_v18  ;;  %6668 = vmatpush.bf16.msra.mxu0 %v8742_v30  ;;  %v12603_v62 = vld [vmem:[%s14227_s8 + $0xc4] sm:$0xf0] }
 0x134   : > { %v9061_v63 = vld [vmem:[%s14227_s8 + $0x488] sm:$0xf]  ;;  %v8550_v8 = vor.u32 %v12603_v62, %v8549_v61 }
 0x135   : > { %6706 = vmatpush.bf16.msra.mxu3 %v10342_v24  ;;  %6681 = vmatpush.bf16.msra.mxu1 %v9254_v31  ;;  %v12731_v1 = vld [vmem:[%s14227_s8 + $0x4c4] sm:$0xf0] }
 0x136   : > { %v9573_v2 = vld [vmem:[%s14227_s8 + $0x888] sm:$0xf]  ;;  %v9062_v11 = vor.u32 %v12731_v1, %v9061_v63 }
 0x137   : > { %6694 = vmatpush.bf16.msra.mxu2 %v9766_v32  ;;  %6669 = vmatpush.bf16.msra.mxu0 %v8678_v45  ;;  %v12859_v3 = vld [vmem:[%s14227_s8 + $0x8c4] sm:$0xf0] }
 0x138   : > { %v10085_v4 = vld [vmem:[%s14227_s8 + $0xc88] sm:$0xf]  ;;  %v9574_v12 = vor.u32 %v12859_v3, %v9573_v2 }
 0x139   : > { %6707 = vmatpush.bf16.msra.mxu3 %v10278_v37  ;;  %6682 = vmatpush.bf16.msra.mxu1 %v9190_v46  ;;  %v12987_v7 = vld [vmem:[%s14227_s8 + $0xcc4] sm:$0xf0] }
 0x13a   : > { %v8485_v9 = vld [vmem:[%s14227_s8 + $0x8] sm:$0xf]  ;;  %v10086_v16 = vor.u32 %v12987_v7, %v10085_v4 }
 0x13b   : > { %6695 = vmatpush.bf16.msra.mxu2 %v9702_v47  ;;  %6670 = vmatpush.bf16.msra.mxu0 %v8614_v57  ;;  %v12587_v10 = vld [vmem:[%s14227_s8 + $0x44] sm:$0xf0] }
 0x13c   : > { %v8997_v13 = vld [vmem:[%s14227_s8 + $0x408] sm:$0xf]  ;;  %v8486_v25 = vor.u32 %v12587_v10, %v8485_v9 }
 0x13d   : > { %6708 = vmatpush.bf16.msra.mxu3 %v10214_v51  ;;  %6683 = vmatpush.bf16.msra.mxu1 %v9126_v58  ;;  %v12715_v14 = vld [vmem:[%s14227_s8 + $0x444] sm:$0xf0] }
 0x13e   : > { %v9509_v15 = vld [vmem:[%s14227_s8 + $0x808] sm:$0xf]  ;;  %v8998_v29 = vor.u32 %v12715_v14, %v8997_v13 }
 0x13f   : > { %6696 = vmatpush.bf16.msra.mxu2 %v9638_v60  ;;  %v12843_v17 = vld [vmem:[%s14227_s8 + $0x844] sm:$0xf0]  ;;  %6671 = vmatpush.bf16.msra.mxu0 %v8550_v8 }
 0x140   : > { %v10021_v18 = vld [vmem:[%s14227_s8 + $0xc08] sm:$0xf]  ;;  %v9510_v30 = vor.u32 %v12843_v17, %v9509_v15 }
 0x141   : > { %6709 = vmatpush.bf16.msra.mxu3 %v10150_v0  ;;  %v12971_v21 = vld [vmem:[%s14227_s8 + $0xc44] sm:$0xf0]  ;;  %6684 = vmatpush.bf16.msra.mxu1 %v9062_v11 }
 0x142   : > { %v10981_v22 = vld [vmem:[%s14227_s8 + $0x1388] sm:$0xf]  ;;  %v10022_v33 = vor.u32 %v12971_v21, %v10021_v18 }
 0x143   : > { %v13211_v23 = vld [vmem:[%s14227_s8 + $0x13c4] sm:$0xf0]  ;;  %6697 = vmatpush.bf16.msra.mxu2 %v9574_v12  ;;  %6672 = vmatpush.bf16.msra.mxu0 %v8486_v25 }
 0x144   : > { %v11493_v24 = vld [vmem:[%s14227_s8 + $0x1788] sm:$0xf]  ;;  %v10982_v34 = vor.u32 %v13211_v23, %v10981_v22 }
 0x145   : > { %v13339_v26 = vld [vmem:[%s14227_s8 + $0x17c4] sm:$0xf0]  ;;  %6710 = vmatpush.bf16.msra.mxu3 %v10086_v16  ;;  %6685 = vmatpush.bf16.msra.mxu1 %v8998_v29 }
 0x146   : > { %v12005_v27 = vld [vmem:[%s14227_s8 + $0x1b88] sm:$0xf]  ;;  %v11494_v35 = vor.u32 %v13339_v26, %v11493_v24  ;;  %6673 = vmatmul.bf16.vlgmr.msra.gmra.mxu0 %v14340_v6 }
 0x147   : > { %v13467_v28 = vld [vmem:[%s14227_s8 + $0x1bc4] sm:$0xf0]  ;;  %6698 = vmatpush.bf16.msra.mxu2 %v9510_v30  ;;  %6717 = vmatpush.bf16.msrb.mxu0 %v10982_v34 }
 0x148   : > { %v12517_v31 = vld [vmem:[%s14227_s8 + $0x1f88] sm:$0xf]  ;;  %v12006_v37 = vor.u32 %v13467_v28, %v12005_v27  ;;  %6686 = vmatmul.bf16.vlgmr.msra.gmra.mxu1 %v14355_v20  ;;  %v6466_v27 = vpop.f32.mrf.mxu0 }
 0x149   : > { %v13595_v32 = vld [vmem:[%s14227_s8 + $0x1fc4] sm:$0xf0]  ;;  %6711 = vmatpush.bf16.msra.mxu3 %v10022_v33  ;;  %6730 = vmatpush.bf16.msrb.mxu1 %v11494_v35 }
 0x14a   : > { %v10917_v38 = vld [vmem:[%s14227_s8 + $0x1308] sm:$0xf]  ;;  %v12518_v43 = vor.u32 %v13595_v32, %v12517_v31  ;;  %6699 = vmatmul.bf16.vlgmr.msra.gmra.mxu2 %v14338_v5 }
 0x14b   : > { %v13195_v40 = vld [vmem:[%s14227_s8 + $0x1344] sm:$0xf0]  ;;  %6743 = vmatpush.bf16.msrb.mxu2 %v12006_v37 }
 0x14c   : > { %v11429_v42 = vld [vmem:[%s14227_s8 + $0x1708] sm:$0xf]  ;;  %v10918_v49 = vor.u32 %v13195_v40, %v10917_v38  ;;  %6712 = vmatmul.bf16.vlgmr.msra.gmra.mxu3 %v14353_v19 }
 0x14d   : > { %v13323_v44 = vld [vmem:[%s14227_s8 + $0x1744] sm:$0xf0]  ;;  %6756 = vmatpush.bf16.msrb.mxu3 %v12518_v43 }
 0x14e   : > { %v11941_v45 = vld [vmem:[%s14227_s8 + $0x1b08] sm:$0xf]  ;;  %v11430_v50 = vor.u32 %v13323_v44, %v11429_v42  ;;  %6718 = vmatpush.bf16.msrb.mxu0 %v10918_v49  ;;  %v6479_v42 = vpop.f32.mrf.mxu1 }
 0x14f   : > { %v13451_v46 = vld [vmem:[%s14227_s8 + $0x1b44] sm:$0xf0]  ;;  %v6480_v44 = vadd.f32 %v6479_v42, %v6466_v27  ;;  %v10407_v42 = vld [vmem:[%s14227_s8 + $0xf48] sm:$0xf0] }
 0x150   : > { %v12453_v47 = vld [vmem:[%s14227_s8 + $0x1f08] sm:$0xf]  ;;  %v11942_v51 = vor.u32 %v13451_v46, %v11941_v45  ;;  %6731 = vmatpush.bf16.msrb.mxu1 %v11430_v50  ;;  %v6492_v50 = vpop.f32.mrf.mxu2 }
 0x151   : > { %v13579_v48 = vld [vmem:[%s14227_s8 + $0x1f44] sm:$0xf0] }
 0x152   : > { %v10853_v52 = vld [vmem:[%s14227_s8 + $0x1288] sm:$0xf]  ;;  %v12454_v55 = vor.u32 %v13579_v48, %v12453_v47  ;;  %6744 = vmatpush.bf16.msrb.mxu2 %v11942_v51 }
 0x153   : > { %v13179_v53 = vld [vmem:[%s14227_s8 + $0x12c4] sm:$0xf0] }
 0x154   : > { %v11365_v54 = vld [vmem:[%s14227_s8 + $0x1688] sm:$0xf]  ;;  %v10854_v62 = vor.u32 %v13179_v53, %v10853_v52  ;;  %6757 = vmatpush.bf16.msrb.mxu3 %v12454_v55  ;;  %v6493_v55 = vadd.f32 %v6492_v50, %v6480_v44 }
 0x155   : > { %v13307_v56 = vld [vmem:[%s14227_s8 + $0x16c4] sm:$0xf0] }
 0x156   : > { %v11877_v57 = vld [vmem:[%s14227_s8 + $0x1a88] sm:$0xf]  ;;  %v11366_v63 = vor.u32 %v13307_v56, %v11365_v54  ;;  %6719 = vmatpush.bf16.msrb.mxu0 %v10854_v62  ;;  %v6468_v62 = vpop.f32.mrf.mxu0 }
 0x157   : > { %v13435_v58 = vld [vmem:[%s14227_s8 + $0x1ac4] sm:$0xf0]  ;;  %v12771_v62 = vld [vmem:[%s14227_s8 + $0x60c] sm:$0xf] }
 0x158   : > { %v12389_v60 = vld [vmem:[%s14227_s8 + $0x1e88] sm:$0xf]  ;;  %v11878_v0 = vor.u32 %v13435_v58, %v11877_v57  ;;  %6732 = vmatpush.bf16.msrb.mxu1 %v11366_v63 }
 0x159   : > { %v13563_v61 = vld [vmem:[%s14227_s8 + $0x1ec4] sm:$0xf0] }
 0x15a   : > { %v10789_v1 = vld [vmem:[%s14227_s8 + $0x1208] sm:$0xf]  ;;  %v12390_v4 = vor.u32 %v13563_v61, %v12389_v60  ;;  %6745 = vmatpush.bf16.msrb.mxu2 %v11878_v0 }
 0x15b   : > { %v13163_v2 = vld [vmem:[%s14227_s8 + $0x1244] sm:$0xf0] }
 0x15c   : > { %v11301_v3 = vld [vmem:[%s14227_s8 + $0x1608] sm:$0xf]  ;;  %v10790_v12 = vor.u32 %v13163_v2, %v10789_v1  ;;  %6758 = vmatpush.bf16.msrb.mxu3 %v12390_v4 }
 0x15d   : > { %v13291_v7 = vld [vmem:[%s14227_s8 + $0x1644] sm:$0xf0] }
 0x15e   : > { %v11813_v8 = vld [vmem:[%s14227_s8 + $0x1a08] sm:$0xf]  ;;  %v11302_v13 = vor.u32 %v13291_v7, %v11301_v3  ;;  %6720 = vmatpush.bf16.msrb.mxu0 %v10790_v12  ;;  %v8935_v12 = vld [vmem:[%s14227_s8 + $0x3c8] sm:$0xf0] }
 0x15f   : > { %v13419_v9 = vld [vmem:[%s14227_s8 + $0x1a44] sm:$0xf0] }
 0x160   : > { %v12325_v10 = vld [vmem:[%s14227_s8 + $0x1e08] sm:$0xf]  ;;  %v11814_v14 = vor.u32 %v13419_v9, %v11813_v8  ;;  %6733 = vmatpush.bf16.msrb.mxu1 %v11302_v13  ;;  %v12819_v13 = vld [vmem:[%s14227_s8 + $0x78c] sm:$0xf] }
 0x161   : > { %v13547_v11 = vld [vmem:[%s14227_s8 + $0x1e44] sm:$0xf0] }
 0x162   : > { %v10725_v15 = vld [vmem:[%s14227_s8 + $0x1188] sm:$0xf]  ;;  %v12326_v18 = vor.u32 %v13547_v11, %v12325_v10  ;;  %6746 = vmatpush.bf16.msrb.mxu2 %v11814_v14  ;;  %v6505_v10 = vpop.f32.mrf.mxu3  ;;  %v12691_v11 = vld [vmem:[%s14227_s8 + $0x38c] sm:$0xf] }
 0x163   : > { %v13147_v16 = vld [vmem:[%s14227_s8 + $0x11c4] sm:$0xf0]  ;;  %v14678_v14 = vadd.f32 %v6505_v10, %v6493_v55  ;;  %v10343_v55 = vld [vmem:[%s14227_s8 + $0xec8] sm:$0xf0] }
 0x164   : > { %v11237_v17 = vld [vmem:[%s14227_s8 + $0x1588] sm:$0xf]  ;;  %v10726_v26 = vor.u32 %v13147_v16, %v10725_v15  ;;  %6759 = vmatpush.bf16.msrb.mxu3 %v12326_v18  ;;  %v6481_v15 = vpop.f32.mrf.mxu1  ;;  %v12947_v18 = vld [vmem:[%s14227_s8 + $0xb8c] sm:$0xf] }
 0x165   : > { %v13275_v21 = vld [vmem:[%s14227_s8 + $0x15c4] sm:$0xf0] }
 0x166   : > { %v11749_v22 = vld [vmem:[%s14227_s8 + $0x1988] sm:$0xf]  ;;  %v11238_v28 = vor.u32 %v13275_v21, %v11237_v17  ;;  %6721 = vmatpush.bf16.msrb.mxu0 %v10726_v26  ;;  %v9447_v17 = vld [vmem:[%s14227_s8 + $0x7c8] sm:$0xf0]  ;;  %v6494_v26 = vpop.f32.mrf.mxu2 }
 0x167   : > { %v13403_v23 = vld [vmem:[%s14227_s8 + $0x19c4] sm:$0xf0]  ;;  %v9959_v21 = vld [vmem:[%s14227_s8 + $0xbc8] sm:$0xf0] }
 0x168   : > { %v12261_v24 = vld [vmem:[%s14227_s8 + $0x1d88] sm:$0xf]  ;;  %v11750_v29 = vor.u32 %v13403_v23, %v11749_v22  ;;  %6734 = vmatpush.bf16.msrb.mxu1 %v11238_v28  ;;  %v8938_v28 = vor.u32 %v12691_v11, %v8935_v12  ;;  %v12627_v11 = vld [vmem:[%s14227_s8 + $0x18c] sm:$0xf] }
 0x169   : > { %v13531_v25 = vld [vmem:[%s14227_s8 + $0x1dc4] sm:$0xf0]  ;;  %v8679_v12 = vld [vmem:[%s14227_s8 + $0x1c8] sm:$0xf0] }
 0x16a   : > { %v10661_v30 = vld [vmem:[%s14227_s8 + $0x1108] sm:$0xf]  ;;  %v12262_v33 = vor.u32 %v13531_v25, %v12261_v24  ;;  %6747 = vmatpush.bf16.msrb.mxu2 %v11750_v29  ;;  %v13075_v24 = vld [vmem:[%s14227_s8 + $0xf8c] sm:$0xf]  ;;  %v9450_v29 = vor.u32 %v12819_v13, %v9447_v17  ;;  %v6507_v44 = vpop.f32.mrf.mxu3  ;;  %v8682_v26 = vor.u32 %v12627_v11, %v8679_v12 }
 0x16b   : > { %v13131_v31 = vld [vmem:[%s14227_s8 + $0x1144] sm:$0xf0]  ;;  %v10471_v25 = vld [vmem:[%s14227_s8 + $0xfc8] sm:$0xf0] }
 0x16c   : > { %v11173_v32 = vld [vmem:[%s14227_s8 + $0x1508] sm:$0xf]  ;;  %v10662_v43 = vor.u32 %v13131_v31, %v10661_v30  ;;  %6760 = vmatpush.bf16.msrb.mxu3 %v12262_v33  ;;  %v9962_v30 = vor.u32 %v12947_v18, %v9959_v21  ;;  %v12675_v31 = vld [vmem:[%s14227_s8 + $0x30c] sm:$0xf] }
 0x16d   : > { %v13259_v34 = vld [vmem:[%s14227_s8 + $0x1544] sm:$0xf0]  ;;  %v12803_v33 = vld [vmem:[%s14227_s8 + $0x70c] sm:$0xf] }
 0x16e   : > { %v11685_v35 = vld [vmem:[%s14227_s8 + $0x1908] sm:$0xf]  ;;  %v11174_v45 = vor.u32 %v13259_v34, %v11173_v32  ;;  %6722 = vmatpush.bf16.msrb.mxu0 %v10662_v43  ;;  %v8871_v32 = vld [vmem:[%s14227_s8 + $0x348] sm:$0xf0]  ;;  %v10474_v34 = vor.u32 %v13075_v24, %v10471_v25 }
 0x16f   : > { %v13387_v37 = vld [vmem:[%s14227_s8 + $0x1944] sm:$0xf0]  ;;  %v8874_v43 = vor.u32 %v12675_v31, %v8871_v32  ;;  %v12755_v13 = vld [vmem:[%s14227_s8 + $0x58c] sm:$0xf]  ;;  %v6544_v31 = vpop.f32.mrf.mxu2 }
 0x170   : > { %v12197_v38 = vld [vmem:[%s14227_s8 + $0x1d08] sm:$0xf]  ;;  %v11686_v46 = vor.u32 %v13387_v37, %v11685_v35  ;;  %6735 = vmatpush.bf16.msrb.mxu1 %v11174_v45  ;;  %v9383_v35 = vld [vmem:[%s14227_s8 + $0x748] sm:$0xf0] }
 0x171   : > { %v13515_v40 = vld [vmem:[%s14227_s8 + $0x1d44] sm:$0xf0]  ;;  %v12931_v37 = vld [vmem:[%s14227_s8 + $0xb0c] sm:$0xf]  ;;  %v9386_v45 = vor.u32 %v12803_v33, %v9383_v35 }
 0x172   : > { %v10597_v47 = vld [vmem:[%s14227_s8 + $0x1088] sm:$0xf]  ;;  %v12198_v51 = vor.u32 %v13515_v40, %v12197_v38  ;;  %6748 = vmatpush.bf16.msrb.mxu2 %v11686_v46  ;;  %v9895_v38 = vld [vmem:[%s14227_s8 + $0xb48] sm:$0xf0] }
 0x173   : > { %v13115_v48 = vld [vmem:[%s14227_s8 + $0x10c4] sm:$0xf0]  ;;  %v13059_v40 = vld [vmem:[%s14227_s8 + $0xf0c] sm:$0xf]  ;;  %v9898_v46 = vor.u32 %v12931_v37, %v9895_v38  ;;  %v6557_v38 = vpop.f32.mrf.mxu3 }
 0x174   : > { %v11109_v49 = vld [vmem:[%s14227_s8 + $0x1488] sm:$0xf]  ;;  %v10598_v58 = vor.u32 %v13115_v48, %v10597_v47  ;;  %6761 = vmatpush.bf16.msrb.mxu3 %v12198_v51  ;;  %v12659_v47 = vld [vmem:[%s14227_s8 + $0x28c] sm:$0xf]  ;;  %v10410_v50 = vor.u32 %v13059_v40, %v10407_v42 }
 0x175   : > { %v13243_v52 = vld [vmem:[%s14227_s8 + $0x14c4] sm:$0xf0]  ;;  %v8807_v48 = vld [vmem:[%s14227_s8 + $0x2c8] sm:$0xf0] }
 0x176   : > { %v11621_v53 = vld [vmem:[%s14227_s8 + $0x1888] sm:$0xf]  ;;  %v11110_v63 = vor.u32 %v13243_v52, %v11109_v49  ;;  %6723 = vmatpush.bf16.msrb.mxu0 %v10598_v58  ;;  %v12787_v49 = vld [vmem:[%s14227_s8 + $0x68c] sm:$0xf] }
 0x177   : > { %v13371_v54 = vld [vmem:[%s14227_s8 + $0x18c4] sm:$0xf0]  ;;  %v9319_v51 = vld [vmem:[%s14227_s8 + $0x6c8] sm:$0xf0] }
 0x178   : > { %v12133_v56 = vld [vmem:[%s14227_s8 + $0x1c88] sm:$0xf]  ;;  %v11622_v0 = vor.u32 %v13371_v54, %v11621_v53  ;;  %6736 = vmatpush.bf16.msrb.mxu1 %v11110_v63  ;;  %v12915_v52 = vld [vmem:[%s14227_s8 + $0xa8c] sm:$0xf] }
 0x179   : > { %v13499_v57 = vld [vmem:[%s14227_s8 + $0x1cc4] sm:$0xf0]  ;;  %v9831_v53 = vld [vmem:[%s14227_s8 + $0xac8] sm:$0xf0] }
 0x17a   : > { %v10533_v60 = vld [vmem:[%s14227_s8 + $0x1008] sm:$0xf]  ;;  %v12134_v4 = vor.u32 %v13499_v57, %v12133_v56  ;;  %6749 = vmatpush.bf16.msrb.mxu2 %v11622_v0  ;;  %v13043_v54 = vld [vmem:[%s14227_s8 + $0xe8c] sm:$0xf]  ;;  %v8810_v56 = vor.u32 %v12659_v47, %v8807_v48  ;;  %v9322_v57 = vor.u32 %v12787_v49, %v9319_v51  ;;  %v9834_v58 = vor.u32 %v12915_v52, %v9831_v53 }
 0x17b   : > { %v13099_v61 = vld [vmem:[%s14227_s8 + $0x1044] sm:$0xf0]  ;;  %v10346_v63 = vor.u32 %v13043_v54, %v10343_v55  ;;  %v9255_v0 = vld [vmem:[%s14227_s8 + $0x648] sm:$0xf0] }
 0x17c   : > { %v11045_v1 = vld [vmem:[%s14227_s8 + $0x1408] sm:$0xf]  ;;  %v10534_v16 = vor.u32 %v13099_v61, %v10533_v60  ;;  %6762 = vmatpush.bf16.msrb.mxu3 %v12134_v4  ;;  %v12643_v60 = vld [vmem:[%s14227_s8 + $0x20c] sm:$0xf] }
 0x17d   : > { %v13227_v2 = vld [vmem:[%s14227_s8 + $0x1444] sm:$0xf0]  ;;  %v8743_v61 = vld [vmem:[%s14227_s8 + $0x248] sm:$0xf0] }
 0x17e   : > { %v11557_v3 = vld [vmem:[%s14227_s8 + $0x1808] sm:$0xf]  ;;  %v11046_v22 = vor.u32 %v13227_v2, %v11045_v1  ;;  %6724 = vmatpush.bf16.msrb.mxu0 %v10534_v16  ;;  %v12899_v1 = vld [vmem:[%s14227_s8 + $0xa0c] sm:$0xf]  ;;  %v6531_v16 = vpop.f32.mrf.mxu1 }
 0x17f   : > { %v13355_v7 = vld [vmem:[%s14227_s8 + $0x1844] sm:$0xf0]  ;;  %v9767_v2 = vld [vmem:[%s14227_s8 + $0xa48] sm:$0xf0] }
 0x180   : > { %v12069_v8 = vld [vmem:[%s14227_s8 + $0x1c08] sm:$0xf]  ;;  %v11558_v23 = vor.u32 %v13355_v7, %v11557_v3  ;;  %6737 = vmatpush.bf16.msrb.mxu1 %v11046_v22  ;;  %v13027_v3 = vld [vmem:[%s14227_s8 + $0xe0c] sm:$0xf]  ;;  %v8746_v7 = vor.u32 %v12643_v60, %v8743_v61  ;;  %v9770_v10 = vor.u32 %v12899_v1, %v9767_v2 }
 0x181   : > { %v13483_v9 = vld [vmem:[%s14227_s8 + $0x1c44] sm:$0xf0]  ;;  %6725 = vmatmul.bf16.vlgmr.msrb.gmra.mxu0 %v14413_v59  ;;  %v10279_v4 = vld [vmem:[%s14227_s8 + $0xe48] sm:$0xf0] }
 0x182   : > { %v12070_v27 = vor.u32 %v13483_v9, %v12069_v8  ;;  %6750 = vmatpush.bf16.msrb.mxu2 %v11558_v23  ;;  %6769 = vmatpush.bf16.msra.mxu0 %v8938_v28  ;;  %v6518_v8 = vpop.f32.mrf.mxu0  ;;  %v9258_v9 = vor.u32 %v12771_v62, %v9255_v0  ;;  %v10282_v17 = vor.u32 %v13027_v3, %v10279_v4  ;;  %v9191_v18 = vld [vmem:[%s14227_s8 + $0x5c8] sm:$0xf0]  ;;  %v6546_v3 = vpop.f32.mrf.mxu2 }
 0x183   : > { %6738 = vmatmul.bf16.vlgmr.msrb.gmra.mxu1 %v14417_v41  ;;  %v6519_v15 = vadd.f32 %v6518_v8, %v14678_v14  ;;  %v12883_v21 = vld [vmem:[%s14227_s8 + $0x98c] sm:$0xf]  ;;  %v9194_v14 = vor.u32 %v12755_v13, %v9191_v18 }
 0x184   : > { %6763 = vmatpush.bf16.msrb.mxu3 %v12070_v27  ;;  %6782 = vmatpush.bf16.msra.mxu1 %v9450_v29  ;;  %v9703_v22 = vld [vmem:[%s14227_s8 + $0x9c8] sm:$0xf0] }
 0x185   : > { %6751 = vmatmul.bf16.vlgmr.msrb.gmra.mxu2 %v14409_v36  ;;  %v13011_v23 = vld [vmem:[%s14227_s8 + $0xd8c] sm:$0xf]  ;;  %v6532_v25 = vadd.f32 %v6531_v16, %v6519_v15  ;;  %v9706_v27 = vor.u32 %v12883_v21, %v9703_v22 }
 0x186   : > { %6795 = vmatpush.bf16.msra.mxu2 %v9962_v30  ;;  %6770 = vmatpush.bf16.msra.mxu0 %v8874_v43  ;;  %v10215_v24 = vld [vmem:[%s14227_s8 + $0xdc8] sm:$0xf0]  ;;  %v6533_v51 = vpop.f32.mrf.mxu1 }
 0x187   : > { %6764 = vmatmul.bf16.vlgmr.msrb.gmra.mxu3 %v14415_v39  ;;  %v12611_v28 = vld [vmem:[%s14227_s8 + $0x10c] sm:$0xf]  ;;  %v10218_v32 = vor.u32 %v13011_v23, %v10215_v24  ;;  %v6545_v37 = vadd.f32 %v6544_v31, %v6532_v25 }
 0x188   : > { %6808 = vmatpush.bf16.msra.mxu3 %v10474_v34  ;;  %6783 = vmatpush.bf16.msra.mxu1 %v9386_v45  ;;  %v8615_v29 = vld [vmem:[%s14227_s8 + $0x148] sm:$0xf0] }
 0x189   : > { %v12739_v30 = vld [vmem:[%s14227_s8 + $0x50c] sm:$0xf]  ;;  %v8618_v43 = vor.u32 %v12611_v28, %v8615_v29  ;;  %v14730_v44 = vadd.f32 %v6557_v38, %v6545_v37 }
 0x18a   : > { %6796 = vmatpush.bf16.msra.mxu2 %v9898_v46  ;;  %6771 = vmatpush.bf16.msra.mxu0 %v8810_v56  ;;  %v9127_v33 = vld [vmem:[%s14227_s8 + $0x548] sm:$0xf0]  ;;  %v6520_v45 = vpop.f32.mrf.mxu0 }
 0x18b   : > { %v12867_v34 = vld [vmem:[%s14227_s8 + $0x90c] sm:$0xf]  ;;  %v9130_v46 = vor.u32 %v12739_v30, %v9127_v33 }
 0x18c   : > { %6809 = vmatpush.bf16.msra.mxu3 %v10410_v50  ;;  %6784 = vmatpush.bf16.msra.mxu1 %v9322_v57  ;;  %v9639_v35 = vld [vmem:[%s14227_s8 + $0x948] sm:$0xf0] }
 0x18d   : > { %v12995_v40 = vld [vmem:[%s14227_s8 + $0xd0c] sm:$0xf]  ;;  %v9642_v47 = vor.u32 %v12867_v34, %v9639_v35 }
 0x18e   : > { %6797 = vmatpush.bf16.msra.mxu2 %v9834_v58  ;;  %6772 = vmatpush.bf16.msra.mxu0 %v8746_v7  ;;  %v10151_v42 = vld [vmem:[%s14227_s8 + $0xd48] sm:$0xf0] }
 0x18f   : > { %v12595_v48 = vld [vmem:[%s14227_s8 + $0x8c] sm:$0xf]  ;;  %v10154_v52 = vor.u32 %v12995_v40, %v10151_v42 }
 0x190   : > { %6810 = vmatpush.bf16.msra.mxu3 %v10346_v63  ;;  %6785 = vmatpush.bf16.msra.mxu1 %v9258_v9  ;;  %v8551_v49 = vld [vmem:[%s14227_s8 + $0xc8] sm:$0xf0] }
 0x191   : > { %v12723_v50 = vld [vmem:[%s14227_s8 + $0x48c] sm:$0xf]  ;;  %v8554_v58 = vor.u32 %v12595_v48, %v8551_v49 }
 0x192   : > { %6798 = vmatpush.bf16.msra.mxu2 %v9770_v10  ;;  %6773 = vmatpush.bf16.msra.mxu0 %v8682_v26  ;;  %v9063_v53 = vld [vmem:[%s14227_s8 + $0x4c8] sm:$0xf0]  ;;  %v6559_v10 = vpop.f32.mrf.mxu3  ;;  %v6570_v3 = vpop.f32.mrf.mxu0 }
 0x193   : > { %v12851_v54 = vld [vmem:[%s14227_s8 + $0x88c] sm:$0xf]  ;;  %v9066_v62 = vor.u32 %v12723_v50, %v9063_v53 }
 0x194   : > { %6811 = vmatpush.bf16.msra.mxu3 %v10282_v17  ;;  %6786 = vmatpush.bf16.msra.mxu1 %v9194_v14  ;;  %v9575_v55 = vld [vmem:[%s14227_s8 + $0x8c8] sm:$0xf0] }
 0x195   : > { %v12979_v56 = vld [vmem:[%s14227_s8 + $0xc8c] sm:$0xf]  ;;  %v9578_v63 = vor.u32 %v12851_v54, %v9575_v55 }
 0x196   : > { %6799 = vmatpush.bf16.msra.mxu2 %v9706_v27  ;;  %v10087_v57 = vld [vmem:[%s14227_s8 + $0xcc8] sm:$0xf0]  ;;  %6774 = vmatpush.bf16.msra.mxu0 %v8618_v43 }
 0x197   : > { %v12579_v60 = vld [vmem:[%s14227_s8 + $0xc] sm:$0xf]  ;;  %v10090_v4 = vor.u32 %v12979_v56, %v10087_v57 }
 0x198   : > { %6812 = vmatpush.bf16.msra.mxu3 %v10218_v32  ;;  %v8487_v61 = vld [vmem:[%s14227_s8 + $0x48] sm:$0xf0]  ;;  %6787 = vmatpush.bf16.msra.mxu1 %v9130_v46 }
 0x199   : > { %v12707_v0 = vld [vmem:[%s14227_s8 + $0x40c] sm:$0xf]  ;;  %v8490_v15 = vor.u32 %v12579_v60, %v8487_v61 }
 0x19a   : > { %6800 = vmatpush.bf16.msra.mxu2 %v9642_v47  ;;  %v8999_v1 = vld [vmem:[%s14227_s8 + $0x448] sm:$0xf0]  ;;  %6775 = vmatpush.bf16.msra.mxu0 %v8554_v58 }
 0x19b   : > { %v12835_v2 = vld [vmem:[%s14227_s8 + $0x80c] sm:$0xf]  ;;  %v9002_v21 = vor.u32 %v12707_v0, %v8999_v1 }
 0x19c   : > { %6813 = vmatpush.bf16.msra.mxu3 %v10154_v52  ;;  %v9511_v7 = vld [vmem:[%s14227_s8 + $0x848] sm:$0xf0]  ;;  %6788 = vmatpush.bf16.msra.mxu1 %v9066_v62 }
 0x19d   : > { %v12963_v8 = vld [vmem:[%s14227_s8 + $0xc0c] sm:$0xf]  ;;  %v9514_v22 = vor.u32 %v12835_v2, %v9511_v7 }
 0x19e   : > { %v10023_v9 = vld [vmem:[%s14227_s8 + $0xc48] sm:$0xf0]  ;;  %6801 = vmatpush.bf16.msra.mxu2 %v9578_v63  ;;  %6776 = vmatpush.bf16.msra.mxu0 %v8490_v15 }
 0x19f   : > { %v13203_v11 = vld [vmem:[%s14227_s8 + $0x138c] sm:$0xf]  ;;  %v10026_v25 = vor.u32 %v12963_v8, %v10023_v9 }
 0x1a0   : > { %v10983_v12 = vld [vmem:[%s14227_s8 + $0x13c8] sm:$0xf0]  ;;  %6814 = vmatpush.bf16.msra.mxu3 %v10090_v4  ;;  %6789 = vmatpush.bf16.msra.mxu1 %v9002_v21 }
 0x1a1   : > { %v13331_v13 = vld [vmem:[%s14227_s8 + $0x178c] sm:$0xf]  ;;  %v10986_v26 = vor.u32 %v13203_v11, %v10983_v12  ;;  %6777 = vmatmul.bf16.vlgmr.msra.gmra.mxu0 %v14340_v6  ;;  %v6583_v11 = vpop.f32.mrf.mxu1 }
 0x1a2   : > { %v11495_v16 = vld [vmem:[%s14227_s8 + $0x17c8] sm:$0xf0]  ;;  %6802 = vmatpush.bf16.msra.mxu2 %v9514_v22 }
 0x1a3   : > { %v13459_v17 = vld [vmem:[%s14227_s8 + $0x1b8c] sm:$0xf]  ;;  %v11498_v14 = vor.u32 %v13331_v13, %v11495_v16  ;;  %6821 = vmatpush.bf16.msrb.mxu0 %v10986_v26  ;;  %6790 = vmatmul.bf16.vlgmr.msra.gmra.mxu1 %v14355_v20 }
 0x1a4   : > { %v12007_v18 = vld [vmem:[%s14227_s8 + $0x1bc8] sm:$0xf0]  ;;  %6815 = vmatpush.bf16.msra.mxu3 %v10026_v25 }
 0x1a5   : > { %v13587_v23 = vld [vmem:[%s14227_s8 + $0x1f8c] sm:$0xf]  ;;  %v12010_v27 = vor.u32 %v13459_v17, %v12007_v18  ;;  %6834 = vmatpush.bf16.msrb.mxu1 %v11498_v14  ;;  %6803 = vmatmul.bf16.vlgmr.msra.gmra.mxu2 %v14338_v5  ;;  %v6584_v17 = vadd.f32 %v6583_v11, %v6570_v3 }
 0x1a6   : > { %v12519_v24 = vld [vmem:[%s14227_s8 + $0x1fc8] sm:$0xf0] }
 0x1a7   : > { %v13187_v28 = vld [vmem:[%s14227_s8 + $0x130c] sm:$0xf]  ;;  %v12522_v31 = vor.u32 %v13587_v23, %v12519_v24  ;;  %6847 = vmatpush.bf16.msrb.mxu2 %v12010_v27  ;;  %6816 = vmatmul.bf16.vlgmr.msra.gmra.mxu3 %v14353_v19  ;;  %v6596_v27 = vpop.f32.mrf.mxu2 }
 0x1a8   : > { %v10919_v29 = vld [vmem:[%s14227_s8 + $0x1348] sm:$0xf0] }
 0x1a9   : > { %v13315_v30 = vld [vmem:[%s14227_s8 + $0x170c] sm:$0xf]  ;;  %v10922_v38 = vor.u32 %v13187_v28, %v10919_v29  ;;  %6860 = vmatpush.bf16.msrb.mxu3 %v12522_v31 }
 0x1aa   : > { %v11431_v32 = vld [vmem:[%s14227_s8 + $0x1748] sm:$0xf0] }
 0x1ab   : > { %v13443_v33 = vld [vmem:[%s14227_s8 + $0x1b0c] sm:$0xf]  ;;  %v11434_v40 = vor.u32 %v13315_v30, %v11431_v32  ;;  %6822 = vmatpush.bf16.msrb.mxu0 %v10922_v38  ;;  %v6597_v32 = vadd.f32 %v6596_v27, %v6584_v17  ;;  %v9389_v27 = vld [vmem:[%s14227_s8 + $0x710] sm:$0xf] }
 0x1ac   : > { %v11943_v34 = vld [vmem:[%s14227_s8 + $0x1b48] sm:$0xf0] }
 0x1ad   : > { %v13571_v35 = vld [vmem:[%s14227_s8 + $0x1f0c] sm:$0xf]  ;;  %v11946_v42 = vor.u32 %v13443_v33, %v11943_v34  ;;  %6835 = vmatpush.bf16.msrb.mxu1 %v11434_v40  ;;  %v6609_v33 = vpop.f32.mrf.mxu3  ;;  %v6572_v40 = vpop.f32.mrf.mxu0 }
 0x1ae   : > { %v12455_v37 = vld [vmem:[%s14227_s8 + $0x1f48] sm:$0xf0]  ;;  %v14800_v38 = vadd.f32 %v6609_v33, %v6597_v32  ;;  %v10413_v32 = vld [vmem:[%s14227_s8 + $0xf10] sm:$0xf] }
 0x1af   : > { %v13171_v43 = vld [vmem:[%s14227_s8 + $0x128c] sm:$0xf]  ;;  %v12458_v47 = vor.u32 %v13571_v35, %v12455_v37  ;;  %6848 = vmatpush.bf16.msrb.mxu2 %v11946_v42  ;;  %v13068_v33 = vld [vmem:[%s14227_s8 + $0xf4c] sm:$0xf0] }
 0x1b0   : > { %v10855_v45 = vld [vmem:[%s14227_s8 + $0x12c8] sm:$0xf0]  ;;  %v8813_v40 = vld [vmem:[%s14227_s8 + $0x290] sm:$0xf] }
 0x1b1   : > { %v13299_v46 = vld [vmem:[%s14227_s8 + $0x168c] sm:$0xf]  ;;  %v10858_v53 = vor.u32 %v13171_v43, %v10855_v45  ;;  %6861 = vmatpush.bf16.msrb.mxu3 %v12458_v47 }
 0x1b2   : > { %v11367_v48 = vld [vmem:[%s14227_s8 + $0x16c8] sm:$0xf0] }
 0x1b3   : > { %v13427_v49 = vld [vmem:[%s14227_s8 + $0x1a8c] sm:$0xf]  ;;  %v11370_v54 = vor.u32 %v13299_v46, %v11367_v48  ;;  %6823 = vmatpush.bf16.msrb.mxu0 %v10858_v53  ;;  %v6585_v48 = vpop.f32.mrf.mxu1 }
 0x1b4   : > { %v11879_v50 = vld [vmem:[%s14227_s8 + $0x1ac8] sm:$0xf0]  ;;  %v12924_v48 = vld [vmem:[%s14227_s8 + $0xacc] sm:$0xf0] }
 0x1b5   : > { %v13555_v51 = vld [vmem:[%s14227_s8 + $0x1e8c] sm:$0xf]  ;;  %v11882_v55 = vor.u32 %v13427_v49, %v11879_v50  ;;  %6836 = vmatpush.bf16.msrb.mxu1 %v11370_v54 }
 0x1b6   : > { %v12391_v52 = vld [vmem:[%s14227_s8 + $0x1ec8] sm:$0xf0] }
 0x1b7   : > { %v13155_v56 = vld [vmem:[%s14227_s8 + $0x120c] sm:$0xf]  ;;  %v12394_v60 = vor.u32 %v13555_v51, %v12391_v52  ;;  %6849 = vmatpush.bf16.msrb.mxu2 %v11882_v55 }
 0x1b8   : > { %v10791_v57 = vld [vmem:[%s14227_s8 + $0x1248] sm:$0xf0] }
 0x1b9   : > { %v13283_v58 = vld [vmem:[%s14227_s8 + $0x160c] sm:$0xf]  ;;  %v10794_v2 = vor.u32 %v13155_v56, %v10791_v57  ;;  %6862 = vmatpush.bf16.msrb.mxu3 %v12394_v60 }
 0x1ba   : > { %v11303_v61 = vld [vmem:[%s14227_s8 + $0x1648] sm:$0xf0] }
 0x1bb   : > { %v13411_v62 = vld [vmem:[%s14227_s8 + $0x1a0c] sm:$0xf]  ;;  %v11306_v4 = vor.u32 %v13283_v58, %v11303_v61  ;;  %6824 = vmatpush.bf16.msrb.mxu0 %v10794_v2 }
 0x1bc   : > { %v11815_v63 = vld [vmem:[%s14227_s8 + $0x1a48] sm:$0xf0] }
 0x1bd   : > { %v13539_v0 = vld [vmem:[%s14227_s8 + $0x1e0c] sm:$0xf]  ;;  %v11818_v7 = vor.u32 %v13411_v62, %v11815_v63  ;;  %6837 = vmatpush.bf16.msrb.mxu1 %v11306_v4 }
 0x1be   : > { %v12327_v1 = vld [vmem:[%s14227_s8 + $0x1e48] sm:$0xf0] }
 0x1bf   : > { %v13139_v8 = vld [vmem:[%s14227_s8 + $0x118c] sm:$0xf]  ;;  %v12330_v12 = vor.u32 %v13539_v0, %v12327_v1  ;;  %6850 = vmatpush.bf16.msrb.mxu2 %v11818_v7  ;;  %v6598_v0 = vpop.f32.mrf.mxu2  ;;  %v6611_v7 = vpop.f32.mrf.mxu3 }
 0x1c0   : > { %v10727_v9 = vld [vmem:[%s14227_s8 + $0x11c8] sm:$0xf0]  ;;  %v12636_v7 = vld [vmem:[%s14227_s8 + $0x1cc] sm:$0xf0] }
 0x1c1   : > { %v13267_v10 = vld [vmem:[%s14227_s8 + $0x158c] sm:$0xf]  ;;  %v10730_v22 = vor.u32 %v13139_v8, %v10727_v9  ;;  %6863 = vmatpush.bf16.msrb.mxu3 %v12330_v12  ;;  %v8941_v8 = vld [vmem:[%s14227_s8 + $0x390] sm:$0xf] }
 0x1c2   : > { %v11239_v13 = vld [vmem:[%s14227_s8 + $0x15c8] sm:$0xf0]  ;;  %v12700_v9 = vld [vmem:[%s14227_s8 + $0x3cc] sm:$0xf0] }
 0x1c3   : > { %v13395_v15 = vld [vmem:[%s14227_s8 + $0x198c] sm:$0xf]  ;;  %v11242_v23 = vor.u32 %v13267_v10, %v11239_v13  ;;  %6825 = vmatpush.bf16.msrb.mxu0 %v10730_v22  ;;  %v9453_v10 = vld [vmem:[%s14227_s8 + $0x790] sm:$0xf] }
 0x1c4   : > { %v11751_v16 = vld [vmem:[%s14227_s8 + $0x19c8] sm:$0xf0]  ;;  %v12828_v12 = vld [vmem:[%s14227_s8 + $0x7cc] sm:$0xf0] }
 0x1c5   : > { %v13523_v18 = vld [vmem:[%s14227_s8 + $0x1d8c] sm:$0xf]  ;;  %v11754_v24 = vor.u32 %v13395_v15, %v11751_v16  ;;  %6838 = vmatpush.bf16.msrb.mxu1 %v11242_v23  ;;  %v9965_v13 = vld [vmem:[%s14227_s8 + $0xb90] sm:$0xf]  ;;  %v8942_v23 = vor.u32 %v12700_v9, %v8941_v8 }
 0x1c6   : > { %v12263_v21 = vld [vmem:[%s14227_s8 + $0x1dc8] sm:$0xf0]  ;;  %v12956_v15 = vld [vmem:[%s14227_s8 + $0xbcc] sm:$0xf0] }
 0x1c7   : > { %v13123_v25 = vld [vmem:[%s14227_s8 + $0x110c] sm:$0xf]  ;;  %v12266_v28 = vor.u32 %v13523_v18, %v12263_v21  ;;  %6851 = vmatpush.bf16.msrb.mxu2 %v11754_v24  ;;  %v10477_v18 = vld [vmem:[%s14227_s8 + $0xf90] sm:$0xf]  ;;  %v9454_v24 = vor.u32 %v12828_v12, %v9453_v10  ;;  %v6635_v10 = vpop.f32.mrf.mxu1 }
 0x1c8   : > { %v10663_v26 = vld [vmem:[%s14227_s8 + $0x1148] sm:$0xf0]  ;;  %v13084_v21 = vld [vmem:[%s14227_s8 + $0xfcc] sm:$0xf0] }
 0x1c9   : > { %v13251_v14 = vld [vmem:[%s14227_s8 + $0x150c] sm:$0xf]  ;;  %v10666_v37 = vor.u32 %v13123_v25, %v10663_v26  ;;  %6864 = vmatpush.bf16.msrb.mxu3 %v12266_v28  ;;  %v9966_v25 = vor.u32 %v12956_v15, %v9965_v13  ;;  %v8877_v26 = vld [vmem:[%s14227_s8 + $0x310] sm:$0xf]  ;;  %v10478_v28 = vor.u32 %v13084_v21, %v10477_v18 }
 0x1ca   : > { %v11175_v29 = vld [vmem:[%s14227_s8 + $0x1548] sm:$0xf0]  ;;  %v9197_v8 = vld [vmem:[%s14227_s8 + $0x590] sm:$0xf] }
 0x1cb   : > { %v13379_v30 = vld [vmem:[%s14227_s8 + $0x190c] sm:$0xf]  ;;  %v11178_v42 = vor.u32 %v13251_v14, %v11175_v29  ;;  %6826 = vmatpush.bf16.msrb.mxu0 %v10666_v37  ;;  %v12684_v14 = vld [vmem:[%s14227_s8 + $0x34c] sm:$0xf0] }
 0x1cc   : > { %v11687_v31 = vld [vmem:[%s14227_s8 + $0x1948] sm:$0xf0]  ;;  %v12812_v29 = vld [vmem:[%s14227_s8 + $0x74c] sm:$0xf0] }
 0x1cd   : > { %v13507_v34 = vld [vmem:[%s14227_s8 + $0x1d0c] sm:$0xf]  ;;  %v11690_v43 = vor.u32 %v13379_v30, %v11687_v31  ;;  %6839 = vmatpush.bf16.msrb.mxu1 %v11178_v42  ;;  %v9901_v30 = vld [vmem:[%s14227_s8 + $0xb10] sm:$0xf] }
 0x1ce   : > { %v12199_v35 = vld [vmem:[%s14227_s8 + $0x1d48] sm:$0xf0]  ;;  %v12940_v31 = vld [vmem:[%s14227_s8 + $0xb4c] sm:$0xf0] }
 0x1cf   : > { %v13107_v45 = vld [vmem:[%s14227_s8 + $0x108c] sm:$0xf]  ;;  %v12202_v49 = vor.u32 %v13507_v34, %v12199_v35  ;;  %6852 = vmatpush.bf16.msrb.mxu2 %v11690_v43  ;;  %v8878_v34 = vor.u32 %v12684_v14, %v8877_v26  ;;  %v9390_v35 = vor.u32 %v12812_v29, %v9389_v27  ;;  %v9902_v37 = vor.u32 %v12940_v31, %v9901_v30  ;;  %v12668_v42 = vld [vmem:[%s14227_s8 + $0x2cc] sm:$0xf0]  ;;  %v6648_v26 = vpop.f32.mrf.mxu2  ;;  %v6661_v31 = vpop.f32.mrf.mxu3 }
 0x1d0   : > { %v10599_v46 = vld [vmem:[%s14227_s8 + $0x10c8] sm:$0xf0]  ;;  %v9325_v43 = vld [vmem:[%s14227_s8 + $0x690] sm:$0xf] }
 0x1d1   : > { %v13235_v47 = vld [vmem:[%s14227_s8 + $0x148c] sm:$0xf]  ;;  %v10602_v55 = vor.u32 %v13107_v45, %v10599_v46  ;;  %6865 = vmatpush.bf16.msrb.mxu3 %v12202_v49  ;;  %v10414_v45 = vor.u32 %v13068_v33, %v10413_v32  ;;  %v12796_v46 = vld [vmem:[%s14227_s8 + $0x6cc] sm:$0xf0] }
 0x1d2   : > { %v11111_v50 = vld [vmem:[%s14227_s8 + $0x14c8] sm:$0xf0]  ;;  %v10349_v49 = vld [vmem:[%s14227_s8 + $0xe90] sm:$0xf] }
 0x1d3   : > { %v13363_v51 = vld [vmem:[%s14227_s8 + $0x188c] sm:$0xf]  ;;  %v11114_v58 = vor.u32 %v13235_v47, %v11111_v50  ;;  %6827 = vmatpush.bf16.msrb.mxu0 %v10602_v55  ;;  %v9837_v47 = vld [vmem:[%s14227_s8 + $0xa90] sm:$0xf] }
 0x1d4   : > { %v11623_v52 = vld [vmem:[%s14227_s8 + $0x18c8] sm:$0xf0]  ;;  %v13052_v50 = vld [vmem:[%s14227_s8 + $0xecc] sm:$0xf0] }
 0x1d5   : > { %v13491_v53 = vld [vmem:[%s14227_s8 + $0x1c8c] sm:$0xf]  ;;  %v11626_v60 = vor.u32 %v13363_v51, %v11623_v52  ;;  %6840 = vmatpush.bf16.msrb.mxu1 %v11114_v58  ;;  %v8814_v51 = vor.u32 %v12668_v42, %v8813_v40  ;;  %v9326_v52 = vor.u32 %v12796_v46, %v9325_v43  ;;  %v12652_v55 = vld [vmem:[%s14227_s8 + $0x24c] sm:$0xf0] }
 0x1d6   : > { %v12135_v54 = vld [vmem:[%s14227_s8 + $0x1cc8] sm:$0xf0]  ;;  %v12780_v58 = vld [vmem:[%s14227_s8 + $0x64c] sm:$0xf0] }
 0x1d7   : > { %v13091_v56 = vld [vmem:[%s14227_s8 + $0x100c] sm:$0xf]  ;;  %v12138_v1 = vor.u32 %v13491_v53, %v12135_v54  ;;  %6853 = vmatpush.bf16.msrb.mxu2 %v11626_v60  ;;  %v9838_v53 = vor.u32 %v12924_v48, %v9837_v47  ;;  %v8749_v54 = vld [vmem:[%s14227_s8 + $0x210] sm:$0xf]  ;;  %v6637_v47 = vpop.f32.mrf.mxu1 }
 0x1d8   : > { %v10535_v57 = vld [vmem:[%s14227_s8 + $0x1048] sm:$0xf0]  ;;  %v9773_v60 = vld [vmem:[%s14227_s8 + $0xa10] sm:$0xf]  ;;  %v8750_v0 = vor.u32 %v12652_v55, %v8749_v54 }
 0x1d9   : > { %v13219_v61 = vld [vmem:[%s14227_s8 + $0x140c] sm:$0xf]  ;;  %v10538_v11 = vor.u32 %v13091_v56, %v10535_v57  ;;  %6866 = vmatpush.bf16.msrb.mxu3 %v12138_v1  ;;  %v9261_v56 = vld [vmem:[%s14227_s8 + $0x610] sm:$0xf]  ;;  %v10350_v57 = vor.u32 %v13052_v50, %v10349_v49  ;;  %v6622_v1 = vpop.f32.mrf.mxu0 }
 0x1da   : > { %v11047_v62 = vld [vmem:[%s14227_s8 + $0x1448] sm:$0xf0]  ;;  %v6623_v9 = vadd.f32 %v6622_v1, %v14800_v38  ;;  %v12764_v12 = vld [vmem:[%s14227_s8 + $0x5cc] sm:$0xf0] }
 0x1db   : > { %v13347_v63 = vld [vmem:[%s14227_s8 + $0x180c] sm:$0xf]  ;;  %v11050_v16 = vor.u32 %v13219_v61, %v11047_v62  ;;  %6828 = vmatpush.bf16.msrb.mxu0 %v10538_v11  ;;  %v12908_v61 = vld [vmem:[%s14227_s8 + $0xa4c] sm:$0xf0]  ;;  %v9198_v38 = vor.u32 %v12764_v12, %v9197_v8 }
 0x1dc   : > { %v11559_v2 = vld [vmem:[%s14227_s8 + $0x1848] sm:$0xf0]  ;;  %v10285_v62 = vld [vmem:[%s14227_s8 + $0xe10] sm:$0xf]  ;;  %v6636_v18 = vadd.f32 %v6635_v10, %v6623_v9 }
 0x1dd   : > { %v13475_v3 = vld [vmem:[%s14227_s8 + $0x1c0c] sm:$0xf]  ;;  %v11562_v17 = vor.u32 %v13347_v63, %v11559_v2  ;;  %6841 = vmatpush.bf16.msrb.mxu1 %v11050_v16  ;;  %v13036_v63 = vld [vmem:[%s14227_s8 + $0xe4c] sm:$0xf0]  ;;  %v9262_v2 = vor.u32 %v12780_v58, %v9261_v56 }
 0x1de   : > { %v12071_v4 = vld [vmem:[%s14227_s8 + $0x1c48] sm:$0xf0]  ;;  %6829 = vmatmul.bf16.vlgmr.msrb.gmra.mxu0 %v14413_v59  ;;  %v10286_v11 = vor.u32 %v13036_v63, %v10285_v62  ;;  %v9709_v13 = vld [vmem:[%s14227_s8 + $0x990] sm:$0xf]  ;;  %v6649_v30 = vadd.f32 %v6648_v26, %v6636_v18  ;;  %v6650_v63 = vpop.f32.mrf.mxu2 }
 0x1df   : > { %v12074_v22 = vor.u32 %v13475_v3, %v12071_v4  ;;  %6854 = vmatpush.bf16.msrb.mxu2 %v11562_v17  ;;  %6873 = vmatpush.bf16.msra.mxu0 %v8942_v23  ;;  %v9774_v3 = vor.u32 %v12908_v61, %v9773_v60  ;;  %v8685_v4 = vld [vmem:[%s14227_s8 + $0x190] sm:$0xf] }
 0x1e0   : > { %6842 = vmatmul.bf16.vlgmr.msrb.gmra.mxu1 %v14417_v41  ;;  %v12892_v15 = vld [vmem:[%s14227_s8 + $0x9cc] sm:$0xf0]  ;;  %v8686_v21 = vor.u32 %v12636_v7, %v8685_v4  ;;  %v6663_v4 = vpop.f32.mrf.mxu3 }
 0x1e1   : > { %6867 = vmatpush.bf16.msrb.mxu3 %v12074_v22  ;;  %6886 = vmatpush.bf16.msra.mxu1 %v9454_v24  ;;  %v10221_v16 = vld [vmem:[%s14227_s8 + $0xd90] sm:$0xf]  ;;  %v9710_v22 = vor.u32 %v12892_v15, %v9709_v13 }
 0x1e2   : > { %6855 = vmatmul.bf16.vlgmr.msrb.gmra.mxu2 %v14409_v36  ;;  %v13020_v17 = vld [vmem:[%s14227_s8 + $0xdcc] sm:$0xf0] }
 0x1e3   : > { %6899 = vmatpush.bf16.msra.mxu2 %v9966_v25  ;;  %6874 = vmatpush.bf16.msra.mxu0 %v8878_v34  ;;  %v8621_v23 = vld [vmem:[%s14227_s8 + $0x110] sm:$0xf]  ;;  %v10222_v14 = vor.u32 %v13020_v17, %v10221_v16 }
 0x1e4   : > { %6868 = vmatmul.bf16.vlgmr.msrb.gmra.mxu3 %v14415_v39  ;;  %v12620_v24 = vld [vmem:[%s14227_s8 + $0x14c] sm:$0xf0] }
 0x1e5   : > { %6912 = vmatpush.bf16.msra.mxu3 %v10478_v28  ;;  %6887 = vmatpush.bf16.msra.mxu1 %v9390_v35  ;;  %v9133_v25 = vld [vmem:[%s14227_s8 + $0x510] sm:$0xf]  ;;  %v8622_v34 = vor.u32 %v12620_v24, %v8621_v23  ;;  %v14871_v35 = vadd.f32 %v6661_v31, %v6649_v30 }
 0x1e6   : > { %v12748_v27 = vld [vmem:[%s14227_s8 + $0x54c] sm:$0xf0] }
 0x1e7   : > { %6900 = vmatpush.bf16.msra.mxu2 %v9902_v37  ;;  %6875 = vmatpush.bf16.msra.mxu0 %v8814_v51  ;;  %v9645_v28 = vld [vmem:[%s14227_s8 + $0x910] sm:$0xf]  ;;  %v6624_v37 = vpop.f32.mrf.mxu0  ;;  %v9134_v40 = vor.u32 %v12748_v27, %v9133_v25 }
 0x1e8   : > { %v12876_v29 = vld [vmem:[%s14227_s8 + $0x94c] sm:$0xf0] }
 0x1e9   : > { %6913 = vmatpush.bf16.msra.mxu3 %v10414_v45  ;;  %6888 = vmatpush.bf16.msra.mxu1 %v9326_v52  ;;  %v10157_v32 = vld [vmem:[%s14227_s8 + $0xd10] sm:$0xf]  ;;  %v9646_v42 = vor.u32 %v12876_v29, %v9645_v28 }
 0x1ea   : > { %v13004_v33 = vld [vmem:[%s14227_s8 + $0xd4c] sm:$0xf0] }
 0x1eb   : > { %6901 = vmatpush.bf16.msra.mxu2 %v9838_v53  ;;  %6876 = vmatpush.bf16.msra.mxu0 %v8750_v0  ;;  %v8557_v43 = vld [vmem:[%s14227_s8 + $0x90] sm:$0xf]  ;;  %v10158_v48 = vor.u32 %v13004_v33, %v10157_v32 }
 0x1ec   : > { %v12604_v45 = vld [vmem:[%s14227_s8 + $0xcc] sm:$0xf0] }
 0x1ed   : > { %6914 = vmatpush.bf16.msra.mxu3 %v10350_v57  ;;  %6889 = vmatpush.bf16.msra.mxu1 %v9262_v2  ;;  %v9069_v46 = vld [vmem:[%s14227_s8 + $0x490] sm:$0xf]  ;;  %v8558_v54 = vor.u32 %v12604_v45, %v8557_v43 }
 0x1ee   : > { %v12732_v49 = vld [vmem:[%s14227_s8 + $0x4cc] sm:$0xf0] }
 0x1ef   : > { %6902 = vmatpush.bf16.msra.mxu2 %v9774_v3  ;;  %6877 = vmatpush.bf16.msra.mxu0 %v8686_v21  ;;  %v9581_v50 = vld [vmem:[%s14227_s8 + $0x890] sm:$0xf]  ;;  %v9070_v57 = vor.u32 %v12732_v49, %v9069_v46 }
 0x1f0   : > { %v12860_v51 = vld [vmem:[%s14227_s8 + $0x8cc] sm:$0xf0] }
 0x1f1   : > { %6915 = vmatpush.bf16.msra.mxu3 %v10286_v11  ;;  %6890 = vmatpush.bf16.msra.mxu1 %v9198_v38  ;;  %v10093_v52 = vld [vmem:[%s14227_s8 + $0xc90] sm:$0xf]  ;;  %v9582_v58 = vor.u32 %v12860_v51, %v9581_v50 }
 0x1f2   : > { %v12988_v53 = vld [vmem:[%s14227_s8 + $0xccc] sm:$0xf0] }
 0x1f3   : > { %6903 = vmatpush.bf16.msra.mxu2 %v9710_v22  ;;  %6878 = vmatpush.bf16.msra.mxu0 %v8622_v34  ;;  %v8493_v55 = vld [vmem:[%s14227_s8 + $0x10] sm:$0xf]  ;;  %v10094_v0 = vor.u32 %v12988_v53, %v10093_v52 }
 0x1f4   : > { %v12588_v56 = vld [vmem:[%s14227_s8 + $0x4c] sm:$0xf0] }
 0x1f5   : > { %6916 = vmatpush.bf16.msra.mxu3 %v10222_v14  ;;  %6891 = vmatpush.bf16.msra.mxu1 %v9134_v40  ;;  %v9005_v60 = vld [vmem:[%s14227_s8 + $0x410] sm:$0xf]  ;;  %v8494_v10 = vor.u32 %v12588_v56, %v8493_v55 }
 0x1f6   : > { %v12716_v61 = vld [vmem:[%s14227_s8 + $0x44c] sm:$0xf0] }
 0x1f7   : > { %6904 = vmatpush.bf16.msra.mxu2 %v9646_v42  ;;  %v9517_v62 = vld [vmem:[%s14227_s8 + $0x810] sm:$0xf]  ;;  %6879 = vmatpush.bf16.msra.mxu0 %v8558_v54  ;;  %v9006_v15 = vor.u32 %v12716_v61, %v9005_v60 }
 0x1f8   : > { %v12844_v1 = vld [vmem:[%s14227_s8 + $0x84c] sm:$0xf0] }
 0x1f9   : > { %6917 = vmatpush.bf16.msra.mxu3 %v10158_v48  ;;  %v10029_v2 = vld [vmem:[%s14227_s8 + $0xc10] sm:$0xf]  ;;  %6892 = vmatpush.bf16.msra.mxu1 %v9070_v57  ;;  %v9518_v16 = vor.u32 %v12844_v1, %v9517_v62 }
 0x1fa   : > { %v12972_v3 = vld [vmem:[%s14227_s8 + $0xc4c] sm:$0xf0] }
 0x1fb   : > { %v10989_v7 = vld [vmem:[%s14227_s8 + $0x1390] sm:$0xf]  ;;  %6905 = vmatpush.bf16.msra.mxu2 %v9582_v58  ;;  %v10030_v21 = vor.u32 %v12972_v3, %v10029_v2  ;;  %6880 = vmatpush.bf16.msra.mxu0 %v8494_v10 }
 0x1fc   : > { %v13212_v8 = vld [vmem:[%s14227_s8 + $0x13cc] sm:$0xf0] }
 0x1fd   : > { %v11501_v9 = vld [vmem:[%s14227_s8 + $0x1790] sm:$0xf]  ;;  %6918 = vmatpush.bf16.msra.mxu3 %v10094_v0  ;;  %v10990_v38 = vor.u32 %v13212_v8, %v10989_v7  ;;  %6893 = vmatpush.bf16.msra.mxu1 %v9006_v15  ;;  %v6674_v0 = vpop.f32.mrf.mxu0  ;;  %v6687_v8 = vpop.f32.mrf.mxu1 }
 0x1fe   : > { %v13340_v11 = vld [vmem:[%s14227_s8 + $0x17cc] sm:$0xf0]  ;;  %6881 = vmatmul.bf16.vlgmr.msra.gmra.mxu0 %v14340_v6 }
 0x1ff   : > { %v12013_v12 = vld [vmem:[%s14227_s8 + $0x1b90] sm:$0xf]  ;;  %v11502_v22 = vor.u32 %v13340_v11, %v11501_v9  ;;  %6906 = vmatpush.bf16.msra.mxu2 %v9518_v16  ;;  %6925 = vmatpush.bf16.msrb.mxu0 %v10990_v38 }
 0x200   : > { %v13468_v13 = vld [vmem:[%s14227_s8 + $0x1bcc] sm:$0xf0]  ;;  %6894 = vmatmul.bf16.vlgmr.msra.gmra.mxu1 %v14355_v20 }
 0x201   : > { %v12525_v17 = vld [vmem:[%s14227_s8 + $0x1f90] sm:$0xf]  ;;  %v12014_v23 = vor.u32 %v13468_v13, %v12013_v12  ;;  %6919 = vmatpush.bf16.msra.mxu3 %v10030_v21  ;;  %6938 = vmatpush.bf16.msrb.mxu1 %v11502_v22  ;;  %v6688_v13 = vadd.f32 %v6687_v8, %v6674_v0  ;;  %v12820_v8 = vld [vmem:[%s14227_s8 + $0x794] sm:$0xf] }
 0x202   : > { %v13596_v18 = vld [vmem:[%s14227_s8 + $0x1fcc] sm:$0xf0]  ;;  %6907 = vmatmul.bf16.vlgmr.msra.gmra.mxu2 %v14338_v5 }
 0x203   : > { %v10925_v24 = vld [vmem:[%s14227_s8 + $0x1310] sm:$0xf]  ;;  %v12526_v14 = vor.u32 %v13596_v18, %v12525_v17  ;;  %6951 = vmatpush.bf16.msrb.mxu2 %v12014_v23 }
 0x204   : > { %v13196_v25 = vld [vmem:[%s14227_s8 + $0x134c] sm:$0xf0]  ;;  %6920 = vmatmul.bf16.vlgmr.msra.gmra.mxu3 %v14353_v19 }
 0x205   : > { %v11437_v26 = vld [vmem:[%s14227_s8 + $0x1710] sm:$0xf]  ;;  %v10926_v32 = vor.u32 %v13196_v25, %v10925_v24  ;;  %6964 = vmatpush.bf16.msrb.mxu3 %v12526_v14  ;;  %v6700_v24 = vpop.f32.mrf.mxu2 }
 0x206   : > { %v13324_v27 = vld [vmem:[%s14227_s8 + $0x174c] sm:$0xf0] }
 0x207   : > { %v11949_v28 = vld [vmem:[%s14227_s8 + $0x1b10] sm:$0xf]  ;;  %v11438_v33 = vor.u32 %v13324_v27, %v11437_v26  ;;  %6926 = vmatpush.bf16.msrb.mxu0 %v10926_v32 }
 0x208   : > { %v13452_v29 = vld [vmem:[%s14227_s8 + $0x1b4c] sm:$0xf0] }
 0x209   : > { %v12461_v30 = vld [vmem:[%s14227_s8 + $0x1f10] sm:$0xf]  ;;  %v11950_v34 = vor.u32 %v13452_v29, %v11949_v28  ;;  %6939 = vmatpush.bf16.msrb.mxu1 %v11438_v33  ;;  %v6701_v28 = vadd.f32 %v6700_v24, %v6688_v13  ;;  %v6713_v29 = vpop.f32.mrf.mxu3  ;;  %v8879_v24 = vld [vmem:[%s14227_s8 + $0x350] sm:$0xf0] }
 0x20a   : > { %v13580_v31 = vld [vmem:[%s14227_s8 + $0x1f4c] sm:$0xf0] }
 0x20b   : > { %v10861_v37 = vld [vmem:[%s14227_s8 + $0x1290] sm:$0xf]  ;;  %v12462_v43 = vor.u32 %v13580_v31, %v12461_v30  ;;  %6952 = vmatpush.bf16.msrb.mxu2 %v11950_v34  ;;  %v14941_v33 = vadd.f32 %v6713_v29, %v6701_v28  ;;  %v6676_v34 = vpop.f32.mrf.mxu0  ;;  %v9903_v28 = vld [vmem:[%s14227_s8 + $0xb50] sm:$0xf0] }
 0x20c   : > { %v13180_v40 = vld [vmem:[%s14227_s8 + $0x12cc] sm:$0xf0]  ;;  %v13060_v29 = vld [vmem:[%s14227_s8 + $0xf14] sm:$0xf] }
 0x20d   : > { %v11373_v42 = vld [vmem:[%s14227_s8 + $0x1690] sm:$0xf]  ;;  %v10862_v50 = vor.u32 %v13180_v40, %v10861_v37  ;;  %6965 = vmatpush.bf16.msrb.mxu3 %v12462_v43 }
 0x20e   : > { %v13308_v45 = vld [vmem:[%s14227_s8 + $0x16cc] sm:$0xf0] }
 0x20f   : > { %v11885_v46 = vld [vmem:[%s14227_s8 + $0x1a90] sm:$0xf]  ;;  %v11374_v51 = vor.u32 %v13308_v45, %v11373_v42  ;;  %6927 = vmatpush.bf16.msrb.mxu0 %v10862_v50 }
 0x210   : > { %v13436_v47 = vld [vmem:[%s14227_s8 + $0x1acc] sm:$0xf0] }
 0x211   : > { %v12397_v48 = vld [vmem:[%s14227_s8 + $0x1e90] sm:$0xf]  ;;  %v11886_v52 = vor.u32 %v13436_v47, %v11885_v46  ;;  %6940 = vmatpush.bf16.msrb.mxu1 %v11374_v51  ;;  %v6689_v46 = vpop.f32.mrf.mxu1 }
 0x212   : > { %v13564_v49 = vld [vmem:[%s14227_s8 + $0x1ecc] sm:$0xf0]  ;;  %v12916_v46 = vld [vmem:[%s14227_s8 + $0xa94] sm:$0xf] }
 0x213   : > { %v10797_v53 = vld [vmem:[%s14227_s8 + $0x1210] sm:$0xf]  ;;  %v12398_v56 = vor.u32 %v13564_v49, %v12397_v48  ;;  %6953 = vmatpush.bf16.msrb.mxu2 %v11886_v52 }
 0x214   : > { %v13164_v54 = vld [vmem:[%s14227_s8 + $0x124c] sm:$0xf0] }
 0x215   : > { %v11309_v55 = vld [vmem:[%s14227_s8 + $0x1610] sm:$0xf]  ;;  %v10798_v63 = vor.u32 %v13164_v54, %v10797_v53  ;;  %6966 = vmatpush.bf16.msrb.mxu3 %v12398_v56 }
 0x216   : > { %v13292_v57 = vld [vmem:[%s14227_s8 + $0x164c] sm:$0xf0] }
 0x217   : > { %v11821_v58 = vld [vmem:[%s14227_s8 + $0x1a10] sm:$0xf]  ;;  %v11310_v1 = vor.u32 %v13292_v57, %v11309_v55  ;;  %6928 = vmatpush.bf16.msrb.mxu0 %v10798_v63 }
 0x218   : > { %v13420_v60 = vld [vmem:[%s14227_s8 + $0x1a4c] sm:$0xf0] }
 0x219   : > { %v12333_v61 = vld [vmem:[%s14227_s8 + $0x1e10] sm:$0xf]  ;;  %v11822_v2 = vor.u32 %v13420_v60, %v11821_v58  ;;  %6941 = vmatpush.bf16.msrb.mxu1 %v11310_v1 }
 0x21a   : > { %v13548_v62 = vld [vmem:[%s14227_s8 + $0x1e4c] sm:$0xf0] }
 0x21b   : > { %v10733_v3 = vld [vmem:[%s14227_s8 + $0x1190] sm:$0xf]  ;;  %v12334_v9 = vor.u32 %v13548_v62, %v12333_v61  ;;  %6954 = vmatpush.bf16.msrb.mxu2 %v11822_v2  ;;  %v6702_v62 = vpop.f32.mrf.mxu2 }
 0x21c   : > { %v13148_v4 = vld [vmem:[%s14227_s8 + $0x11cc] sm:$0xf0]  ;;  %v10287_v62 = vld [vmem:[%s14227_s8 + $0xe50] sm:$0xf0] }
 0x21d   : > { %v11245_v7 = vld [vmem:[%s14227_s8 + $0x1590] sm:$0xf]  ;;  %v10734_v17 = vor.u32 %v13148_v4, %v10733_v3  ;;  %6967 = vmatpush.bf16.msrb.mxu3 %v12334_v9  ;;  %v6715_v3 = vpop.f32.mrf.mxu3  ;;  %v12692_v4 = vld [vmem:[%s14227_s8 + $0x394] sm:$0xf] }
 0x21e   : > { %v13276_v10 = vld [vmem:[%s14227_s8 + $0x15cc] sm:$0xf0]  ;;  %v12628_v3 = vld [vmem:[%s14227_s8 + $0x194] sm:$0xf] }
 0x21f   : > { %v11757_v11 = vld [vmem:[%s14227_s8 + $0x1990] sm:$0xf]  ;;  %v11246_v18 = vor.u32 %v13276_v10, %v11245_v7  ;;  %6929 = vmatpush.bf16.msrb.mxu0 %v10734_v17  ;;  %v8943_v7 = vld [vmem:[%s14227_s8 + $0x3d0] sm:$0xf0] }
 0x220   : > { %v13404_v12 = vld [vmem:[%s14227_s8 + $0x19cc] sm:$0xf0]  ;;  %v9455_v10 = vld [vmem:[%s14227_s8 + $0x7d0] sm:$0xf0] }
 0x221   : > { %v12269_v15 = vld [vmem:[%s14227_s8 + $0x1d90] sm:$0xf]  ;;  %v11758_v21 = vor.u32 %v13404_v12, %v11757_v11  ;;  %6942 = vmatpush.bf16.msrb.mxu1 %v11246_v18  ;;  %v12948_v11 = vld [vmem:[%s14227_s8 + $0xb94] sm:$0xf] }
 0x222   : > { %v13532_v16 = vld [vmem:[%s14227_s8 + $0x1dcc] sm:$0xf0]  ;;  %v9967_v12 = vld [vmem:[%s14227_s8 + $0xbd0] sm:$0xf0] }
 0x223   : > { %v10669_v38 = vld [vmem:[%s14227_s8 + $0x1110] sm:$0xf]  ;;  %v12270_v25 = vor.u32 %v13532_v16, %v12269_v15  ;;  %6955 = vmatpush.bf16.msrb.mxu2 %v11758_v21  ;;  %v13076_v16 = vld [vmem:[%s14227_s8 + $0xf94] sm:$0xf]  ;;  %v8946_v21 = vor.u32 %v12692_v4, %v8943_v7 }
 0x224   : > { %v13132_v22 = vld [vmem:[%s14227_s8 + $0x114c] sm:$0xf0]  ;;  %v10479_v17 = vld [vmem:[%s14227_s8 + $0xfd0] sm:$0xf0] }
 0x225   : > { %v11181_v23 = vld [vmem:[%s14227_s8 + $0x1510] sm:$0xf]  ;;  %v10670_v32 = vor.u32 %v13132_v22, %v10669_v38  ;;  %6968 = vmatpush.bf16.msrb.mxu3 %v12270_v25  ;;  %v9458_v38 = vor.u32 %v12820_v8, %v9455_v10  ;;  %v9970_v22 = vor.u32 %v12948_v11, %v9967_v12  ;;  %v12804_v25 = vld [vmem:[%s14227_s8 + $0x714] sm:$0xf] }
 0x226   : > { %v13260_v26 = vld [vmem:[%s14227_s8 + $0x154c] sm:$0xf0]  ;;  %v8687_v4 = vld [vmem:[%s14227_s8 + $0x1d0] sm:$0xf0] }
 0x227   : > { %v11693_v14 = vld [vmem:[%s14227_s8 + $0x1910] sm:$0xf]  ;;  %v11182_v37 = vor.u32 %v13260_v26, %v11181_v23  ;;  %6930 = vmatpush.bf16.msrb.mxu0 %v10670_v32  ;;  %v12676_v23 = vld [vmem:[%s14227_s8 + $0x314] sm:$0xf]  ;;  %v10482_v26 = vor.u32 %v13076_v16, %v10479_v17 }
 0x228   : > { %v13388_v27 = vld [vmem:[%s14227_s8 + $0x194c] sm:$0xf0]  ;;  %v12756_v7 = vld [vmem:[%s14227_s8 + $0x594] sm:$0xf] }
 0x229   : > { %v12205_v30 = vld [vmem:[%s14227_s8 + $0x1d10] sm:$0xf]  ;;  %v11694_v40 = vor.u32 %v13388_v27, %v11693_v14  ;;  %6943 = vmatpush.bf16.msrb.mxu1 %v11182_v37  ;;  %v9391_v14 = vld [vmem:[%s14227_s8 + $0x750] sm:$0xf0] }
 0x22a   : > { %v13516_v31 = vld [vmem:[%s14227_s8 + $0x1d4c] sm:$0xf0]  ;;  %v12932_v27 = vld [vmem:[%s14227_s8 + $0xb14] sm:$0xf]  ;;  %v9394_v32 = vor.u32 %v12804_v25, %v9391_v14 }
 0x22b   : > { %v10605_v42 = vld [vmem:[%s14227_s8 + $0x1090] sm:$0xf]  ;;  %v12206_v47 = vor.u32 %v13516_v31, %v12205_v30  ;;  %6956 = vmatpush.bf16.msrb.mxu2 %v11694_v40  ;;  %v10415_v30 = vld [vmem:[%s14227_s8 + $0xf50] sm:$0xf0]  ;;  %v8882_v31 = vor.u32 %v12676_v23, %v8879_v24  ;;  %v9906_v34 = vor.u32 %v12932_v27, %v9903_v28  ;;  %v6752_v24 = vpop.f32.mrf.mxu2 }
 0x22c   : > { %v13116_v43 = vld [vmem:[%s14227_s8 + $0x10cc] sm:$0xf0]  ;;  %v12660_v37 = vld [vmem:[%s14227_s8 + $0x294] sm:$0xf] }
 0x22d   : > { %v11117_v45 = vld [vmem:[%s14227_s8 + $0x1490] sm:$0xf]  ;;  %v10606_v53 = vor.u32 %v13116_v43, %v10605_v42  ;;  %6969 = vmatpush.bf16.msrb.mxu3 %v12206_v47  ;;  %v8815_v40 = vld [vmem:[%s14227_s8 + $0x2d0] sm:$0xf0]  ;;  %v10418_v43 = vor.u32 %v13060_v29, %v10415_v30  ;;  %v6765_v29 = vpop.f32.mrf.mxu3 }
 0x22e   : > { %v13244_v48 = vld [vmem:[%s14227_s8 + $0x14cc] sm:$0xf0]  ;;  %v12788_v42 = vld [vmem:[%s14227_s8 + $0x694] sm:$0xf] }
 0x22f   : > { %v11629_v49 = vld [vmem:[%s14227_s8 + $0x1890] sm:$0xf]  ;;  %v11118_v56 = vor.u32 %v13244_v48, %v11117_v45  ;;  %6931 = vmatpush.bf16.msrb.mxu0 %v10606_v53  ;;  %v9327_v45 = vld [vmem:[%s14227_s8 + $0x6d0] sm:$0xf0] }
 0x230   : > { %v13372_v50 = vld [vmem:[%s14227_s8 + $0x18cc] sm:$0xf0]  ;;  %v9839_v47 = vld [vmem:[%s14227_s8 + $0xad0] sm:$0xf0] }
 0x231   : > { %v12141_v51 = vld [vmem:[%s14227_s8 + $0x1c90] sm:$0xf]  ;;  %v11630_v57 = vor.u32 %v13372_v50, %v11629_v49  ;;  %6944 = vmatpush.bf16.msrb.mxu1 %v11118_v56  ;;  %v13044_v48 = vld [vmem:[%s14227_s8 + $0xe94] sm:$0xf]  ;;  %v8818_v50 = vor.u32 %v12660_v37, %v8815_v40 }
 0x232   : > { %v13500_v52 = vld [vmem:[%s14227_s8 + $0x1ccc] sm:$0xf0]  ;;  %v10351_v49 = vld [vmem:[%s14227_s8 + $0xed0] sm:$0xf0] }
 0x233   : > { %v10541_v54 = vld [vmem:[%s14227_s8 + $0x1010] sm:$0xf]  ;;  %v12142_v63 = vor.u32 %v13500_v52, %v12141_v51  ;;  %6957 = vmatpush.bf16.msrb.mxu2 %v11630_v57  ;;  %v9330_v51 = vor.u32 %v12788_v42, %v9327_v45  ;;  %v9842_v52 = vor.u32 %v12916_v46, %v9839_v47  ;;  %v12644_v53 = vld [vmem:[%s14227_s8 + $0x214] sm:$0xf]  ;;  %v10354_v56 = vor.u32 %v13044_v48, %v10351_v49 }
 0x234   : > { %v13100_v55 = vld [vmem:[%s14227_s8 + $0x104c] sm:$0xf0]  ;;  %v9263_v57 = vld [vmem:[%s14227_s8 + $0x650] sm:$0xf0] }
 0x235   : > { %v11053_v58 = vld [vmem:[%s14227_s8 + $0x1410] sm:$0xf]  ;;  %v10542_v9 = vor.u32 %v13100_v55, %v10541_v54  ;;  %6970 = vmatpush.bf16.msrb.mxu3 %v12142_v63  ;;  %v8751_v54 = vld [vmem:[%s14227_s8 + $0x250] sm:$0xf0] }
 0x236   : > { %v13228_v60 = vld [vmem:[%s14227_s8 + $0x144c] sm:$0xf0]  ;;  %v12772_v55 = vld [vmem:[%s14227_s8 + $0x614] sm:$0xf]  ;;  %v8754_v63 = vor.u32 %v12644_v53, %v8751_v54 }
 0x237   : > { %v11565_v61 = vld [vmem:[%s14227_s8 + $0x1810] sm:$0xf]  ;;  %v11054_v13 = vor.u32 %v13228_v60, %v11053_v58  ;;  %6932 = vmatpush.bf16.msrb.mxu0 %v10542_v9  ;;  %v12900_v58 = vld [vmem:[%s14227_s8 + $0xa14] sm:$0xf]  ;;  %v6739_v9 = vpop.f32.mrf.mxu1 }
 0x238   : > { %v13356_v0 = vld [vmem:[%s14227_s8 + $0x184c] sm:$0xf0]  ;;  %v9775_v60 = vld [vmem:[%s14227_s8 + $0xa50] sm:$0xf0] }
 0x239   : > { %v12077_v1 = vld [vmem:[%s14227_s8 + $0x1c10] sm:$0xf]  ;;  %v11566_v15 = vor.u32 %v13356_v0, %v11565_v61  ;;  %6945 = vmatpush.bf16.msrb.mxu1 %v11054_v13  ;;  %v13028_v61 = vld [vmem:[%s14227_s8 + $0xe14] sm:$0xf]  ;;  %v6726_v0 = vpop.f32.mrf.mxu0 }
 0x23a   : > { %v13484_v2 = vld [vmem:[%s14227_s8 + $0x1c4c] sm:$0xf0]  ;;  %6933 = vmatmul.bf16.vlgmr.msrb.gmra.mxu0 %v14413_v59  ;;  %v6727_v8 = vadd.f32 %v6726_v0, %v14941_v33  ;;  %v10290_v10 = vor.u32 %v13028_v61, %v10287_v62  ;;  %v9199_v11 = vld [vmem:[%s14227_s8 + $0x5d0] sm:$0xf0] }
 0x23b   : > { %v12078_v18 = vor.u32 %v13484_v2, %v12077_v1  ;;  %6958 = vmatpush.bf16.msrb.mxu2 %v11566_v15  ;;  %6977 = vmatpush.bf16.msra.mxu0 %v8946_v21  ;;  %v9266_v1 = vor.u32 %v12772_v55, %v9263_v57  ;;  %v9778_v2 = vor.u32 %v12900_v58, %v9775_v60  ;;  %v12884_v12 = vld [vmem:[%s14227_s8 + $0x994] sm:$0xf] }
 0x23c   : > { %6946 = vmatmul.bf16.vlgmr.msrb.gmra.mxu1 %v14417_v41  ;;  %v9711_v13 = vld [vmem:[%s14227_s8 + $0x9d0] sm:$0xf0]  ;;  %v6740_v17 = vadd.f32 %v6739_v9, %v6727_v8  ;;  %v9202_v33 = vor.u32 %v12756_v7, %v9199_v11 }
 0x23d   : > { %6971 = vmatpush.bf16.msrb.mxu3 %v12078_v18  ;;  %6990 = vmatpush.bf16.msra.mxu1 %v9458_v38  ;;  %v13012_v15 = vld [vmem:[%s14227_s8 + $0xd94] sm:$0xf]  ;;  %v8690_v18 = vor.u32 %v12628_v3, %v8687_v4  ;;  %v9714_v21 = vor.u32 %v12884_v12, %v9711_v13  ;;  %v6767_v4 = vpop.f32.mrf.mxu3 }
 0x23e   : > { %6959 = vmatmul.bf16.vlgmr.msrb.gmra.mxu2 %v14409_v36  ;;  %v10223_v16 = vld [vmem:[%s14227_s8 + $0xdd0] sm:$0xf0]  ;;  %v6753_v28 = vadd.f32 %v6752_v24, %v6740_v17 }
 0x23f   : > { %7003 = vmatpush.bf16.msra.mxu2 %v9970_v22  ;;  %6978 = vmatpush.bf16.msra.mxu0 %v8882_v31  ;;  %v12612_v38 = vld [vmem:[%s14227_s8 + $0x114] sm:$0xf]  ;;  %v10226_v25 = vor.u32 %v13012_v15, %v10223_v16  ;;  %v6741_v47 = vpop.f32.mrf.mxu1 }
 0x240   : > { %6972 = vmatmul.bf16.vlgmr.msrb.gmra.mxu3 %v14415_v39  ;;  %v8623_v22 = vld [vmem:[%s14227_s8 + $0x150] sm:$0xf0] }
 0x241   : > { %7016 = vmatpush.bf16.msra.mxu3 %v10482_v26  ;;  %6991 = vmatpush.bf16.msra.mxu1 %v9394_v32  ;;  %v12740_v23 = vld [vmem:[%s14227_s8 + $0x514] sm:$0xf]  ;;  %v8626_v32 = vor.u32 %v12612_v38, %v8623_v22  ;;  %v6728_v37 = vpop.f32.mrf.mxu0 }
 0x242   : > { %v9135_v26 = vld [vmem:[%s14227_s8 + $0x550] sm:$0xf0] }
 0x243   : > { %7004 = vmatpush.bf16.msra.mxu2 %v9906_v34  ;;  %6979 = vmatpush.bf16.msra.mxu0 %v8818_v50  ;;  %v12868_v14 = vld [vmem:[%s14227_s8 + $0x914] sm:$0xf]  ;;  %v15012_v34 = vadd.f32 %v6765_v29, %v6753_v28  ;;  %v9138_v40 = vor.u32 %v12740_v23, %v9135_v26 }
 0x244   : > { %v9647_v27 = vld [vmem:[%s14227_s8 + $0x950] sm:$0xf0] }
 0x245   : > { %7017 = vmatpush.bf16.msra.mxu3 %v10418_v43  ;;  %6992 = vmatpush.bf16.msra.mxu1 %v9330_v51  ;;  %v12996_v30 = vld [vmem:[%s14227_s8 + $0xd14] sm:$0xf]  ;;  %v9650_v42 = vor.u32 %v12868_v14, %v9647_v27 }
 0x246   : > { %v10159_v31 = vld [vmem:[%s14227_s8 + $0xd50] sm:$0xf0] }
 0x247   : > { %7005 = vmatpush.bf16.msra.mxu2 %v9842_v52  ;;  %6980 = vmatpush.bf16.msra.mxu0 %v8754_v63  ;;  %v12596_v43 = vld [vmem:[%s14227_s8 + $0x94] sm:$0xf]  ;;  %v10162_v48 = vor.u32 %v12996_v30, %v10159_v31  ;;  %v6754_v63 = vpop.f32.mrf.mxu2 }
 0x248   : > { %v8559_v45 = vld [vmem:[%s14227_s8 + $0xd0] sm:$0xf0] }
 0x249   : > { %7018 = vmatpush.bf16.msra.mxu3 %v10354_v56  ;;  %6993 = vmatpush.bf16.msra.mxu1 %v9266_v1  ;;  %v12724_v46 = vld [vmem:[%s14227_s8 + $0x494] sm:$0xf]  ;;  %v8562_v54 = vor.u32 %v12596_v43, %v8559_v45 }
 0x24a   : > { %v9071_v49 = vld [vmem:[%s14227_s8 + $0x4d0] sm:$0xf0] }
 0x24b   : > { %7006 = vmatpush.bf16.msra.mxu2 %v9778_v2  ;;  %6981 = vmatpush.bf16.msra.mxu0 %v8690_v18  ;;  %v12852_v50 = vld [vmem:[%s14227_s8 + $0x894] sm:$0xf]  ;;  %v9074_v57 = vor.u32 %v12724_v46, %v9071_v49 }
 0x24c   : > { %v9583_v51 = vld [vmem:[%s14227_s8 + $0x8d0] sm:$0xf0] }
 0x24d   : > { %7019 = vmatpush.bf16.msra.mxu3 %v10290_v10  ;;  %6994 = vmatpush.bf16.msra.mxu1 %v9202_v33  ;;  %v12980_v52 = vld [vmem:[%s14227_s8 + $0xc94] sm:$0xf]  ;;  %v9586_v58 = vor.u32 %v12852_v50, %v9583_v51 }
 0x24e   : > { %v10095_v53 = vld [vmem:[%s14227_s8 + $0xcd0] sm:$0xf0] }
 0x24f   : > { %7007 = vmatpush.bf16.msra.mxu2 %v9714_v21  ;;  %6982 = vmatpush.bf16.msra.mxu0 %v8626_v32  ;;  %v12580_v55 = vld [vmem:[%s14227_s8 + $0x14] sm:$0xf]  ;;  %v10098_v0 = vor.u32 %v12980_v52, %v10095_v53 }
 0x250   : > { %v8495_v56 = vld [vmem:[%s14227_s8 + $0x50] sm:$0xf0] }
 0x251   : > { %7020 = vmatpush.bf16.msra.mxu3 %v10226_v25  ;;  %6995 = vmatpush.bf16.msra.mxu1 %v9138_v40  ;;  %v12708_v60 = vld [vmem:[%s14227_s8 + $0x414] sm:$0xf]  ;;  %v8498_v10 = vor.u32 %v12580_v55, %v8495_v56 }
 0x252   : > { %v9007_v61 = vld [vmem:[%s14227_s8 + $0x450] sm:$0xf0] }
 0x253   : > { %7008 = vmatpush.bf16.msra.mxu2 %v9650_v42  ;;  %v12836_v62 = vld [vmem:[%s14227_s8 + $0x814] sm:$0xf]  ;;  %6983 = vmatpush.bf16.msra.mxu0 %v8562_v54  ;;  %v9010_v15 = vor.u32 %v12708_v60, %v9007_v61 }
 0x254   : > { %v9519_v1 = vld [vmem:[%s14227_s8 + $0x850] sm:$0xf0] }
 0x255   : > { %7021 = vmatpush.bf16.msra.mxu3 %v10162_v48  ;;  %v12964_v2 = vld [vmem:[%s14227_s8 + $0xc14] sm:$0xf]  ;;  %6996 = vmatpush.bf16.msra.mxu1 %v9074_v57  ;;  %v9522_v16 = vor.u32 %v12836_v62, %v9519_v1  ;;  %v6778_v1 = vpop.f32.mrf.mxu0 }
 0x256   : > { %v10031_v3 = vld [vmem:[%s14227_s8 + $0xc50] sm:$0xf0] }
 0x257   : > { %v13204_v7 = vld [vmem:[%s14227_s8 + $0x1394] sm:$0xf]  ;;  %7009 = vmatpush.bf16.msra.mxu2 %v9586_v58  ;;  %v10034_v33 = vor.u32 %v12964_v2, %v10031_v3  ;;  %6984 = vmatpush.bf16.msra.mxu0 %v8498_v10 }
 0x258   : > { %v10991_v8 = vld [vmem:[%s14227_s8 + $0x13d0] sm:$0xf0] }
 0x259   : > { %v13332_v9 = vld [vmem:[%s14227_s8 + $0x1794] sm:$0xf]  ;;  %7022 = vmatpush.bf16.msra.mxu3 %v10098_v0  ;;  %v10994_v21 = vor.u32 %v13204_v7, %v10991_v8  ;;  %6997 = vmatpush.bf16.msra.mxu1 %v9010_v15 }
 0x25a   : > { %v11503_v11 = vld [vmem:[%s14227_s8 + $0x17d0] sm:$0xf0]  ;;  %6985 = vmatmul.bf16.vlgmr.msra.gmra.mxu0 %v14340_v6 }
 0x25b   : > { %v13460_v12 = vld [vmem:[%s14227_s8 + $0x1b94] sm:$0xf]  ;;  %v11506_v38 = vor.u32 %v13332_v9, %v11503_v11  ;;  %7010 = vmatpush.bf16.msra.mxu2 %v9522_v16  ;;  %7029 = vmatpush.bf16.msrb.mxu0 %v10994_v21  ;;  %v6791_v9 = vpop.f32.mrf.mxu1 }
 0x25c   : > { %v12015_v13 = vld [vmem:[%s14227_s8 + $0x1bd0] sm:$0xf0]  ;;  %6998 = vmatmul.bf16.vlgmr.msra.gmra.mxu1 %v14355_v20  ;;  %v6792_v15 = vadd.f32 %v6791_v9, %v6778_v1  ;;  %v12701_v9 = vld [vmem:[%s14227_s8 + $0x3d4] sm:$0xf0] }
 0x25d   : > { %v13588_v17 = vld [vmem:[%s14227_s8 + $0x1f94] sm:$0xf]  ;;  %v12018_v22 = vor.u32 %v13460_v12, %v12015_v13  ;;  %7023 = vmatpush.bf16.msra.mxu3 %v10034_v33  ;;  %7042 = vmatpush.bf16.msrb.mxu1 %v11506_v38 }
 0x25e   : > { %v12527_v18 = vld [vmem:[%s14227_s8 + $0x1fd0] sm:$0xf0]  ;;  %7011 = vmatmul.bf16.vlgmr.msra.gmra.mxu2 %v14338_v5 }
 0x25f   : > { %v13188_v23 = vld [vmem:[%s14227_s8 + $0x1314] sm:$0xf]  ;;  %v12530_v26 = vor.u32 %v13588_v17, %v12527_v18  ;;  %7055 = vmatpush.bf16.msrb.mxu2 %v12018_v22 }
 0x260   : > { %v10927_v24 = vld [vmem:[%s14227_s8 + $0x1350] sm:$0xf0]  ;;  %7024 = vmatmul.bf16.vlgmr.msra.gmra.mxu3 %v14353_v19 }
 0x261   : > { %v13316_v25 = vld [vmem:[%s14227_s8 + $0x1714] sm:$0xf]  ;;  %v10930_v31 = vor.u32 %v13188_v23, %v10927_v24  ;;  %7068 = vmatpush.bf16.msrb.mxu3 %v12530_v26  ;;  %v6804_v24 = vpop.f32.mrf.mxu2 }
 0x262   : > { %v11439_v14 = vld [vmem:[%s14227_s8 + $0x1750] sm:$0xf0] }
 0x263   : > { %v13444_v27 = vld [vmem:[%s14227_s8 + $0x1b14] sm:$0xf]  ;;  %v11442_v32 = vor.u32 %v13316_v25, %v11439_v14  ;;  %7030 = vmatpush.bf16.msrb.mxu0 %v10930_v31 }
 0x264   : > { %v11951_v28 = vld [vmem:[%s14227_s8 + $0x1b50] sm:$0xf0] }
 0x265   : > { %v13572_v29 = vld [vmem:[%s14227_s8 + $0x1f14] sm:$0xf]  ;;  %v11954_v37 = vor.u32 %v13444_v27, %v11951_v28  ;;  %7043 = vmatpush.bf16.msrb.mxu1 %v11442_v32  ;;  %v6805_v28 = vadd.f32 %v6804_v24, %v6792_v15  ;;  %v12957_v15 = vld [vmem:[%s14227_s8 + $0xbd4] sm:$0xf0] }
 0x266   : > { %v12463_v30 = vld [vmem:[%s14227_s8 + $0x1f50] sm:$0xf0]  ;;  %v8885_v24 = vld [vmem:[%s14227_s8 + $0x318] sm:$0xf] }
 0x267   : > { %v13172_v40 = vld [vmem:[%s14227_s8 + $0x1294] sm:$0xf]  ;;  %v12466_v45 = vor.u32 %v13572_v29, %v12463_v30  ;;  %7056 = vmatpush.bf16.msrb.mxu2 %v11954_v37  ;;  %v6817_v29 = vpop.f32.mrf.mxu3 }
 0x268   : > { %v10863_v42 = vld [vmem:[%s14227_s8 + $0x12d0] sm:$0xf0]  ;;  %v15082_v37 = vadd.f32 %v6817_v29, %v6805_v28  ;;  %v9909_v28 = vld [vmem:[%s14227_s8 + $0xb18] sm:$0xf] }
 0x269   : > { %v13300_v43 = vld [vmem:[%s14227_s8 + $0x1694] sm:$0xf]  ;;  %v10866_v51 = vor.u32 %v13172_v40, %v10863_v42  ;;  %7069 = vmatpush.bf16.msrb.mxu3 %v12466_v45  ;;  %v6780_v40 = vpop.f32.mrf.mxu0  ;;  %v12941_v29 = vld [vmem:[%s14227_s8 + $0xb54] sm:$0xf0] }
 0x26a   : > { %v11375_v46 = vld [vmem:[%s14227_s8 + $0x16d0] sm:$0xf0] }
 0x26b   : > { %v13428_v47 = vld [vmem:[%s14227_s8 + $0x1a94] sm:$0xf]  ;;  %v11378_v52 = vor.u32 %v13300_v43, %v11375_v46  ;;  %7031 = vmatpush.bf16.msrb.mxu0 %v10866_v51 }
 0x26c   : > { %v11887_v48 = vld [vmem:[%s14227_s8 + $0x1ad0] sm:$0xf0] }
 0x26d   : > { %v13556_v49 = vld [vmem:[%s14227_s8 + $0x1e94] sm:$0xf]  ;;  %v11890_v53 = vor.u32 %v13428_v47, %v11887_v48  ;;  %7044 = vmatpush.bf16.msrb.mxu1 %v11378_v52  ;;  %v6793_v48 = vpop.f32.mrf.mxu1 }
 0x26e   : > { %v12399_v50 = vld [vmem:[%s14227_s8 + $0x1ed0] sm:$0xf0]  ;;  %v12797_v48 = vld [vmem:[%s14227_s8 + $0x6d4] sm:$0xf0] }
 0x26f   : > { %v13156_v54 = vld [vmem:[%s14227_s8 + $0x1214] sm:$0xf]  ;;  %v12402_v57 = vor.u32 %v13556_v49, %v12399_v50  ;;  %7057 = vmatpush.bf16.msrb.mxu2 %v11890_v53 }
 0x270   : > { %v10799_v55 = vld [vmem:[%s14227_s8 + $0x1250] sm:$0xf0] }
 0x271   : > { %v13284_v56 = vld [vmem:[%s14227_s8 + $0x1614] sm:$0xf]  ;;  %v10802_v0 = vor.u32 %v13156_v54, %v10799_v55  ;;  %7070 = vmatpush.bf16.msrb.mxu3 %v12402_v57 }
 0x272   : > { %v11311_v58 = vld [vmem:[%s14227_s8 + $0x1650] sm:$0xf0] }
 0x273   : > { %v13412_v60 = vld [vmem:[%s14227_s8 + $0x1a14] sm:$0xf]  ;;  %v11314_v2 = vor.u32 %v13284_v56, %v11311_v58  ;;  %7032 = vmatpush.bf16.msrb.mxu0 %v10802_v0  ;;  %v6806_v0 = vpop.f32.mrf.mxu2 }
 0x274   : > { %v11823_v61 = vld [vmem:[%s14227_s8 + $0x1a50] sm:$0xf0]  ;;  %v10293_v0 = vld [vmem:[%s14227_s8 + $0xe18] sm:$0xf] }
 0x275   : > { %v13540_v62 = vld [vmem:[%s14227_s8 + $0x1e14] sm:$0xf]  ;;  %v11826_v3 = vor.u32 %v13412_v60, %v11823_v61  ;;  %7045 = vmatpush.bf16.msrb.mxu1 %v11314_v2 }
 0x276   : > { %v12335_v63 = vld [vmem:[%s14227_s8 + $0x1e50] sm:$0xf0] }
 0x277   : > { %v13140_v4 = vld [vmem:[%s14227_s8 + $0x1194] sm:$0xf]  ;;  %v12338_v10 = vor.u32 %v13540_v62, %v12335_v63  ;;  %7058 = vmatpush.bf16.msrb.mxu2 %v11826_v3 }
 0x278   : > { %v10735_v7 = vld [vmem:[%s14227_s8 + $0x11d0] sm:$0xf0] }
 0x279   : > { %v13268_v8 = vld [vmem:[%s14227_s8 + $0x1594] sm:$0xf]  ;;  %v10738_v18 = vor.u32 %v13140_v4, %v10735_v7  ;;  %7071 = vmatpush.bf16.msrb.mxu3 %v12338_v10  ;;  %v6819_v7 = vpop.f32.mrf.mxu3  ;;  %v9461_v10 = vld [vmem:[%s14227_s8 + $0x798] sm:$0xf] }
 0x27a   : > { %v11247_v11 = vld [vmem:[%s14227_s8 + $0x15d0] sm:$0xf0] }
 0x27b   : > { %v13396_v12 = vld [vmem:[%s14227_s8 + $0x1994] sm:$0xf]  ;;  %v11250_v33 = vor.u32 %v13268_v8, %v11247_v11  ;;  %7033 = vmatpush.bf16.msrb.mxu0 %v10738_v18  ;;  %v8949_v8 = vld [vmem:[%s14227_s8 + $0x398] sm:$0xf] }
 0x27c   : > { %v11759_v13 = vld [vmem:[%s14227_s8 + $0x19d0] sm:$0xf0]  ;;  %v10485_v18 = vld [vmem:[%s14227_s8 + $0xf98] sm:$0xf] }
 0x27d   : > { %v13524_v16 = vld [vmem:[%s14227_s8 + $0x1d94] sm:$0xf]  ;;  %v11762_v21 = vor.u32 %v13396_v12, %v11759_v13  ;;  %7046 = vmatpush.bf16.msrb.mxu1 %v11250_v33  ;;  %v12829_v12 = vld [vmem:[%s14227_s8 + $0x7d4] sm:$0xf0] }
 0x27e   : > { %v12271_v17 = vld [vmem:[%s14227_s8 + $0x1dd0] sm:$0xf0]  ;;  %v9973_v13 = vld [vmem:[%s14227_s8 + $0xb98] sm:$0xf] }
 0x27f   : > { %v13124_v38 = vld [vmem:[%s14227_s8 + $0x1114] sm:$0xf]  ;;  %v12274_v25 = vor.u32 %v13524_v16, %v12271_v17  ;;  %7059 = vmatpush.bf16.msrb.mxu2 %v11762_v21  ;;  %v13085_v33 = vld [vmem:[%s14227_s8 + $0xfd4] sm:$0xf0] }
 0x280   : > { %v10671_v22 = vld [vmem:[%s14227_s8 + $0x1150] sm:$0xf0] }
 0x281   : > { %v13252_v23 = vld [vmem:[%s14227_s8 + $0x1514] sm:$0xf]  ;;  %v10674_v32 = vor.u32 %v13124_v38, %v10671_v22  ;;  %7072 = vmatpush.bf16.msrb.mxu3 %v12274_v25  ;;  %v8950_v38 = vor.u32 %v12701_v9, %v8949_v8  ;;  %v9462_v22 = vor.u32 %v12829_v12, %v9461_v10  ;;  %v12685_v25 = vld [vmem:[%s14227_s8 + $0x354] sm:$0xf0]  ;;  %v6843_v12 = vpop.f32.mrf.mxu1 }
 0x282   : > { %v11183_v26 = vld [vmem:[%s14227_s8 + $0x1550] sm:$0xf0]  ;;  %v8693_v8 = vld [vmem:[%s14227_s8 + $0x198] sm:$0xf] }
 0x283   : > { %v13380_v14 = vld [vmem:[%s14227_s8 + $0x1914] sm:$0xf]  ;;  %v11186_v42 = vor.u32 %v13252_v23, %v11183_v26  ;;  %7034 = vmatpush.bf16.msrb.mxu0 %v10674_v32  ;;  %v9974_v23 = vor.u32 %v12957_v15, %v9973_v13  ;;  %v9397_v26 = vld [vmem:[%s14227_s8 + $0x718] sm:$0xf]  ;;  %v8886_v32 = vor.u32 %v12685_v25, %v8885_v24 }
 0x284   : > { %v11695_v27 = vld [vmem:[%s14227_s8 + $0x1950] sm:$0xf0]  ;;  %v12637_v9 = vld [vmem:[%s14227_s8 + $0x1d4] sm:$0xf0] }
 0x285   : > { %v13508_v30 = vld [vmem:[%s14227_s8 + $0x1d14] sm:$0xf]  ;;  %v11698_v43 = vor.u32 %v13380_v14, %v11695_v27  ;;  %7047 = vmatpush.bf16.msrb.mxu1 %v11186_v42  ;;  %v10486_v14 = vor.u32 %v13085_v33, %v10485_v18  ;;  %v12813_v27 = vld [vmem:[%s14227_s8 + $0x754] sm:$0xf0]  ;;  %v9910_v42 = vor.u32 %v12941_v29, %v9909_v28 }
 0x286   : > { %v12207_v31 = vld [vmem:[%s14227_s8 + $0x1d50] sm:$0xf0]  ;;  %v9398_v40 = vor.u32 %v12813_v27, %v9397_v26  ;;  %v9205_v10 = vld [vmem:[%s14227_s8 + $0x598] sm:$0xf]  ;;  %v6856_v26 = vpop.f32.mrf.mxu2 }
 0x287   : > { %v13108_v45 = vld [vmem:[%s14227_s8 + $0x1094] sm:$0xf]  ;;  %v12210_v49 = vor.u32 %v13508_v30, %v12207_v31  ;;  %7060 = vmatpush.bf16.msrb.mxu2 %v11698_v43  ;;  %v10421_v30 = vld [vmem:[%s14227_s8 + $0xf18] sm:$0xf] }
 0x288   : > { %v10607_v46 = vld [vmem:[%s14227_s8 + $0x10d0] sm:$0xf0]  ;;  %v13069_v31 = vld [vmem:[%s14227_s8 + $0xf54] sm:$0xf0] }
 0x289   : > { %v13236_v47 = vld [vmem:[%s14227_s8 + $0x1494] sm:$0xf]  ;;  %v10610_v55 = vor.u32 %v13108_v45, %v10607_v46  ;;  %7073 = vmatpush.bf16.msrb.mxu3 %v12210_v49  ;;  %v8821_v43 = vld [vmem:[%s14227_s8 + $0x298] sm:$0xf] }
 0x28a   : > { %v11119_v50 = vld [vmem:[%s14227_s8 + $0x14d0] sm:$0xf0]  ;;  %v12669_v45 = vld [vmem:[%s14227_s8 + $0x2d4] sm:$0xf0] }
 0x28b   : > { %v13364_v51 = vld [vmem:[%s14227_s8 + $0x1894] sm:$0xf]  ;;  %v11122_v58 = vor.u32 %v13236_v47, %v11119_v50  ;;  %7035 = vmatpush.bf16.msrb.mxu0 %v10610_v55  ;;  %v9333_v46 = vld [vmem:[%s14227_s8 + $0x698] sm:$0xf]  ;;  %v10422_v47 = vor.u32 %v13069_v31, %v10421_v30  ;;  %v6869_v31 = vpop.f32.mrf.mxu3 }
 0x28c   : > { %v11631_v52 = vld [vmem:[%s14227_s8 + $0x18d0] sm:$0xf0]  ;;  %v9845_v49 = vld [vmem:[%s14227_s8 + $0xa98] sm:$0xf] }
 0x28d   : > { %v13492_v53 = vld [vmem:[%s14227_s8 + $0x1c94] sm:$0xf]  ;;  %v11634_v60 = vor.u32 %v13364_v51, %v11631_v52  ;;  %7048 = vmatpush.bf16.msrb.mxu1 %v11122_v58  ;;  %v12925_v50 = vld [vmem:[%s14227_s8 + $0xad4] sm:$0xf0] }
 0x28e   : > { %v12143_v54 = vld [vmem:[%s14227_s8 + $0x1cd0] sm:$0xf0]  ;;  %v10357_v51 = vld [vmem:[%s14227_s8 + $0xe98] sm:$0xf]  ;;  %v9846_v55 = vor.u32 %v12925_v50, %v9845_v49 }
 0x28f   : > { %v13092_v56 = vld [vmem:[%s14227_s8 + $0x1014] sm:$0xf]  ;;  %v12146_v1 = vor.u32 %v13492_v53, %v12143_v54  ;;  %7061 = vmatpush.bf16.msrb.mxu2 %v11634_v60  ;;  %v13053_v52 = vld [vmem:[%s14227_s8 + $0xed4] sm:$0xf0]  ;;  %v8822_v53 = vor.u32 %v12669_v45, %v8821_v43  ;;  %v9334_v54 = vor.u32 %v12797_v48, %v9333_v46 }
 0x290   : > { %v10543_v57 = vld [vmem:[%s14227_s8 + $0x1050] sm:$0xf0]  ;;  %v9269_v58 = vld [vmem:[%s14227_s8 + $0x618] sm:$0xf]  ;;  %v10358_v60 = vor.u32 %v13053_v52, %v10357_v51  ;;  %v6845_v51 = vpop.f32.mrf.mxu1 }
 0x291   : > { %v13220_v61 = vld [vmem:[%s14227_s8 + $0x1414] sm:$0xf]  ;;  %v10546_v11 = vor.u32 %v13092_v56, %v10543_v57  ;;  %7074 = vmatpush.bf16.msrb.mxu3 %v12146_v1  ;;  %v8757_v56 = vld [vmem:[%s14227_s8 + $0x218] sm:$0xf] }
 0x292   : > { %v11055_v62 = vld [vmem:[%s14227_s8 + $0x1450] sm:$0xf0]  ;;  %v12653_v57 = vld [vmem:[%s14227_s8 + $0x254] sm:$0xf0] }
 0x293   : > { %v13348_v63 = vld [vmem:[%s14227_s8 + $0x1814] sm:$0xf]  ;;  %v11058_v16 = vor.u32 %v13220_v61, %v11055_v62  ;;  %7036 = vmatpush.bf16.msrb.mxu0 %v10546_v11  ;;  %v12781_v61 = vld [vmem:[%s14227_s8 + $0x654] sm:$0xf0] }
 0x294   : > { %v11567_v2 = vld [vmem:[%s14227_s8 + $0x1850] sm:$0xf0]  ;;  %v9781_v62 = vld [vmem:[%s14227_s8 + $0xa18] sm:$0xf] }
 0x295   : > { %v13476_v3 = vld [vmem:[%s14227_s8 + $0x1c14] sm:$0xf]  ;;  %v11570_v17 = vor.u32 %v13348_v63, %v11567_v2  ;;  %7049 = vmatpush.bf16.msrb.mxu1 %v11058_v16  ;;  %v12909_v63 = vld [vmem:[%s14227_s8 + $0xa54] sm:$0xf0]  ;;  %v8758_v2 = vor.u32 %v12653_v57, %v8757_v56 }
 0x296   : > { %v12079_v4 = vld [vmem:[%s14227_s8 + $0x1c50] sm:$0xf0]  ;;  %7037 = vmatmul.bf16.vlgmr.msrb.gmra.mxu0 %v14413_v59  ;;  %v13037_v1 = vld [vmem:[%s14227_s8 + $0xe54] sm:$0xf0]  ;;  %v9782_v7 = vor.u32 %v12909_v63, %v9781_v62 }
 0x297   : > { %v12082_v21 = vor.u32 %v13476_v3, %v12079_v4  ;;  %7062 = vmatpush.bf16.msrb.mxu2 %v11570_v17  ;;  %7081 = vmatpush.bf16.msra.mxu0 %v8950_v38  ;;  %v6830_v3 = vpop.f32.mrf.mxu0  ;;  %v9270_v4 = vor.u32 %v12781_v61, %v9269_v58  ;;  %v10294_v13 = vor.u32 %v13037_v1, %v10293_v0  ;;  %v12765_v15 = vld [vmem:[%s14227_s8 + $0x5d4] sm:$0xf0] }
 0x298   : > { %7050 = vmatmul.bf16.vlgmr.msrb.gmra.mxu1 %v14417_v41  ;;  %v6831_v11 = vadd.f32 %v6830_v3, %v15082_v37  ;;  %v9717_v16 = vld [vmem:[%s14227_s8 + $0x998] sm:$0xf]  ;;  %v8694_v38 = vor.u32 %v12637_v9, %v8693_v8  ;;  %v9206_v37 = vor.u32 %v12765_v15, %v9205_v10  ;;  %v6858_v3 = vpop.f32.mrf.mxu2  ;;  %v6871_v10 = vpop.f32.mrf.mxu3 }
 0x299   : > { %7075 = vmatpush.bf16.msrb.mxu3 %v12082_v21  ;;  %7094 = vmatpush.bf16.msra.mxu1 %v9462_v22  ;;  %v12893_v17 = vld [vmem:[%s14227_s8 + $0x9d4] sm:$0xf0] }
 0x29a   : > { %7063 = vmatmul.bf16.vlgmr.msrb.gmra.mxu2 %v14409_v36  ;;  %v10229_v18 = vld [vmem:[%s14227_s8 + $0xd98] sm:$0xf]  ;;  %v6844_v21 = vadd.f32 %v6843_v12, %v6831_v11  ;;  %v9718_v22 = vor.u32 %v12893_v17, %v9717_v16 }
 0x29b   : > { %7107 = vmatpush.bf16.msra.mxu2 %v9974_v23  ;;  %7082 = vmatpush.bf16.msra.mxu0 %v8886_v32  ;;  %v13021_v33 = vld [vmem:[%s14227_s8 + $0xdd4] sm:$0xf0] }
 0x29c   : > { %7076 = vmatmul.bf16.vlgmr.msrb.gmra.mxu3 %v14415_v39  ;;  %v8629_v23 = vld [vmem:[%s14227_s8 + $0x118] sm:$0xf]  ;;  %v6857_v30 = vadd.f32 %v6856_v26, %v6844_v21 }
 0x29d   : > { %7120 = vmatpush.bf16.msra.mxu3 %v10486_v14  ;;  %7095 = vmatpush.bf16.msra.mxu1 %v9398_v40  ;;  %v12621_v24 = vld [vmem:[%s14227_s8 + $0x154] sm:$0xf0]  ;;  %v10230_v14 = vor.u32 %v13021_v33, %v10229_v18 }
 0x29e   : > { %v9141_v25 = vld [vmem:[%s14227_s8 + $0x518] sm:$0xf]  ;;  %v15153_v43 = vadd.f32 %v6869_v31, %v6857_v30 }
 0x29f   : > { %7108 = vmatpush.bf16.msra.mxu2 %v9910_v42  ;;  %7083 = vmatpush.bf16.msra.mxu0 %v8822_v53  ;;  %v12749_v27 = vld [vmem:[%s14227_s8 + $0x554] sm:$0xf0]  ;;  %v8630_v42 = vor.u32 %v12621_v24, %v8629_v23  ;;  %v6832_v45 = vpop.f32.mrf.mxu0 }
 0x2a0   : > { %v9653_v28 = vld [vmem:[%s14227_s8 + $0x918] sm:$0xf]  ;;  %v9142_v46 = vor.u32 %v12749_v27, %v9141_v25 }
 0x2a1   : > { %7121 = vmatpush.bf16.msra.mxu3 %v10422_v47  ;;  %7096 = vmatpush.bf16.msra.mxu1 %v9334_v54  ;;  %v12877_v29 = vld [vmem:[%s14227_s8 + $0x954] sm:$0xf0] }
 0x2a2   : > { %v10165_v32 = vld [vmem:[%s14227_s8 + $0xd18] sm:$0xf]  ;;  %v9654_v47 = vor.u32 %v12877_v29, %v9653_v28 }
 0x2a3   : > { %7109 = vmatpush.bf16.msra.mxu2 %v9846_v55  ;;  %7084 = vmatpush.bf16.msra.mxu0 %v8758_v2  ;;  %v13005_v40 = vld [vmem:[%s14227_s8 + $0xd54] sm:$0xf0] }
 0x2a4   : > { %v8565_v48 = vld [vmem:[%s14227_s8 + $0x98] sm:$0xf]  ;;  %v10166_v52 = vor.u32 %v13005_v40, %v10165_v32 }
 0x2a5   : > { %7122 = vmatpush.bf16.msra.mxu3 %v10358_v60  ;;  %7097 = vmatpush.bf16.msra.mxu1 %v9270_v4  ;;  %v12605_v49 = vld [vmem:[%s14227_s8 + $0xd4] sm:$0xf0] }
 0x2a6   : > { %v9077_v50 = vld [vmem:[%s14227_s8 + $0x498] sm:$0xf]  ;;  %v8566_v58 = vor.u32 %v12605_v49, %v8565_v48 }
 0x2a7   : > { %7110 = vmatpush.bf16.msra.mxu2 %v9782_v7  ;;  %7085 = vmatpush.bf16.msra.mxu0 %v8694_v38  ;;  %v12733_v53 = vld [vmem:[%s14227_s8 + $0x4d4] sm:$0xf0] }
 0x2a8   : > { %v9589_v54 = vld [vmem:[%s14227_s8 + $0x898] sm:$0xf]  ;;  %v9078_v62 = vor.u32 %v12733_v53, %v9077_v50 }
 0x2a9   : > { %7123 = vmatpush.bf16.msra.mxu3 %v10294_v13  ;;  %7098 = vmatpush.bf16.msra.mxu1 %v9206_v37  ;;  %v12861_v55 = vld [vmem:[%s14227_s8 + $0x8d4] sm:$0xf0] }
 0x2aa   : > { %v10101_v56 = vld [vmem:[%s14227_s8 + $0xc98] sm:$0xf]  ;;  %v9590_v63 = vor.u32 %v12861_v55, %v9589_v54 }
 0x2ab   : > { %7111 = vmatpush.bf16.msra.mxu2 %v9718_v22  ;;  %v12989_v57 = vld [vmem:[%s14227_s8 + $0xcd4] sm:$0xf0]  ;;  %7086 = vmatpush.bf16.msra.mxu0 %v8630_v42 }
 0x2ac   : > { %v8501_v60 = vld [vmem:[%s14227_s8 + $0x18] sm:$0xf]  ;;  %v10102_v4 = vor.u32 %v12989_v57, %v10101_v56 }
 0x2ad   : > { %7124 = vmatpush.bf16.msra.mxu3 %v10230_v14  ;;  %v12589_v61 = vld [vmem:[%s14227_s8 + $0x54] sm:$0xf0]  ;;  %7099 = vmatpush.bf16.msra.mxu1 %v9142_v46 }
 0x2ae   : > { %v9013_v0 = vld [vmem:[%s14227_s8 + $0x418] sm:$0xf]  ;;  %v8502_v15 = vor.u32 %v12589_v61, %v8501_v60 }
 0x2af   : > { %7112 = vmatpush.bf16.msra.mxu2 %v9654_v47  ;;  %v12717_v1 = vld [vmem:[%s14227_s8 + $0x454] sm:$0xf0]  ;;  %7087 = vmatpush.bf16.msra.mxu0 %v8566_v58 }
 0x2b0   : > { %v9525_v2 = vld [vmem:[%s14227_s8 + $0x818] sm:$0xf]  ;;  %v9014_v33 = vor.u32 %v12717_v1, %v9013_v0 }
 0x2b1   : > { %7125 = vmatpush.bf16.msra.mxu3 %v10166_v52  ;;  %v12845_v7 = vld [vmem:[%s14227_s8 + $0x854] sm:$0xf0]  ;;  %7100 = vmatpush.bf16.msra.mxu1 %v9078_v62 }
 0x2b2   : > { %v10037_v8 = vld [vmem:[%s14227_s8 + $0xc18] sm:$0xf]  ;;  %v9526_v21 = vor.u32 %v12845_v7, %v9525_v2 }
 0x2b3   : > { %v12973_v9 = vld [vmem:[%s14227_s8 + $0xc54] sm:$0xf0]  ;;  %7113 = vmatpush.bf16.msra.mxu2 %v9590_v63  ;;  %7088 = vmatpush.bf16.msra.mxu0 %v8502_v15  ;;  %v6895_v15 = vpop.f32.mrf.mxu1 }
 0x2b4   : > { %v10997_v11 = vld [vmem:[%s14227_s8 + $0x1398] sm:$0xf]  ;;  %v10038_v22 = vor.u32 %v12973_v9, %v10037_v8  ;;  %v6882_v8 = vpop.f32.mrf.mxu0 }
 0x2b5   : > { %v13213_v12 = vld [vmem:[%s14227_s8 + $0x13d4] sm:$0xf0]  ;;  %7126 = vmatpush.bf16.msra.mxu3 %v10102_v4  ;;  %7101 = vmatpush.bf16.msra.mxu1 %v9014_v33 }
 0x2b6   : > { %v11509_v13 = vld [vmem:[%s14227_s8 + $0x1798] sm:$0xf]  ;;  %v10998_v23 = vor.u32 %v13213_v12, %v10997_v11  ;;  %7089 = vmatmul.bf16.vlgmr.msra.gmra.mxu0 %v14340_v6 }
 0x2b7   : > { %v13341_v16 = vld [vmem:[%s14227_s8 + $0x17d4] sm:$0xf0]  ;;  %7114 = vmatpush.bf16.msra.mxu2 %v9526_v21  ;;  %v6896_v21 = vadd.f32 %v6895_v15, %v6882_v8  ;;  %v12693_v15 = vld [vmem:[%s14227_s8 + $0x39c] sm:$0xf] }
 0x2b8   : > { %v12021_v17 = vld [vmem:[%s14227_s8 + $0x1b98] sm:$0xf]  ;;  %v11510_v24 = vor.u32 %v13341_v16, %v11509_v13  ;;  %7133 = vmatpush.bf16.msrb.mxu0 %v10998_v23  ;;  %7102 = vmatmul.bf16.vlgmr.msra.gmra.mxu1 %v14355_v20 }
 0x2b9   : > { %v13469_v18 = vld [vmem:[%s14227_s8 + $0x1bd4] sm:$0xf0]  ;;  %7127 = vmatpush.bf16.msra.mxu3 %v10038_v22 }
 0x2ba   : > { %v12533_v38 = vld [vmem:[%s14227_s8 + $0x1f98] sm:$0xf]  ;;  %v12022_v25 = vor.u32 %v13469_v18, %v12021_v17  ;;  %7146 = vmatpush.bf16.msrb.mxu1 %v11510_v24  ;;  %7115 = vmatmul.bf16.vlgmr.msra.gmra.mxu2 %v14338_v5 }
 0x2bb   : > { %v13597_v37 = vld [vmem:[%s14227_s8 + $0x1fd4] sm:$0xf0] }
 0x2bc   : > { %v10933_v26 = vld [vmem:[%s14227_s8 + $0x1318] sm:$0xf]  ;;  %v12534_v28 = vor.u32 %v13597_v37, %v12533_v38  ;;  %7159 = vmatpush.bf16.msrb.mxu2 %v12022_v25  ;;  %7128 = vmatmul.bf16.vlgmr.msra.gmra.mxu3 %v14353_v19 }
 0x2bd   : > { %v13197_v14 = vld [vmem:[%s14227_s8 + $0x1354] sm:$0xf0] }
 0x2be   : > { %v11445_v27 = vld [vmem:[%s14227_s8 + $0x1718] sm:$0xf]  ;;  %v10934_v42 = vor.u32 %v13197_v14, %v10933_v26  ;;  %7172 = vmatpush.bf16.msrb.mxu3 %v12534_v28 }
 0x2bf   : > { %v13325_v29 = vld [vmem:[%s14227_s8 + $0x1754] sm:$0xf0] }
 0x2c0   : > { %v11957_v30 = vld [vmem:[%s14227_s8 + $0x1b18] sm:$0xf]  ;;  %v11446_v45 = vor.u32 %v13325_v29, %v11445_v27  ;;  %7134 = vmatpush.bf16.msrb.mxu0 %v10934_v42  ;;  %v6908_v27 = vpop.f32.mrf.mxu2 }
 0x2c1   : > { %v13453_v31 = vld [vmem:[%s14227_s8 + $0x1b54] sm:$0xf0] }
 0x2c2   : > { %v12469_v32 = vld [vmem:[%s14227_s8 + $0x1f18] sm:$0xf]  ;;  %v11958_v46 = vor.u32 %v13453_v31, %v11957_v30  ;;  %7147 = vmatpush.bf16.msrb.mxu1 %v11446_v45 }
 0x2c3   : > { %v13581_v40 = vld [vmem:[%s14227_s8 + $0x1f54] sm:$0xf0] }
 0x2c4   : > { %v10869_v47 = vld [vmem:[%s14227_s8 + $0x1298] sm:$0xf]  ;;  %v12470_v50 = vor.u32 %v13581_v40, %v12469_v32  ;;  %7160 = vmatpush.bf16.msrb.mxu2 %v11958_v46  ;;  %v6909_v32 = vadd.f32 %v6908_v27, %v6896_v21  ;;  %v6921_v40 = vpop.f32.mrf.mxu3  ;;  %v12949_v21 = vld [vmem:[%s14227_s8 + $0xb9c] sm:$0xf] }
 0x2c5   : > { %v13181_v48 = vld [vmem:[%s14227_s8 + $0x12d4] sm:$0xf0] }
 0x2c6   : > { %v11381_v49 = vld [vmem:[%s14227_s8 + $0x1698] sm:$0xf]  ;;  %v10870_v56 = vor.u32 %v13181_v48, %v10869_v47  ;;  %7173 = vmatpush.bf16.msrb.mxu3 %v12470_v50  ;;  %v15223_v47 = vadd.f32 %v6921_v40, %v6909_v32  ;;  %v6884_v48 = vpop.f32.mrf.mxu0  ;;  %v9399_v32 = vld [vmem:[%s14227_s8 + $0x758] sm:$0xf0] }
 0x2c7   : > { %v13309_v51 = vld [vmem:[%s14227_s8 + $0x16d4] sm:$0xf0]  ;;  %v12933_v40 = vld [vmem:[%s14227_s8 + $0xb1c] sm:$0xf] }
 0x2c8   : > { %v11893_v52 = vld [vmem:[%s14227_s8 + $0x1a98] sm:$0xf]  ;;  %v11382_v57 = vor.u32 %v13309_v51, %v11381_v49  ;;  %7135 = vmatpush.bf16.msrb.mxu0 %v10870_v56  ;;  %v6910_v8 = vpop.f32.mrf.mxu2 }
 0x2c9   : > { %v13437_v53 = vld [vmem:[%s14227_s8 + $0x1ad4] sm:$0xf0]  ;;  %v9783_v8 = vld [vmem:[%s14227_s8 + $0xa58] sm:$0xf0] }
 0x2ca   : > { %v12405_v54 = vld [vmem:[%s14227_s8 + $0x1e98] sm:$0xf]  ;;  %v11894_v58 = vor.u32 %v13437_v53, %v11893_v52  ;;  %7148 = vmatpush.bf16.msrb.mxu1 %v11382_v57 }
 0x2cb   : > { %v13565_v55 = vld [vmem:[%s14227_s8 + $0x1ed4] sm:$0xf0] }
 0x2cc   : > { %v10805_v60 = vld [vmem:[%s14227_s8 + $0x1218] sm:$0xf]  ;;  %v12406_v63 = vor.u32 %v13565_v55, %v12405_v54  ;;  %7161 = vmatpush.bf16.msrb.mxu2 %v11894_v58  ;;  %v6897_v54 = vpop.f32.mrf.mxu1 }
 0x2cd   : > { %v13165_v61 = vld [vmem:[%s14227_s8 + $0x1254] sm:$0xf0] }
 0x2ce   : > { %v11317_v62 = vld [vmem:[%s14227_s8 + $0x1618] sm:$0xf]  ;;  %v10806_v7 = vor.u32 %v13165_v61, %v10805_v60  ;;  %7174 = vmatpush.bf16.msrb.mxu3 %v12406_v63 }
 0x2cf   : > { %v13293_v0 = vld [vmem:[%s14227_s8 + $0x1654] sm:$0xf0] }
 0x2d0   : > { %v11829_v1 = vld [vmem:[%s14227_s8 + $0x1a18] sm:$0xf]  ;;  %v11318_v9 = vor.u32 %v13293_v0, %v11317_v62  ;;  %7136 = vmatpush.bf16.msrb.mxu0 %v10806_v7 }
 0x2d1   : > { %v13421_v2 = vld [vmem:[%s14227_s8 + $0x1a54] sm:$0xf0] }
 0x2d2   : > { %v12341_v3 = vld [vmem:[%s14227_s8 + $0x1e18] sm:$0xf]  ;;  %v11830_v10 = vor.u32 %v13421_v2, %v11829_v1  ;;  %7149 = vmatpush.bf16.msrb.mxu1 %v11318_v9 }
 0x2d3   : > { %v13549_v4 = vld [vmem:[%s14227_s8 + $0x1e54] sm:$0xf0] }
 0x2d4   : > { %v10741_v11 = vld [vmem:[%s14227_s8 + $0x1198] sm:$0xf]  ;;  %v12342_v16 = vor.u32 %v13549_v4, %v12341_v3  ;;  %7162 = vmatpush.bf16.msrb.mxu2 %v11830_v10 }
 0x2d5   : > { %v13149_v12 = vld [vmem:[%s14227_s8 + $0x11d4] sm:$0xf0] }
 0x2d6   : > { %v11253_v13 = vld [vmem:[%s14227_s8 + $0x1598] sm:$0xf]  ;;  %v10742_v22 = vor.u32 %v13149_v12, %v10741_v11  ;;  %7175 = vmatpush.bf16.msrb.mxu3 %v12342_v16  ;;  %v8951_v16 = vld [vmem:[%s14227_s8 + $0x3d8] sm:$0xf0] }
 0x2d7   : > { %v13277_v17 = vld [vmem:[%s14227_s8 + $0x15d4] sm:$0xf0] }
 0x2d8   : > { %v11765_v18 = vld [vmem:[%s14227_s8 + $0x1998] sm:$0xf]  ;;  %v11254_v23 = vor.u32 %v13277_v17, %v11253_v13  ;;  %7137 = vmatpush.bf16.msrb.mxu0 %v10742_v22  ;;  %v6923_v13 = vpop.f32.mrf.mxu3  ;;  %v12821_v17 = vld [vmem:[%s14227_s8 + $0x79c] sm:$0xf] }
 0x2d9   : > { %v13405_v33 = vld [vmem:[%s14227_s8 + $0x19d4] sm:$0xf0] }
 0x2da   : > { %v12277_v38 = vld [vmem:[%s14227_s8 + $0x1d98] sm:$0xf]  ;;  %v11766_v24 = vor.u32 %v13405_v33, %v11765_v18  ;;  %7150 = vmatpush.bf16.msrb.mxu1 %v11254_v23  ;;  %v9463_v33 = vld [vmem:[%s14227_s8 + $0x7d8] sm:$0xf0] }
 0x2db   : > { %v13533_v37 = vld [vmem:[%s14227_s8 + $0x1dd4] sm:$0xf0]  ;;  %v13077_v23 = vld [vmem:[%s14227_s8 + $0xf9c] sm:$0xf] }
 0x2dc   : > { %v10677_v25 = vld [vmem:[%s14227_s8 + $0x1118] sm:$0xf]  ;;  %v12278_v28 = vor.u32 %v13533_v37, %v12277_v38  ;;  %7163 = vmatpush.bf16.msrb.mxu2 %v11766_v24  ;;  %v9975_v38 = vld [vmem:[%s14227_s8 + $0xbd8] sm:$0xf0] }
 0x2dd   : > { %v13133_v26 = vld [vmem:[%s14227_s8 + $0x1154] sm:$0xf0]  ;;  %v10487_v24 = vld [vmem:[%s14227_s8 + $0xfd8] sm:$0xf0]  ;;  %v9978_v27 = vor.u32 %v12949_v21, %v9975_v38  ;;  %v6947_v21 = vpop.f32.mrf.mxu1 }
 0x2de   : > { %v11189_v14 = vld [vmem:[%s14227_s8 + $0x1518] sm:$0xf]  ;;  %v10678_v46 = vor.u32 %v13133_v26, %v10677_v25  ;;  %7176 = vmatpush.bf16.msrb.mxu3 %v12278_v28  ;;  %v8954_v26 = vor.u32 %v12693_v15, %v8951_v16  ;;  %v12677_v28 = vld [vmem:[%s14227_s8 + $0x31c] sm:$0xf] }
 0x2df   : > { %v13261_v29 = vld [vmem:[%s14227_s8 + $0x1554] sm:$0xf0]  ;;  %v12629_v16 = vld [vmem:[%s14227_s8 + $0x19c] sm:$0xf] }
 0x2e0   : > { %v11701_v30 = vld [vmem:[%s14227_s8 + $0x1918] sm:$0xf]  ;;  %v11190_v49 = vor.u32 %v13261_v29, %v11189_v14  ;;  %7138 = vmatpush.bf16.msrb.mxu0 %v10678_v46  ;;  %v9466_v14 = vor.u32 %v12821_v17, %v9463_v33  ;;  %v8887_v29 = vld [vmem:[%s14227_s8 + $0x358] sm:$0xf0] }
 0x2e1   : > { %v13389_v31 = vld [vmem:[%s14227_s8 + $0x1954] sm:$0xf0]  ;;  %v10423_v46 = vld [vmem:[%s14227_s8 + $0xf58] sm:$0xf0]  ;;  %v8890_v48 = vor.u32 %v12677_v28, %v8887_v29 }
 0x2e2   : > { %v12213_v42 = vld [vmem:[%s14227_s8 + $0x1d18] sm:$0xf]  ;;  %v11702_v50 = vor.u32 %v13389_v31, %v11701_v30  ;;  %7151 = vmatpush.bf16.msrb.mxu1 %v11190_v49  ;;  %v12805_v30 = vld [vmem:[%s14227_s8 + $0x71c] sm:$0xf]  ;;  %v10490_v31 = vor.u32 %v13077_v23, %v10487_v24 }
 0x2e3   : > { %v13517_v45 = vld [vmem:[%s14227_s8 + $0x1d54] sm:$0xf0]  ;;  %v9402_v49 = vor.u32 %v12805_v30, %v9399_v32  ;;  %v8695_v17 = vld [vmem:[%s14227_s8 + $0x1d8] sm:$0xf0] }
 0x2e4   : > { %v10613_v51 = vld [vmem:[%s14227_s8 + $0x1098] sm:$0xf]  ;;  %v12214_v55 = vor.u32 %v13517_v45, %v12213_v42  ;;  %7164 = vmatpush.bf16.msrb.mxu2 %v11702_v50  ;;  %v9911_v42 = vld [vmem:[%s14227_s8 + $0xb58] sm:$0xf0] }
 0x2e5   : > { %v13117_v52 = vld [vmem:[%s14227_s8 + $0x10d4] sm:$0xf0]  ;;  %v13061_v45 = vld [vmem:[%s14227_s8 + $0xf1c] sm:$0xf]  ;;  %v9914_v50 = vor.u32 %v12933_v40, %v9911_v42 }
 0x2e6   : > { %v11125_v53 = vld [vmem:[%s14227_s8 + $0x1498] sm:$0xf]  ;;  %v10614_v62 = vor.u32 %v13117_v52, %v10613_v51  ;;  %7177 = vmatpush.bf16.msrb.mxu3 %v12214_v55  ;;  %v12661_v51 = vld [vmem:[%s14227_s8 + $0x29c] sm:$0xf]  ;;  %v10426_v54 = vor.u32 %v13061_v45, %v10423_v46 }
 0x2e7   : > { %v13245_v56 = vld [vmem:[%s14227_s8 + $0x14d4] sm:$0xf0]  ;;  %v8823_v52 = vld [vmem:[%s14227_s8 + $0x2d8] sm:$0xf0] }
 0x2e8   : > { %v11637_v57 = vld [vmem:[%s14227_s8 + $0x1898] sm:$0xf]  ;;  %v11126_v1 = vor.u32 %v13245_v56, %v11125_v53  ;;  %7139 = vmatpush.bf16.msrb.mxu0 %v10614_v62  ;;  %v12789_v53 = vld [vmem:[%s14227_s8 + $0x69c] sm:$0xf] }
 0x2e9   : > { %v13373_v58 = vld [vmem:[%s14227_s8 + $0x18d4] sm:$0xf0]  ;;  %v9335_v55 = vld [vmem:[%s14227_s8 + $0x6d8] sm:$0xf0] }
 0x2ea   : > { %v12149_v60 = vld [vmem:[%s14227_s8 + $0x1c98] sm:$0xf]  ;;  %v11638_v2 = vor.u32 %v13373_v58, %v11637_v57  ;;  %7152 = vmatpush.bf16.msrb.mxu1 %v11126_v1  ;;  %v12917_v56 = vld [vmem:[%s14227_s8 + $0xa9c] sm:$0xf]  ;;  %v9338_v62 = vor.u32 %v12789_v53, %v9335_v55 }
 0x2eb   : > { %v13501_v61 = vld [vmem:[%s14227_s8 + $0x1cd4] sm:$0xf0]  ;;  %v9847_v57 = vld [vmem:[%s14227_s8 + $0xad8] sm:$0xf0] }
 0x2ec   : > { %v10549_v63 = vld [vmem:[%s14227_s8 + $0x1018] sm:$0xf]  ;;  %v12150_v9 = vor.u32 %v13501_v61, %v12149_v60  ;;  %7165 = vmatpush.bf16.msrb.mxu2 %v11638_v2  ;;  %v13045_v58 = vld [vmem:[%s14227_s8 + $0xe9c] sm:$0xf]  ;;  %v8826_v61 = vor.u32 %v12661_v51, %v8823_v52 }
 0x2ed   : > { %v13101_v0 = vld [vmem:[%s14227_s8 + $0x1054] sm:$0xf0]  ;;  %v10359_v60 = vld [vmem:[%s14227_s8 + $0xed8] sm:$0xf0] }
 0x2ee   : > { %v11061_v3 = vld [vmem:[%s14227_s8 + $0x1418] sm:$0xf]  ;;  %v10550_v18 = vor.u32 %v13101_v0, %v10549_v63  ;;  %7178 = vmatpush.bf16.msrb.mxu3 %v12150_v9  ;;  %v9850_v63 = vor.u32 %v12917_v56, %v9847_v57  ;;  %v12645_v0 = vld [vmem:[%s14227_s8 + $0x21c] sm:$0xf] }
 0x2ef   : > { %v13229_v4 = vld [vmem:[%s14227_s8 + $0x1454] sm:$0xf0]  ;;  %v8759_v1 = vld [vmem:[%s14227_s8 + $0x258] sm:$0xf0] }
 0x2f0   : > { %v11573_v7 = vld [vmem:[%s14227_s8 + $0x1818] sm:$0xf]  ;;  %v11062_v37 = vor.u32 %v13229_v4, %v11061_v3  ;;  %7140 = vmatpush.bf16.msrb.mxu0 %v10550_v18  ;;  %v12773_v2 = vld [vmem:[%s14227_s8 + $0x61c] sm:$0xf]  ;;  %v10362_v3 = vor.u32 %v13045_v58, %v10359_v60  ;;  %v6949_v60 = vpop.f32.mrf.mxu1 }
 0x2f1   : > { %v13357_v10 = vld [vmem:[%s14227_s8 + $0x1854] sm:$0xf0]  ;;  %v9271_v4 = vld [vmem:[%s14227_s8 + $0x658] sm:$0xf0] }
 0x2f2   : > { %v12085_v11 = vld [vmem:[%s14227_s8 + $0x1c18] sm:$0xf]  ;;  %v11574_v22 = vor.u32 %v13357_v10, %v11573_v7  ;;  %7153 = vmatpush.bf16.msrb.mxu1 %v11062_v37  ;;  %v12901_v7 = vld [vmem:[%s14227_s8 + $0xa1c] sm:$0xf]  ;;  %v9274_v13 = vor.u32 %v12773_v2, %v9271_v4 }
 0x2f3   : > { %v13485_v12 = vld [vmem:[%s14227_s8 + $0x1c54] sm:$0xf0]  ;;  %7141 = vmatmul.bf16.vlgmr.msrb.gmra.mxu0 %v14413_v59  ;;  %v13029_v9 = vld [vmem:[%s14227_s8 + $0xe1c] sm:$0xf]  ;;  %v9786_v15 = vor.u32 %v12901_v7, %v9783_v8 }
 0x2f4   : > { %v12086_v25 = vor.u32 %v13485_v12, %v12085_v11  ;;  %7166 = vmatpush.bf16.msrb.mxu2 %v11574_v22  ;;  %7185 = vmatpush.bf16.msra.mxu0 %v8954_v26  ;;  %v10295_v10 = vld [vmem:[%s14227_s8 + $0xe58] sm:$0xf0]  ;;  %v8762_v11 = vor.u32 %v12645_v0, %v8759_v1  ;;  %v6934_v12 = vpop.f32.mrf.mxu0 }
 0x2f5   : > { %7154 = vmatmul.bf16.vlgmr.msrb.gmra.mxu1 %v14417_v41  ;;  %v12757_v18 = vld [vmem:[%s14227_s8 + $0x59c] sm:$0xf]  ;;  %v6935_v33 = vadd.f32 %v6934_v12, %v15223_v47  ;;  %v10298_v38 = vor.u32 %v13029_v9, %v10295_v10 }
 0x2f6   : > { %7179 = vmatpush.bf16.msrb.mxu3 %v12086_v25  ;;  %7198 = vmatpush.bf16.msra.mxu1 %v9466_v14  ;;  %v9207_v37 = vld [vmem:[%s14227_s8 + $0x5d8] sm:$0xf0]  ;;  %v8698_v14 = vor.u32 %v12629_v16, %v8695_v17 }
 0x2f7   : > { %7167 = vmatmul.bf16.vlgmr.msrb.gmra.mxu2 %v14409_v36  ;;  %v12885_v22 = vld [vmem:[%s14227_s8 + $0x99c] sm:$0xf]  ;;  %v6948_v26 = vadd.f32 %v6947_v21, %v6935_v33  ;;  %v9210_v47 = vor.u32 %v12757_v18, %v9207_v37 }
 0x2f8   : > { %7211 = vmatpush.bf16.msra.mxu2 %v9978_v27  ;;  %7186 = vmatpush.bf16.msra.mxu0 %v8890_v48  ;;  %v9719_v23 = vld [vmem:[%s14227_s8 + $0x9d8] sm:$0xf0]  ;;  %v6973_v48 = vpop.f32.mrf.mxu3 }
 0x2f9   : > { %7180 = vmatmul.bf16.vlgmr.msrb.gmra.mxu3 %v14415_v39  ;;  %v13013_v24 = vld [vmem:[%s14227_s8 + $0xd9c] sm:$0xf]  ;;  %v9722_v27 = vor.u32 %v12885_v22, %v9719_v23 }
 0x2fa   : > { %7224 = vmatpush.bf16.msra.mxu3 %v10490_v31  ;;  %7199 = vmatpush.bf16.msra.mxu1 %v9402_v49  ;;  %v10231_v25 = vld [vmem:[%s14227_s8 + $0xdd8] sm:$0xf0]  ;;  %v6960_v31 = vpop.f32.mrf.mxu2 }
 0x2fb   : > { %v12613_v28 = vld [vmem:[%s14227_s8 + $0x11c] sm:$0xf]  ;;  %v10234_v32 = vor.u32 %v13013_v24, %v10231_v25  ;;  %v6961_v46 = vadd.f32 %v6960_v31, %v6948_v26 }
 0x2fc   : > { %7212 = vmatpush.bf16.msra.mxu2 %v9914_v50  ;;  %7187 = vmatpush.bf16.msra.mxu0 %v8826_v61  ;;  %v8631_v29 = vld [vmem:[%s14227_s8 + $0x158] sm:$0xf0]  ;;  %v6936_v53 = vpop.f32.mrf.mxu0 }
 0x2fd   : > { %v12741_v30 = vld [vmem:[%s14227_s8 + $0x51c] sm:$0xf]  ;;  %v8634_v51 = vor.u32 %v12613_v28, %v8631_v29  ;;  %v15294_v52 = vadd.f32 %v6973_v48, %v6961_v46 }
 0x2fe   : > { %7225 = vmatpush.bf16.msra.mxu3 %v10426_v54  ;;  %7200 = vmatpush.bf16.msra.mxu1 %v9338_v62  ;;  %v9143_v40 = vld [vmem:[%s14227_s8 + $0x558] sm:$0xf0] }
 0x2ff   : > { %v12869_v42 = vld [vmem:[%s14227_s8 + $0x91c] sm:$0xf]  ;;  %v9146_v54 = vor.u32 %v12741_v30, %v9143_v40 }
 0x300   : > { %7213 = vmatpush.bf16.msra.mxu2 %v9850_v63  ;;  %7188 = vmatpush.bf16.msra.mxu0 %v8762_v11  ;;  %v9655_v45 = vld [vmem:[%s14227_s8 + $0x958] sm:$0xf0]  ;;  %v6975_v33 = vpop.f32.mrf.mxu3 }
 0x301   : > { %v12997_v49 = vld [vmem:[%s14227_s8 + $0xd1c] sm:$0xf]  ;;  %v9658_v55 = vor.u32 %v12869_v42, %v9655_v45 }
 0x302   : > { %7226 = vmatpush.bf16.msra.mxu3 %v10362_v3  ;;  %7201 = vmatpush.bf16.msra.mxu1 %v9274_v13  ;;  %v10167_v50 = vld [vmem:[%s14227_s8 + $0xd58] sm:$0xf0]  ;;  %v6962_v13 = vpop.f32.mrf.mxu2 }
 0x303   : > { %v12597_v56 = vld [vmem:[%s14227_s8 + $0x9c] sm:$0xf]  ;;  %v10170_v61 = vor.u32 %v12997_v49, %v10167_v50 }
 0x304   : > { %7214 = vmatpush.bf16.msra.mxu2 %v9786_v15  ;;  %7189 = vmatpush.bf16.msra.mxu0 %v8698_v14  ;;  %v8567_v57 = vld [vmem:[%s14227_s8 + $0xd8] sm:$0xf0] }
 0x305   : > { %v12725_v58 = vld [vmem:[%s14227_s8 + $0x49c] sm:$0xf]  ;;  %v8570_v3 = vor.u32 %v12597_v56, %v8567_v57 }
 0x306   : > { %7227 = vmatpush.bf16.msra.mxu3 %v10298_v38  ;;  %7202 = vmatpush.bf16.msra.mxu1 %v9210_v47  ;;  %v9079_v62 = vld [vmem:[%s14227_s8 + $0x4d8] sm:$0xf0] }
 0x307   : > { %v12853_v63 = vld [vmem:[%s14227_s8 + $0x89c] sm:$0xf]  ;;  %v9082_v8 = vor.u32 %v12725_v58, %v9079_v62 }
 0x308   : > { %7215 = vmatpush.bf16.msra.mxu2 %v9722_v27  ;;  %v9591_v0 = vld [vmem:[%s14227_s8 + $0x8d8] sm:$0xf0]  ;;  %7190 = vmatpush.bf16.msra.mxu0 %v8634_v51 }
 0x309   : > { %v12981_v1 = vld [vmem:[%s14227_s8 + $0xc9c] sm:$0xf]  ;;  %v9594_v9 = vor.u32 %v12853_v63, %v9591_v0 }
 0x30a   : > { %7228 = vmatpush.bf16.msra.mxu3 %v10234_v32  ;;  %v10103_v2 = vld [vmem:[%s14227_s8 + $0xcd8] sm:$0xf0]  ;;  %7203 = vmatpush.bf16.msra.mxu1 %v9146_v54 }
 0x30b   : > { %v12581_v4 = vld [vmem:[%s14227_s8 + $0x1c] sm:$0xf]  ;;  %v10106_v15 = vor.u32 %v12981_v1, %v10103_v2 }
 0x30c   : > { %v8503_v7 = vld [vmem:[%s14227_s8 + $0x58] sm:$0xf0]  ;;  %7216 = vmatpush.bf16.msra.mxu2 %v9658_v55  ;;  %7191 = vmatpush.bf16.msra.mxu0 %v8570_v3 }
 0x30d   : > { %v12709_v10 = vld [vmem:[%s14227_s8 + $0x41c] sm:$0xf]  ;;  %v8506_v22 = vor.u32 %v12581_v4, %v8503_v7 }
 0x30e   : > { %v9015_v11 = vld [vmem:[%s14227_s8 + $0x458] sm:$0xf0]  ;;  %7229 = vmatpush.bf16.msra.mxu3 %v10170_v61  ;;  %7204 = vmatpush.bf16.msra.mxu1 %v9082_v8 }
 0x30f   : > { %v12837_v12 = vld [vmem:[%s14227_s8 + $0x81c] sm:$0xf]  ;;  %v9018_v26 = vor.u32 %v12709_v10, %v9015_v11 }
 0x310   : > { %v9527_v16 = vld [vmem:[%s14227_s8 + $0x858] sm:$0xf0]  ;;  %7217 = vmatpush.bf16.msra.mxu2 %v9594_v9  ;;  %7192 = vmatpush.bf16.msra.mxu0 %v8506_v22 }
 0x311   : > { %v12965_v17 = vld [vmem:[%s14227_s8 + $0xc1c] sm:$0xf]  ;;  %v9530_v14 = vor.u32 %v12837_v12, %v9527_v16 }
 0x312   : > { %v10039_v18 = vld [vmem:[%s14227_s8 + $0xc58] sm:$0xf0]  ;;  %7230 = vmatpush.bf16.msra.mxu3 %v10106_v15  ;;  %7205 = vmatpush.bf16.msra.mxu1 %v9018_v26 }
 0x313   : > { %v13205_v21 = vld [vmem:[%s14227_s8 + $0x139c] sm:$0xf]  ;;  %v10042_v28 = vor.u32 %v12965_v17, %v10039_v18  ;;  %7193 = vmatmul.bf16.vlgmr.msra.gmra.mxu0 %v14340_v6  ;;  %v6986_v18 = vpop.f32.mrf.mxu0 }
 0x314   : > { %v10999_v38 = vld [vmem:[%s14227_s8 + $0x13d8] sm:$0xf0]  ;;  %7218 = vmatpush.bf16.msra.mxu2 %v9530_v14 }
 0x315   : > { %v13333_v37 = vld [vmem:[%s14227_s8 + $0x179c] sm:$0xf]  ;;  %v11002_v29 = vor.u32 %v13205_v21, %v10999_v38  ;;  %7206 = vmatmul.bf16.vlgmr.msra.gmra.mxu1 %v14355_v20 }
 0x316   : > { %v11511_v23 = vld [vmem:[%s14227_s8 + $0x17d8] sm:$0xf0]  ;;  %7231 = vmatpush.bf16.msra.mxu3 %v10042_v28 }
 0x317   : > { %v13461_v24 = vld [vmem:[%s14227_s8 + $0x1b9c] sm:$0xf]  ;;  %v11514_v30 = vor.u32 %v13333_v37, %v11511_v23  ;;  %7237 = vmatpush.bf16.msrb.mxu0 %v11002_v29  ;;  %7219 = vmatmul.bf16.vlgmr.msra.gmra.mxu2 %v14338_v5  ;;  %v6999_v23 = vpop.f32.mrf.mxu1 }
 0x318   : > { %v12023_v25 = vld [vmem:[%s14227_s8 + $0x1bd8] sm:$0xf0] }
 0x319   : > { %v13589_v47 = vld [vmem:[%s14227_s8 + $0x1f9c] sm:$0xf]  ;;  %v12026_v31 = vor.u32 %v13461_v24, %v12023_v25  ;;  %7250 = vmatpush.bf16.msrb.mxu1 %v11514_v30  ;;  %7232 = vmatmul.bf16.vlgmr.msra.gmra.mxu3 %v14353_v19 }
 0x31a   : > { %v12535_v27 = vld [vmem:[%s14227_s8 + $0x1fd8] sm:$0xf0] }
 0x31b   : > { %v13189_v32 = vld [vmem:[%s14227_s8 + $0x131c] sm:$0xf]  ;;  %v12538_v45 = vor.u32 %v13589_v47, %v12535_v27  ;;  %7263 = vmatpush.bf16.msrb.mxu2 %v12026_v31  ;;  %v7000_v47 = vadd.f32 %v6999_v23, %v6986_v18 }
 0x31c   : > { %v10935_v40 = vld [vmem:[%s14227_s8 + $0x1358] sm:$0xf0] }
 0x31d   : > { %v13317_v42 = vld [vmem:[%s14227_s8 + $0x171c] sm:$0xf]  ;;  %v10938_v53 = vor.u32 %v13189_v32, %v10935_v40  ;;  %7276 = vmatpush.bf16.msrb.mxu3 %v12538_v45  ;;  %v7012_v45 = vpop.f32.mrf.mxu2 }
 0x31e   : > { %v11447_v46 = vld [vmem:[%s14227_s8 + $0x1758] sm:$0xf0] }
 0x31f   : > { %v13445_v48 = vld [vmem:[%s14227_s8 + $0x1b1c] sm:$0xf]  ;;  %v11450_v54 = vor.u32 %v13317_v42, %v11447_v46  ;;  %7238 = vmatpush.bf16.msrb.mxu0 %v10938_v53  ;;  %v7025_v53 = vpop.f32.mrf.mxu3 }
 0x320   : > { %v11959_v49 = vld [vmem:[%s14227_s8 + $0x1b58] sm:$0xf0] }
 0x321   : > { %v13573_v50 = vld [vmem:[%s14227_s8 + $0x1f1c] sm:$0xf]  ;;  %v11962_v55 = vor.u32 %v13445_v48, %v11959_v49  ;;  %7251 = vmatpush.bf16.msrb.mxu1 %v11450_v54 }
 0x322   : > { %v12471_v51 = vld [vmem:[%s14227_s8 + $0x1f58] sm:$0xf0] }
 0x323   : > { %v13173_v56 = vld [vmem:[%s14227_s8 + $0x129c] sm:$0xf]  ;;  %v12474_v60 = vor.u32 %v13573_v50, %v12471_v51  ;;  %7264 = vmatpush.bf16.msrb.mxu2 %v11962_v55  ;;  %v7013_v51 = vadd.f32 %v7012_v45, %v7000_v47  ;;  %v12830_v47 = vld [vmem:[%s14227_s8 + $0x7dc] sm:$0xf0] }
 0x324   : > { %v10871_v57 = vld [vmem:[%s14227_s8 + $0x12d8] sm:$0xf0] }
 0x325   : > { %v13301_v58 = vld [vmem:[%s14227_s8 + $0x169c] sm:$0xf]  ;;  %v10874_v2 = vor.u32 %v13173_v56, %v10871_v57  ;;  %7277 = vmatpush.bf16.msrb.mxu3 %v12474_v60  ;;  %v15364_v57 = vadd.f32 %v7025_v53, %v7013_v51  ;;  %v12814_v53 = vld [vmem:[%s14227_s8 + $0x75c] sm:$0xf0] }
 0x326   : > { %v11383_v61 = vld [vmem:[%s14227_s8 + $0x16d8] sm:$0xf0] }
 0x327   : > { %v13429_v62 = vld [vmem:[%s14227_s8 + $0x1a9c] sm:$0xf]  ;;  %v11386_v3 = vor.u32 %v13301_v58, %v11383_v61  ;;  %7239 = vmatpush.bf16.msrb.mxu0 %v10874_v2  ;;  %v6988_v58 = vpop.f32.mrf.mxu0  ;;  %v7027_v23 = vpop.f32.mrf.mxu3 }
 0x328   : > { %v11895_v63 = vld [vmem:[%s14227_s8 + $0x1ad8] sm:$0xf0]  ;;  %v13070_v58 = vld [vmem:[%s14227_s8 + $0xf5c] sm:$0xf0] }
 0x329   : > { %v13557_v0 = vld [vmem:[%s14227_s8 + $0x1e9c] sm:$0xf]  ;;  %v11898_v4 = vor.u32 %v13429_v62, %v11895_v63  ;;  %7252 = vmatpush.bf16.msrb.mxu1 %v11386_v3 }
 0x32a   : > { %v12407_v1 = vld [vmem:[%s14227_s8 + $0x1ed8] sm:$0xf0] }
 0x32b   : > { %v13157_v7 = vld [vmem:[%s14227_s8 + $0x121c] sm:$0xf]  ;;  %v12410_v10 = vor.u32 %v13557_v0, %v12407_v1  ;;  %7265 = vmatpush.bf16.msrb.mxu2 %v11898_v4  ;;  %v7001_v1 = vpop.f32.mrf.mxu1 }
 0x32c   : > { %v10807_v8 = vld [vmem:[%s14227_s8 + $0x1258] sm:$0xf0]  ;;  %v9341_v1 = vld [vmem:[%s14227_s8 + $0x6a0] sm:$0xf] }
 0x32d   : > { %v13285_v9 = vld [vmem:[%s14227_s8 + $0x161c] sm:$0xf]  ;;  %v10810_v17 = vor.u32 %v13157_v7, %v10807_v8  ;;  %7278 = vmatpush.bf16.msrb.mxu3 %v12410_v10 }
 0x32e   : > { %v11319_v11 = vld [vmem:[%s14227_s8 + $0x1658] sm:$0xf0] }
 0x32f   : > { %v13413_v12 = vld [vmem:[%s14227_s8 + $0x1a1c] sm:$0xf]  ;;  %v11322_v33 = vor.u32 %v13285_v9, %v11319_v11  ;;  %7240 = vmatpush.bf16.msrb.mxu0 %v10810_v17  ;;  %v7038_v23 = vpop.f32.mrf.mxu0 }
 0x330   : > { %v11831_v13 = vld [vmem:[%s14227_s8 + $0x1a58] sm:$0xf0] }
 0x331   : > { %v13541_v15 = vld [vmem:[%s14227_s8 + $0x1e1c] sm:$0xf]  ;;  %v11834_v21 = vor.u32 %v13413_v12, %v11831_v13  ;;  %7253 = vmatpush.bf16.msrb.mxu1 %v11322_v33  ;;  %v7014_v33 = vpop.f32.mrf.mxu2 }
 0x332   : > { %v12343_v16 = vld [vmem:[%s14227_s8 + $0x1e58] sm:$0xf0]  ;;  %v9789_v33 = vld [vmem:[%s14227_s8 + $0xa20] sm:$0xf] }
 0x333   : > { %v13141_v38 = vld [vmem:[%s14227_s8 + $0x119c] sm:$0xf]  ;;  %v12346_v24 = vor.u32 %v13541_v15, %v12343_v16  ;;  %7266 = vmatpush.bf16.msrb.mxu2 %v11834_v21 }
 0x334   : > { %v10743_v37 = vld [vmem:[%s14227_s8 + $0x11d8] sm:$0xf0] }
 0x335   : > { %v13269_v22 = vld [vmem:[%s14227_s8 + $0x159c] sm:$0xf]  ;;  %v10746_v29 = vor.u32 %v13141_v38, %v10743_v37  ;;  %7279 = vmatpush.bf16.msrb.mxu3 %v12346_v24  ;;  %v8957_v24 = vld [vmem:[%s14227_s8 + $0x3a0] sm:$0xf] }
 0x336   : > { %v11255_v25 = vld [vmem:[%s14227_s8 + $0x15d8] sm:$0xf0] }
 0x337   : > { %v13397_v26 = vld [vmem:[%s14227_s8 + $0x199c] sm:$0xf]  ;;  %v11258_v30 = vor.u32 %v13269_v22, %v11255_v25  ;;  %7241 = vmatpush.bf16.msrb.mxu0 %v10746_v29  ;;  %v12702_v25 = vld [vmem:[%s14227_s8 + $0x3dc] sm:$0xf0] }
 0x338   : > { %v11767_v14 = vld [vmem:[%s14227_s8 + $0x19d8] sm:$0xf0] }
 0x339   : > { %v13525_v27 = vld [vmem:[%s14227_s8 + $0x1d9c] sm:$0xf]  ;;  %v11770_v31 = vor.u32 %v13397_v26, %v11767_v14  ;;  %7254 = vmatpush.bf16.msrb.mxu1 %v11258_v30  ;;  %v9469_v26 = vld [vmem:[%s14227_s8 + $0x7a0] sm:$0xf] }
 0x33a   : > { %v12279_v28 = vld [vmem:[%s14227_s8 + $0x1dd8] sm:$0xf0]  ;;  %v9470_v45 = vor.u32 %v12830_v47, %v9469_v26  ;;  %v8701_v26 = vld [vmem:[%s14227_s8 + $0x1a0] sm:$0xf] }
 0x33b   : > { %v13125_v32 = vld [vmem:[%s14227_s8 + $0x111c] sm:$0xf]  ;;  %v12282_v46 = vor.u32 %v13525_v27, %v12279_v28  ;;  %7267 = vmatpush.bf16.msrb.mxu2 %v11770_v31  ;;  %v9981_v27 = vld [vmem:[%s14227_s8 + $0xba0] sm:$0xf] }
 0x33c   : > { %v10679_v40 = vld [vmem:[%s14227_s8 + $0x1158] sm:$0xf0]  ;;  %v12958_v28 = vld [vmem:[%s14227_s8 + $0xbdc] sm:$0xf0] }
 0x33d   : > { %v13253_v42 = vld [vmem:[%s14227_s8 + $0x151c] sm:$0xf]  ;;  %v10682_v56 = vor.u32 %v13125_v32, %v10679_v40  ;;  %7280 = vmatpush.bf16.msrb.mxu3 %v12282_v46  ;;  %v10493_v31 = vld [vmem:[%s14227_s8 + $0xfa0] sm:$0xf]  ;;  %v9982_v46 = vor.u32 %v12958_v28, %v9981_v27  ;;  %v7039_v27 = vadd.f32 %v7038_v23, %v15364_v57  ;;  %v7051_v28 = vpop.f32.mrf.mxu1 }
 0x33e   : > { %v11191_v48 = vld [vmem:[%s14227_s8 + $0x1558] sm:$0xf0]  ;;  %v13086_v32 = vld [vmem:[%s14227_s8 + $0xfdc] sm:$0xf0] }
 0x33f   : > { %v13381_v49 = vld [vmem:[%s14227_s8 + $0x191c] sm:$0xf]  ;;  %v11194_v60 = vor.u32 %v13253_v42, %v11191_v48  ;;  %7242 = vmatpush.bf16.msrb.mxu0 %v10682_v56  ;;  %v8958_v42 = vor.u32 %v12702_v25, %v8957_v24  ;;  %v8893_v48 = vld [vmem:[%s14227_s8 + $0x320] sm:$0xf]  ;;  %v10494_v51 = vor.u32 %v13086_v32, %v10493_v31 }
 0x340   : > { %v11703_v50 = vld [vmem:[%s14227_s8 + $0x1958] sm:$0xf0]  ;;  %v10429_v56 = vld [vmem:[%s14227_s8 + $0xf20] sm:$0xf] }
 0x341   : > { %v13509_v54 = vld [vmem:[%s14227_s8 + $0x1d1c] sm:$0xf]  ;;  %v11706_v61 = vor.u32 %v13381_v49, %v11703_v50  ;;  %7255 = vmatpush.bf16.msrb.mxu1 %v11194_v60  ;;  %v12686_v49 = vld [vmem:[%s14227_s8 + $0x35c] sm:$0xf0] }
 0x342   : > { %v12215_v55 = vld [vmem:[%s14227_s8 + $0x1d58] sm:$0xf0]  ;;  %v9405_v50 = vld [vmem:[%s14227_s8 + $0x720] sm:$0xf]  ;;  %v8894_v60 = vor.u32 %v12686_v49, %v8893_v48 }
 0x343   : > { %v13109_v62 = vld [vmem:[%s14227_s8 + $0x109c] sm:$0xf]  ;;  %v12218_v2 = vor.u32 %v13509_v54, %v12215_v55  ;;  %7268 = vmatpush.bf16.msrb.mxu2 %v11706_v61  ;;  %v9917_v54 = vld [vmem:[%s14227_s8 + $0xb20] sm:$0xf]  ;;  %v9406_v61 = vor.u32 %v12814_v53, %v9405_v50  ;;  %v7064_v53 = vpop.f32.mrf.mxu2 }
 0x344   : > { %v10615_v63 = vld [vmem:[%s14227_s8 + $0x10d8] sm:$0xf0]  ;;  %v12942_v55 = vld [vmem:[%s14227_s8 + $0xb5c] sm:$0xf0] }
 0x345   : > { %v13237_v0 = vld [vmem:[%s14227_s8 + $0x149c] sm:$0xf]  ;;  %v10618_v10 = vor.u32 %v13109_v62, %v10615_v63  ;;  %7281 = vmatpush.bf16.msrb.mxu3 %v12218_v2  ;;  %v9918_v62 = vor.u32 %v12942_v55, %v9917_v54  ;;  %v8829_v63 = vld [vmem:[%s14227_s8 + $0x2a0] sm:$0xf]  ;;  %v10430_v2 = vor.u32 %v13070_v58, %v10429_v56 }
 0x346   : > { %v11127_v3 = vld [vmem:[%s14227_s8 + $0x14d8] sm:$0xf0]  ;;  %v9213_v47 = vld [vmem:[%s14227_s8 + $0x5a0] sm:$0xf] }
 0x347   : > { %v13365_v4 = vld [vmem:[%s14227_s8 + $0x189c] sm:$0xf]  ;;  %v11130_v13 = vor.u32 %v13237_v0, %v11127_v3  ;;  %7243 = vmatpush.bf16.msrb.mxu0 %v10618_v10  ;;  %v12670_v0 = vld [vmem:[%s14227_s8 + $0x2dc] sm:$0xf0] }
 0x348   : > { %v11639_v7 = vld [vmem:[%s14227_s8 + $0x18d8] sm:$0xf0]  ;;  %v12798_v3 = vld [vmem:[%s14227_s8 + $0x6dc] sm:$0xf0]  ;;  %v8830_v10 = vor.u32 %v12670_v0, %v8829_v63 }
 0x349   : > { %v13493_v8 = vld [vmem:[%s14227_s8 + $0x1c9c] sm:$0xf]  ;;  %v11642_v15 = vor.u32 %v13365_v4, %v11639_v7  ;;  %7256 = vmatpush.bf16.msrb.mxu1 %v11130_v13  ;;  %v9853_v4 = vld [vmem:[%s14227_s8 + $0xaa0] sm:$0xf] }
 0x34a   : > { %v12151_v9 = vld [vmem:[%s14227_s8 + $0x1cd8] sm:$0xf0]  ;;  %v12926_v7 = vld [vmem:[%s14227_s8 + $0xadc] sm:$0xf0] }
 0x34b   : > { %v13093_v11 = vld [vmem:[%s14227_s8 + $0x101c] sm:$0xf]  ;;  %v12154_v21 = vor.u32 %v13493_v8, %v12151_v9  ;;  %7269 = vmatpush.bf16.msrb.mxu2 %v11642_v15  ;;  %v10365_v8 = vld [vmem:[%s14227_s8 + $0xea0] sm:$0xf] }
 0x34c   : > { %v10551_v12 = vld [vmem:[%s14227_s8 + $0x1058] sm:$0xf0]  ;;  %v13054_v9 = vld [vmem:[%s14227_s8 + $0xedc] sm:$0xf0] }
 0x34d   : > { %v13221_v16 = vld [vmem:[%s14227_s8 + $0x141c] sm:$0xf]  ;;  %v10554_v14 = vor.u32 %v13093_v11, %v10551_v12  ;;  %7282 = vmatpush.bf16.msrb.mxu3 %v12154_v21  ;;  %v9342_v11 = vor.u32 %v12798_v3, %v9341_v1  ;;  %v9854_v12 = vor.u32 %v12926_v7, %v9853_v4  ;;  %v8765_v13 = vld [vmem:[%s14227_s8 + $0x220] sm:$0xf] }
 0x34e   : > { %v11063_v17 = vld [vmem:[%s14227_s8 + $0x1458] sm:$0xf0]  ;;  %v12654_v15 = vld [vmem:[%s14227_s8 + $0x25c] sm:$0xf0] }
 0x34f   : > { %v13349_v18 = vld [vmem:[%s14227_s8 + $0x181c] sm:$0xf]  ;;  %v11066_v29 = vor.u32 %v13221_v16, %v11063_v17  ;;  %7244 = vmatpush.bf16.msrb.mxu0 %v10554_v14  ;;  %v9277_v16 = vld [vmem:[%s14227_s8 + $0x620] sm:$0xf]  ;;  %v10366_v17 = vor.u32 %v13054_v9, %v10365_v8 }
 0x350   : > { %v11575_v38 = vld [vmem:[%s14227_s8 + $0x1858] sm:$0xf0]  ;;  %v12910_v21 = vld [vmem:[%s14227_s8 + $0xa5c] sm:$0xf0] }
 0x351   : > { %v13477_v37 = vld [vmem:[%s14227_s8 + $0x1c1c] sm:$0xf]  ;;  %v11578_v30 = vor.u32 %v13349_v18, %v11575_v38  ;;  %7257 = vmatpush.bf16.msrb.mxu1 %v11066_v29  ;;  %v12782_v18 = vld [vmem:[%s14227_s8 + $0x65c] sm:$0xf0]  ;;  %v9790_v25 = vor.u32 %v12910_v21, %v9789_v33 }
 0x352   : > { %v12087_v22 = vld [vmem:[%s14227_s8 + $0x1c58] sm:$0xf0]  ;;  %7245 = vmatmul.bf16.vlgmr.msrb.gmra.mxu0 %v14413_v59  ;;  %v10301_v38 = vld [vmem:[%s14227_s8 + $0xe20] sm:$0xf]  ;;  %v9278_v24 = vor.u32 %v12782_v18, %v9277_v16 }
 0x353   : > { %v12090_v40 = vor.u32 %v13477_v37, %v12087_v22  ;;  %7270 = vmatpush.bf16.msrb.mxu2 %v11578_v30  ;;  %7289 = vmatpush.bf16.msra.mxu0 %v8958_v42  ;;  %v13038_v37 = vld [vmem:[%s14227_s8 + $0xe5c] sm:$0xf0]  ;;  %v8766_v22 = vor.u32 %v12654_v15, %v8765_v13 }
 0x354   : > { %7258 = vmatmul.bf16.vlgmr.msrb.gmra.mxu1 %v14417_v41  ;;  %v12638_v14 = vld [vmem:[%s14227_s8 + $0x1dc] sm:$0xf0]  ;;  %v10302_v29 = vor.u32 %v13038_v37, %v10301_v38 }
 0x355   : > { %7283 = vmatpush.bf16.msrb.mxu3 %v12090_v40  ;;  %7302 = vmatpush.bf16.msra.mxu1 %v9470_v45  ;;  %v12766_v30 = vld [vmem:[%s14227_s8 + $0x5dc] sm:$0xf0]  ;;  %v7052_v45 = vadd.f32 %v7051_v28, %v7039_v27 }
 0x356   : > { %7271 = vmatmul.bf16.vlgmr.msrb.gmra.mxu2 %v14409_v36  ;;  %v9725_v31 = vld [vmem:[%s14227_s8 + $0x9a0] sm:$0xf]  ;;  %v9214_v57 = vor.u32 %v12766_v30, %v9213_v47 }
 0x357   : > { %7315 = vmatpush.bf16.msra.mxu2 %v9982_v46  ;;  %7290 = vmatpush.bf16.msra.mxu0 %v8894_v60  ;;  %v12894_v32 = vld [vmem:[%s14227_s8 + $0x9dc] sm:$0xf0]  ;;  %v8702_v46 = vor.u32 %v12638_v14, %v8701_v26  ;;  %v7065_v60 = vadd.f32 %v7064_v53, %v7052_v45 }
 0x358   : > { %7284 = vmatmul.bf16.vlgmr.msrb.gmra.mxu3 %v14415_v39  ;;  %v10237_v40 = vld [vmem:[%s14227_s8 + $0xda0] sm:$0xf]  ;;  %v9726_v48 = vor.u32 %v12894_v32, %v9725_v31 }
 0x359   : > { %7328 = vmatpush.bf16.msra.mxu3 %v10494_v51  ;;  %7303 = vmatpush.bf16.msra.mxu1 %v9406_v61  ;;  %v13022_v42 = vld [vmem:[%s14227_s8 + $0xddc] sm:$0xf0]  ;;  %v7077_v61 = vpop.f32.mrf.mxu3 }
 0x35a   : > { %v8637_v49 = vld [vmem:[%s14227_s8 + $0x120] sm:$0xf]  ;;  %v10238_v54 = vor.u32 %v13022_v42, %v10237_v40  ;;  %v15435_v1 = vadd.f32 %v7077_v61, %v7065_v60 }
 0x35b   : > { %7316 = vmatpush.bf16.msra.mxu2 %v9918_v62  ;;  %7291 = vmatpush.bf16.msra.mxu0 %v8830_v10  ;;  %v12622_v50 = vld [vmem:[%s14227_s8 + $0x15c] sm:$0xf0]  ;;  %v7053_v10 = vpop.f32.mrf.mxu1 }
 0x35c   : > { %v9149_v51 = vld [vmem:[%s14227_s8 + $0x520] sm:$0xf]  ;;  %v8638_v0 = vor.u32 %v12622_v50, %v8637_v49 }
 0x35d   : > { %7329 = vmatpush.bf16.msra.mxu3 %v10430_v2  ;;  %7304 = vmatpush.bf16.msra.mxu1 %v9342_v11  ;;  %v12750_v55 = vld [vmem:[%s14227_s8 + $0x55c] sm:$0xf0]  ;;  %v7040_v2 = vpop.f32.mrf.mxu0 }
 0x35e   : > { %v9661_v56 = vld [vmem:[%s14227_s8 + $0x920] sm:$0xf]  ;;  %v9150_v3 = vor.u32 %v12750_v55, %v9149_v51 }
 0x35f   : > { %7317 = vmatpush.bf16.msra.mxu2 %v9854_v12  ;;  %7292 = vmatpush.bf16.msra.mxu0 %v8766_v22  ;;  %v12878_v58 = vld [vmem:[%s14227_s8 + $0x95c] sm:$0xf0] }
 0x360   : > { %v10173_v62 = vld [vmem:[%s14227_s8 + $0xd20] sm:$0xf]  ;;  %v9662_v4 = vor.u32 %v12878_v58, %v9661_v56 }
 0x361   : > { %7330 = vmatpush.bf16.msra.mxu3 %v10366_v17  ;;  %7305 = vmatpush.bf16.msra.mxu1 %v9278_v24  ;;  %v13006_v63 = vld [vmem:[%s14227_s8 + $0xd5c] sm:$0xf0]  ;;  %v7079_v28 = vpop.f32.mrf.mxu3 }
 0x362   : > { %v8573_v7 = vld [vmem:[%s14227_s8 + $0xa0] sm:$0xf]  ;;  %v10174_v11 = vor.u32 %v13006_v63, %v10173_v62 }
 0x363   : > { %7318 = vmatpush.bf16.msra.mxu2 %v9790_v25  ;;  %7293 = vmatpush.bf16.msra.mxu0 %v8702_v46  ;;  %v12606_v8 = vld [vmem:[%s14227_s8 + $0xdc] sm:$0xf0]  ;;  %v7066_v25 = vpop.f32.mrf.mxu2 }
 0x364   : > { %v9085_v9 = vld [vmem:[%s14227_s8 + $0x4a0] sm:$0xf]  ;;  %v8574_v18 = vor.u32 %v12606_v8, %v8573_v7 }
 0x365   : > { %7331 = vmatpush.bf16.msra.mxu3 %v10302_v29  ;;  %7306 = vmatpush.bf16.msra.mxu1 %v9214_v57  ;;  %v12734_v12 = vld [vmem:[%s14227_s8 + $0x4dc] sm:$0xf0]  ;;  %v7090_v28 = vpop.f32.mrf.mxu0 }
 0x366   : > { %v9597_v13 = vld [vmem:[%s14227_s8 + $0x8a0] sm:$0xf]  ;;  %v9086_v38 = vor.u32 %v12734_v12, %v9085_v9 }
 0x367   : > { %7319 = vmatpush.bf16.msra.mxu2 %v9726_v48  ;;  %v12862_v15 = vld [vmem:[%s14227_s8 + $0x8dc] sm:$0xf0]  ;;  %7294 = vmatpush.bf16.msra.mxu0 %v8638_v0 }
 0x368   : > { %v10109_v16 = vld [vmem:[%s14227_s8 + $0xca0] sm:$0xf]  ;;  %v9598_v37 = vor.u32 %v12862_v15, %v9597_v13 }
 0x369   : > { %7332 = vmatpush.bf16.msra.mxu3 %v10238_v54  ;;  %v12990_v17 = vld [vmem:[%s14227_s8 + $0xcdc] sm:$0xf0]  ;;  %7307 = vmatpush.bf16.msra.mxu1 %v9150_v3 }
 0x36a   : > { %v8509_v33 = vld [vmem:[%s14227_s8 + $0x20] sm:$0xf]  ;;  %v10110_v26 = vor.u32 %v12990_v17, %v10109_v16 }
 0x36b   : > { %v12590_v21 = vld [vmem:[%s14227_s8 + $0x5c] sm:$0xf0]  ;;  %7320 = vmatpush.bf16.msra.mxu2 %v9662_v4  ;;  %7295 = vmatpush.bf16.msra.mxu0 %v8574_v18 }
 0x36c   : > { %v9021_v22 = vld [vmem:[%s14227_s8 + $0x420] sm:$0xf]  ;;  %v8510_v32 = vor.u32 %v12590_v21, %v8509_v33 }
 0x36d   : > { %v12718_v23 = vld [vmem:[%s14227_s8 + $0x45c] sm:$0xf0]  ;;  %7333 = vmatpush.bf16.msra.mxu3 %v10174_v11  ;;  %7308 = vmatpush.bf16.msra.mxu1 %v9086_v38 }
 0x36e   : > { %v9533_v24 = vld [vmem:[%s14227_s8 + $0x820] sm:$0xf]  ;;  %v9022_v46 = vor.u32 %v12718_v23, %v9021_v22 }
 0x36f   : > { %v12846_v14 = vld [vmem:[%s14227_s8 + $0x85c] sm:$0xf0]  ;;  %7321 = vmatpush.bf16.msra.mxu2 %v9598_v37  ;;  %7296 = vmatpush.bf16.msra.mxu0 %v8510_v32 }
 0x370   : > { %v10045_v47 = vld [vmem:[%s14227_s8 + $0xc20] sm:$0xf]  ;;  %v9534_v57 = vor.u32 %v12846_v14, %v9533_v24 }
 0x371   : > { %v12974_v27 = vld [vmem:[%s14227_s8 + $0xc5c] sm:$0xf0]  ;;  %7334 = vmatpush.bf16.msra.mxu3 %v10110_v26  ;;  %7309 = vmatpush.bf16.msra.mxu1 %v9022_v46 }
 0x372   : > { %v11005_v29 = vld [vmem:[%s14227_s8 + $0x13a0] sm:$0xf]  ;;  %v10046_v50 = vor.u32 %v12974_v27, %v10045_v47  ;;  %7297 = vmatmul.bf16.vlgmr.msra.gmra.mxu0 %v14340_v6 }
 0x373   : > { %v13214_v30 = vld [vmem:[%s14227_s8 + $0x13dc] sm:$0xf0]  ;;  %7322 = vmatpush.bf16.msra.mxu2 %v9534_v57 }
 0x374   : > { %v11517_v31 = vld [vmem:[%s14227_s8 + $0x17a0] sm:$0xf]  ;;  %v11006_v51 = vor.u32 %v13214_v30, %v11005_v29  ;;  %7310 = vmatmul.bf16.vlgmr.msra.gmra.mxu1 %v14355_v20 }
 0x375   : > { %v13342_v40 = vld [vmem:[%s14227_s8 + $0x17dc] sm:$0xf0]  ;;  %7335 = vmatpush.bf16.msra.mxu3 %v10046_v50 }
 0x376   : > { %v12029_v42 = vld [vmem:[%s14227_s8 + $0x1ba0] sm:$0xf]  ;;  %v11518_v53 = vor.u32 %v13342_v40, %v11517_v31  ;;  %7341 = vmatpush.bf16.msrb.mxu0 %v11006_v51  ;;  %7323 = vmatmul.bf16.vlgmr.msra.gmra.mxu2 %v14338_v5 }
 0x377   : > { %v13470_v45 = vld [vmem:[%s14227_s8 + $0x1bdc] sm:$0xf0] }
 0x378   : > { %v12541_v48 = vld [vmem:[%s14227_s8 + $0x1fa0] sm:$0xf]  ;;  %v12030_v54 = vor.u32 %v13470_v45, %v12029_v42  ;;  %7354 = vmatpush.bf16.msrb.mxu1 %v11518_v53  ;;  %7336 = vmatmul.bf16.vlgmr.msra.gmra.mxu3 %v14353_v19  ;;  %v7103_v42 = vpop.f32.mrf.mxu1 }
 0x379   : > { %v13598_v49 = vld [vmem:[%s14227_s8 + $0x1fdc] sm:$0xf0] }
 0x37a   : > { %v10941_v55 = vld [vmem:[%s14227_s8 + $0x1320] sm:$0xf]  ;;  %v12542_v60 = vor.u32 %v13598_v49, %v12541_v48  ;;  %7367 = vmatpush.bf16.msrb.mxu2 %v12030_v54  ;;  %v7104_v49 = vadd.f32 %v7103_v42, %v7090_v28 }
 0x37b   : > { %v13198_v56 = vld [vmem:[%s14227_s8 + $0x135c] sm:$0xf0] }
 0x37c   : > { %v11453_v58 = vld [vmem:[%s14227_s8 + $0x1720] sm:$0xf]  ;;  %v10942_v3 = vor.u32 %v13198_v56, %v10941_v55  ;;  %7380 = vmatpush.bf16.msrb.mxu3 %v12542_v60 }
 0x37d   : > { %v13326_v61 = vld [vmem:[%s14227_s8 + $0x175c] sm:$0xf0] }
 0x37e   : > { %v11965_v62 = vld [vmem:[%s14227_s8 + $0x1b20] sm:$0xf]  ;;  %v11454_v4 = vor.u32 %v13326_v61, %v11453_v58  ;;  %7342 = vmatpush.bf16.msrb.mxu0 %v10942_v3  ;;  %v7116_v61 = vpop.f32.mrf.mxu2 }
 0x37f   : > { %v13454_v63 = vld [vmem:[%s14227_s8 + $0x1b5c] sm:$0xf0]  ;;  %v7117_v3 = vadd.f32 %v7116_v61, %v7104_v49 }
 0x380   : > { %v12477_v0 = vld [vmem:[%s14227_s8 + $0x1f20] sm:$0xf]  ;;  %v11966_v7 = vor.u32 %v13454_v63, %v11965_v62  ;;  %7355 = vmatpush.bf16.msrb.mxu1 %v11454_v4  ;;  %v7129_v4 = vpop.f32.mrf.mxu3 }
 0x381   : > { %v13582_v2 = vld [vmem:[%s14227_s8 + $0x1f5c] sm:$0xf0] }
 0x382   : > { %v10877_v8 = vld [vmem:[%s14227_s8 + $0x12a0] sm:$0xf]  ;;  %v12478_v11 = vor.u32 %v13582_v2, %v12477_v0  ;;  %7368 = vmatpush.bf16.msrb.mxu2 %v11966_v7 }
 0x383   : > { %v13182_v9 = vld [vmem:[%s14227_s8 + $0x12dc] sm:$0xf0] }
 0x384   : > { %v11389_v10 = vld [vmem:[%s14227_s8 + $0x16a0] sm:$0xf]  ;;  %v10878_v18 = vor.u32 %v13182_v9, %v10877_v8  ;;  %7381 = vmatpush.bf16.msrb.mxu3 %v12478_v11  ;;  %v7092_v11 = vpop.f32.mrf.mxu0 }
 0x385   : > { %v13310_v12 = vld [vmem:[%s14227_s8 + $0x16dc] sm:$0xf0]  ;;  %v13062_v11 = vld [vmem:[%s14227_s8 + $0xf24] sm:$0xf] }
 0x386   : > { %v11901_v13 = vld [vmem:[%s14227_s8 + $0x1aa0] sm:$0xf]  ;;  %v11390_v33 = vor.u32 %v13310_v12, %v11389_v10  ;;  %7343 = vmatpush.bf16.msrb.mxu0 %v10878_v18  ;;  %v15505_v10 = vadd.f32 %v7129_v4, %v7117_v3  ;;  %v7105_v18 = vpop.f32.mrf.mxu1  ;;  %v12806_v3 = vld [vmem:[%s14227_s8 + $0x724] sm:$0xf] }
 0x387   : > { %v13438_v15 = vld [vmem:[%s14227_s8 + $0x1adc] sm:$0xf0]  ;;  %v8831_v18 = vld [vmem:[%s14227_s8 + $0x2e0] sm:$0xf0] }
 0x388   : > { %v12413_v16 = vld [vmem:[%s14227_s8 + $0x1ea0] sm:$0xf]  ;;  %v11902_v21 = vor.u32 %v13438_v15, %v11901_v13  ;;  %7356 = vmatpush.bf16.msrb.mxu1 %v11390_v33 }
 0x389   : > { %v13566_v17 = vld [vmem:[%s14227_s8 + $0x1edc] sm:$0xf0] }
 0x38a   : > { %v10813_v38 = vld [vmem:[%s14227_s8 + $0x1220] sm:$0xf]  ;;  %v12414_v23 = vor.u32 %v13566_v17, %v12413_v16  ;;  %7369 = vmatpush.bf16.msrb.mxu2 %v11902_v21 }
 0x38b   : > { %v13166_v37 = vld [vmem:[%s14227_s8 + $0x125c] sm:$0xf0] }
 0x38c   : > { %v11325_v22 = vld [vmem:[%s14227_s8 + $0x1620] sm:$0xf]  ;;  %v10814_v27 = vor.u32 %v13166_v37, %v10813_v38  ;;  %7382 = vmatpush.bf16.msrb.mxu3 %v12414_v23 }
 0x38d   : > { %v13294_v24 = vld [vmem:[%s14227_s8 + $0x165c] sm:$0xf0] }
 0x38e   : > { %v11837_v25 = vld [vmem:[%s14227_s8 + $0x1a20] sm:$0xf]  ;;  %v11326_v29 = vor.u32 %v13294_v24, %v11325_v22  ;;  %7344 = vmatpush.bf16.msrb.mxu0 %v10814_v27 }
 0x38f   : > { %v13422_v26 = vld [vmem:[%s14227_s8 + $0x1a5c] sm:$0xf0] }
 0x390   : > { %v12349_v14 = vld [vmem:[%s14227_s8 + $0x1e20] sm:$0xf]  ;;  %v11838_v30 = vor.u32 %v13422_v26, %v11837_v25  ;;  %7357 = vmatpush.bf16.msrb.mxu1 %v11326_v29 }
 0x391   : > { %v13550_v47 = vld [vmem:[%s14227_s8 + $0x1e5c] sm:$0xf0] }
 0x392   : > { %v10749_v31 = vld [vmem:[%s14227_s8 + $0x11a0] sm:$0xf]  ;;  %v12350_v45 = vor.u32 %v13550_v47, %v12349_v14  ;;  %7370 = vmatpush.bf16.msrb.mxu2 %v11838_v30  ;;  %v7118_v30 = vpop.f32.mrf.mxu2 }
 0x393   : > { %v13150_v32 = vld [vmem:[%s14227_s8 + $0x11dc] sm:$0xf0]  ;;  %v9279_v30 = vld [vmem:[%s14227_s8 + $0x660] sm:$0xf0] }
 0x394   : > { %v11261_v40 = vld [vmem:[%s14227_s8 + $0x15a0] sm:$0xf]  ;;  %v10750_v53 = vor.u32 %v13150_v32, %v10749_v31  ;;  %7383 = vmatpush.bf16.msrb.mxu3 %v12350_v45  ;;  %v7131_v45 = vpop.f32.mrf.mxu3 }
 0x395   : > { %v13278_v46 = vld [vmem:[%s14227_s8 + $0x15dc] sm:$0xf0] }
 0x396   : > { %v11773_v57 = vld [vmem:[%s14227_s8 + $0x19a0] sm:$0xf]  ;;  %v11262_v54 = vor.u32 %v13278_v46, %v11261_v40  ;;  %7345 = vmatpush.bf16.msrb.mxu0 %v10750_v53  ;;  %v12694_v46 = vld [vmem:[%s14227_s8 + $0x3a4] sm:$0xf] }
 0x397   : > { %v13406_v48 = vld [vmem:[%s14227_s8 + $0x19dc] sm:$0xf0]  ;;  %v9983_v53 = vld [vmem:[%s14227_s8 + $0xbe0] sm:$0xf0] }
 0x398   : > { %v12285_v50 = vld [vmem:[%s14227_s8 + $0x1da0] sm:$0xf]  ;;  %v11774_v55 = vor.u32 %v13406_v48, %v11773_v57  ;;  %7358 = vmatpush.bf16.msrb.mxu1 %v11262_v54  ;;  %v8959_v57 = vld [vmem:[%s14227_s8 + $0x3e0] sm:$0xf0] }
 0x399   : > { %v13534_v51 = vld [vmem:[%s14227_s8 + $0x1ddc] sm:$0xf0]  ;;  %v12822_v48 = vld [vmem:[%s14227_s8 + $0x7a4] sm:$0xf]  ;;  %v8962_v61 = vor.u32 %v12694_v46, %v8959_v57  ;;  %v7142_v46 = vpop.f32.mrf.mxu0 }
 0x39a   : > { %v10685_v56 = vld [vmem:[%s14227_s8 + $0x1120] sm:$0xf]  ;;  %v12286_v62 = vor.u32 %v13534_v51, %v12285_v50  ;;  %7371 = vmatpush.bf16.msrb.mxu2 %v11774_v55  ;;  %v9471_v50 = vld [vmem:[%s14227_s8 + $0x7e0] sm:$0xf0] }
 0x39b   : > { %v13134_v58 = vld [vmem:[%s14227_s8 + $0x115c] sm:$0xf0]  ;;  %v12950_v51 = vld [vmem:[%s14227_s8 + $0xba4] sm:$0xf] }
 0x39c   : > { %v11197_v60 = vld [vmem:[%s14227_s8 + $0x1520] sm:$0xf]  ;;  %v10686_v9 = vor.u32 %v13134_v58, %v10685_v56  ;;  %7384 = vmatpush.bf16.msrb.mxu3 %v12286_v62  ;;  %v13078_v56 = vld [vmem:[%s14227_s8 + $0xfa4] sm:$0xf]  ;;  %v9474_v62 = vor.u32 %v12822_v48, %v9471_v50 }
 0x39d   : > { %v13262_v63 = vld [vmem:[%s14227_s8 + $0x155c] sm:$0xf0]  ;;  %v10495_v58 = vld [vmem:[%s14227_s8 + $0xfe0] sm:$0xf0] }
 0x39e   : > { %v11709_v0 = vld [vmem:[%s14227_s8 + $0x1920] sm:$0xf]  ;;  %v11198_v12 = vor.u32 %v13262_v63, %v11197_v60  ;;  %7346 = vmatpush.bf16.msrb.mxu0 %v10686_v9  ;;  %v9986_v63 = vor.u32 %v12950_v51, %v9983_v53  ;;  %v10498_v4 = vor.u32 %v13078_v56, %v10495_v58  ;;  %v9919_v9 = vld [vmem:[%s14227_s8 + $0xb60] sm:$0xf0]  ;;  %v7143_v53 = vadd.f32 %v7142_v46, %v15505_v10 }
 0x39f   : > { %v13390_v2 = vld [vmem:[%s14227_s8 + $0x195c] sm:$0xf0]  ;;  %v8703_v50 = vld [vmem:[%s14227_s8 + $0x1e0] sm:$0xf0] }
 0x3a0   : > { %v12221_v7 = vld [vmem:[%s14227_s8 + $0x1d20] sm:$0xf]  ;;  %v11710_v13 = vor.u32 %v13390_v2, %v11709_v0  ;;  %7359 = vmatpush.bf16.msrb.mxu1 %v11198_v12  ;;  %v12678_v0 = vld [vmem:[%s14227_s8 + $0x324] sm:$0xf] }
 0x3a1   : > { %v13518_v8 = vld [vmem:[%s14227_s8 + $0x1d5c] sm:$0xf0]  ;;  %v8895_v2 = vld [vmem:[%s14227_s8 + $0x360] sm:$0xf0] }
 0x3a2   : > { %v10621_v15 = vld [vmem:[%s14227_s8 + $0x10a0] sm:$0xf]  ;;  %v12222_v33 = vor.u32 %v13518_v8, %v12221_v7  ;;  %7372 = vmatpush.bf16.msrb.mxu2 %v11710_v13  ;;  %v9407_v7 = vld [vmem:[%s14227_s8 + $0x760] sm:$0xf0]  ;;  %v8898_v13 = vor.u32 %v12678_v0, %v8895_v2 }
 0x3a3   : > { %v13118_v16 = vld [vmem:[%s14227_s8 + $0x10dc] sm:$0xf0]  ;;  %v12934_v8 = vld [vmem:[%s14227_s8 + $0xb24] sm:$0xf] }
 0x3a4   : > { %v11133_v17 = vld [vmem:[%s14227_s8 + $0x14a0] sm:$0xf]  ;;  %v10622_v24 = vor.u32 %v13118_v16, %v10621_v15  ;;  %7385 = vmatpush.bf16.msrb.mxu3 %v12222_v33  ;;  %v10431_v12 = vld [vmem:[%s14227_s8 + $0xf60] sm:$0xf0]  ;;  %v9410_v15 = vor.u32 %v12806_v3, %v9407_v7  ;;  %v9922_v16 = vor.u32 %v12934_v8, %v9919_v9  ;;  %v7168_v8 = vpop.f32.mrf.mxu2 }
 0x3a5   : > { %v13246_v21 = vld [vmem:[%s14227_s8 + $0x14dc] sm:$0xf0]  ;;  %v12790_v33 = vld [vmem:[%s14227_s8 + $0x6a4] sm:$0xf] }
 0x3a6   : > { %v11645_v38 = vld [vmem:[%s14227_s8 + $0x18a0] sm:$0xf]  ;;  %v11134_v14 = vor.u32 %v13246_v21, %v11133_v17  ;;  %7347 = vmatpush.bf16.msrb.mxu0 %v10622_v24  ;;  %v12662_v17 = vld [vmem:[%s14227_s8 + $0x2a4] sm:$0xf]  ;;  %v10434_v21 = vor.u32 %v13062_v11, %v10431_v12 }
 0x3a7   : > { %v13374_v37 = vld [vmem:[%s14227_s8 + $0x18dc] sm:$0xf0]  ;;  %v10367_v24 = vld [vmem:[%s14227_s8 + $0xee0] sm:$0xf0] }
 0x3a8   : > { %v12157_v22 = vld [vmem:[%s14227_s8 + $0x1ca0] sm:$0xf]  ;;  %v11646_v47 = vor.u32 %v13374_v37, %v11645_v38  ;;  %7360 = vmatpush.bf16.msrb.mxu1 %v11134_v14  ;;  %v9343_v38 = vld [vmem:[%s14227_s8 + $0x6e0] sm:$0xf0] }
 0x3a9   : > { %v13502_v23 = vld [vmem:[%s14227_s8 + $0x1cdc] sm:$0xf0]  ;;  %v12918_v37 = vld [vmem:[%s14227_s8 + $0xaa4] sm:$0xf] }
 0x3aa   : > { %v10557_v25 = vld [vmem:[%s14227_s8 + $0x1020] sm:$0xf]  ;;  %v12158_v31 = vor.u32 %v13502_v23, %v12157_v22  ;;  %7373 = vmatpush.bf16.msrb.mxu2 %v11646_v47  ;;  %v9855_v22 = vld [vmem:[%s14227_s8 + $0xae0] sm:$0xf0] }
 0x3ab   : > { %v13102_v26 = vld [vmem:[%s14227_s8 + $0x105c] sm:$0xf0]  ;;  %v13046_v23 = vld [vmem:[%s14227_s8 + $0xea4] sm:$0xf]  ;;  %v9858_v14 = vor.u32 %v12918_v37, %v9855_v22 }
 0x3ac   : > { %v11069_v27 = vld [vmem:[%s14227_s8 + $0x1420] sm:$0xf]  ;;  %v10558_v49 = vor.u32 %v13102_v26, %v10557_v25  ;;  %7386 = vmatpush.bf16.msrb.mxu3 %v12158_v31  ;;  %v8834_v25 = vor.u32 %v12662_v17, %v8831_v18  ;;  %v9346_v26 = vor.u32 %v12790_v33, %v9343_v38  ;;  %v12646_v47 = vld [vmem:[%s14227_s8 + $0x224] sm:$0xf]  ;;  %v7144_v38 = vpop.f32.mrf.mxu0 }
 0x3ad   : > { %v13230_v28 = vld [vmem:[%s14227_s8 + $0x145c] sm:$0xf0]  ;;  %v12902_v31 = vld [vmem:[%s14227_s8 + $0xa24] sm:$0xf] }
 0x3ae   : > { %v11581_v29 = vld [vmem:[%s14227_s8 + $0x1820] sm:$0xf]  ;;  %v11070_v54 = vor.u32 %v13230_v28, %v11069_v27  ;;  %7348 = vmatpush.bf16.msrb.mxu0 %v10558_v49  ;;  %v8767_v27 = vld [vmem:[%s14227_s8 + $0x260] sm:$0xf0] }
 0x3af   : > { %v13358_v32 = vld [vmem:[%s14227_s8 + $0x185c] sm:$0xf0]  ;;  %v12774_v28 = vld [vmem:[%s14227_s8 + $0x624] sm:$0xf]  ;;  %v8770_v45 = vor.u32 %v12646_v47, %v8767_v27 }
 0x3b0   : > { %v12093_v40 = vld [vmem:[%s14227_s8 + $0x1c20] sm:$0xf]  ;;  %v11582_v55 = vor.u32 %v13358_v32, %v11581_v29  ;;  %7361 = vmatpush.bf16.msrb.mxu1 %v11070_v54  ;;  %v10370_v29 = vor.u32 %v13046_v23, %v10367_v24  ;;  %v9791_v32 = vld [vmem:[%s14227_s8 + $0xa60] sm:$0xf0]  ;;  %v9282_v57 = vor.u32 %v12774_v28, %v9279_v30  ;;  %v7155_v54 = vpop.f32.mrf.mxu1 }
 0x3b1   : > { %v13486_v42 = vld [vmem:[%s14227_s8 + $0x1c5c] sm:$0xf0]  ;;  %7349 = vmatmul.bf16.vlgmr.msrb.gmra.mxu0 %v14413_v59  ;;  %v9794_v48 = vor.u32 %v12902_v31, %v9791_v32  ;;  %v12630_v49 = vld [vmem:[%s14227_s8 + $0x1a4] sm:$0xf] }
 0x3b2   : > { %v12094_v60 = vor.u32 %v13486_v42, %v12093_v40  ;;  %7374 = vmatpush.bf16.msrb.mxu2 %v11582_v55  ;;  %7393 = vmatpush.bf16.msra.mxu0 %v8962_v61  ;;  %v13030_v40 = vld [vmem:[%s14227_s8 + $0xe24] sm:$0xf]  ;;  %v8706_v0 = vor.u32 %v12630_v49, %v8703_v50  ;;  %v7170_v49 = vpop.f32.mrf.mxu2 }
 0x3b3   : > { %7362 = vmatmul.bf16.vlgmr.msrb.gmra.mxu1 %v14417_v41  ;;  %v10303_v42 = vld [vmem:[%s14227_s8 + $0xe60] sm:$0xf0] }
 0x3b4   : > { %7387 = vmatpush.bf16.msrb.mxu3 %v12094_v60  ;;  %7406 = vmatpush.bf16.msra.mxu1 %v9474_v62  ;;  %v12758_v51 = vld [vmem:[%s14227_s8 + $0x5a4] sm:$0xf]  ;;  %v10306_v55 = vor.u32 %v13030_v40, %v10303_v42 }
 0x3b5   : > { %7375 = vmatmul.bf16.vlgmr.msrb.gmra.mxu2 %v14409_v36  ;;  %v9215_v56 = vld [vmem:[%s14227_s8 + $0x5e0] sm:$0xf0] }
 0x3b6   : > { %7419 = vmatpush.bf16.msra.mxu2 %v9986_v63  ;;  %7394 = vmatpush.bf16.msra.mxu0 %v8898_v13  ;;  %v12886_v58 = vld [vmem:[%s14227_s8 + $0x9a4] sm:$0xf]  ;;  %v7156_v63 = vadd.f32 %v7155_v54, %v7143_v53  ;;  %v9218_v10 = vor.u32 %v12758_v51, %v9215_v56 }
 0x3b7   : > { %7388 = vmatmul.bf16.vlgmr.msrb.gmra.mxu3 %v14415_v39  ;;  %v9727_v60 = vld [vmem:[%s14227_s8 + $0x9e0] sm:$0xf0] }
 0x3b8   : > { %7432 = vmatpush.bf16.msra.mxu3 %v10498_v4  ;;  %7407 = vmatpush.bf16.msra.mxu1 %v9410_v15  ;;  %v13014_v61 = vld [vmem:[%s14227_s8 + $0xda4] sm:$0xf]  ;;  %v9730_v2 = vor.u32 %v12886_v58, %v9727_v60  ;;  %v7169_v15 = vadd.f32 %v7168_v8, %v7156_v63 }
 0x3b9   : > { %v10239_v62 = vld [vmem:[%s14227_s8 + $0xde0] sm:$0xf0] }
 0x3ba   : > { %7420 = vmatpush.bf16.msra.mxu2 %v9922_v16  ;;  %7395 = vmatpush.bf16.msra.mxu0 %v8834_v25  ;;  %v12614_v3 = vld [vmem:[%s14227_s8 + $0x124] sm:$0xf]  ;;  %v10242_v9 = vor.u32 %v13014_v61, %v10239_v62  ;;  %v7181_v16 = vpop.f32.mrf.mxu3 }
 0x3bb   : > { %v8639_v4 = vld [vmem:[%s14227_s8 + $0x160] sm:$0xf0] }
 0x3bc   : > { %7433 = vmatpush.bf16.msra.mxu3 %v10434_v21  ;;  %7408 = vmatpush.bf16.msra.mxu1 %v9346_v26  ;;  %v12742_v7 = vld [vmem:[%s14227_s8 + $0x524] sm:$0xf]  ;;  %v8642_v33 = vor.u32 %v12614_v3, %v8639_v4  ;;  %v15576_v21 = vadd.f32 %v7181_v16, %v7169_v15  ;;  %v7157_v26 = vpop.f32.mrf.mxu1 }
 0x3bd   : > { %v9151_v11 = vld [vmem:[%s14227_s8 + $0x560] sm:$0xf0] }
 0x3be   : > { %7421 = vmatpush.bf16.msra.mxu2 %v9858_v14  ;;  %7396 = vmatpush.bf16.msra.mxu0 %v8770_v45  ;;  %v12870_v12 = vld [vmem:[%s14227_s8 + $0x924] sm:$0xf]  ;;  %v9154_v37 = vor.u32 %v12742_v7, %v9151_v11 }
 0x3bf   : > { %v9663_v13 = vld [vmem:[%s14227_s8 + $0x960] sm:$0xf0] }
 0x3c0   : > { %7434 = vmatpush.bf16.msra.mxu3 %v10370_v29  ;;  %7409 = vmatpush.bf16.msra.mxu1 %v9282_v57  ;;  %v12998_v17 = vld [vmem:[%s14227_s8 + $0xd24] sm:$0xf]  ;;  %v9666_v22 = vor.u32 %v12870_v12, %v9663_v13 }
 0x3c1   : > { %v10175_v18 = vld [vmem:[%s14227_s8 + $0xd60] sm:$0xf0] }
 0x3c2   : > { %7422 = vmatpush.bf16.msra.mxu2 %v9794_v48  ;;  %7397 = vmatpush.bf16.msra.mxu0 %v8706_v0  ;;  %v12598_v23 = vld [vmem:[%s14227_s8 + $0xa4] sm:$0xf]  ;;  %v10178_v14 = vor.u32 %v12998_v17, %v10175_v18 }
 0x3c3   : > { %v8575_v24 = vld [vmem:[%s14227_s8 + $0xe0] sm:$0xf0] }
 0x3c4   : > { %7435 = vmatpush.bf16.msra.mxu3 %v10306_v55  ;;  %7410 = vmatpush.bf16.msra.mxu1 %v9218_v10  ;;  %v12726_v25 = vld [vmem:[%s14227_s8 + $0x4a4] sm:$0xf]  ;;  %v8578_v31 = vor.u32 %v12598_v23, %v8575_v24  ;;  %v7183_v55 = vpop.f32.mrf.mxu3 }
 0x3c5   : > { %v9087_v47 = vld [vmem:[%s14227_s8 + $0x4e0] sm:$0xf0] }
 0x3c6   : > { %7423 = vmatpush.bf16.msra.mxu2 %v9730_v2  ;;  %v12854_v27 = vld [vmem:[%s14227_s8 + $0x8a4] sm:$0xf]  ;;  %7398 = vmatpush.bf16.msra.mxu0 %v8642_v33  ;;  %v9090_v42 = vor.u32 %v12726_v25, %v9087_v47 }
 0x3c7   : > { %v9599_v28 = vld [vmem:[%s14227_s8 + $0x8e0] sm:$0xf0] }
 0x3c8   : > { %7436 = vmatpush.bf16.msra.mxu3 %v10242_v9  ;;  %v12982_v29 = vld [vmem:[%s14227_s8 + $0xca4] sm:$0xf]  ;;  %7411 = vmatpush.bf16.msra.mxu1 %v9154_v37  ;;  %v9602_v45 = vor.u32 %v12854_v27, %v9599_v28 }
 0x3c9   : > { %v10111_v30 = vld [vmem:[%s14227_s8 + $0xce0] sm:$0xf0] }
 0x3ca   : > { %v12582_v32 = vld [vmem:[%s14227_s8 + $0x24] sm:$0xf]  ;;  %7424 = vmatpush.bf16.msra.mxu2 %v9666_v22  ;;  %v10114_v50 = vor.u32 %v12982_v29, %v10111_v30  ;;  %7399 = vmatpush.bf16.msra.mxu0 %v8578_v31 }
 0x3cb   : > { %v8511_v40 = vld [vmem:[%s14227_s8 + $0x60] sm:$0xf0] }
 0x3cc   : > { %v12710_v46 = vld [vmem:[%s14227_s8 + $0x424] sm:$0xf]  ;;  %7437 = vmatpush.bf16.msra.mxu3 %v10178_v14  ;;  %v8514_v61 = vor.u32 %v12582_v32, %v8511_v40  ;;  %7412 = vmatpush.bf16.msra.mxu1 %v9090_v42 }
 0x3cd   : > { %v9023_v57 = vld [vmem:[%s14227_s8 + $0x460] sm:$0xf0] }
 0x3ce   : > { %v12838_v48 = vld [vmem:[%s14227_s8 + $0x824] sm:$0xf]  ;;  %7425 = vmatpush.bf16.msra.mxu2 %v9602_v45  ;;  %v9026_v10 = vor.u32 %v12710_v46, %v9023_v57  ;;  %7400 = vmatpush.bf16.msra.mxu0 %v8514_v61 }
 0x3cf   : > { %v9535_v51 = vld [vmem:[%s14227_s8 + $0x860] sm:$0xf0] }
 0x3d0   : > { %v12966_v53 = vld [vmem:[%s14227_s8 + $0xc24] sm:$0xf]  ;;  %v9538_v2 = vor.u32 %v12838_v48, %v9535_v51  ;;  %7438 = vmatpush.bf16.msra.mxu3 %v10114_v50  ;;  %7413 = vmatpush.bf16.msra.mxu1 %v9026_v10 }
 0x3d1   : > { %v10047_v54 = vld [vmem:[%s14227_s8 + $0xc60] sm:$0xf0]  ;;  %7401 = vmatmul.bf16.vlgmr.msra.gmra.mxu0 %v14340_v6 }
 0x3d2   : > { %v13206_v56 = vld [vmem:[%s14227_s8 + $0x13a4] sm:$0xf]  ;;  %v10050_v7 = vor.u32 %v12966_v53, %v10047_v54  ;;  %7426 = vmatpush.bf16.msra.mxu2 %v9538_v2 }
 0x3d3   : > { %v11007_v58 = vld [vmem:[%s14227_s8 + $0x13e0] sm:$0xf0]  ;;  %7414 = vmatmul.bf16.vlgmr.msra.gmra.mxu1 %v14355_v20 }
 0x3d4   : > { %v13334_v60 = vld [vmem:[%s14227_s8 + $0x17a4] sm:$0xf]  ;;  %v11010_v8 = vor.u32 %v13206_v56, %v11007_v58  ;;  %7439 = vmatpush.bf16.msra.mxu3 %v10050_v7  ;;  %v7194_v56 = vpop.f32.mrf.mxu0 }
 0x3d5   : > { %v11519_v62 = vld [vmem:[%s14227_s8 + $0x17e0] sm:$0xf0]  ;;  %7427 = vmatmul.bf16.vlgmr.msra.gmra.mxu2 %v14338_v5 }
 0x3d6   : > { %v13462_v63 = vld [vmem:[%s14227_s8 + $0x1ba4] sm:$0xf]  ;;  %v11522_v9 = vor.u32 %v13334_v60, %v11519_v62  ;;  %7445 = vmatpush.bf16.msrb.mxu0 %v11010_v8 }
 0x3d7   : > { %v12031_v0 = vld [vmem:[%s14227_s8 + $0x1be0] sm:$0xf0]  ;;  %7440 = vmatmul.bf16.vlgmr.msra.gmra.mxu3 %v14353_v19 }
 0x3d8   : > { %v13590_v3 = vld [vmem:[%s14227_s8 + $0x1fa4] sm:$0xf]  ;;  %v12034_v11 = vor.u32 %v13462_v63, %v12031_v0  ;;  %7458 = vmatpush.bf16.msrb.mxu1 %v11522_v9  ;;  %v7207_v0 = vpop.f32.mrf.mxu1 }
 0x3d9   : > { %v12543_v4 = vld [vmem:[%s14227_s8 + $0x1fe0] sm:$0xf0]  ;;  %v7208_v7 = vadd.f32 %v7207_v0, %v7194_v56 }
 0x3da   : > { %v13190_v12 = vld [vmem:[%s14227_s8 + $0x1324] sm:$0xf]  ;;  %v12546_v16 = vor.u32 %v13590_v3, %v12543_v4  ;;  %7471 = vmatpush.bf16.msrb.mxu2 %v12034_v11 }
 0x3db   : > { %v10943_v13 = vld [vmem:[%s14227_s8 + $0x1360] sm:$0xf0] }
 0x3dc   : > { %v13318_v15 = vld [vmem:[%s14227_s8 + $0x1724] sm:$0xf]  ;;  %v10946_v22 = vor.u32 %v13190_v12, %v10943_v13  ;;  %7484 = vmatpush.bf16.msrb.mxu3 %v12546_v16 }
 0x3dd   : > { %v11455_v17 = vld [vmem:[%s14227_s8 + $0x1760] sm:$0xf0] }
 0x3de   : > { %v13446_v18 = vld [vmem:[%s14227_s8 + $0x1b24] sm:$0xf]  ;;  %v11458_v23 = vor.u32 %v13318_v15, %v11455_v17  ;;  %7446 = vmatpush.bf16.msrb.mxu0 %v10946_v22 }
 0x3df   : > { %v11967_v33 = vld [vmem:[%s14227_s8 + $0x1b60] sm:$0xf0] }
 0x3e0   : > { %v13574_v38 = vld [vmem:[%s14227_s8 + $0x1f24] sm:$0xf]  ;;  %v11970_v24 = vor.u32 %v13446_v18, %v11967_v33  ;;  %7459 = vmatpush.bf16.msrb.mxu1 %v11458_v23  ;;  %v7220_v18 = vpop.f32.mrf.mxu2 }
 0x3e1   : > { %v12479_v37 = vld [vmem:[%s14227_s8 + $0x1f60] sm:$0xf0]  ;;  %v7221_v23 = vadd.f32 %v7220_v18, %v7208_v7  ;;  %v9477_v7 = vld [vmem:[%s14227_s8 + $0x7a8] sm:$0xf] }
 0x3e2   : > { %v13174_v25 = vld [vmem:[%s14227_s8 + $0x12a4] sm:$0xf]  ;;  %v12482_v47 = vor.u32 %v13574_v38, %v12479_v37  ;;  %7472 = vmatpush.bf16.msrb.mxu2 %v11970_v24  ;;  %v7233_v24 = vpop.f32.mrf.mxu3 }
 0x3e3   : > { %v10879_v26 = vld [vmem:[%s14227_s8 + $0x12e0] sm:$0xf0] }
 0x3e4   : > { %v13302_v14 = vld [vmem:[%s14227_s8 + $0x16a4] sm:$0xf]  ;;  %v10882_v32 = vor.u32 %v13174_v25, %v10879_v26  ;;  %7485 = vmatpush.bf16.msrb.mxu3 %v12482_v47  ;;  %v15646_v47 = vadd.f32 %v7233_v24, %v7221_v23  ;;  %v12687_v23 = vld [vmem:[%s14227_s8 + $0x364] sm:$0xf0] }
 0x3e5   : > { %v11391_v27 = vld [vmem:[%s14227_s8 + $0x16e0] sm:$0xf0]  ;;  %v9413_v24 = vld [vmem:[%s14227_s8 + $0x728] sm:$0xf] }
 0x3e6   : > { %v13430_v28 = vld [vmem:[%s14227_s8 + $0x1aa4] sm:$0xf]  ;;  %v11394_v40 = vor.u32 %v13302_v14, %v11391_v27  ;;  %7447 = vmatpush.bf16.msrb.mxu0 %v10882_v32  ;;  %v7196_v27 = vpop.f32.mrf.mxu0 }
 0x3e7   : > { %v11903_v29 = vld [vmem:[%s14227_s8 + $0x1ae0] sm:$0xf0]  ;;  %v12943_v27 = vld [vmem:[%s14227_s8 + $0xb64] sm:$0xf0] }
 0x3e8   : > { %v13558_v30 = vld [vmem:[%s14227_s8 + $0x1ea4] sm:$0xf]  ;;  %v11906_v42 = vor.u32 %v13430_v28, %v11903_v29  ;;  %7460 = vmatpush.bf16.msrb.mxu1 %v11394_v40  ;;  %v7209_v40 = vpop.f32.mrf.mxu1 }
 0x3e9   : > { %v12415_v31 = vld [vmem:[%s14227_s8 + $0x1ee0] sm:$0xf0]  ;;  %v8837_v40 = vld [vmem:[%s14227_s8 + $0x2a8] sm:$0xf] }
 0x3ea   : > { %v13158_v45 = vld [vmem:[%s14227_s8 + $0x1224] sm:$0xf]  ;;  %v12418_v48 = vor.u32 %v13558_v30, %v12415_v31  ;;  %7473 = vmatpush.bf16.msrb.mxu2 %v11906_v42 }
 0x3eb   : > { %v10815_v46 = vld [vmem:[%s14227_s8 + $0x1260] sm:$0xf0] }
 0x3ec   : > { %v13286_v57 = vld [vmem:[%s14227_s8 + $0x1624] sm:$0xf]  ;;  %v10818_v55 = vor.u32 %v13158_v45, %v10815_v46  ;;  %7486 = vmatpush.bf16.msrb.mxu3 %v12418_v48 }
 0x3ed   : > { %v11327_v49 = vld [vmem:[%s14227_s8 + $0x1660] sm:$0xf0] }
 0x3ee   : > { %v13414_v50 = vld [vmem:[%s14227_s8 + $0x1a24] sm:$0xf]  ;;  %v11330_v58 = vor.u32 %v13286_v57, %v11327_v49  ;;  %7448 = vmatpush.bf16.msrb.mxu0 %v10818_v55 }
 0x3ef   : > { %v11839_v51 = vld [vmem:[%s14227_s8 + $0x1a60] sm:$0xf0] }
 0x3f0   : > { %v13542_v53 = vld [vmem:[%s14227_s8 + $0x1e24] sm:$0xf]  ;;  %v11842_v60 = vor.u32 %v13414_v50, %v11839_v51  ;;  %7461 = vmatpush.bf16.msrb.mxu1 %v11330_v58 }
 0x3f1   : > { %v12351_v54 = vld [vmem:[%s14227_s8 + $0x1e60] sm:$0xf0] }
 0x3f2   : > { %v13142_v61 = vld [vmem:[%s14227_s8 + $0x11a4] sm:$0xf]  ;;  %v12354_v10 = vor.u32 %v13542_v53, %v12351_v54  ;;  %7474 = vmatpush.bf16.msrb.mxu2 %v11842_v60 }
 0x3f3   : > { %v10751_v62 = vld [vmem:[%s14227_s8 + $0x11e0] sm:$0xf0] }
 0x3f4   : > { %v13270_v63 = vld [vmem:[%s14227_s8 + $0x15a4] sm:$0xf]  ;;  %v10754_v11 = vor.u32 %v13142_v61, %v10751_v62  ;;  %7487 = vmatpush.bf16.msrb.mxu3 %v12354_v10  ;;  %v7222_v61 = vpop.f32.mrf.mxu2 }
 0x3f5   : > { %v11263_v2 = vld [vmem:[%s14227_s8 + $0x15e0] sm:$0xf0] }
 0x3f6   : > { %v13398_v3 = vld [vmem:[%s14227_s8 + $0x19a4] sm:$0xf]  ;;  %v11266_v12 = vor.u32 %v13270_v63, %v11263_v2  ;;  %7449 = vmatpush.bf16.msrb.mxu0 %v10754_v11  ;;  %v7235_v2 = vpop.f32.mrf.mxu3  ;;  %v9989_v11 = vld [vmem:[%s14227_s8 + $0xba8] sm:$0xf] }
 0x3f7   : > { %v11775_v4 = vld [vmem:[%s14227_s8 + $0x19e0] sm:$0xf0]  ;;  %v13039_v2 = vld [vmem:[%s14227_s8 + $0xe64] sm:$0xf0] }
 0x3f8   : > { %v13526_v8 = vld [vmem:[%s14227_s8 + $0x1da4] sm:$0xf]  ;;  %v11778_v13 = vor.u32 %v13398_v3, %v11775_v4  ;;  %7462 = vmatpush.bf16.msrb.mxu1 %v11266_v12  ;;  %v8965_v3 = vld [vmem:[%s14227_s8 + $0x3a8] sm:$0xf] }
 0x3f9   : > { %v12287_v9 = vld [vmem:[%s14227_s8 + $0x1de0] sm:$0xf0]  ;;  %v12703_v4 = vld [vmem:[%s14227_s8 + $0x3e4] sm:$0xf0] }
 0x3fa   : > { %v13126_v15 = vld [vmem:[%s14227_s8 + $0x1124] sm:$0xf]  ;;  %v12290_v33 = vor.u32 %v13526_v8, %v12287_v9  ;;  %7475 = vmatpush.bf16.msrb.mxu2 %v11778_v13  ;;  %v12831_v9 = vld [vmem:[%s14227_s8 + $0x7e4] sm:$0xf0] }
 0x3fb   : > { %v10687_v16 = vld [vmem:[%s14227_s8 + $0x1160] sm:$0xf0]  ;;  %v12959_v12 = vld [vmem:[%s14227_s8 + $0xbe4] sm:$0xf0] }
 0x3fc   : > { %v13254_v17 = vld [vmem:[%s14227_s8 + $0x1524] sm:$0xf]  ;;  %v10690_v14 = vor.u32 %v13126_v15, %v10687_v16  ;;  %7488 = vmatpush.bf16.msrb.mxu3 %v12290_v33  ;;  %v10501_v16 = vld [vmem:[%s14227_s8 + $0xfa8] sm:$0xf]  ;;  %v8966_v33 = vor.u32 %v12703_v4, %v8965_v3  ;;  %v7246_v4 = vpop.f32.mrf.mxu0 }
 0x3fd   : > { %v11199_v38 = vld [vmem:[%s14227_s8 + $0x1560] sm:$0xf0] }
 0x3fe   : > { %v13382_v37 = vld [vmem:[%s14227_s8 + $0x1924] sm:$0xf]  ;;  %v11202_v28 = vor.u32 %v13254_v17, %v11199_v38  ;;  %7450 = vmatpush.bf16.msrb.mxu0 %v10690_v14  ;;  %v13087_v17 = vld [vmem:[%s14227_s8 + $0xfe4] sm:$0xf0]  ;;  %v9478_v38 = vor.u32 %v12831_v9, %v9477_v7 }
 0x3ff   : > { %v11711_v22 = vld [vmem:[%s14227_s8 + $0x1960] sm:$0xf0]  ;;  %v9925_v14 = vld [vmem:[%s14227_s8 + $0xb28] sm:$0xf] }
 0x400   : > { %v13510_v25 = vld [vmem:[%s14227_s8 + $0x1d24] sm:$0xf]  ;;  %v11714_v29 = vor.u32 %v13382_v37, %v11711_v22  ;;  %7463 = vmatpush.bf16.msrb.mxu1 %v11202_v28  ;;  %v9990_v37 = vor.u32 %v12959_v12, %v9989_v11  ;;  %v8901_v22 = vld [vmem:[%s14227_s8 + $0x328] sm:$0xf] }
 0x401   : > { %v12223_v26 = vld [vmem:[%s14227_s8 + $0x1d60] sm:$0xf0]  ;;  %v10437_v28 = vld [vmem:[%s14227_s8 + $0xf28] sm:$0xf] }
 0x402   : > { %v13110_v30 = vld [vmem:[%s14227_s8 + $0x10a4] sm:$0xf]  ;;  %v12226_v42 = vor.u32 %v13510_v25, %v12223_v26  ;;  %7476 = vmatpush.bf16.msrb.mxu2 %v11714_v29  ;;  %v10502_v25 = vor.u32 %v13087_v17, %v10501_v16  ;;  %v12815_v26 = vld [vmem:[%s14227_s8 + $0x764] sm:$0xf0] }
 0x403   : > { %v10623_v31 = vld [vmem:[%s14227_s8 + $0x10e0] sm:$0xf0]  ;;  %v13071_v29 = vld [vmem:[%s14227_s8 + $0xf64] sm:$0xf0] }
 0x404   : > { %v13238_v32 = vld [vmem:[%s14227_s8 + $0x14a4] sm:$0xf]  ;;  %v10626_v50 = vor.u32 %v13110_v30, %v10623_v31  ;;  %7489 = vmatpush.bf16.msrb.mxu3 %v12226_v42  ;;  %v8902_v30 = vor.u32 %v12687_v23, %v8901_v22  ;;  %v9414_v31 = vor.u32 %v12815_v26, %v9413_v24  ;;  %v12671_v42 = vld [vmem:[%s14227_s8 + $0x2e4] sm:$0xf0] }
 0x405   : > { %v11135_v45 = vld [vmem:[%s14227_s8 + $0x14e0] sm:$0xf0]  ;;  %v8709_v9 = vld [vmem:[%s14227_s8 + $0x1a8] sm:$0xf] }
 0x406   : > { %v13366_v46 = vld [vmem:[%s14227_s8 + $0x18a4] sm:$0xf]  ;;  %v11138_v54 = vor.u32 %v13238_v32, %v11135_v45  ;;  %7451 = vmatpush.bf16.msrb.mxu0 %v10626_v50  ;;  %v9926_v32 = vor.u32 %v12943_v27, %v9925_v14  ;;  %v9349_v45 = vld [vmem:[%s14227_s8 + $0x6a8] sm:$0xf]  ;;  %v7272_v27 = vpop.f32.mrf.mxu2 }
 0x407   : > { %v11647_v57 = vld [vmem:[%s14227_s8 + $0x18e0] sm:$0xf0]  ;;  %v10373_v50 = vld [vmem:[%s14227_s8 + $0xea8] sm:$0xf] }
 0x408   : > { %v13494_v48 = vld [vmem:[%s14227_s8 + $0x1ca4] sm:$0xf]  ;;  %v11650_v55 = vor.u32 %v13366_v46, %v11647_v57  ;;  %7464 = vmatpush.bf16.msrb.mxu1 %v11138_v54  ;;  %v10438_v46 = vor.u32 %v13071_v29, %v10437_v28  ;;  %v12799_v57 = vld [vmem:[%s14227_s8 + $0x6e4] sm:$0xf0] }
 0x409   : > { %v12159_v49 = vld [vmem:[%s14227_s8 + $0x1ce0] sm:$0xf0]  ;;  %v9350_v54 = vor.u32 %v12799_v57, %v9349_v45  ;;  %v12639_v11 = vld [vmem:[%s14227_s8 + $0x1e4] sm:$0xf0] }
 0x40a   : > { %v13094_v51 = vld [vmem:[%s14227_s8 + $0x1024] sm:$0xf]  ;;  %v12162_v62 = vor.u32 %v13494_v48, %v12159_v49  ;;  %7477 = vmatpush.bf16.msrb.mxu2 %v11650_v55  ;;  %v9861_v48 = vld [vmem:[%s14227_s8 + $0xaa8] sm:$0xf]  ;;  %v8710_v23 = vor.u32 %v12639_v11, %v8709_v9 }
 0x40b   : > { %v10559_v53 = vld [vmem:[%s14227_s8 + $0x1060] sm:$0xf0]  ;;  %v12927_v49 = vld [vmem:[%s14227_s8 + $0xae4] sm:$0xf0] }
 0x40c   : > { %v13222_v56 = vld [vmem:[%s14227_s8 + $0x1424] sm:$0xf]  ;;  %v10562_v8 = vor.u32 %v13094_v51, %v10559_v53  ;;  %7490 = vmatpush.bf16.msrb.mxu3 %v12162_v62  ;;  %v13055_v51 = vld [vmem:[%s14227_s8 + $0xee4] sm:$0xf0]  ;;  %v8838_v53 = vor.u32 %v12671_v42, %v8837_v40  ;;  %v9862_v55 = vor.u32 %v12927_v49, %v9861_v48  ;;  %v7285_v40 = vpop.f32.mrf.mxu3  ;;  %v7248_v48 = vpop.f32.mrf.mxu0 }
 0x40d   : > { %v11071_v58 = vld [vmem:[%s14227_s8 + $0x1460] sm:$0xf0]  ;;  %v10374_v61 = vor.u32 %v13055_v51, %v10373_v50  ;;  %v12783_v62 = vld [vmem:[%s14227_s8 + $0x664] sm:$0xf0] }
 0x40e   : > { %v13350_v60 = vld [vmem:[%s14227_s8 + $0x1824] sm:$0xf]  ;;  %v11074_v13 = vor.u32 %v13222_v56, %v11071_v58  ;;  %7452 = vmatpush.bf16.msrb.mxu0 %v10562_v8  ;;  %v8773_v56 = vld [vmem:[%s14227_s8 + $0x228] sm:$0xf]  ;;  %v7274_v11 = vpop.f32.mrf.mxu2 }
 0x40f   : > { %v11583_v63 = vld [vmem:[%s14227_s8 + $0x1860] sm:$0xf0]  ;;  %v12655_v58 = vld [vmem:[%s14227_s8 + $0x264] sm:$0xf0] }
 0x410   : > { %v13478_v0 = vld [vmem:[%s14227_s8 + $0x1c24] sm:$0xf]  ;;  %v11586_v15 = vor.u32 %v13350_v60, %v11583_v63  ;;  %7465 = vmatpush.bf16.msrb.mxu1 %v11074_v13  ;;  %v9285_v60 = vld [vmem:[%s14227_s8 + $0x628] sm:$0xf]  ;;  %v8774_v3 = vor.u32 %v12655_v58, %v8773_v56  ;;  %v7247_v13 = vadd.f32 %v7246_v4, %v15646_v47 }
 0x411   : > { %v12095_v10 = vld [vmem:[%s14227_s8 + $0x1c60] sm:$0xf0]  ;;  %7453 = vmatmul.bf16.vlgmr.msrb.gmra.mxu0 %v14413_v59  ;;  %v9797_v63 = vld [vmem:[%s14227_s8 + $0xa28] sm:$0xf]  ;;  %v9286_v7 = vor.u32 %v12783_v62, %v9285_v60 }
 0x412   : > { %v12098_v18 = vor.u32 %v13478_v0, %v12095_v10  ;;  %7478 = vmatpush.bf16.msrb.mxu2 %v11586_v15  ;;  %7497 = vmatpush.bf16.msra.mxu0 %v8966_v33  ;;  %v12911_v0 = vld [vmem:[%s14227_s8 + $0xa64] sm:$0xf0]  ;;  %v7259_v15 = vpop.f32.mrf.mxu1 }
 0x413   : > { %7466 = vmatmul.bf16.vlgmr.msrb.gmra.mxu1 %v14417_v41  ;;  %v10309_v10 = vld [vmem:[%s14227_s8 + $0xe28] sm:$0xf]  ;;  %v9798_v8 = vor.u32 %v12911_v0, %v9797_v63  ;;  %v7260_v22 = vadd.f32 %v7259_v15, %v7247_v13 }
 0x414   : > { %7491 = vmatpush.bf16.msrb.mxu3 %v12098_v18  ;;  %7510 = vmatpush.bf16.msra.mxu1 %v9478_v38  ;;  %v9221_v12 = vld [vmem:[%s14227_s8 + $0x5a8] sm:$0xf]  ;;  %v10310_v16 = vor.u32 %v13039_v2, %v10309_v10 }
 0x415   : > { %7479 = vmatmul.bf16.vlgmr.msrb.gmra.mxu2 %v14409_v36  ;;  %v12767_v17 = vld [vmem:[%s14227_s8 + $0x5e4] sm:$0xf0] }
 0x416   : > { %7523 = vmatpush.bf16.msra.mxu2 %v9990_v37  ;;  %7498 = vmatpush.bf16.msra.mxu0 %v8902_v30  ;;  %v9733_v18 = vld [vmem:[%s14227_s8 + $0x9a8] sm:$0xf]  ;;  %v9222_v47 = vor.u32 %v12767_v17, %v9221_v12  ;;  %v7287_v17 = vpop.f32.mrf.mxu3 }
 0x417   : > { %7492 = vmatmul.bf16.vlgmr.msrb.gmra.mxu3 %v14415_v39  ;;  %v12895_v33 = vld [vmem:[%s14227_s8 + $0x9e4] sm:$0xf0] }
 0x418   : > { %7536 = vmatpush.bf16.msra.mxu3 %v10502_v25  ;;  %7511 = vmatpush.bf16.msra.mxu1 %v9414_v31  ;;  %v10245_v38 = vld [vmem:[%s14227_s8 + $0xda8] sm:$0xf]  ;;  %v9734_v24 = vor.u32 %v12895_v33, %v9733_v18 }
 0x419   : > { %v13023_v37 = vld [vmem:[%s14227_s8 + $0xde4] sm:$0xf0] }
 0x41a   : > { %7524 = vmatpush.bf16.msra.mxu2 %v9926_v32  ;;  %7499 = vmatpush.bf16.msra.mxu0 %v8838_v53  ;;  %v8645_v25 = vld [vmem:[%s14227_s8 + $0x128] sm:$0xf]  ;;  %v10246_v28 = vor.u32 %v13023_v37, %v10245_v38  ;;  %v7273_v32 = vadd.f32 %v7272_v27, %v7260_v22 }
 0x41b   : > { %v12623_v26 = vld [vmem:[%s14227_s8 + $0x164] sm:$0xf0] }
 0x41c   : > { %7537 = vmatpush.bf16.msra.mxu3 %v10438_v46  ;;  %7512 = vmatpush.bf16.msra.mxu1 %v9350_v54  ;;  %v9157_v14 = vld [vmem:[%s14227_s8 + $0x528] sm:$0xf]  ;;  %v8646_v46 = vor.u32 %v12623_v26, %v8645_v25  ;;  %v15717_v57 = vadd.f32 %v7285_v40, %v7273_v32 }
 0x41d   : > { %v12751_v29 = vld [vmem:[%s14227_s8 + $0x564] sm:$0xf0] }
 0x41e   : > { %7525 = vmatpush.bf16.msra.mxu2 %v9862_v55  ;;  %7500 = vmatpush.bf16.msra.mxu0 %v8774_v3  ;;  %v9669_v30 = vld [vmem:[%s14227_s8 + $0x928] sm:$0xf]  ;;  %v9158_v49 = vor.u32 %v12751_v29, %v9157_v14  ;;  %v7261_v55 = vpop.f32.mrf.mxu1 }
 0x41f   : > { %v12879_v31 = vld [vmem:[%s14227_s8 + $0x964] sm:$0xf0] }
 0x420   : > { %7538 = vmatpush.bf16.msra.mxu3 %v10374_v61  ;;  %7513 = vmatpush.bf16.msra.mxu1 %v9286_v7  ;;  %v10181_v42 = vld [vmem:[%s14227_s8 + $0xd28] sm:$0xf]  ;;  %v9670_v50 = vor.u32 %v12879_v31, %v9669_v30 }
 0x421   : > { %v13007_v45 = vld [vmem:[%s14227_s8 + $0xd64] sm:$0xf0] }
 0x422   : > { %7526 = vmatpush.bf16.msra.mxu2 %v9798_v8  ;;  %7501 = vmatpush.bf16.msra.mxu0 %v8710_v23  ;;  %v8581_v51 = vld [vmem:[%s14227_s8 + $0xa8] sm:$0xf]  ;;  %v10182_v56 = vor.u32 %v13007_v45, %v10181_v42 }
 0x423   : > { %v12607_v53 = vld [vmem:[%s14227_s8 + $0xe4] sm:$0xf0] }
 0x424   : > { %7539 = vmatpush.bf16.msra.mxu3 %v10310_v16  ;;  %7514 = vmatpush.bf16.msra.mxu1 %v9222_v47  ;;  %v9093_v54 = vld [vmem:[%s14227_s8 + $0x4a8] sm:$0xf]  ;;  %v8582_v0 = vor.u32 %v12607_v53, %v8581_v51 }
 0x425   : > { %v12735_v58 = vld [vmem:[%s14227_s8 + $0x4e4] sm:$0xf0] }
 0x426   : > { %7527 = vmatpush.bf16.msra.mxu2 %v9734_v24  ;;  %v9605_v60 = vld [vmem:[%s14227_s8 + $0x8a8] sm:$0xf]  ;;  %7502 = vmatpush.bf16.msra.mxu0 %v8646_v46  ;;  %v9094_v3 = vor.u32 %v12735_v58, %v9093_v54 }
 0x427   : > { %v12863_v61 = vld [vmem:[%s14227_s8 + $0x8e4] sm:$0xf0] }
 0x428   : > { %7540 = vmatpush.bf16.msra.mxu3 %v10246_v28  ;;  %v10117_v62 = vld [vmem:[%s14227_s8 + $0xca8] sm:$0xf]  ;;  %7515 = vmatpush.bf16.msra.mxu1 %v9158_v49  ;;  %v9606_v4 = vor.u32 %v12863_v61, %v9605_v60 }
 0x429   : > { %v12991_v63 = vld [vmem:[%s14227_s8 + $0xce4] sm:$0xf0] }
 0x42a   : > { %v8517_v10 = vld [vmem:[%s14227_s8 + $0x28] sm:$0xf]  ;;  %7528 = vmatpush.bf16.msra.mxu2 %v9670_v50  ;;  %v10118_v12 = vor.u32 %v12991_v63, %v10117_v62  ;;  %7503 = vmatpush.bf16.msra.mxu0 %v8582_v0 }
 0x42b   : > { %v12591_v2 = vld [vmem:[%s14227_s8 + $0x64] sm:$0xf0] }
 0x42c   : > { %v9029_v7 = vld [vmem:[%s14227_s8 + $0x428] sm:$0xf]  ;;  %7541 = vmatpush.bf16.msra.mxu3 %v10182_v56  ;;  %v8518_v37 = vor.u32 %v12591_v2, %v8517_v10  ;;  %7516 = vmatpush.bf16.msra.mxu1 %v9094_v3 }
 0x42d   : > { %v12719_v8 = vld [vmem:[%s14227_s8 + $0x464] sm:$0xf0] }
 0x42e   : > { %v9541_v9 = vld [vmem:[%s14227_s8 + $0x828] sm:$0xf]  ;;  %7529 = vmatpush.bf16.msra.mxu2 %v9606_v4  ;;  %v9030_v24 = vor.u32 %v12719_v8, %v9029_v7  ;;  %7504 = vmatpush.bf16.msra.mxu0 %v8518_v37 }
 0x42f   : > { %v12847_v13 = vld [vmem:[%s14227_s8 + $0x864] sm:$0xf0] }
 0x430   : > { %v10053_v15 = vld [vmem:[%s14227_s8 + $0xc28] sm:$0xf]  ;;  %v9542_v25 = vor.u32 %v12847_v13, %v9541_v9  ;;  %7542 = vmatpush.bf16.msra.mxu3 %v10118_v12  ;;  %7517 = vmatpush.bf16.msra.mxu1 %v9030_v24  ;;  %v7311_v24 = vpop.f32.mrf.mxu1 }
 0x431   : > { %v12975_v16 = vld [vmem:[%s14227_s8 + $0xc64] sm:$0xf0]  ;;  %7505 = vmatmul.bf16.vlgmr.msra.gmra.mxu0 %v14340_v6 }
 0x432   : > { %v11013_v18 = vld [vmem:[%s14227_s8 + $0x13a8] sm:$0xf]  ;;  %v10054_v27 = vor.u32 %v12975_v16, %v10053_v15  ;;  %7530 = vmatpush.bf16.msra.mxu2 %v9542_v25 }
 0x433   : > { %v13215_v33 = vld [vmem:[%s14227_s8 + $0x13e4] sm:$0xf0]  ;;  %7518 = vmatmul.bf16.vlgmr.msra.gmra.mxu1 %v14355_v20 }
 0x434   : > { %v11525_v38 = vld [vmem:[%s14227_s8 + $0x17a8] sm:$0xf]  ;;  %v11014_v28 = vor.u32 %v13215_v33, %v11013_v18  ;;  %7543 = vmatpush.bf16.msra.mxu3 %v10054_v27  ;;  %v7298_v33 = vpop.f32.mrf.mxu0 }
 0x435   : > { %v13343_v22 = vld [vmem:[%s14227_s8 + $0x17e4] sm:$0xf0]  ;;  %7531 = vmatmul.bf16.vlgmr.msra.gmra.mxu2 %v14338_v5 }
 0x436   : > { %v12037_v23 = vld [vmem:[%s14227_s8 + $0x1ba8] sm:$0xf]  ;;  %v11526_v29 = vor.u32 %v13343_v22, %v11525_v38  ;;  %7549 = vmatpush.bf16.msrb.mxu0 %v11014_v28  ;;  %v7312_v28 = vadd.f32 %v7311_v24, %v7298_v33 }
 0x437   : > { %v13471_v47 = vld [vmem:[%s14227_s8 + $0x1be4] sm:$0xf0]  ;;  %7544 = vmatmul.bf16.vlgmr.msra.gmra.mxu3 %v14353_v19 }
 0x438   : > { %v12549_v26 = vld [vmem:[%s14227_s8 + $0x1fa8] sm:$0xf]  ;;  %v12038_v30 = vor.u32 %v13471_v47, %v12037_v23  ;;  %7562 = vmatpush.bf16.msrb.mxu1 %v11526_v29 }
 0x439   : > { %v13599_v14 = vld [vmem:[%s14227_s8 + $0x1fe4] sm:$0xf0] }
 0x43a   : > { %v10949_v31 = vld [vmem:[%s14227_s8 + $0x1328] sm:$0xf]  ;;  %v12550_v42 = vor.u32 %v13599_v14, %v12549_v26  ;;  %7575 = vmatpush.bf16.msrb.mxu2 %v12038_v30 }
 0x43b   : > { %v13199_v32 = vld [vmem:[%s14227_s8 + $0x1364] sm:$0xf0] }
 0x43c   : > { %v11461_v40 = vld [vmem:[%s14227_s8 + $0x1728] sm:$0xf]  ;;  %v10950_v51 = vor.u32 %v13199_v32, %v10949_v31  ;;  %7588 = vmatpush.bf16.msrb.mxu3 %v12550_v42 }
 0x43d   : > { %v13327_v45 = vld [vmem:[%s14227_s8 + $0x1764] sm:$0xf0] }
 0x43e   : > { %v11973_v46 = vld [vmem:[%s14227_s8 + $0x1b28] sm:$0xf]  ;;  %v11462_v53 = vor.u32 %v13327_v45, %v11461_v40  ;;  %7550 = vmatpush.bf16.msrb.mxu0 %v10950_v51 }
 0x43f   : > { %v13455_v48 = vld [vmem:[%s14227_s8 + $0x1b64] sm:$0xf0] }
 0x440   : > { %v12485_v49 = vld [vmem:[%s14227_s8 + $0x1f28] sm:$0xf]  ;;  %v11974_v54 = vor.u32 %v13455_v48, %v11973_v46  ;;  %7563 = vmatpush.bf16.msrb.mxu1 %v11462_v53  ;;  %v7324_v48 = vpop.f32.mrf.mxu2 }
 0x441   : > { %v13583_v50 = vld [vmem:[%s14227_s8 + $0x1f64] sm:$0xf0] }
 0x442   : > { %v10885_v55 = vld [vmem:[%s14227_s8 + $0x12a8] sm:$0xf]  ;;  %v12486_v60 = vor.u32 %v13583_v50, %v12485_v49  ;;  %7576 = vmatpush.bf16.msrb.mxu2 %v11974_v54  ;;  %v7325_v54 = vadd.f32 %v7324_v48, %v7312_v28  ;;  %v8967_v28 = vld [vmem:[%s14227_s8 + $0x3e8] sm:$0xf0] }
 0x443   : > { %v13183_v56 = vld [vmem:[%s14227_s8 + $0x12e4] sm:$0xf0]  ;;  %v10503_v48 = vld [vmem:[%s14227_s8 + $0xfe8] sm:$0xf0] }
 0x444   : > { %v11397_v58 = vld [vmem:[%s14227_s8 + $0x16a8] sm:$0xf]  ;;  %v10886_v2 = vor.u32 %v13183_v56, %v10885_v55  ;;  %7589 = vmatpush.bf16.msrb.mxu3 %v12486_v60  ;;  %v7337_v55 = vpop.f32.mrf.mxu3 }
 0x445   : > { %v13311_v61 = vld [vmem:[%s14227_s8 + $0x16e4] sm:$0xf0] }
 0x446   : > { %v11909_v62 = vld [vmem:[%s14227_s8 + $0x1aa8] sm:$0xf]  ;;  %v11398_v3 = vor.u32 %v13311_v61, %v11397_v58  ;;  %7551 = vmatpush.bf16.msrb.mxu0 %v10886_v2  ;;  %v15787_v61 = vadd.f32 %v7337_v55, %v7325_v54  ;;  %v12679_v54 = vld [vmem:[%s14227_s8 + $0x32c] sm:$0xf] }
 0x447   : > { %v13439_v63 = vld [vmem:[%s14227_s8 + $0x1ae4] sm:$0xf0]  ;;  %v8903_v55 = vld [vmem:[%s14227_s8 + $0x368] sm:$0xf0] }
 0x448   : > { %v12421_v0 = vld [vmem:[%s14227_s8 + $0x1ea8] sm:$0xf]  ;;  %v11910_v4 = vor.u32 %v13439_v63, %v11909_v62  ;;  %7564 = vmatpush.bf16.msrb.mxu1 %v11398_v3  ;;  %v7300_v62 = vpop.f32.mrf.mxu0 }
 0x449   : > { %v13567_v10 = vld [vmem:[%s14227_s8 + $0x1ee4] sm:$0xf0]  ;;  %v12935_v62 = vld [vmem:[%s14227_s8 + $0xb2c] sm:$0xf] }
 0x44a   : > { %v10821_v7 = vld [vmem:[%s14227_s8 + $0x1228] sm:$0xf]  ;;  %v12422_v11 = vor.u32 %v13567_v10, %v12421_v0  ;;  %7577 = vmatpush.bf16.msrb.mxu2 %v11910_v4  ;;  %v7313_v4 = vpop.f32.mrf.mxu1 }
 0x44b   : > { %v13167_v8 = vld [vmem:[%s14227_s8 + $0x1264] sm:$0xf0] }
 0x44c   : > { %v11333_v9 = vld [vmem:[%s14227_s8 + $0x1628] sm:$0xf]  ;;  %v10822_v18 = vor.u32 %v13167_v8, %v10821_v7  ;;  %7590 = vmatpush.bf16.msrb.mxu3 %v12422_v11 }
 0x44d   : > { %v13295_v12 = vld [vmem:[%s14227_s8 + $0x1664] sm:$0xf0] }
 0x44e   : > { %v11845_v13 = vld [vmem:[%s14227_s8 + $0x1a28] sm:$0xf]  ;;  %v11334_v38 = vor.u32 %v13295_v12, %v11333_v9  ;;  %7552 = vmatpush.bf16.msrb.mxu0 %v10822_v18 }
 0x44f   : > { %v13423_v15 = vld [vmem:[%s14227_s8 + $0x1a64] sm:$0xf0] }
 0x450   : > { %v12357_v16 = vld [vmem:[%s14227_s8 + $0x1e28] sm:$0xf]  ;;  %v11846_v37 = vor.u32 %v13423_v15, %v11845_v13  ;;  %7565 = vmatpush.bf16.msrb.mxu1 %v11334_v38 }
 0x451   : > { %v13551_v17 = vld [vmem:[%s14227_s8 + $0x1e64] sm:$0xf0] }
 0x452   : > { %v10757_v22 = vld [vmem:[%s14227_s8 + $0x11a8] sm:$0xf]  ;;  %v12358_v25 = vor.u32 %v13551_v17, %v12357_v16  ;;  %7578 = vmatpush.bf16.msrb.mxu2 %v11846_v37 }
 0x453   : > { %v13151_v23 = vld [vmem:[%s14227_s8 + $0x11e4] sm:$0xf0] }
 0x454   : > { %v11269_v47 = vld [vmem:[%s14227_s8 + $0x15a8] sm:$0xf]  ;;  %v10758_v31 = vor.u32 %v13151_v23, %v10757_v22  ;;  %7591 = vmatpush.bf16.msrb.mxu3 %v12358_v25  ;;  %v7326_v23 = vpop.f32.mrf.mxu2 }
 0x455   : > { %v13279_v26 = vld [vmem:[%s14227_s8 + $0x15e4] sm:$0xf0]  ;;  %v12775_v23 = vld [vmem:[%s14227_s8 + $0x62c] sm:$0xf] }
 0x456   : > { %v11781_v14 = vld [vmem:[%s14227_s8 + $0x19a8] sm:$0xf]  ;;  %v11270_v32 = vor.u32 %v13279_v26, %v11269_v47  ;;  %7553 = vmatpush.bf16.msrb.mxu0 %v10758_v31  ;;  %v9479_v31 = vld [vmem:[%s14227_s8 + $0x7e8] sm:$0xf0] }
 0x457   : > { %v13407_v27 = vld [vmem:[%s14227_s8 + $0x19e4] sm:$0xf0] }
 0x458   : > { %v12293_v29 = vld [vmem:[%s14227_s8 + $0x1da8] sm:$0xf]  ;;  %v11782_v40 = vor.u32 %v13407_v27, %v11781_v14  ;;  %7566 = vmatpush.bf16.msrb.mxu1 %v11270_v32  ;;  %v7339_v14 = vpop.f32.mrf.mxu3  ;;  %v12695_v27 = vld [vmem:[%s14227_s8 + $0x3ac] sm:$0xf] }
 0x459   : > { %v13535_v30 = vld [vmem:[%s14227_s8 + $0x1de4] sm:$0xf0]  ;;  %v12951_v32 = vld [vmem:[%s14227_s8 + $0xbac] sm:$0xf] }
 0x45a   : > { %v10693_v42 = vld [vmem:[%s14227_s8 + $0x1128] sm:$0xf]  ;;  %v12294_v49 = vor.u32 %v13535_v30, %v12293_v29  ;;  %7579 = vmatpush.bf16.msrb.mxu2 %v11782_v40  ;;  %v12823_v29 = vld [vmem:[%s14227_s8 + $0x7ac] sm:$0xf] }
 0x45b   : > { %v13135_v45 = vld [vmem:[%s14227_s8 + $0x1164] sm:$0xf0]  ;;  %v9991_v40 = vld [vmem:[%s14227_s8 + $0xbe8] sm:$0xf0] }
 0x45c   : > { %v11205_v46 = vld [vmem:[%s14227_s8 + $0x1528] sm:$0xf]  ;;  %v10694_v60 = vor.u32 %v13135_v45, %v10693_v42  ;;  %7592 = vmatpush.bf16.msrb.mxu3 %v12294_v49  ;;  %v13031_v14 = vld [vmem:[%s14227_s8 + $0xe2c] sm:$0xf] }
 0x45d   : > { %v13263_v50 = vld [vmem:[%s14227_s8 + $0x1564] sm:$0xf0] }
 0x45e   : > { %v11717_v51 = vld [vmem:[%s14227_s8 + $0x1928] sm:$0xf]  ;;  %v11206_v63 = vor.u32 %v13263_v50, %v11205_v46  ;;  %7554 = vmatpush.bf16.msrb.mxu0 %v10694_v60  ;;  %v13079_v46 = vld [vmem:[%s14227_s8 + $0xfac] sm:$0xf]  ;;  %v8970_v50 = vor.u32 %v12695_v27, %v8967_v28 }
 0x45f   : > { %v13391_v53 = vld [vmem:[%s14227_s8 + $0x1964] sm:$0xf0]  ;;  %v9415_v60 = vld [vmem:[%s14227_s8 + $0x768] sm:$0xf0] }
 0x460   : > { %v12229_v56 = vld [vmem:[%s14227_s8 + $0x1d28] sm:$0xf]  ;;  %v11718_v0 = vor.u32 %v13391_v53, %v11717_v51  ;;  %7567 = vmatpush.bf16.msrb.mxu1 %v11206_v63  ;;  %v9482_v51 = vor.u32 %v12823_v29, %v9479_v31  ;;  %v9994_v53 = vor.u32 %v12951_v32, %v9991_v40  ;;  %v9927_v63 = vld [vmem:[%s14227_s8 + $0xb68] sm:$0xf0]  ;;  %v7350_v29 = vpop.f32.mrf.mxu0 }
 0x461   : > { %v13519_v58 = vld [vmem:[%s14227_s8 + $0x1d64] sm:$0xf0]  ;;  %v9930_v4 = vor.u32 %v12935_v62, %v9927_v63  ;;  %v10311_v27 = vld [vmem:[%s14227_s8 + $0xe68] sm:$0xf0] }
 0x462   : > { %v10629_v10 = vld [vmem:[%s14227_s8 + $0x10a8] sm:$0xf]  ;;  %v12230_v7 = vor.u32 %v13519_v58, %v12229_v56  ;;  %7580 = vmatpush.bf16.msrb.mxu2 %v11718_v0  ;;  %v12807_v56 = vld [vmem:[%s14227_s8 + $0x72c] sm:$0xf]  ;;  %v10506_v58 = vor.u32 %v13079_v46, %v10503_v48  ;;  %v7363_v46 = vpop.f32.mrf.mxu1  ;;  %v10314_v48 = vor.u32 %v13031_v14, %v10311_v27 }
 0x463   : > { %v13119_v2 = vld [vmem:[%s14227_s8 + $0x10e4] sm:$0xf0]  ;;  %v13063_v0 = vld [vmem:[%s14227_s8 + $0xf2c] sm:$0xf] }
 0x464   : > { %v11141_v3 = vld [vmem:[%s14227_s8 + $0x14a8] sm:$0xf]  ;;  %v10630_v15 = vor.u32 %v13119_v2, %v10629_v10  ;;  %7593 = vmatpush.bf16.msrb.mxu3 %v12230_v7  ;;  %v10439_v10 = vld [vmem:[%s14227_s8 + $0xf68] sm:$0xf0]  ;;  %v8906_v2 = vor.u32 %v12679_v54, %v8903_v55 }
 0x465   : > { %v13247_v8 = vld [vmem:[%s14227_s8 + $0x14e4] sm:$0xf0]  ;;  %v12663_v7 = vld [vmem:[%s14227_s8 + $0x2ac] sm:$0xf] }
 0x466   : > { %v11653_v9 = vld [vmem:[%s14227_s8 + $0x18a8] sm:$0xf]  ;;  %v11142_v18 = vor.u32 %v13247_v8, %v11141_v3  ;;  %7555 = vmatpush.bf16.msrb.mxu0 %v10630_v15  ;;  %v9418_v3 = vor.u32 %v12807_v56, %v9415_v60  ;;  %v8839_v8 = vld [vmem:[%s14227_s8 + $0x2e8] sm:$0xf0] }
 0x467   : > { %v13375_v11 = vld [vmem:[%s14227_s8 + $0x18e4] sm:$0xf0]  ;;  %v9863_v15 = vld [vmem:[%s14227_s8 + $0xae8] sm:$0xf0] }
 0x468   : > { %v12165_v12 = vld [vmem:[%s14227_s8 + $0x1ca8] sm:$0xf]  ;;  %v11654_v33 = vor.u32 %v13375_v11, %v11653_v9  ;;  %7568 = vmatpush.bf16.msrb.mxu1 %v11142_v18  ;;  %v12791_v9 = vld [vmem:[%s14227_s8 + $0x6ac] sm:$0xf]  ;;  %v10442_v11 = vor.u32 %v13063_v0, %v10439_v10  ;;  %v8842_v18 = vor.u32 %v12663_v7, %v8839_v8  ;;  %v7376_v0 = vpop.f32.mrf.mxu2  ;;  %v7389_v8 = vpop.f32.mrf.mxu3 }
 0x469   : > { %v13503_v13 = vld [vmem:[%s14227_s8 + $0x1ce4] sm:$0xf0]  ;;  %v12631_v32 = vld [vmem:[%s14227_s8 + $0x1ac] sm:$0xf] }
 0x46a   : > { %v10565_v16 = vld [vmem:[%s14227_s8 + $0x1028] sm:$0xf]  ;;  %v12166_v47 = vor.u32 %v13503_v13, %v12165_v12  ;;  %7581 = vmatpush.bf16.msrb.mxu2 %v11654_v33  ;;  %v9351_v12 = vld [vmem:[%s14227_s8 + $0x6e8] sm:$0xf0] }
 0x46b   : > { %v13103_v17 = vld [vmem:[%s14227_s8 + $0x1064] sm:$0xf0]  ;;  %v12919_v13 = vld [vmem:[%s14227_s8 + $0xaac] sm:$0xf]  ;;  %v9354_v33 = vor.u32 %v12791_v9, %v9351_v12 }
 0x46c   : > { %v11077_v38 = vld [vmem:[%s14227_s8 + $0x1428] sm:$0xf]  ;;  %v10566_v30 = vor.u32 %v13103_v17, %v10565_v16  ;;  %7594 = vmatpush.bf16.msrb.mxu3 %v12166_v47  ;;  %v13047_v16 = vld [vmem:[%s14227_s8 + $0xeac] sm:$0xf] }
 0x46d   : > { %v13231_v37 = vld [vmem:[%s14227_s8 + $0x1464] sm:$0xf0]  ;;  %v10375_v17 = vld [vmem:[%s14227_s8 + $0xee8] sm:$0xf0] }
 0x46e   : > { %v11589_v22 = vld [vmem:[%s14227_s8 + $0x1828] sm:$0xf]  ;;  %v11078_v42 = vor.u32 %v13231_v37, %v11077_v38  ;;  %7556 = vmatpush.bf16.msrb.mxu0 %v10566_v30  ;;  %v9866_v38 = vor.u32 %v12919_v13, %v9863_v15  ;;  %v12647_v37 = vld [vmem:[%s14227_s8 + $0x22c] sm:$0xf]  ;;  %v10378_v47 = vor.u32 %v13047_v16, %v10375_v17  ;;  %v7352_v15 = vpop.f32.mrf.mxu0 }
 0x46f   : > { %v13359_v24 = vld [vmem:[%s14227_s8 + $0x1864] sm:$0xf0]  ;;  %v8711_v40 = vld [vmem:[%s14227_s8 + $0x1e8] sm:$0xf0] }
 0x470   : > { %v12101_v25 = vld [vmem:[%s14227_s8 + $0x1c28] sm:$0xf]  ;;  %v11590_v45 = vor.u32 %v13359_v24, %v11589_v22  ;;  %7569 = vmatpush.bf16.msrb.mxu1 %v11078_v42  ;;  %v8775_v22 = vld [vmem:[%s14227_s8 + $0x268] sm:$0xf0]  ;;  %v8714_v56 = vor.u32 %v12631_v32, %v8711_v40 }
 0x471   : > { %v13487_v26 = vld [vmem:[%s14227_s8 + $0x1c64] sm:$0xf0]  ;;  %7557 = vmatmul.bf16.vlgmr.msrb.gmra.mxu0 %v14413_v59  ;;  %v9287_v24 = vld [vmem:[%s14227_s8 + $0x668] sm:$0xf0]  ;;  %v8778_v28 = vor.u32 %v12647_v37, %v8775_v22  ;;  %v7365_v37 = vpop.f32.mrf.mxu1 }
 0x472   : > { %v12102_v49 = vor.u32 %v13487_v26, %v12101_v25  ;;  %7582 = vmatpush.bf16.msrb.mxu2 %v11590_v45  ;;  %7601 = vmatpush.bf16.msra.mxu0 %v8970_v50  ;;  %v12903_v25 = vld [vmem:[%s14227_s8 + $0xa2c] sm:$0xf]  ;;  %v9290_v30 = vor.u32 %v12775_v23, %v9287_v24  ;;  %v7351_v45 = vadd.f32 %v7350_v29, %v15787_v61 }
 0x473   : > { %7570 = vmatmul.bf16.vlgmr.msrb.gmra.mxu1 %v14417_v41  ;;  %v9799_v26 = vld [vmem:[%s14227_s8 + $0xa68] sm:$0xf0] }
 0x474   : > { %7595 = vmatpush.bf16.msrb.mxu3 %v12102_v49  ;;  %7614 = vmatpush.bf16.msra.mxu1 %v9482_v51  ;;  %v9802_v31 = vor.u32 %v12903_v25, %v9799_v26  ;;  %v12759_v42 = vld [vmem:[%s14227_s8 + $0x5ac] sm:$0xf]  ;;  %v7364_v55 = vadd.f32 %v7363_v46, %v7351_v45 }
 0x475   : > { %7583 = vmatmul.bf16.vlgmr.msrb.gmra.mxu2 %v14409_v36  ;;  %v9223_v49 = vld [vmem:[%s14227_s8 + $0x5e8] sm:$0xf0] }
 0x476   : > { %7627 = vmatpush.bf16.msra.mxu2 %v9994_v53  ;;  %7602 = vmatpush.bf16.msra.mxu0 %v8906_v2  ;;  %v12887_v50 = vld [vmem:[%s14227_s8 + $0x9ac] sm:$0xf]  ;;  %v9226_v61 = vor.u32 %v12759_v42, %v9223_v49  ;;  %v7377_v7 = vadd.f32 %v7376_v0, %v7364_v55  ;;  %v7378_v42 = vpop.f32.mrf.mxu2 }
 0x477   : > { %7596 = vmatmul.bf16.vlgmr.msrb.gmra.mxu3 %v14415_v39  ;;  %v9735_v51 = vld [vmem:[%s14227_s8 + $0x9e8] sm:$0xf0] }
 0x478   : > { %7640 = vmatpush.bf16.msra.mxu3 %v10506_v58  ;;  %7615 = vmatpush.bf16.msra.mxu1 %v9418_v3  ;;  %v13015_v53 = vld [vmem:[%s14227_s8 + $0xdac] sm:$0xf]  ;;  %v9738_v58 = vor.u32 %v12887_v50, %v9735_v51  ;;  %v15858_v13 = vadd.f32 %v7389_v8, %v7377_v7  ;;  %v7391_v50 = vpop.f32.mrf.mxu3 }
 0x479   : > { %v10247_v54 = vld [vmem:[%s14227_s8 + $0xde8] sm:$0xf0] }
 0x47a   : > { %7628 = vmatpush.bf16.msra.mxu2 %v9930_v4  ;;  %7603 = vmatpush.bf16.msra.mxu0 %v8842_v18  ;;  %v12615_v60 = vld [vmem:[%s14227_s8 + $0x12c] sm:$0xf]  ;;  %v10250_v10 = vor.u32 %v13015_v53, %v10247_v54 }
 0x47b   : > { %v8647_v62 = vld [vmem:[%s14227_s8 + $0x168] sm:$0xf0] }
 0x47c   : > { %7641 = vmatpush.bf16.msra.mxu3 %v10442_v11  ;;  %7616 = vmatpush.bf16.msra.mxu1 %v9354_v33  ;;  %v12743_v63 = vld [vmem:[%s14227_s8 + $0x52c] sm:$0xf]  ;;  %v8650_v12 = vor.u32 %v12615_v60, %v8647_v62 }
 0x47d   : > { %v9159_v2 = vld [vmem:[%s14227_s8 + $0x568] sm:$0xf0] }
 0x47e   : > { %7629 = vmatpush.bf16.msra.mxu2 %v9866_v38  ;;  %7604 = vmatpush.bf16.msra.mxu0 %v8778_v28  ;;  %v12871_v3 = vld [vmem:[%s14227_s8 + $0x92c] sm:$0xf]  ;;  %v9162_v16 = vor.u32 %v12743_v63, %v9159_v2 }
 0x47f   : > { %v9671_v4 = vld [vmem:[%s14227_s8 + $0x968] sm:$0xf0] }
 0x480   : > { %7642 = vmatpush.bf16.msra.mxu3 %v10378_v47  ;;  %7617 = vmatpush.bf16.msra.mxu1 %v9290_v30  ;;  %v12999_v9 = vld [vmem:[%s14227_s8 + $0xd2c] sm:$0xf]  ;;  %v9674_v17 = vor.u32 %v12871_v3, %v9671_v4 }
 0x481   : > { %v10183_v11 = vld [vmem:[%s14227_s8 + $0xd68] sm:$0xf0] }
 0x482   : > { %7630 = vmatpush.bf16.msra.mxu2 %v9802_v31  ;;  %7605 = vmatpush.bf16.msra.mxu0 %v8714_v56  ;;  %v12599_v18 = vld [vmem:[%s14227_s8 + $0xac] sm:$0xf]  ;;  %v10186_v22 = vor.u32 %v12999_v9, %v10183_v11 }
 0x483   : > { %v8583_v33 = vld [vmem:[%s14227_s8 + $0xe8] sm:$0xf0] }
 0x484   : > { %7643 = vmatpush.bf16.msra.mxu3 %v10314_v48  ;;  %7618 = vmatpush.bf16.msra.mxu1 %v9226_v61  ;;  %v12727_v38 = vld [vmem:[%s14227_s8 + $0x4ac] sm:$0xf]  ;;  %v8586_v14 = vor.u32 %v12599_v18, %v8583_v33 }
 0x485   : > { %v9095_v23 = vld [vmem:[%s14227_s8 + $0x4e8] sm:$0xf0] }
 0x486   : > { %7631 = vmatpush.bf16.msra.mxu2 %v9738_v58  ;;  %v12855_v47 = vld [vmem:[%s14227_s8 + $0x8ac] sm:$0xf]  ;;  %7606 = vmatpush.bf16.msra.mxu0 %v8650_v12  ;;  %v9098_v29 = vor.u32 %v12727_v38, %v9095_v23 }
 0x487   : > { %v9607_v24 = vld [vmem:[%s14227_s8 + $0x8e8] sm:$0xf0] }
 0x488   : > { %7644 = vmatpush.bf16.msra.mxu3 %v10250_v10  ;;  %v12983_v25 = vld [vmem:[%s14227_s8 + $0xcac] sm:$0xf]  ;;  %7619 = vmatpush.bf16.msra.mxu1 %v9162_v16  ;;  %v9610_v30 = vor.u32 %v12855_v47, %v9607_v24 }
 0x489   : > { %v10119_v26 = vld [vmem:[%s14227_s8 + $0xce8] sm:$0xf0] }
 0x48a   : > { %v12583_v27 = vld [vmem:[%s14227_s8 + $0x2c] sm:$0xf]  ;;  %7632 = vmatpush.bf16.msra.mxu2 %v9674_v17  ;;  %v10122_v45 = vor.u32 %v12983_v25, %v10119_v26  ;;  %7607 = vmatpush.bf16.msra.mxu0 %v8586_v14 }
 0x48b   : > { %v8519_v28 = vld [vmem:[%s14227_s8 + $0x68] sm:$0xf0] }
 0x48c   : > { %v12711_v31 = vld [vmem:[%s14227_s8 + $0x42c] sm:$0xf]  ;;  %7645 = vmatpush.bf16.msra.mxu3 %v10186_v22  ;;  %v8522_v55 = vor.u32 %v12583_v27, %v8519_v28  ;;  %7620 = vmatpush.bf16.msra.mxu1 %v9098_v29 }
 0x48d   : > { %v9031_v32 = vld [vmem:[%s14227_s8 + $0x468] sm:$0xf0] }
 0x48e   : > { %v12839_v40 = vld [vmem:[%s14227_s8 + $0x82c] sm:$0xf]  ;;  %7633 = vmatpush.bf16.msra.mxu2 %v9610_v30  ;;  %v9034_v60 = vor.u32 %v12711_v31, %v9031_v32  ;;  %7608 = vmatpush.bf16.msra.mxu0 %v8522_v55 }
 0x48f   : > { %v9543_v46 = vld [vmem:[%s14227_s8 + $0x868] sm:$0xf0] }
 0x490   : > { %v12967_v48 = vld [vmem:[%s14227_s8 + $0xc2c] sm:$0xf]  ;;  %v9546_v62 = vor.u32 %v12839_v40, %v9543_v46  ;;  %7646 = vmatpush.bf16.msra.mxu3 %v10122_v45  ;;  %7621 = vmatpush.bf16.msra.mxu1 %v9034_v60 }
 0x491   : > { %v10055_v49 = vld [vmem:[%s14227_s8 + $0xc68] sm:$0xf0]  ;;  %7609 = vmatmul.bf16.vlgmr.msra.gmra.mxu0 %v14340_v6 }
 0x492   : > { %v13207_v51 = vld [vmem:[%s14227_s8 + $0x13ac] sm:$0xf]  ;;  %v10058_v10 = vor.u32 %v12967_v48, %v10055_v49  ;;  %7634 = vmatpush.bf16.msra.mxu2 %v9546_v62  ;;  %v7415_v62 = vpop.f32.mrf.mxu1 }
 0x493   : > { %v11015_v53 = vld [vmem:[%s14227_s8 + $0x13e8] sm:$0xf0]  ;;  %7622 = vmatmul.bf16.vlgmr.msra.gmra.mxu1 %v14355_v20 }
 0x494   : > { %v13335_v54 = vld [vmem:[%s14227_s8 + $0x17ac] sm:$0xf]  ;;  %v11018_v2 = vor.u32 %v13207_v51, %v11015_v53  ;;  %7647 = vmatpush.bf16.msra.mxu3 %v10058_v10 }
 0x495   : > { %v11527_v56 = vld [vmem:[%s14227_s8 + $0x17e8] sm:$0xf0]  ;;  %7635 = vmatmul.bf16.vlgmr.msra.gmra.mxu2 %v14338_v5 }
 0x496   : > { %v13463_v61 = vld [vmem:[%s14227_s8 + $0x1bac] sm:$0xf]  ;;  %v11530_v3 = vor.u32 %v13335_v54, %v11527_v56  ;;  %7653 = vmatpush.bf16.msrb.mxu0 %v11018_v2  ;;  %v7402_v54 = vpop.f32.mrf.mxu0 }
 0x497   : > { %v12039_v58 = vld [vmem:[%s14227_s8 + $0x1be8] sm:$0xf0]  ;;  %7648 = vmatmul.bf16.vlgmr.msra.gmra.mxu3 %v14353_v19 }
 0x498   : > { %v13591_v63 = vld [vmem:[%s14227_s8 + $0x1fac] sm:$0xf]  ;;  %v12042_v4 = vor.u32 %v13463_v61, %v12039_v58  ;;  %7666 = vmatpush.bf16.msrb.mxu1 %v11530_v3  ;;  %v7416_v3 = vadd.f32 %v7415_v62, %v7402_v54 }
 0x499   : > { %v12551_v0 = vld [vmem:[%s14227_s8 + $0x1fe8] sm:$0xf0] }
 0x49a   : > { %v13191_v7 = vld [vmem:[%s14227_s8 + $0x132c] sm:$0xf]  ;;  %v12554_v11 = vor.u32 %v13591_v63, %v12551_v0  ;;  %7679 = vmatpush.bf16.msrb.mxu2 %v12042_v4 }
 0x49b   : > { %v10951_v8 = vld [vmem:[%s14227_s8 + $0x1368] sm:$0xf0] }
 0x49c   : > { %v13319_v9 = vld [vmem:[%s14227_s8 + $0x172c] sm:$0xf]  ;;  %v10954_v33 = vor.u32 %v13191_v7, %v10951_v8  ;;  %7692 = vmatpush.bf16.msrb.mxu3 %v12554_v11 }
 0x49d   : > { %v11463_v12 = vld [vmem:[%s14227_s8 + $0x1768] sm:$0xf0] }
 0x49e   : > { %v13447_v15 = vld [vmem:[%s14227_s8 + $0x1b2c] sm:$0xf]  ;;  %v11466_v38 = vor.u32 %v13319_v9, %v11463_v12  ;;  %7654 = vmatpush.bf16.msrb.mxu0 %v10954_v33 }
 0x49f   : > { %v11975_v16 = vld [vmem:[%s14227_s8 + $0x1b68] sm:$0xf0] }
 0x4a0   : > { %v13575_v17 = vld [vmem:[%s14227_s8 + $0x1f2c] sm:$0xf]  ;;  %v11978_v37 = vor.u32 %v13447_v15, %v11975_v16  ;;  %7667 = vmatpush.bf16.msrb.mxu1 %v11466_v38 }
 0x4a1   : > { %v12487_v18 = vld [vmem:[%s14227_s8 + $0x1f68] sm:$0xf0] }
 0x4a2   : > { %v13175_v22 = vld [vmem:[%s14227_s8 + $0x12ac] sm:$0xf]  ;;  %v12490_v24 = vor.u32 %v13575_v17, %v12487_v18  ;;  %7680 = vmatpush.bf16.msrb.mxu2 %v11978_v37  ;;  %v7428_v17 = vpop.f32.mrf.mxu2 }
 0x4a3   : > { %v10887_v23 = vld [vmem:[%s14227_s8 + $0x12e8] sm:$0xf0] }
 0x4a4   : > { %v13303_v47 = vld [vmem:[%s14227_s8 + $0x16ac] sm:$0xf]  ;;  %v10890_v29 = vor.u32 %v13175_v22, %v10887_v23  ;;  %7693 = vmatpush.bf16.msrb.mxu3 %v12490_v24  ;;  %v7429_v22 = vadd.f32 %v7428_v17, %v7416_v3  ;;  %v7441_v23 = vpop.f32.mrf.mxu3  ;;  %v8973_v3 = vld [vmem:[%s14227_s8 + $0x3b0] sm:$0xf] }
 0x4a5   : > { %v11399_v25 = vld [vmem:[%s14227_s8 + $0x16e8] sm:$0xf0]  ;;  %v10509_v17 = vld [vmem:[%s14227_s8 + $0xfb0] sm:$0xf] }
 0x4a6   : > { %v13431_v26 = vld [vmem:[%s14227_s8 + $0x1aac] sm:$0xf]  ;;  %v11402_v30 = vor.u32 %v13303_v47, %v11399_v25  ;;  %7655 = vmatpush.bf16.msrb.mxu0 %v10890_v29 }
 0x4a7   : > { %v11911_v14 = vld [vmem:[%s14227_s8 + $0x1ae8] sm:$0xf0] }
 0x4a8   : > { %v13559_v27 = vld [vmem:[%s14227_s8 + $0x1eac] sm:$0xf]  ;;  %v11914_v31 = vor.u32 %v13431_v26, %v11911_v14  ;;  %7668 = vmatpush.bf16.msrb.mxu1 %v11402_v30  ;;  %v15928_v26 = vadd.f32 %v7441_v23, %v7429_v22  ;;  %v7404_v14 = vpop.f32.mrf.mxu0  ;;  %v8909_v23 = vld [vmem:[%s14227_s8 + $0x330] sm:$0xf] }
 0x4a9   : > { %v12423_v28 = vld [vmem:[%s14227_s8 + $0x1ee8] sm:$0xf0]  ;;  %v12816_v14 = vld [vmem:[%s14227_s8 + $0x76c] sm:$0xf0] }
 0x4aa   : > { %v13159_v32 = vld [vmem:[%s14227_s8 + $0x122c] sm:$0xf]  ;;  %v12426_v45 = vor.u32 %v13559_v27, %v12423_v28  ;;  %7681 = vmatpush.bf16.msrb.mxu2 %v11914_v31 }
 0x4ab   : > { %v10823_v40 = vld [vmem:[%s14227_s8 + $0x1268] sm:$0xf0] }
 0x4ac   : > { %v13287_v42 = vld [vmem:[%s14227_s8 + $0x162c] sm:$0xf]  ;;  %v10826_v53 = vor.u32 %v13159_v32, %v10823_v40  ;;  %7694 = vmatpush.bf16.msrb.mxu3 %v12426_v45  ;;  %v7417_v32 = vpop.f32.mrf.mxu1 }
 0x4ad   : > { %v11335_v46 = vld [vmem:[%s14227_s8 + $0x1668] sm:$0xf0] }
 0x4ae   : > { %v13415_v48 = vld [vmem:[%s14227_s8 + $0x1a2c] sm:$0xf]  ;;  %v11338_v55 = vor.u32 %v13287_v42, %v11335_v46  ;;  %7656 = vmatpush.bf16.msrb.mxu0 %v10826_v53 }
 0x4af   : > { %v11847_v49 = vld [vmem:[%s14227_s8 + $0x1a68] sm:$0xf0] }
 0x4b0   : > { %v13543_v50 = vld [vmem:[%s14227_s8 + $0x1e2c] sm:$0xf]  ;;  %v11850_v56 = vor.u32 %v13415_v48, %v11847_v49  ;;  %7669 = vmatpush.bf16.msrb.mxu1 %v11338_v55 }
 0x4b1   : > { %v12359_v51 = vld [vmem:[%s14227_s8 + $0x1e68] sm:$0xf0] }
 0x4b2   : > { %v13143_v61 = vld [vmem:[%s14227_s8 + $0x11ac] sm:$0xf]  ;;  %v12362_v63 = vor.u32 %v13543_v50, %v12359_v51  ;;  %7682 = vmatpush.bf16.msrb.mxu2 %v11850_v56 }
 0x4b3   : > { %v10759_v58 = vld [vmem:[%s14227_s8 + $0x11e8] sm:$0xf0] }
 0x4b4   : > { %v13271_v60 = vld [vmem:[%s14227_s8 + $0x15ac] sm:$0xf]  ;;  %v10762_v8 = vor.u32 %v13143_v61, %v10759_v58  ;;  %7695 = vmatpush.bf16.msrb.mxu3 %v12362_v63 }
 0x4b5   : > { %v11271_v0 = vld [vmem:[%s14227_s8 + $0x15e8] sm:$0xf0] }
 0x4b6   : > { %v13399_v10 = vld [vmem:[%s14227_s8 + $0x19ac] sm:$0xf]  ;;  %v11274_v9 = vor.u32 %v13271_v60, %v11271_v0  ;;  %7657 = vmatpush.bf16.msrb.mxu0 %v10762_v8  ;;  %v7430_v60 = vpop.f32.mrf.mxu2 }
 0x4b7   : > { %v11783_v2 = vld [vmem:[%s14227_s8 + $0x19e8] sm:$0xf0]  ;;  %v12656_v60 = vld [vmem:[%s14227_s8 + $0x26c] sm:$0xf0] }
 0x4b8   : > { %v13527_v4 = vld [vmem:[%s14227_s8 + $0x1dac] sm:$0xf]  ;;  %v11786_v11 = vor.u32 %v13399_v10, %v11783_v2  ;;  %7670 = vmatpush.bf16.msrb.mxu1 %v11274_v9  ;;  %v7443_v2 = vpop.f32.mrf.mxu3  ;;  %v12832_v9 = vld [vmem:[%s14227_s8 + $0x7ec] sm:$0xf0] }
 0x4b9   : > { %v12295_v7 = vld [vmem:[%s14227_s8 + $0x1de8] sm:$0xf0]  ;;  %v12912_v2 = vld [vmem:[%s14227_s8 + $0xa6c] sm:$0xf0] }
 0x4ba   : > { %v13127_v12 = vld [vmem:[%s14227_s8 + $0x112c] sm:$0xf]  ;;  %v12298_v18 = vor.u32 %v13527_v4, %v12295_v7  ;;  %7683 = vmatpush.bf16.msrb.mxu2 %v11786_v11  ;;  %v12704_v4 = vld [vmem:[%s14227_s8 + $0x3ec] sm:$0xf0] }
 0x4bb   : > { %v10695_v15 = vld [vmem:[%s14227_s8 + $0x1168] sm:$0xf0]  ;;  %v9485_v7 = vld [vmem:[%s14227_s8 + $0x7b0] sm:$0xf] }
 0x4bc   : > { %v13255_v16 = vld [vmem:[%s14227_s8 + $0x152c] sm:$0xf]  ;;  %v10698_v25 = vor.u32 %v13127_v12, %v10695_v15  ;;  %7696 = vmatpush.bf16.msrb.mxu3 %v12298_v18  ;;  %v9997_v11 = vld [vmem:[%s14227_s8 + $0xbb0] sm:$0xf] }
 0x4bd   : > { %v11207_v33 = vld [vmem:[%s14227_s8 + $0x1568] sm:$0xf0]  ;;  %v12960_v12 = vld [vmem:[%s14227_s8 + $0xbec] sm:$0xf0] }
 0x4be   : > { %v13383_v38 = vld [vmem:[%s14227_s8 + $0x192c] sm:$0xf]  ;;  %v11210_v27 = vor.u32 %v13255_v16, %v11207_v33  ;;  %7658 = vmatpush.bf16.msrb.mxu0 %v10698_v25  ;;  %v13088_v18 = vld [vmem:[%s14227_s8 + $0xfec] sm:$0xf0]  ;;  %v9998_v22 = vor.u32 %v12960_v12, %v9997_v11 }
 0x4bf   : > { %v11719_v37 = vld [vmem:[%s14227_s8 + $0x1968] sm:$0xf0]  ;;  %v10510_v25 = vor.u32 %v13088_v18, %v10509_v17  ;;  %v8717_v12 = vld [vmem:[%s14227_s8 + $0x1b0] sm:$0xf]  ;;  %v7467_v18 = vpop.f32.mrf.mxu1 }
 0x4c0   : > { %v13511_v47 = vld [vmem:[%s14227_s8 + $0x1d2c] sm:$0xf]  ;;  %v11722_v28 = vor.u32 %v13383_v38, %v11719_v37  ;;  %7671 = vmatpush.bf16.msrb.mxu1 %v11210_v27  ;;  %v8974_v38 = vor.u32 %v12704_v4, %v8973_v3  ;;  %v9486_v37 = vor.u32 %v12832_v9, %v9485_v7  ;;  %v9933_v27 = vld [vmem:[%s14227_s8 + $0xb30] sm:$0xf] }
 0x4c1   : > { %v12231_v24 = vld [vmem:[%s14227_s8 + $0x1d68] sm:$0xf0]  ;;  %v10317_v3 = vld [vmem:[%s14227_s8 + $0xe30] sm:$0xf] }
 0x4c2   : > { %v13111_v29 = vld [vmem:[%s14227_s8 + $0x10ac] sm:$0xf]  ;;  %v12234_v40 = vor.u32 %v13511_v47, %v12231_v24  ;;  %7684 = vmatpush.bf16.msrb.mxu2 %v11722_v28  ;;  %v12688_v47 = vld [vmem:[%s14227_s8 + $0x36c] sm:$0xf0] }
 0x4c3   : > { %v10631_v30 = vld [vmem:[%s14227_s8 + $0x10e8] sm:$0xf0]  ;;  %v9421_v24 = vld [vmem:[%s14227_s8 + $0x730] sm:$0xf] }
 0x4c4   : > { %v13239_v31 = vld [vmem:[%s14227_s8 + $0x14ac] sm:$0xf]  ;;  %v10634_v50 = vor.u32 %v13111_v29, %v10631_v30  ;;  %7697 = vmatpush.bf16.msrb.mxu3 %v12234_v40  ;;  %v12944_v28 = vld [vmem:[%s14227_s8 + $0xb6c] sm:$0xf0]  ;;  %v9422_v32 = vor.u32 %v12816_v14, %v9421_v24 }
 0x4c5   : > { %v11143_v42 = vld [vmem:[%s14227_s8 + $0x14e8] sm:$0xf0]  ;;  %v10445_v29 = vld [vmem:[%s14227_s8 + $0xf30] sm:$0xf]  ;;  %v9934_v40 = vor.u32 %v12944_v28, %v9933_v27 }
 0x4c6   : > { %v13367_v45 = vld [vmem:[%s14227_s8 + $0x18ac] sm:$0xf]  ;;  %v11146_v54 = vor.u32 %v13239_v31, %v11143_v42  ;;  %7659 = vmatpush.bf16.msrb.mxu0 %v10634_v50  ;;  %v13072_v30 = vld [vmem:[%s14227_s8 + $0xf6c] sm:$0xf0]  ;;  %v8910_v31 = vor.u32 %v12688_v47, %v8909_v23 }
 0x4c7   : > { %v11655_v46 = vld [vmem:[%s14227_s8 + $0x18e8] sm:$0xf0]  ;;  %v8845_v42 = vld [vmem:[%s14227_s8 + $0x2b0] sm:$0xf] }
 0x4c8   : > { %v13495_v48 = vld [vmem:[%s14227_s8 + $0x1cac] sm:$0xf]  ;;  %v11658_v55 = vor.u32 %v13367_v45, %v11655_v46  ;;  %7672 = vmatpush.bf16.msrb.mxu1 %v11146_v54  ;;  %v12672_v45 = vld [vmem:[%s14227_s8 + $0x2ec] sm:$0xf0] }
 0x4c9   : > { %v12167_v49 = vld [vmem:[%s14227_s8 + $0x1ce8] sm:$0xf0]  ;;  %v9357_v46 = vld [vmem:[%s14227_s8 + $0x6b0] sm:$0xf] }
 0x4ca   : > { %v13095_v51 = vld [vmem:[%s14227_s8 + $0x102c] sm:$0xf]  ;;  %v12170_v62 = vor.u32 %v13495_v48, %v12167_v49  ;;  %7685 = vmatpush.bf16.msrb.mxu2 %v11658_v55  ;;  %v10446_v48 = vor.u32 %v13072_v30, %v10445_v29  ;;  %v12800_v49 = vld [vmem:[%s14227_s8 + $0x6ec] sm:$0xf0]  ;;  %v8846_v55 = vor.u32 %v12672_v45, %v8845_v42  ;;  %v7480_v30 = vpop.f32.mrf.mxu2 }
 0x4cb   : > { %v10567_v53 = vld [vmem:[%s14227_s8 + $0x1068] sm:$0xf0]  ;;  %v9869_v50 = vld [vmem:[%s14227_s8 + $0xab0] sm:$0xf] }
 0x4cc   : > { %v13223_v56 = vld [vmem:[%s14227_s8 + $0x142c] sm:$0xf]  ;;  %v10570_v8 = vor.u32 %v13095_v51, %v10567_v53  ;;  %7698 = vmatpush.bf16.msrb.mxu3 %v12170_v62  ;;  %v12928_v51 = vld [vmem:[%s14227_s8 + $0xaec] sm:$0xf0] }
 0x4cd   : > { %v11079_v61 = vld [vmem:[%s14227_s8 + $0x1468] sm:$0xf0]  ;;  %v10381_v53 = vld [vmem:[%s14227_s8 + $0xeb0] sm:$0xf] }
 0x4ce   : > { %v13351_v58 = vld [vmem:[%s14227_s8 + $0x182c] sm:$0xf]  ;;  %v11082_v15 = vor.u32 %v13223_v56, %v11079_v61  ;;  %7660 = vmatpush.bf16.msrb.mxu0 %v10570_v8  ;;  %v13056_v54 = vld [vmem:[%s14227_s8 + $0xeec] sm:$0xf0]  ;;  %v9358_v56 = vor.u32 %v12800_v49, %v9357_v46  ;;  %v9870_v61 = vor.u32 %v12928_v51, %v9869_v50  ;;  %v7454_v8 = vpop.f32.mrf.mxu0  ;;  %v7493_v46 = vpop.f32.mrf.mxu3 }
 0x4cf   : > { %v11591_v63 = vld [vmem:[%s14227_s8 + $0x1868] sm:$0xf0]  ;;  %v9293_v62 = vld [vmem:[%s14227_s8 + $0x630] sm:$0xf]  ;;  %v7455_v17 = vadd.f32 %v7454_v8, %v15928_v26 }
 0x4d0   : > { %v13479_v0 = vld [vmem:[%s14227_s8 + $0x1c2c] sm:$0xf]  ;;  %v11594_v16 = vor.u32 %v13351_v58, %v11591_v63  ;;  %7673 = vmatpush.bf16.msrb.mxu1 %v11082_v15  ;;  %v8781_v58 = vld [vmem:[%s14227_s8 + $0x230] sm:$0xf]  ;;  %v10382_v63 = vor.u32 %v13056_v54, %v10381_v53 }
 0x4d1   : > { %v12103_v10 = vld [vmem:[%s14227_s8 + $0x1c68] sm:$0xf0]  ;;  %7661 = vmatmul.bf16.vlgmr.msrb.gmra.mxu0 %v14413_v59  ;;  %v13040_v4 = vld [vmem:[%s14227_s8 + $0xe6c] sm:$0xf0]  ;;  %v8782_v7 = vor.u32 %v12656_v60, %v8781_v58  ;;  %v7468_v24 = vadd.f32 %v7467_v18, %v7455_v17  ;;  %v7469_v60 = vpop.f32.mrf.mxu1 }
 0x4d2   : > { %v12106_v33 = vor.u32 %v13479_v0, %v12103_v10  ;;  %7686 = vmatpush.bf16.msrb.mxu2 %v11594_v16  ;;  %7705 = vmatpush.bf16.msra.mxu0 %v8974_v38  ;;  %v12784_v0 = vld [vmem:[%s14227_s8 + $0x66c] sm:$0xf0]  ;;  %v7482_v17 = vpop.f32.mrf.mxu2 }
 0x4d3   : > { %7674 = vmatmul.bf16.vlgmr.msrb.gmra.mxu1 %v14417_v41  ;;  %v9805_v10 = vld [vmem:[%s14227_s8 + $0xa30] sm:$0xf]  ;;  %v9294_v9 = vor.u32 %v12784_v0, %v9293_v62  ;;  %v7481_v45 = vadd.f32 %v7480_v30, %v7468_v24 }
 0x4d4   : > { %7699 = vmatpush.bf16.msrb.mxu3 %v12106_v33  ;;  %7718 = vmatpush.bf16.msra.mxu1 %v9486_v37  ;;  %v9806_v11 = vor.u32 %v12912_v2, %v9805_v10  ;;  %v12640_v15 = vld [vmem:[%s14227_s8 + $0x1ec] sm:$0xf0]  ;;  %v10318_v33 = vor.u32 %v13040_v4, %v10317_v3 }
 0x4d5   : > { %7687 = vmatmul.bf16.vlgmr.msrb.gmra.mxu2 %v14409_v36  ;;  %v9229_v16 = vld [vmem:[%s14227_s8 + $0x5b0] sm:$0xf]  ;;  %v15999_v51 = vadd.f32 %v7493_v46, %v7481_v45 }
 0x4d6   : > { %7731 = vmatpush.bf16.msra.mxu2 %v9998_v22  ;;  %7706 = vmatpush.bf16.msra.mxu0 %v8910_v31  ;;  %v12768_v38 = vld [vmem:[%s14227_s8 + $0x5ec] sm:$0xf0]  ;;  %v7456_v53 = vpop.f32.mrf.mxu0 }
 0x4d7   : > { %7700 = vmatmul.bf16.vlgmr.msrb.gmra.mxu3 %v14415_v39  ;;  %v9741_v37 = vld [vmem:[%s14227_s8 + $0x9b0] sm:$0xf]  ;;  %v9230_v26 = vor.u32 %v12768_v38, %v9229_v16 }
 0x4d8   : > { %7744 = vmatpush.bf16.msra.mxu3 %v10510_v25  ;;  %7719 = vmatpush.bf16.msra.mxu1 %v9422_v32  ;;  %v12896_v22 = vld [vmem:[%s14227_s8 + $0x9ec] sm:$0xf0]  ;;  %v8718_v25 = vor.u32 %v12640_v15, %v8717_v12 }
 0x4d9   : > { %v10253_v23 = vld [vmem:[%s14227_s8 + $0xdb0] sm:$0xf]  ;;  %v9742_v14 = vor.u32 %v12896_v22, %v9741_v37  ;;  %v7495_v22 = vpop.f32.mrf.mxu3 }
 0x4da   : > { %7732 = vmatpush.bf16.msra.mxu2 %v9934_v40  ;;  %7707 = vmatpush.bf16.msra.mxu0 %v8846_v55  ;;  %v13024_v47 = vld [vmem:[%s14227_s8 + $0xdec] sm:$0xf0] }
 0x4db   : > { %v8653_v27 = vld [vmem:[%s14227_s8 + $0x130] sm:$0xf]  ;;  %v10254_v31 = vor.u32 %v13024_v47, %v10253_v23 }
 0x4dc   : > { %7745 = vmatpush.bf16.msra.mxu3 %v10446_v48  ;;  %7720 = vmatpush.bf16.msra.mxu1 %v9358_v56  ;;  %v12624_v28 = vld [vmem:[%s14227_s8 + $0x16c] sm:$0xf0] }
 0x4dd   : > { %v9165_v29 = vld [vmem:[%s14227_s8 + $0x530] sm:$0xf]  ;;  %v8654_v50 = vor.u32 %v12624_v28, %v8653_v27 }
 0x4de   : > { %7733 = vmatpush.bf16.msra.mxu2 %v9870_v61  ;;  %7708 = vmatpush.bf16.msra.mxu0 %v8782_v7  ;;  %v12752_v32 = vld [vmem:[%s14227_s8 + $0x56c] sm:$0xf0] }
 0x4df   : > { %v9677_v40 = vld [vmem:[%s14227_s8 + $0x930] sm:$0xf]  ;;  %v9166_v54 = vor.u32 %v12752_v32, %v9165_v29 }
 0x4e0   : > { %7746 = vmatpush.bf16.msra.mxu3 %v10382_v63  ;;  %7721 = vmatpush.bf16.msra.mxu1 %v9294_v9  ;;  %v12880_v42 = vld [vmem:[%s14227_s8 + $0x96c] sm:$0xf0] }
 0x4e1   : > { %v10189_v48 = vld [vmem:[%s14227_s8 + $0xd30] sm:$0xf]  ;;  %v9678_v55 = vor.u32 %v12880_v42, %v9677_v40 }
 0x4e2   : > { %7734 = vmatpush.bf16.msra.mxu2 %v9806_v11  ;;  %v13008_v49 = vld [vmem:[%s14227_s8 + $0xd6c] sm:$0xf0]  ;;  %7709 = vmatpush.bf16.msra.mxu0 %v8718_v25 }
 0x4e3   : > { %v8589_v56 = vld [vmem:[%s14227_s8 + $0xb0] sm:$0xf]  ;;  %v10190_v62 = vor.u32 %v13008_v49, %v10189_v48 }
 0x4e4   : > { %7747 = vmatpush.bf16.msra.mxu3 %v10318_v33  ;;  %7722 = vmatpush.bf16.msra.mxu1 %v9230_v26  ;;  %v12608_v61 = vld [vmem:[%s14227_s8 + $0xec] sm:$0xf0] }
 0x4e5   : > { %v9101_v58 = vld [vmem:[%s14227_s8 + $0x4b0] sm:$0xf]  ;;  %v8590_v4 = vor.u32 %v12608_v61, %v8589_v56 }
 0x4e6   : > { %7735 = vmatpush.bf16.msra.mxu2 %v9742_v14  ;;  %v12736_v63 = vld [vmem:[%s14227_s8 + $0x4ec] sm:$0xf0]  ;;  %7710 = vmatpush.bf16.msra.mxu0 %v8654_v50 }
 0x4e7   : > { %v9613_v0 = vld [vmem:[%s14227_s8 + $0x8b0] sm:$0xf]  ;;  %v9102_v9 = vor.u32 %v12736_v63, %v9101_v58 }
 0x4e8   : > { %7748 = vmatpush.bf16.msra.mxu3 %v10254_v31  ;;  %v12864_v10 = vld [vmem:[%s14227_s8 + $0x8ec] sm:$0xf0]  ;;  %7723 = vmatpush.bf16.msra.mxu1 %v9166_v54 }
 0x4e9   : > { %v10125_v2 = vld [vmem:[%s14227_s8 + $0xcb0] sm:$0xf]  ;;  %v9614_v11 = vor.u32 %v12864_v10, %v9613_v0 }
 0x4ea   : > { %v12992_v3 = vld [vmem:[%s14227_s8 + $0xcec] sm:$0xf0]  ;;  %7736 = vmatpush.bf16.msra.mxu2 %v9678_v55  ;;  %7711 = vmatpush.bf16.msra.mxu0 %v8590_v4 }
 0x4eb   : > { %v8525_v7 = vld [vmem:[%s14227_s8 + $0x30] sm:$0xf]  ;;  %v10126_v18 = vor.u32 %v12992_v3, %v10125_v2 }
 0x4ec   : > { %v12592_v8 = vld [vmem:[%s14227_s8 + $0x6c] sm:$0xf0]  ;;  %7749 = vmatpush.bf16.msra.mxu3 %v10190_v62  ;;  %7724 = vmatpush.bf16.msra.mxu1 %v9102_v9 }
 0x4ed   : > { %v9037_v12 = vld [vmem:[%s14227_s8 + $0x430] sm:$0xf]  ;;  %v8526_v25 = vor.u32 %v12592_v8, %v8525_v7 }
 0x4ee   : > { %v12720_v15 = vld [vmem:[%s14227_s8 + $0x46c] sm:$0xf0]  ;;  %7737 = vmatpush.bf16.msra.mxu2 %v9614_v11 }
 0x4ef   : > { %v9549_v16 = vld [vmem:[%s14227_s8 + $0x830] sm:$0xf]  ;;  %v9038_v28 = vor.u32 %v12720_v15, %v9037_v12  ;;  %7712 = vmatpush.bf16.msra.mxu0 %v8526_v25  ;;  %v7506_v25 = vpop.f32.mrf.mxu0 }
 0x4f0   : > { %v12848_v33 = vld [vmem:[%s14227_s8 + $0x86c] sm:$0xf0]  ;;  %7750 = vmatpush.bf16.msra.mxu3 %v10126_v18 }
 0x4f1   : > { %v10061_v38 = vld [vmem:[%s14227_s8 + $0xc30] sm:$0xf]  ;;  %v9550_v29 = vor.u32 %v12848_v33, %v9549_v16  ;;  %7725 = vmatpush.bf16.msra.mxu1 %v9038_v28 }
 0x4f2   : > { %v12976_v37 = vld [vmem:[%s14227_s8 + $0xc6c] sm:$0xf0]  ;;  %7713 = vmatmul.bf16.vlgmr.msra.gmra.mxu0 %v14340_v6 }
 0x4f3   : > { %v11021_v23 = vld [vmem:[%s14227_s8 + $0x13b0] sm:$0xf]  ;;  %v10062_v32 = vor.u32 %v12976_v37, %v10061_v38  ;;  %7738 = vmatpush.bf16.msra.mxu2 %v9550_v29 }
 0x4f4   : > { %v13216_v47 = vld [vmem:[%s14227_s8 + $0x13ec] sm:$0xf0]  ;;  %7726 = vmatmul.bf16.vlgmr.msra.gmra.mxu1 %v14355_v20 }
 0x4f5   : > { %v11533_v24 = vld [vmem:[%s14227_s8 + $0x17b0] sm:$0xf]  ;;  %v11022_v40 = vor.u32 %v13216_v47, %v11021_v23  ;;  %7751 = vmatpush.bf16.msra.mxu3 %v10062_v32 }
 0x4f6   : > { %v13344_v26 = vld [vmem:[%s14227_s8 + $0x17ec] sm:$0xf0]  ;;  %7739 = vmatmul.bf16.vlgmr.msra.gmra.mxu2 %v14338_v5 }
 0x4f7   : > { %v12045_v14 = vld [vmem:[%s14227_s8 + $0x1bb0] sm:$0xf]  ;;  %v11534_v42 = vor.u32 %v13344_v26, %v11533_v24  ;;  %7757 = vmatpush.bf16.msrb.mxu0 %v11022_v40 }
 0x4f8   : > { %v13472_v27 = vld [vmem:[%s14227_s8 + $0x1bec] sm:$0xf0]  ;;  %7752 = vmatmul.bf16.vlgmr.msra.gmra.mxu3 %v14353_v19 }
 0x4f9   : > { %v12557_v30 = vld [vmem:[%s14227_s8 + $0x1fb0] sm:$0xf]  ;;  %v12046_v45 = vor.u32 %v13472_v27, %v12045_v14  ;;  %7770 = vmatpush.bf16.msrb.mxu1 %v11534_v42 }
 0x4fa   : > { %v13600_v31 = vld [vmem:[%s14227_s8 + $0x1fec] sm:$0xf0] }
 0x4fb   : > { %v10957_v46 = vld [vmem:[%s14227_s8 + $0x1330] sm:$0xf]  ;;  %v12558_v50 = vor.u32 %v13600_v31, %v12557_v30  ;;  %7783 = vmatpush.bf16.msrb.mxu2 %v12046_v45  ;;  %v7519_v30 = vpop.f32.mrf.mxu1 }
 0x4fc   : > { %v13200_v48 = vld [vmem:[%s14227_s8 + $0x136c] sm:$0xf0]  ;;  %v7520_v45 = vadd.f32 %v7519_v30, %v7506_v25 }
 0x4fd   : > { %v11469_v49 = vld [vmem:[%s14227_s8 + $0x1730] sm:$0xf]  ;;  %v10958_v58 = vor.u32 %v13200_v48, %v10957_v46  ;;  %7796 = vmatpush.bf16.msrb.mxu3 %v12558_v50 }
 0x4fe   : > { %v13328_v53 = vld [vmem:[%s14227_s8 + $0x176c] sm:$0xf0] }
 0x4ff   : > { %v11981_v54 = vld [vmem:[%s14227_s8 + $0x1b30] sm:$0xf]  ;;  %v11470_v60 = vor.u32 %v13328_v53, %v11469_v49  ;;  %7758 = vmatpush.bf16.msrb.mxu0 %v10958_v58 }
 0x500   : > { %v13456_v55 = vld [vmem:[%s14227_s8 + $0x1b6c] sm:$0xf0] }
 0x501   : > { %v12493_v56 = vld [vmem:[%s14227_s8 + $0x1f30] sm:$0xf]  ;;  %v11982_v62 = vor.u32 %v13456_v55, %v11981_v54  ;;  %7771 = vmatpush.bf16.msrb.mxu1 %v11470_v60 }
 0x502   : > { %v13584_v61 = vld [vmem:[%s14227_s8 + $0x1f6c] sm:$0xf0] }
 0x503   : > { %v10893_v63 = vld [vmem:[%s14227_s8 + $0x12b0] sm:$0xf]  ;;  %v12494_v2 = vor.u32 %v13584_v61, %v12493_v56  ;;  %7784 = vmatpush.bf16.msrb.mxu2 %v11982_v62  ;;  %v7532_v61 = vpop.f32.mrf.mxu2 }
 0x504   : > { %v13184_v0 = vld [vmem:[%s14227_s8 + $0x12ec] sm:$0xf0] }
 0x505   : > { %v11405_v10 = vld [vmem:[%s14227_s8 + $0x16b0] sm:$0xf]  ;;  %v10894_v11 = vor.u32 %v13184_v0, %v10893_v63  ;;  %7797 = vmatpush.bf16.msrb.mxu3 %v12494_v2  ;;  %v7533_v0 = vadd.f32 %v7532_v61, %v7520_v45 }
 0x506   : > { %v13312_v3 = vld [vmem:[%s14227_s8 + $0x16ec] sm:$0xf0] }
 0x507   : > { %v11917_v4 = vld [vmem:[%s14227_s8 + $0x1ab0] sm:$0xf]  ;;  %v11406_v12 = vor.u32 %v13312_v3, %v11405_v10  ;;  %7759 = vmatpush.bf16.msrb.mxu0 %v10894_v11  ;;  %v7545_v10 = vpop.f32.mrf.mxu3 }
 0x508   : > { %v13440_v7 = vld [vmem:[%s14227_s8 + $0x1aec] sm:$0xf0] }
 0x509   : > { %v12429_v8 = vld [vmem:[%s14227_s8 + $0x1eb0] sm:$0xf]  ;;  %v11918_v15 = vor.u32 %v13440_v7, %v11917_v4  ;;  %7772 = vmatpush.bf16.msrb.mxu1 %v11406_v12  ;;  %v16069_v7 = vadd.f32 %v7545_v10, %v7533_v0 }
 0x50a   : > { %v13568_v9 = vld [vmem:[%s14227_s8 + $0x1eec] sm:$0xf0] }
 0x50b   : > { %v10829_v16 = vld [vmem:[%s14227_s8 + $0x1230] sm:$0xf]  ;;  %v12430_v33 = vor.u32 %v13568_v9, %v12429_v8  ;;  %7785 = vmatpush.bf16.msrb.mxu2 %v11918_v15  ;;  %v7508_v8 = vpop.f32.mrf.mxu0  ;;  %v7534_v30 = vpop.f32.mrf.mxu2 }
 0x50c   : > { %v13168_v17 = vld [vmem:[%s14227_s8 + $0x126c] sm:$0xf0]  ;;  %v12648_v30 = vld [vmem:[%s14227_s8 + $0x234] sm:$0xf] }
 0x50d   : > { %v11341_v18 = vld [vmem:[%s14227_s8 + $0x1630] sm:$0xf]  ;;  %v10830_v24 = vor.u32 %v13168_v17, %v10829_v16  ;;  %7798 = vmatpush.bf16.msrb.mxu3 %v12430_v33  ;;  %v7521_v17 = vpop.f32.mrf.mxu1 }
 0x50e   : > { %v13296_v38 = vld [vmem:[%s14227_s8 + $0x166c] sm:$0xf0] }
 0x50f   : > { %v11853_v37 = vld [vmem:[%s14227_s8 + $0x1a30] sm:$0xf]  ;;  %v11342_v26 = vor.u32 %v13296_v38, %v11341_v18  ;;  %7760 = vmatpush.bf16.msrb.mxu0 %v10830_v24  ;;  %v7547_v45 = vpop.f32.mrf.mxu3 }
 0x510   : > { %v13424_v22 = vld [vmem:[%s14227_s8 + $0x1a6c] sm:$0xf0]  ;;  %v12904_v45 = vld [vmem:[%s14227_s8 + $0xa34] sm:$0xf] }
 0x511   : > { %v12365_v23 = vld [vmem:[%s14227_s8 + $0x1e30] sm:$0xf]  ;;  %v11854_v14 = vor.u32 %v13424_v22, %v11853_v37  ;;  %7773 = vmatpush.bf16.msrb.mxu1 %v11342_v26 }
 0x512   : > { %v13552_v47 = vld [vmem:[%s14227_s8 + $0x1e6c] sm:$0xf0] }
 0x513   : > { %v10765_v27 = vld [vmem:[%s14227_s8 + $0x11b0] sm:$0xf]  ;;  %v12366_v31 = vor.u32 %v13552_v47, %v12365_v23  ;;  %7786 = vmatpush.bf16.msrb.mxu2 %v11854_v14 }
 0x514   : > { %v13152_v28 = vld [vmem:[%s14227_s8 + $0x11ec] sm:$0xf0] }
 0x515   : > { %v11277_v29 = vld [vmem:[%s14227_s8 + $0x15b0] sm:$0xf]  ;;  %v10766_v49 = vor.u32 %v13152_v28, %v10765_v27  ;;  %7799 = vmatpush.bf16.msrb.mxu3 %v12366_v31 }
 0x516   : > { %v13280_v32 = vld [vmem:[%s14227_s8 + $0x15ec] sm:$0xf0] }
 0x517   : > { %v11789_v40 = vld [vmem:[%s14227_s8 + $0x19b0] sm:$0xf]  ;;  %v11278_v50 = vor.u32 %v13280_v32, %v11277_v29  ;;  %7761 = vmatpush.bf16.msrb.mxu0 %v10766_v49  ;;  %v12824_v49 = vld [vmem:[%s14227_s8 + $0x7b4] sm:$0xf] }
 0x518   : > { %v13408_v42 = vld [vmem:[%s14227_s8 + $0x19ec] sm:$0xf0] }
 0x519   : > { %v12301_v46 = vld [vmem:[%s14227_s8 + $0x1db0] sm:$0xf]  ;;  %v11790_v53 = vor.u32 %v13408_v42, %v11789_v40  ;;  %7774 = vmatpush.bf16.msrb.mxu1 %v11278_v50 }
 0x51a   : > { %v13536_v48 = vld [vmem:[%s14227_s8 + $0x1dec] sm:$0xf0] }
 0x51b   : > { %v10701_v54 = vld [vmem:[%s14227_s8 + $0x1130] sm:$0xf]  ;;  %v12302_v58 = vor.u32 %v13536_v48, %v12301_v46  ;;  %7787 = vmatpush.bf16.msrb.mxu2 %v11790_v53  ;;  %v12696_v46 = vld [vmem:[%s14227_s8 + $0x3b4] sm:$0xf] }
 0x51c   : > { %v13136_v55 = vld [vmem:[%s14227_s8 + $0x116c] sm:$0xf0]  ;;  %v8975_v48 = vld [vmem:[%s14227_s8 + $0x3f0] sm:$0xf0] }
 0x51d   : > { %v11213_v56 = vld [vmem:[%s14227_s8 + $0x1530] sm:$0xf]  ;;  %v10702_v4 = vor.u32 %v13136_v55, %v10701_v54  ;;  %7800 = vmatpush.bf16.msrb.mxu3 %v12302_v58  ;;  %v9487_v53 = vld [vmem:[%s14227_s8 + $0x7f0] sm:$0xf0] }
 0x51e   : > { %v13264_v60 = vld [vmem:[%s14227_s8 + $0x156c] sm:$0xf0]  ;;  %v12952_v54 = vld [vmem:[%s14227_s8 + $0xbb4] sm:$0xf]  ;;  %v9490_v0 = vor.u32 %v12824_v49, %v9487_v53  ;;  %v7558_v53 = vpop.f32.mrf.mxu0 }
 0x51f   : > { %v11725_v62 = vld [vmem:[%s14227_s8 + $0x1930] sm:$0xf]  ;;  %v11214_v9 = vor.u32 %v13264_v60, %v11213_v56  ;;  %7762 = vmatpush.bf16.msrb.mxu0 %v10702_v4  ;;  %v9999_v55 = vld [vmem:[%s14227_s8 + $0xbf0] sm:$0xf0] }
 0x520   : > { %v13392_v63 = vld [vmem:[%s14227_s8 + $0x196c] sm:$0xf0]  ;;  %v13080_v58 = vld [vmem:[%s14227_s8 + $0xfb4] sm:$0xf]  ;;  %v10002_v10 = vor.u32 %v12952_v54, %v9999_v55 }
 0x521   : > { %v12237_v2 = vld [vmem:[%s14227_s8 + $0x1d30] sm:$0xf]  ;;  %v11726_v11 = vor.u32 %v13392_v63, %v11725_v62  ;;  %7775 = vmatpush.bf16.msrb.mxu1 %v11214_v9  ;;  %v10511_v60 = vld [vmem:[%s14227_s8 + $0xff0] sm:$0xf0]  ;;  %v8978_v63 = vor.u32 %v12696_v46, %v8975_v48 }
 0x522   : > { %v13520_v3 = vld [vmem:[%s14227_s8 + $0x1d6c] sm:$0xf0]  ;;  %v12808_v4 = vld [vmem:[%s14227_s8 + $0x734] sm:$0xf]  ;;  %v10514_v8 = vor.u32 %v13080_v58, %v10511_v60  ;;  %v7559_v60 = vadd.f32 %v7558_v53, %v16069_v7 }
 0x523   : > { %v10637_v12 = vld [vmem:[%s14227_s8 + $0x10b0] sm:$0xf]  ;;  %v12238_v18 = vor.u32 %v13520_v3, %v12237_v2  ;;  %7788 = vmatpush.bf16.msrb.mxu2 %v11726_v11  ;;  %v12680_v2 = vld [vmem:[%s14227_s8 + $0x334] sm:$0xf] }
 0x524   : > { %v13120_v15 = vld [vmem:[%s14227_s8 + $0x10ec] sm:$0xf0]  ;;  %v8911_v3 = vld [vmem:[%s14227_s8 + $0x370] sm:$0xf0] }
 0x525   : > { %v11149_v16 = vld [vmem:[%s14227_s8 + $0x14b0] sm:$0xf]  ;;  %v10638_v47 = vor.u32 %v13120_v15, %v10637_v12  ;;  %7801 = vmatpush.bf16.msrb.mxu3 %v12238_v18  ;;  %v9423_v9 = vld [vmem:[%s14227_s8 + $0x770] sm:$0xf0]  ;;  %v8914_v17 = vor.u32 %v12680_v2, %v8911_v3 }
 0x526   : > { %v13248_v33 = vld [vmem:[%s14227_s8 + $0x14ec] sm:$0xf0]  ;;  %v12936_v11 = vld [vmem:[%s14227_s8 + $0xb34] sm:$0xf]  ;;  %v9426_v18 = vor.u32 %v12808_v4, %v9423_v9 }
 0x527   : > { %v11661_v38 = vld [vmem:[%s14227_s8 + $0x18b0] sm:$0xf]  ;;  %v11150_v26 = vor.u32 %v13248_v33, %v11149_v16  ;;  %7763 = vmatpush.bf16.msrb.mxu0 %v10638_v47  ;;  %v9935_v12 = vld [vmem:[%s14227_s8 + $0xb70] sm:$0xf0] }
 0x528   : > { %v13376_v37 = vld [vmem:[%s14227_s8 + $0x18ec] sm:$0xf0]  ;;  %v13064_v15 = vld [vmem:[%s14227_s8 + $0xf34] sm:$0xf]  ;;  %v9938_v33 = vor.u32 %v12936_v11, %v9935_v12 }
 0x529   : > { %v12173_v22 = vld [vmem:[%s14227_s8 + $0x1cb0] sm:$0xf]  ;;  %v11662_v14 = vor.u32 %v13376_v37, %v11661_v38  ;;  %7776 = vmatpush.bf16.msrb.mxu1 %v11150_v26  ;;  %v10447_v16 = vld [vmem:[%s14227_s8 + $0xf70] sm:$0xf0] }
 0x52a   : > { %v13504_v23 = vld [vmem:[%s14227_s8 + $0x1cec] sm:$0xf0]  ;;  %v12664_v38 = vld [vmem:[%s14227_s8 + $0x2b4] sm:$0xf] }
 0x52b   : > { %v10573_v24 = vld [vmem:[%s14227_s8 + $0x1030] sm:$0xf]  ;;  %v12174_v31 = vor.u32 %v13504_v23, %v12173_v22  ;;  %7789 = vmatpush.bf16.msrb.mxu2 %v11662_v14  ;;  %v8847_v37 = vld [vmem:[%s14227_s8 + $0x2f0] sm:$0xf0]  ;;  %v10450_v23 = vor.u32 %v13064_v15, %v10447_v16 }
 0x52c   : > { %v13104_v25 = vld [vmem:[%s14227_s8 + $0x106c] sm:$0xf0]  ;;  %v12792_v22 = vld [vmem:[%s14227_s8 + $0x6b4] sm:$0xf] }
 0x52d   : > { %v11085_v27 = vld [vmem:[%s14227_s8 + $0x1430] sm:$0xf]  ;;  %v10574_v50 = vor.u32 %v13104_v25, %v10573_v24  ;;  %7802 = vmatpush.bf16.msrb.mxu3 %v12174_v31  ;;  %v9359_v47 = vld [vmem:[%s14227_s8 + $0x6f0] sm:$0xf0] }
 0x52e   : > { %v13232_v28 = vld [vmem:[%s14227_s8 + $0x146c] sm:$0xf0]  ;;  %v12920_v24 = vld [vmem:[%s14227_s8 + $0xab4] sm:$0xf] }
 0x52f   : > { %v11597_v29 = vld [vmem:[%s14227_s8 + $0x1830] sm:$0xf]  ;;  %v11086_v56 = vor.u32 %v13232_v28, %v11085_v27  ;;  %7764 = vmatpush.bf16.msrb.mxu0 %v10574_v50  ;;  %v9871_v25 = vld [vmem:[%s14227_s8 + $0xaf0] sm:$0xf0]  ;;  %v8850_v27 = vor.u32 %v12664_v38, %v8847_v37  ;;  %v9362_v28 = vor.u32 %v12792_v22, %v9359_v47 }
 0x530   : > { %v13360_v32 = vld [vmem:[%s14227_s8 + $0x186c] sm:$0xf0]  ;;  %v13048_v26 = vld [vmem:[%s14227_s8 + $0xeb4] sm:$0xf] }
 0x531   : > { %v12109_v40 = vld [vmem:[%s14227_s8 + $0x1c30] sm:$0xf]  ;;  %v11598_v61 = vor.u32 %v13360_v32, %v11597_v29  ;;  %7777 = vmatpush.bf16.msrb.mxu1 %v11086_v56  ;;  %v10383_v14 = vld [vmem:[%s14227_s8 + $0xef0] sm:$0xf0]  ;;  %v9874_v29 = vor.u32 %v12920_v24, %v9871_v25 }
 0x532   : > { %v13488_v42 = vld [vmem:[%s14227_s8 + $0x1c6c] sm:$0xf0]  ;;  %7765 = vmatmul.bf16.vlgmr.msrb.gmra.mxu0 %v14413_v59  ;;  %v8783_v31 = vld [vmem:[%s14227_s8 + $0x270] sm:$0xf0] }
 0x533   : > { %v12110_v62 = vor.u32 %v13488_v42, %v12109_v40  ;;  %7790 = vmatpush.bf16.msrb.mxu2 %v11598_v61  ;;  %7809 = vmatpush.bf16.msra.mxu0 %v8978_v63  ;;  %v12776_v32 = vld [vmem:[%s14227_s8 + $0x634] sm:$0xf]  ;;  %v10386_v40 = vor.u32 %v13048_v26, %v10383_v14  ;;  %v8786_v50 = vor.u32 %v12648_v30, %v8783_v31  ;;  %v7560_v14 = vpop.f32.mrf.mxu0 }
 0x534   : > { %7778 = vmatmul.bf16.vlgmr.msrb.gmra.mxu1 %v14417_v41  ;;  %v9295_v42 = vld [vmem:[%s14227_s8 + $0x670] sm:$0xf0] }
 0x535   : > { %7803 = vmatpush.bf16.msrb.mxu3 %v12110_v62  ;;  %7822 = vmatpush.bf16.msra.mxu1 %v9490_v0  ;;  %v9807_v46 = vld [vmem:[%s14227_s8 + $0xa70] sm:$0xf0]  ;;  %v9298_v54 = vor.u32 %v12776_v32, %v9295_v42  ;;  %v7571_v62 = vpop.f32.mrf.mxu1 }
 0x536   : > { %7791 = vmatmul.bf16.vlgmr.msrb.gmra.mxu2 %v14409_v36  ;;  %v13032_v48 = vld [vmem:[%s14227_s8 + $0xe34] sm:$0xf]  ;;  %v9810_v55 = vor.u32 %v12904_v45, %v9807_v46 }
 0x537   : > { %7835 = vmatpush.bf16.msra.mxu2 %v10002_v10  ;;  %7810 = vmatpush.bf16.msra.mxu0 %v8914_v17  ;;  %v10319_v49 = vld [vmem:[%s14227_s8 + $0xe70] sm:$0xf0]  ;;  %v7584_v17 = vpop.f32.mrf.mxu2 }
 0x538   : > { %7804 = vmatmul.bf16.vlgmr.msrb.gmra.mxu3 %v14415_v39  ;;  %v12632_v56 = vld [vmem:[%s14227_s8 + $0x1b4] sm:$0xf]  ;;  %v10322_v63 = vor.u32 %v13032_v48, %v10319_v49 }
 0x539   : > { %7848 = vmatpush.bf16.msra.mxu3 %v10514_v8  ;;  %7823 = vmatpush.bf16.msra.mxu1 %v9426_v18  ;;  %v8719_v61 = vld [vmem:[%s14227_s8 + $0x1f0] sm:$0xf0]  ;;  %v7572_v8 = vadd.f32 %v7571_v62, %v7559_v60 }
 0x53a   : > { %v12760_v58 = vld [vmem:[%s14227_s8 + $0x5b4] sm:$0xf]  ;;  %v8722_v9 = vor.u32 %v12632_v56, %v8719_v61 }
 0x53b   : > { %7836 = vmatpush.bf16.msra.mxu2 %v9938_v33  ;;  %7811 = vmatpush.bf16.msra.mxu0 %v8850_v27  ;;  %v9231_v0 = vld [vmem:[%s14227_s8 + $0x5f0] sm:$0xf0]  ;;  %v7585_v22 = vadd.f32 %v7584_v17, %v7572_v8 }
 0x53c   : > { %v12888_v10 = vld [vmem:[%s14227_s8 + $0x9b4] sm:$0xf]  ;;  %v9234_v7 = vor.u32 %v12760_v58, %v9231_v0 }
 0x53d   : > { %7849 = vmatpush.bf16.msra.mxu3 %v10450_v23  ;;  %7824 = vmatpush.bf16.msra.mxu1 %v9362_v28  ;;  %v9743_v2 = vld [vmem:[%s14227_s8 + $0x9f0] sm:$0xf0]  ;;  %v7597_v23 = vpop.f32.mrf.mxu3  ;;  %v7573_v32 = vpop.f32.mrf.mxu1 }
 0x53e   : > { %v13016_v3 = vld [vmem:[%s14227_s8 + $0xdb4] sm:$0xf]  ;;  %v9746_v11 = vor.u32 %v12888_v10, %v9743_v2  ;;  %v16140_v26 = vadd.f32 %v7597_v23, %v7585_v22 }
 0x53f   : > { %7837 = vmatpush.bf16.msra.mxu2 %v9874_v29  ;;  %v10255_v4 = vld [vmem:[%s14227_s8 + $0xdf0] sm:$0xf0]  ;;  %7812 = vmatpush.bf16.msra.mxu0 %v8786_v50  ;;  %v7586_v62 = vpop.f32.mrf.mxu2 }
 0x540   : > { %v12616_v12 = vld [vmem:[%s14227_s8 + $0x134] sm:$0xf]  ;;  %v10258_v18 = vor.u32 %v13016_v3, %v10255_v4 }
 0x541   : > { %7850 = vmatpush.bf16.msra.mxu3 %v10386_v40  ;;  %7825 = vmatpush.bf16.msra.mxu1 %v9298_v54  ;;  %v8655_v15 = vld [vmem:[%s14227_s8 + $0x170] sm:$0xf0] }
 0x542   : > { %v12744_v16 = vld [vmem:[%s14227_s8 + $0x534] sm:$0xf]  ;;  %v8658_v25 = vor.u32 %v12616_v12, %v8655_v15 }
 0x543   : > { %7838 = vmatpush.bf16.msra.mxu2 %v9810_v55  ;;  %v9167_v33 = vld [vmem:[%s14227_s8 + $0x570] sm:$0xf0]  ;;  %7813 = vmatpush.bf16.msra.mxu0 %v8722_v9 }
 0x544   : > { %v12872_v38 = vld [vmem:[%s14227_s8 + $0x934] sm:$0xf]  ;;  %v9170_v27 = vor.u32 %v12744_v16, %v9167_v33 }
 0x545   : > { %7851 = vmatpush.bf16.msra.mxu3 %v10322_v63  ;;  %v9679_v37 = vld [vmem:[%s14227_s8 + $0x970] sm:$0xf0]  ;;  %7826 = vmatpush.bf16.msra.mxu1 %v9234_v7  ;;  %v7599_v3 = vpop.f32.mrf.mxu3 }
 0x546   : > { %v13000_v47 = vld [vmem:[%s14227_s8 + $0xd34] sm:$0xf]  ;;  %v9682_v28 = vor.u32 %v12872_v38, %v9679_v37 }
 0x547   : > { %v10191_v24 = vld [vmem:[%s14227_s8 + $0xd70] sm:$0xf0]  ;;  %7839 = vmatpush.bf16.msra.mxu2 %v9746_v11  ;;  %7814 = vmatpush.bf16.msra.mxu0 %v8658_v25 }
 0x548   : > { %v12600_v29 = vld [vmem:[%s14227_s8 + $0xb4] sm:$0xf]  ;;  %v10194_v40 = vor.u32 %v13000_v47, %v10191_v24 }
 0x549   : > { %v8591_v30 = vld [vmem:[%s14227_s8 + $0xf0] sm:$0xf0]  ;;  %7852 = vmatpush.bf16.msra.mxu3 %v10258_v18  ;;  %7827 = vmatpush.bf16.msra.mxu1 %v9170_v27 }
 0x54a   : > { %v12728_v31 = vld [vmem:[%s14227_s8 + $0x4b4] sm:$0xf]  ;;  %v8594_v50 = vor.u32 %v12600_v29, %v8591_v30 }
 0x54b   : > { %v9103_v42 = vld [vmem:[%s14227_s8 + $0x4f0] sm:$0xf0]  ;;  %7840 = vmatpush.bf16.msra.mxu2 %v9682_v28 }
 0x54c   : > { %v12856_v45 = vld [vmem:[%s14227_s8 + $0x8b4] sm:$0xf]  ;;  %v9106_v55 = vor.u32 %v12728_v31, %v9103_v42  ;;  %7815 = vmatpush.bf16.msra.mxu0 %v8594_v50 }
 0x54d   : > { %v9615_v46 = vld [vmem:[%s14227_s8 + $0x8f0] sm:$0xf0]  ;;  %7853 = vmatpush.bf16.msra.mxu3 %v10194_v40 }
 0x54e   : > { %v12984_v48 = vld [vmem:[%s14227_s8 + $0xcb4] sm:$0xf]  ;;  %v9618_v56 = vor.u32 %v12856_v45, %v9615_v46  ;;  %7828 = vmatpush.bf16.msra.mxu1 %v9106_v55 }
 0x54f   : > { %v10127_v49 = vld [vmem:[%s14227_s8 + $0xcf0] sm:$0xf0] }
 0x550   : > { %v12584_v53 = vld [vmem:[%s14227_s8 + $0x34] sm:$0xf]  ;;  %v10130_v63 = vor.u32 %v12984_v48, %v10127_v49  ;;  %7841 = vmatpush.bf16.msra.mxu2 %v9618_v56 }
 0x551   : > { %v8527_v54 = vld [vmem:[%s14227_s8 + $0x70] sm:$0xf0] }
 0x552   : > { %v12712_v61 = vld [vmem:[%s14227_s8 + $0x434] sm:$0xf]  ;;  %v8530_v7 = vor.u32 %v12584_v53, %v8527_v54  ;;  %7854 = vmatpush.bf16.msra.mxu3 %v10130_v63 }
 0x553   : > { %v9039_v58 = vld [vmem:[%s14227_s8 + $0x470] sm:$0xf0] }
 0x554   : > { %v12840_v60 = vld [vmem:[%s14227_s8 + $0x834] sm:$0xf]  ;;  %v9042_v16 = vor.u32 %v12712_v61, %v9039_v58  ;;  %7816 = vmatpush.bf16.msra.mxu0 %v8530_v7 }
 0x555   : > { %v9551_v0 = vld [vmem:[%s14227_s8 + $0x870] sm:$0xf0] }
 0x556   : > { %v12968_v10 = vld [vmem:[%s14227_s8 + $0xc34] sm:$0xf]  ;;  %v9554_v17 = vor.u32 %v12840_v60, %v9551_v0  ;;  %7829 = vmatpush.bf16.msra.mxu1 %v9042_v16 }
 0x557   : > { %v10063_v2 = vld [vmem:[%s14227_s8 + $0xc70] sm:$0xf0]  ;;  %7817 = vmatmul.bf16.vlgmr.msra.gmra.mxu0 %v14340_v6 }
 0x558   : > { %v13208_v4 = vld [vmem:[%s14227_s8 + $0x13b4] sm:$0xf]  ;;  %v10066_v38 = vor.u32 %v12968_v10, %v10063_v2  ;;  %7842 = vmatpush.bf16.msra.mxu2 %v9554_v17 }
 0x559   : > { %v11023_v8 = vld [vmem:[%s14227_s8 + $0x13f0] sm:$0xf0]  ;;  %7830 = vmatmul.bf16.vlgmr.msra.gmra.mxu1 %v14355_v20 }
 0x55a   : > { %v13336_v9 = vld [vmem:[%s14227_s8 + $0x17b4] sm:$0xf]  ;;  %v11026_v37 = vor.u32 %v13208_v4, %v11023_v8  ;;  %7855 = vmatpush.bf16.msra.mxu3 %v10066_v38 }
 0x55b   : > { %v11535_v11 = vld [vmem:[%s14227_s8 + $0x17f0] sm:$0xf0]  ;;  %7843 = vmatmul.bf16.vlgmr.msra.gmra.mxu2 %v14338_v5 }
 0x55c   : > { %v13464_v12 = vld [vmem:[%s14227_s8 + $0x1bb4] sm:$0xf]  ;;  %v11538_v22 = vor.u32 %v13336_v9, %v11535_v11  ;;  %7861 = vmatpush.bf16.msrb.mxu0 %v11026_v37  ;;  %v7610_v11 = vpop.f32.mrf.mxu0 }
 0x55d   : > { %v12047_v15 = vld [vmem:[%s14227_s8 + $0x1bf0] sm:$0xf0]  ;;  %7856 = vmatmul.bf16.vlgmr.msra.gmra.mxu3 %v14353_v19 }
 0x55e   : > { %v13592_v18 = vld [vmem:[%s14227_s8 + $0x1fb4] sm:$0xf]  ;;  %v12050_v23 = vor.u32 %v13464_v12, %v12047_v15  ;;  %7874 = vmatpush.bf16.msrb.mxu1 %v11538_v22 }
 0x55f   : > { %v12559_v33 = vld [vmem:[%s14227_s8 + $0x1ff0] sm:$0xf0] }
 0x560   : > { %v13192_v47 = vld [vmem:[%s14227_s8 + $0x1334] sm:$0xf]  ;;  %v12562_v14 = vor.u32 %v13592_v18, %v12559_v33  ;;  %7887 = vmatpush.bf16.msrb.mxu2 %v12050_v23  ;;  %v7623_v33 = vpop.f32.mrf.mxu1 }
 0x561   : > { %v10959_v24 = vld [vmem:[%s14227_s8 + $0x1370] sm:$0xf0] }
 0x562   : > { %v13320_v25 = vld [vmem:[%s14227_s8 + $0x1734] sm:$0xf]  ;;  %v10962_v32 = vor.u32 %v13192_v47, %v10959_v24  ;;  %7900 = vmatpush.bf16.msrb.mxu3 %v12562_v14  ;;  %v7624_v47 = vadd.f32 %v7623_v33, %v7610_v11 }
 0x563   : > { %v11471_v27 = vld [vmem:[%s14227_s8 + $0x1770] sm:$0xf0] }
 0x564   : > { %v13448_v28 = vld [vmem:[%s14227_s8 + $0x1b34] sm:$0xf]  ;;  %v11474_v40 = vor.u32 %v13320_v25, %v11471_v27  ;;  %7862 = vmatpush.bf16.msrb.mxu0 %v10962_v32  ;;  %v7636_v32 = vpop.f32.mrf.mxu2 }
 0x565   : > { %v11983_v29 = vld [vmem:[%s14227_s8 + $0x1b70] sm:$0xf0] }
 0x566   : > { %v13576_v30 = vld [vmem:[%s14227_s8 + $0x1f34] sm:$0xf]  ;;  %v11986_v42 = vor.u32 %v13448_v28, %v11983_v29  ;;  %7875 = vmatpush.bf16.msrb.mxu1 %v11474_v40 }
 0x567   : > { %v12495_v31 = vld [vmem:[%s14227_s8 + $0x1f70] sm:$0xf0] }
 0x568   : > { %v13176_v45 = vld [vmem:[%s14227_s8 + $0x12b4] sm:$0xf]  ;;  %v12498_v49 = vor.u32 %v13576_v30, %v12495_v31  ;;  %7888 = vmatpush.bf16.msrb.mxu2 %v11986_v42 }
 0x569   : > { %v10895_v46 = vld [vmem:[%s14227_s8 + $0x12f0] sm:$0xf0] }
 0x56a   : > { %v13304_v48 = vld [vmem:[%s14227_s8 + $0x16b4] sm:$0xf]  ;;  %v10898_v61 = vor.u32 %v13176_v45, %v10895_v46  ;;  %7901 = vmatpush.bf16.msrb.mxu3 %v12498_v49  ;;  %v7649_v49 = vpop.f32.mrf.mxu3 }
 0x56b   : > { %v11407_v50 = vld [vmem:[%s14227_s8 + $0x16f0] sm:$0xf0] }
 0x56c   : > { %v13432_v53 = vld [vmem:[%s14227_s8 + $0x1ab4] sm:$0xf]  ;;  %v11410_v58 = vor.u32 %v13304_v48, %v11407_v50  ;;  %7863 = vmatpush.bf16.msrb.mxu0 %v10898_v61  ;;  %v7637_v48 = vadd.f32 %v7636_v32, %v7624_v47 }
 0x56d   : > { %v11919_v54 = vld [vmem:[%s14227_s8 + $0x1af0] sm:$0xf0] }
 0x56e   : > { %v13560_v55 = vld [vmem:[%s14227_s8 + $0x1eb4] sm:$0xf]  ;;  %v11922_v60 = vor.u32 %v13432_v53, %v11919_v54  ;;  %7876 = vmatpush.bf16.msrb.mxu1 %v11410_v58 }
 0x56f   : > { %v12431_v56 = vld [vmem:[%s14227_s8 + $0x1ef0] sm:$0xf0] }
 0x570   : > { %v13160_v62 = vld [vmem:[%s14227_s8 + $0x1234] sm:$0xf]  ;;  %v12434_v10 = vor.u32 %v13560_v55, %v12431_v56  ;;  %7889 = vmatpush.bf16.msrb.mxu2 %v11922_v60  ;;  %v16210_v55 = vadd.f32 %v7649_v49, %v7637_v48  ;;  %v7612_v56 = vpop.f32.mrf.mxu0 }
 0x571   : > { %v10831_v63 = vld [vmem:[%s14227_s8 + $0x1270] sm:$0xf0]  ;;  %v9429_v56 = vld [vmem:[%s14227_s8 + $0x738] sm:$0xf] }
 0x572   : > { %v13288_v0 = vld [vmem:[%s14227_s8 + $0x1634] sm:$0xf]  ;;  %v10834_v7 = vor.u32 %v13160_v62, %v10831_v63  ;;  %7902 = vmatpush.bf16.msrb.mxu3 %v12434_v10 }
 0x573   : > { %v11343_v2 = vld [vmem:[%s14227_s8 + $0x1670] sm:$0xf0] }
 0x574   : > { %v13416_v3 = vld [vmem:[%s14227_s8 + $0x1a34] sm:$0xf]  ;;  %v11346_v12 = vor.u32 %v13288_v0, %v11343_v2  ;;  %7864 = vmatpush.bf16.msrb.mxu0 %v10834_v7  ;;  %v7625_v0 = vpop.f32.mrf.mxu1 }
 0x575   : > { %v11855_v4 = vld [vmem:[%s14227_s8 + $0x1a70] sm:$0xf0]  ;;  %v13073_v0 = vld [vmem:[%s14227_s8 + $0xf74] sm:$0xf0] }
 0x576   : > { %v13544_v8 = vld [vmem:[%s14227_s8 + $0x1e34] sm:$0xf]  ;;  %v11858_v15 = vor.u32 %v13416_v3, %v11855_v4  ;;  %7877 = vmatpush.bf16.msrb.mxu1 %v11346_v12 }
 0x577   : > { %v12367_v9 = vld [vmem:[%s14227_s8 + $0x1e70] sm:$0xf0] }
 0x578   : > { %v13144_v16 = vld [vmem:[%s14227_s8 + $0x11b4] sm:$0xf]  ;;  %v12370_v38 = vor.u32 %v13544_v8, %v12367_v9  ;;  %7890 = vmatpush.bf16.msrb.mxu2 %v11858_v15 }
 0x579   : > { %v10767_v17 = vld [vmem:[%s14227_s8 + $0x11f0] sm:$0xf0] }
 0x57a   : > { %v13272_v18 = vld [vmem:[%s14227_s8 + $0x15b4] sm:$0xf]  ;;  %v10770_v14 = vor.u32 %v13144_v16, %v10767_v17  ;;  %7903 = vmatpush.bf16.msrb.mxu3 %v12370_v38  ;;  %v7638_v38 = vpop.f32.mrf.mxu2 }
 0x57b   : > { %v11279_v37 = vld [vmem:[%s14227_s8 + $0x15f0] sm:$0xf0] }
 0x57c   : > { %v13400_v22 = vld [vmem:[%s14227_s8 + $0x19b4] sm:$0xf]  ;;  %v11282_v27 = vor.u32 %v13272_v18, %v11279_v37  ;;  %7865 = vmatpush.bf16.msrb.mxu0 %v10770_v14  ;;  %v12705_v14 = vld [vmem:[%s14227_s8 + $0x3f4] sm:$0xf0] }
 0x57d   : > { %v11791_v23 = vld [vmem:[%s14227_s8 + $0x19f0] sm:$0xf0] }
 0x57e   : > { %v13528_v24 = vld [vmem:[%s14227_s8 + $0x1db4] sm:$0xf]  ;;  %v11794_v28 = vor.u32 %v13400_v22, %v11791_v23  ;;  %7878 = vmatpush.bf16.msrb.mxu1 %v11282_v27  ;;  %v9493_v27 = vld [vmem:[%s14227_s8 + $0x7b8] sm:$0xf] }
 0x57f   : > { %v12303_v25 = vld [vmem:[%s14227_s8 + $0x1df0] sm:$0xf0] }
 0x580   : > { %v13128_v29 = vld [vmem:[%s14227_s8 + $0x1134] sm:$0xf]  ;;  %v12306_v40 = vor.u32 %v13528_v24, %v12303_v25  ;;  %7891 = vmatpush.bf16.msrb.mxu2 %v11794_v28  ;;  %v7651_v24 = vpop.f32.mrf.mxu3  ;;  %v8981_v25 = vld [vmem:[%s14227_s8 + $0x3b8] sm:$0xf] }
 0x581   : > { %v10703_v30 = vld [vmem:[%s14227_s8 + $0x1170] sm:$0xf0]  ;;  %v8982_v48 = vor.u32 %v12705_v14, %v8981_v25  ;;  %v12785_v24 = vld [vmem:[%s14227_s8 + $0x674] sm:$0xf0] }
 0x582   : > { %v13256_v31 = vld [vmem:[%s14227_s8 + $0x1534] sm:$0xf]  ;;  %v10706_v54 = vor.u32 %v13128_v29, %v10703_v30  ;;  %7904 = vmatpush.bf16.msrb.mxu3 %v12306_v40  ;;  %v12833_v29 = vld [vmem:[%s14227_s8 + $0x7f4] sm:$0xf0] }
 0x583   : > { %v11215_v42 = vld [vmem:[%s14227_s8 + $0x1570] sm:$0xf0]  ;;  %v10005_v30 = vld [vmem:[%s14227_s8 + $0xbb8] sm:$0xf]  ;;  %v9494_v49 = vor.u32 %v12833_v29, %v9493_v27 }
 0x584   : > { %v13384_v45 = vld [vmem:[%s14227_s8 + $0x1934] sm:$0xf]  ;;  %v11218_v61 = vor.u32 %v13256_v31, %v11215_v42  ;;  %7866 = vmatpush.bf16.msrb.mxu0 %v10706_v54  ;;  %v12961_v31 = vld [vmem:[%s14227_s8 + $0xbf4] sm:$0xf0] }
 0x585   : > { %v11727_v46 = vld [vmem:[%s14227_s8 + $0x1970] sm:$0xf0]  ;;  %v10517_v42 = vld [vmem:[%s14227_s8 + $0xfb8] sm:$0xf] }
 0x586   : > { %v13512_v50 = vld [vmem:[%s14227_s8 + $0x1d34] sm:$0xf]  ;;  %v11730_v58 = vor.u32 %v13384_v45, %v11727_v46  ;;  %7879 = vmatpush.bf16.msrb.mxu1 %v11218_v61  ;;  %v13089_v45 = vld [vmem:[%s14227_s8 + $0xff4] sm:$0xf0] }
 0x587   : > { %v12239_v53 = vld [vmem:[%s14227_s8 + $0x1d70] sm:$0xf0]  ;;  %v12689_v54 = vld [vmem:[%s14227_s8 + $0x374] sm:$0xf0]  ;;  %v10518_v61 = vor.u32 %v13089_v45, %v10517_v42 }
 0x588   : > { %v13112_v60 = vld [vmem:[%s14227_s8 + $0x10b4] sm:$0xf]  ;;  %v12242_v10 = vor.u32 %v13512_v50, %v12239_v53  ;;  %7892 = vmatpush.bf16.msrb.mxu2 %v11730_v58  ;;  %v10006_v50 = vor.u32 %v12961_v31, %v10005_v30  ;;  %v8917_v53 = vld [vmem:[%s14227_s8 + $0x338] sm:$0xf]  ;;  %v7662_v30 = vpop.f32.mrf.mxu0 }
 0x589   : > { %v10639_v62 = vld [vmem:[%s14227_s8 + $0x10f0] sm:$0xf0]  ;;  %v12817_v58 = vld [vmem:[%s14227_s8 + $0x774] sm:$0xf0] }
 0x58a   : > { %v13240_v63 = vld [vmem:[%s14227_s8 + $0x14b4] sm:$0xf]  ;;  %v10642_v7 = vor.u32 %v13112_v60, %v10639_v62  ;;  %7905 = vmatpush.bf16.msrb.mxu3 %v12242_v10  ;;  %v9941_v60 = vld [vmem:[%s14227_s8 + $0xb38] sm:$0xf]  ;;  %v8918_v10 = vor.u32 %v12689_v54, %v8917_v53 }
 0x58b   : > { %v11151_v2 = vld [vmem:[%s14227_s8 + $0x14f0] sm:$0xf0]  ;;  %v12945_v62 = vld [vmem:[%s14227_s8 + $0xb74] sm:$0xf0] }
 0x58c   : > { %v13368_v3 = vld [vmem:[%s14227_s8 + $0x18b4] sm:$0xf]  ;;  %v11154_v15 = vor.u32 %v13240_v63, %v11151_v2  ;;  %7867 = vmatpush.bf16.msrb.mxu0 %v10642_v7  ;;  %v10453_v63 = vld [vmem:[%s14227_s8 + $0xf38] sm:$0xf]  ;;  %v9430_v2 = vor.u32 %v12817_v58, %v9429_v56 }
 0x58d   : > { %v11663_v4 = vld [vmem:[%s14227_s8 + $0x18f0] sm:$0xf0]  ;;  %v10454_v7 = vor.u32 %v13073_v0, %v10453_v63  ;;  %v9813_v25 = vld [vmem:[%s14227_s8 + $0xa38] sm:$0xf] }
 0x58e   : > { %v13496_v8 = vld [vmem:[%s14227_s8 + $0x1cb4] sm:$0xf]  ;;  %v11666_v16 = vor.u32 %v13368_v3, %v11663_v4  ;;  %7880 = vmatpush.bf16.msrb.mxu1 %v11154_v15  ;;  %v9942_v3 = vor.u32 %v12945_v62, %v9941_v60  ;;  %v8853_v4 = vld [vmem:[%s14227_s8 + $0x2b8] sm:$0xf] }
 0x58f   : > { %v12175_v9 = vld [vmem:[%s14227_s8 + $0x1cf0] sm:$0xf0]  ;;  %v12929_v15 = vld [vmem:[%s14227_s8 + $0xaf4] sm:$0xf0] }
 0x590   : > { %v13096_v11 = vld [vmem:[%s14227_s8 + $0x1034] sm:$0xf]  ;;  %v12178_v37 = vor.u32 %v13496_v8, %v12175_v9  ;;  %7893 = vmatpush.bf16.msrb.mxu2 %v11666_v16  ;;  %v12673_v8 = vld [vmem:[%s14227_s8 + $0x2f4] sm:$0xf0] }
 0x591   : > { %v10575_v12 = vld [vmem:[%s14227_s8 + $0x1070] sm:$0xf0]  ;;  %v9365_v9 = vld [vmem:[%s14227_s8 + $0x6b8] sm:$0xf] }
 0x592   : > { %v13224_v17 = vld [vmem:[%s14227_s8 + $0x1434] sm:$0xf]  ;;  %v10578_v28 = vor.u32 %v13096_v11, %v10575_v12  ;;  %7906 = vmatpush.bf16.msrb.mxu3 %v12178_v37  ;;  %v12801_v11 = vld [vmem:[%s14227_s8 + $0x6f4] sm:$0xf0] }
 0x593   : > { %v11087_v18 = vld [vmem:[%s14227_s8 + $0x1470] sm:$0xf0]  ;;  %v9877_v12 = vld [vmem:[%s14227_s8 + $0xab8] sm:$0xf] }
 0x594   : > { %v13352_v33 = vld [vmem:[%s14227_s8 + $0x1834] sm:$0xf]  ;;  %v11090_v32 = vor.u32 %v13224_v17, %v11087_v18  ;;  %7868 = vmatpush.bf16.msrb.mxu0 %v10578_v28  ;;  %v10389_v16 = vld [vmem:[%s14227_s8 + $0xeb8] sm:$0xf]  ;;  %v8854_v18 = vor.u32 %v12673_v8, %v8853_v4  ;;  %v9878_v38 = vor.u32 %v12929_v15, %v9877_v12 }
 0x595   : > { %v11599_v22 = vld [vmem:[%s14227_s8 + $0x1870] sm:$0xf0]  ;;  %v13057_v17 = vld [vmem:[%s14227_s8 + $0xef4] sm:$0xf0] }
 0x596   : > { %v13480_v23 = vld [vmem:[%s14227_s8 + $0x1c34] sm:$0xf]  ;;  %v11602_v40 = vor.u32 %v13352_v33, %v11599_v22  ;;  %7881 = vmatpush.bf16.msrb.mxu1 %v11090_v32  ;;  %v9366_v33 = vor.u32 %v12801_v11, %v9365_v9  ;;  %v8789_v37 = vld [vmem:[%s14227_s8 + $0x238] sm:$0xf]  ;;  %v7701_v11 = vpop.f32.mrf.mxu3 }
 0x597   : > { %v12111_v47 = vld [vmem:[%s14227_s8 + $0x1c70] sm:$0xf0]  ;;  %7869 = vmatmul.bf16.vlgmr.msrb.gmra.mxu0 %v14413_v59  ;;  %v12657_v22 = vld [vmem:[%s14227_s8 + $0x274] sm:$0xf0] }
 0x598   : > { %v12114_v46 = vor.u32 %v13480_v23, %v12111_v47  ;;  %7894 = vmatpush.bf16.msrb.mxu2 %v11602_v40  ;;  %7913 = vmatpush.bf16.msra.mxu0 %v8982_v48  ;;  %v9301_v23 = vld [vmem:[%s14227_s8 + $0x638] sm:$0xf]  ;;  %v10390_v47 = vor.u32 %v13057_v17, %v10389_v16  ;;  %v8790_v29 = vor.u32 %v12657_v22, %v8789_v37  ;;  %v7675_v48 = vpop.f32.mrf.mxu1 }
 0x599   : > { %7882 = vmatmul.bf16.vlgmr.msrb.gmra.mxu1 %v14417_v41  ;;  %v12913_v14 = vld [vmem:[%s14227_s8 + $0xa74] sm:$0xf0]  ;;  %v9302_v31 = vor.u32 %v12785_v24, %v9301_v23 }
 0x59a   : > { %7907 = vmatpush.bf16.msrb.mxu3 %v12114_v46  ;;  %7926 = vmatpush.bf16.msra.mxu1 %v9494_v49  ;;  %v10325_v27 = vld [vmem:[%s14227_s8 + $0xe38] sm:$0xf]  ;;  %v9814_v32 = vor.u32 %v12913_v14, %v9813_v25  ;;  %v7663_v46 = vadd.f32 %v7662_v30, %v16210_v55 }
 0x59b   : > { %7895 = vmatmul.bf16.vlgmr.msrb.gmra.mxu2 %v14409_v36  ;;  %v13041_v28 = vld [vmem:[%s14227_s8 + $0xe74] sm:$0xf0] }
 0x59c   : > { %7939 = vmatpush.bf16.msra.mxu2 %v10006_v50  ;;  %7914 = vmatpush.bf16.msra.mxu0 %v8918_v10  ;;  %v8725_v40 = vld [vmem:[%s14227_s8 + $0x1b8] sm:$0xf]  ;;  %v10326_v49 = vor.u32 %v13041_v28, %v10325_v27  ;;  %v7676_v58 = vadd.f32 %v7675_v48, %v7663_v46 }
 0x59d   : > { %7908 = vmatmul.bf16.vlgmr.msrb.gmra.mxu3 %v14415_v39  ;;  %v12641_v42 = vld [vmem:[%s14227_s8 + $0x1f4] sm:$0xf0] }
 0x59e   : > { %7952 = vmatpush.bf16.msra.mxu3 %v10518_v61  ;;  %7927 = vmatpush.bf16.msra.mxu1 %v9430_v2  ;;  %v9237_v45 = vld [vmem:[%s14227_s8 + $0x5b8] sm:$0xf]  ;;  %v8726_v60 = vor.u32 %v12641_v42, %v8725_v40  ;;  %v7688_v2 = vpop.f32.mrf.mxu2 }
 0x59f   : > { %v12769_v50 = vld [vmem:[%s14227_s8 + $0x5f4] sm:$0xf0] }
 0x5a0   : > { %7940 = vmatpush.bf16.msra.mxu2 %v9942_v3  ;;  %7915 = vmatpush.bf16.msra.mxu0 %v8854_v18  ;;  %v9749_v53 = vld [vmem:[%s14227_s8 + $0x9b8] sm:$0xf]  ;;  %v9238_v55 = vor.u32 %v12769_v50, %v9237_v45  ;;  %v7664_v18 = vpop.f32.mrf.mxu0 }
 0x5a1   : > { %v12897_v54 = vld [vmem:[%s14227_s8 + $0x9f4] sm:$0xf0] }
 0x5a2   : > { %7953 = vmatpush.bf16.msra.mxu3 %v10454_v7  ;;  %7928 = vmatpush.bf16.msra.mxu1 %v9366_v33  ;;  %v10261_v56 = vld [vmem:[%s14227_s8 + $0xdb8] sm:$0xf]  ;;  %v9750_v62 = vor.u32 %v12897_v54, %v9749_v53  ;;  %v7689_v7 = vadd.f32 %v7688_v2, %v7676_v58 }
 0x5a3   : > { %v13025_v61 = vld [vmem:[%s14227_s8 + $0xdf4] sm:$0xf0] }
 0x5a4   : > { %7941 = vmatpush.bf16.msra.mxu2 %v9878_v38  ;;  %7916 = vmatpush.bf16.msra.mxu0 %v8790_v29  ;;  %v8661_v63 = vld [vmem:[%s14227_s8 + $0x138] sm:$0xf]  ;;  %v10262_v3 = vor.u32 %v13025_v61, %v10261_v56  ;;  %v16281_v17 = vadd.f32 %v7701_v11, %v7689_v7  ;;  %v7703_v61 = vpop.f32.mrf.mxu3 }
 0x5a5   : > { %v12625_v0 = vld [vmem:[%s14227_s8 + $0x174] sm:$0xf0] }
 0x5a6   : > { %7954 = vmatpush.bf16.msra.mxu3 %v10390_v47  ;;  %7929 = vmatpush.bf16.msra.mxu1 %v9302_v31  ;;  %v9173_v10 = vld [vmem:[%s14227_s8 + $0x538] sm:$0xf]  ;;  %v8662_v16 = vor.u32 %v12625_v0, %v8661_v63  ;;  %v7677_v47 = vpop.f32.mrf.mxu1 }
 0x5a7   : > { %v12753_v4 = vld [vmem:[%s14227_s8 + $0x574] sm:$0xf0] }
 0x5a8   : > { %7942 = vmatpush.bf16.msra.mxu2 %v9814_v32  ;;  %v9685_v8 = vld [vmem:[%s14227_s8 + $0x938] sm:$0xf]  ;;  %7917 = vmatpush.bf16.msra.mxu0 %v8726_v60  ;;  %v9174_v33 = vor.u32 %v12753_v4, %v9173_v10 }
 0x5a9   : > { %v12881_v9 = vld [vmem:[%s14227_s8 + $0x974] sm:$0xf0] }
 0x5aa   : > { %7955 = vmatpush.bf16.msra.mxu3 %v10326_v49  ;;  %v10197_v12 = vld [vmem:[%s14227_s8 + $0xd38] sm:$0xf]  ;;  %7930 = vmatpush.bf16.msra.mxu1 %v9238_v55  ;;  %v9686_v38 = vor.u32 %v12881_v9, %v9685_v8  ;;  %v7690_v49 = vpop.f32.mrf.mxu2 }
 0x5ab   : > { %v13009_v15 = vld [vmem:[%s14227_s8 + $0xd74] sm:$0xf0] }
 0x5ac   : > { %7943 = vmatpush.bf16.msra.mxu2 %v9750_v62  ;;  %v8597_v37 = vld [vmem:[%s14227_s8 + $0xb8] sm:$0xf]  ;;  %v10198_v24 = vor.u32 %v13009_v15, %v10197_v12  ;;  %7918 = vmatpush.bf16.msra.mxu0 %v8662_v16 }
 0x5ad   : > { %v12609_v22 = vld [vmem:[%s14227_s8 + $0xf4] sm:$0xf0] }
 0x5ae   : > { %v9109_v23 = vld [vmem:[%s14227_s8 + $0x4b8] sm:$0xf]  ;;  %7956 = vmatpush.bf16.msra.mxu3 %v10262_v3  ;;  %v8598_v30 = vor.u32 %v12609_v22, %v8597_v37  ;;  %7931 = vmatpush.bf16.msra.mxu1 %v9174_v33 }
 0x5af   : > { %v12737_v25 = vld [vmem:[%s14227_s8 + $0x4f4] sm:$0xf0] }
 0x5b0   : > { %v9621_v14 = vld [vmem:[%s14227_s8 + $0x8b8] sm:$0xf]  ;;  %7944 = vmatpush.bf16.msra.mxu2 %v9686_v38  ;;  %v9110_v40 = vor.u32 %v12737_v25, %v9109_v23  ;;  %7919 = vmatpush.bf16.msra.mxu0 %v8598_v30 }
 0x5b1   : > { %v12865_v27 = vld [vmem:[%s14227_s8 + $0x8f4] sm:$0xf0] }
 0x5b2   : > { %v10133_v28 = vld [vmem:[%s14227_s8 + $0xcb8] sm:$0xf]  ;;  %v9622_v42 = vor.u32 %v12865_v27, %v9621_v14  ;;  %7957 = vmatpush.bf16.msra.mxu3 %v10198_v24  ;;  %7932 = vmatpush.bf16.msra.mxu1 %v9110_v40 }
 0x5b3   : > { %v12993_v29 = vld [vmem:[%s14227_s8 + $0xcf4] sm:$0xf0] }
 0x5b4   : > { %v8533_v31 = vld [vmem:[%s14227_s8 + $0x38] sm:$0xf]  ;;  %v10134_v50 = vor.u32 %v12993_v29, %v10133_v28  ;;  %7945 = vmatpush.bf16.msra.mxu2 %v9622_v42 }
 0x5b5   : > { %v12593_v32 = vld [vmem:[%s14227_s8 + $0x74] sm:$0xf0] }
 0x5b6   : > { %v9045_v45 = vld [vmem:[%s14227_s8 + $0x438] sm:$0xf]  ;;  %v8534_v62 = vor.u32 %v12593_v32, %v8533_v31  ;;  %7958 = vmatpush.bf16.msra.mxu3 %v10134_v50 }
 0x5b7   : > { %v12721_v46 = vld [vmem:[%s14227_s8 + $0x474] sm:$0xf0] }
 0x5b8   : > { %v9557_v48 = vld [vmem:[%s14227_s8 + $0x838] sm:$0xf]  ;;  %v9046_v2 = vor.u32 %v12721_v46, %v9045_v45  ;;  %7920 = vmatpush.bf16.msra.mxu0 %v8534_v62 }
 0x5b9   : > { %v12849_v53 = vld [vmem:[%s14227_s8 + $0x874] sm:$0xf0] }
 0x5ba   : > { %v10069_v54 = vld [vmem:[%s14227_s8 + $0xc38] sm:$0xf]  ;;  %v9558_v3 = vor.u32 %v12849_v53, %v9557_v48  ;;  %7933 = vmatpush.bf16.msra.mxu1 %v9046_v2 }
 0x5bb   : > { %v12977_v56 = vld [vmem:[%s14227_s8 + $0xc74] sm:$0xf0]  ;;  %7921 = vmatmul.bf16.vlgmr.msra.gmra.mxu0 %v14340_v6 }
 0x5bc   : > { %v11029_v58 = vld [vmem:[%s14227_s8 + $0x13b8] sm:$0xf]  ;;  %v10070_v9 = vor.u32 %v12977_v56, %v10069_v54  ;;  %7946 = vmatpush.bf16.msra.mxu2 %v9558_v3 }
 0x5bd   : > { %v13217_v60 = vld [vmem:[%s14227_s8 + $0x13f4] sm:$0xf0]  ;;  %7934 = vmatmul.bf16.vlgmr.msra.gmra.mxu1 %v14355_v20 }
 0x5be   : > { %v11541_v55 = vld [vmem:[%s14227_s8 + $0x17b8] sm:$0xf]  ;;  %v11030_v7 = vor.u32 %v13217_v60, %v11029_v58  ;;  %7959 = vmatpush.bf16.msra.mxu3 %v10070_v9  ;;  %v7727_v9 = vpop.f32.mrf.mxu1 }
 0x5bf   : > { %v13345_v63 = vld [vmem:[%s14227_s8 + $0x17f4] sm:$0xf0]  ;;  %7947 = vmatmul.bf16.vlgmr.msra.gmra.mxu2 %v14338_v5 }
 0x5c0   : > { %v12053_v0 = vld [vmem:[%s14227_s8 + $0x1bb8] sm:$0xf]  ;;  %v11542_v11 = vor.u32 %v13345_v63, %v11541_v55  ;;  %7965 = vmatpush.bf16.msrb.mxu0 %v11030_v7 }
 0x5c1   : > { %v13473_v10 = vld [vmem:[%s14227_s8 + $0x1bf4] sm:$0xf0]  ;;  %7960 = vmatmul.bf16.vlgmr.msra.gmra.mxu3 %v14353_v19 }
 0x5c2   : > { %v12565_v4 = vld [vmem:[%s14227_s8 + $0x1fb8] sm:$0xf]  ;;  %v12054_v12 = vor.u32 %v13473_v10, %v12053_v0  ;;  %7978 = vmatpush.bf16.msrb.mxu1 %v11542_v11  ;;  %v7714_v0 = vpop.f32.mrf.mxu0 }
 0x5c3   : > { %v13601_v8 = vld [vmem:[%s14227_s8 + $0x1ff4] sm:$0xf0] }
 0x5c4   : > { %v10965_v15 = vld [vmem:[%s14227_s8 + $0x1338] sm:$0xf]  ;;  %v12566_v33 = vor.u32 %v13601_v8, %v12565_v4  ;;  %7991 = vmatpush.bf16.msrb.mxu2 %v12054_v12 }
 0x5c5   : > { %v13201_v16 = vld [vmem:[%s14227_s8 + $0x1374] sm:$0xf0] }
 0x5c6   : > { %v11477_v18 = vld [vmem:[%s14227_s8 + $0x1738] sm:$0xf]  ;;  %v10966_v24 = vor.u32 %v13201_v16, %v10965_v15  ;;  %8004 = vmatpush.bf16.msrb.mxu3 %v12566_v33  ;;  %v7728_v16 = vadd.f32 %v7727_v9, %v7714_v0 }
 0x5c7   : > { %v13329_v38 = vld [vmem:[%s14227_s8 + $0x1774] sm:$0xf0] }
 0x5c8   : > { %v11989_v37 = vld [vmem:[%s14227_s8 + $0x1b38] sm:$0xf]  ;;  %v11478_v25 = vor.u32 %v13329_v38, %v11477_v18  ;;  %7966 = vmatpush.bf16.msrb.mxu0 %v10966_v24 }
 0x5c9   : > { %v13457_v22 = vld [vmem:[%s14227_s8 + $0x1b74] sm:$0xf0] }
 0x5ca   : > { %v12501_v23 = vld [vmem:[%s14227_s8 + $0x1f38] sm:$0xf]  ;;  %v11990_v14 = vor.u32 %v13457_v22, %v11989_v37  ;;  %7979 = vmatpush.bf16.msrb.mxu1 %v11478_v25  ;;  %v7740_v25 = vpop.f32.mrf.mxu2 }
 0x5cb   : > { %v13585_v47 = vld [vmem:[%s14227_s8 + $0x1f74] sm:$0xf0] }
 0x5cc   : > { %v10901_v27 = vld [vmem:[%s14227_s8 + $0x12b8] sm:$0xf]  ;;  %v12502_v30 = vor.u32 %v13585_v47, %v12501_v23  ;;  %7992 = vmatpush.bf16.msrb.mxu2 %v11990_v14 }
 0x5cd   : > { %v13185_v28 = vld [vmem:[%s14227_s8 + $0x12f4] sm:$0xf0] }
 0x5ce   : > { %v11413_v29 = vld [vmem:[%s14227_s8 + $0x16b8] sm:$0xf]  ;;  %v10902_v46 = vor.u32 %v13185_v28, %v10901_v27  ;;  %8005 = vmatpush.bf16.msrb.mxu3 %v12502_v30  ;;  %v7741_v30 = vadd.f32 %v7740_v25, %v7728_v16  ;;  %v10007_v25 = vld [vmem:[%s14227_s8 + $0xbf8] sm:$0xf0] }
 0x5cf   : > { %v13313_v31 = vld [vmem:[%s14227_s8 + $0x16f4] sm:$0xf0] }
 0x5d0   : > { %v11925_v32 = vld [vmem:[%s14227_s8 + $0x1ab8] sm:$0xf]  ;;  %v11414_v48 = vor.u32 %v13313_v31, %v11413_v29  ;;  %7967 = vmatpush.bf16.msrb.mxu0 %v10902_v46  ;;  %v7753_v31 = vpop.f32.mrf.mxu3  ;;  %v7716_v46 = vpop.f32.mrf.mxu0 }
 0x5d1   : > { %v13441_v40 = vld [vmem:[%s14227_s8 + $0x1af4] sm:$0xf0]  ;;  %v8919_v46 = vld [vmem:[%s14227_s8 + $0x378] sm:$0xf0] }
 0x5d2   : > { %v12437_v42 = vld [vmem:[%s14227_s8 + $0x1eb8] sm:$0xf]  ;;  %v11926_v49 = vor.u32 %v13441_v40, %v11925_v32  ;;  %7980 = vmatpush.bf16.msrb.mxu1 %v11414_v48 }
 0x5d3   : > { %v13569_v45 = vld [vmem:[%s14227_s8 + $0x1ef4] sm:$0xf0] }
 0x5d4   : > { %v10837_v50 = vld [vmem:[%s14227_s8 + $0x1238] sm:$0xf]  ;;  %v12438_v56 = vor.u32 %v13569_v45, %v12437_v42  ;;  %7993 = vmatpush.bf16.msrb.mxu2 %v11926_v49  ;;  %v16351_v45 = vadd.f32 %v7753_v31, %v7741_v30 }
 0x5d5   : > { %v13169_v53 = vld [vmem:[%s14227_s8 + $0x1274] sm:$0xf0] }
 0x5d6   : > { %v11349_v54 = vld [vmem:[%s14227_s8 + $0x1638] sm:$0xf]  ;;  %v10838_v63 = vor.u32 %v13169_v53, %v10837_v50  ;;  %8006 = vmatpush.bf16.msrb.mxu3 %v12438_v56  ;;  %v7729_v56 = vpop.f32.mrf.mxu1 }
 0x5d7   : > { %v13297_v61 = vld [vmem:[%s14227_s8 + $0x1674] sm:$0xf0]  ;;  %v13065_v56 = vld [vmem:[%s14227_s8 + $0xf3c] sm:$0xf] }
 0x5d8   : > { %v11861_v58 = vld [vmem:[%s14227_s8 + $0x1a38] sm:$0xf]  ;;  %v11350_v10 = vor.u32 %v13297_v61, %v11349_v54  ;;  %7968 = vmatpush.bf16.msrb.mxu0 %v10838_v63 }
 0x5d9   : > { %v13425_v60 = vld [vmem:[%s14227_s8 + $0x1a74] sm:$0xf0] }
 0x5da   : > { %v12373_v55 = vld [vmem:[%s14227_s8 + $0x1e38] sm:$0xf]  ;;  %v11862_v2 = vor.u32 %v13425_v60, %v11861_v58  ;;  %7981 = vmatpush.bf16.msrb.mxu1 %v11350_v10 }
 0x5db   : > { %v13553_v62 = vld [vmem:[%s14227_s8 + $0x1e74] sm:$0xf0] }
 0x5dc   : > { %v10773_v3 = vld [vmem:[%s14227_s8 + $0x11b8] sm:$0xf]  ;;  %v12374_v7 = vor.u32 %v13553_v62, %v12373_v55  ;;  %7994 = vmatpush.bf16.msrb.mxu2 %v11862_v2 }
 0x5dd   : > { %v13153_v4 = vld [vmem:[%s14227_s8 + $0x11f4] sm:$0xf0] }
 0x5de   : > { %v11285_v8 = vld [vmem:[%s14227_s8 + $0x15b8] sm:$0xf]  ;;  %v10774_v38 = vor.u32 %v13153_v4, %v10773_v3  ;;  %8007 = vmatpush.bf16.msrb.mxu3 %v12374_v7 }
 0x5df   : > { %v13281_v11 = vld [vmem:[%s14227_s8 + $0x15f4] sm:$0xf0] }
 0x5e0   : > { %v11797_v12 = vld [vmem:[%s14227_s8 + $0x19b8] sm:$0xf]  ;;  %v11286_v37 = vor.u32 %v13281_v11, %v11285_v8  ;;  %7969 = vmatpush.bf16.msrb.mxu0 %v10774_v38  ;;  %v7742_v11 = vpop.f32.mrf.mxu2  ;;  %v12697_v38 = vld [vmem:[%s14227_s8 + $0x3bc] sm:$0xf] }
 0x5e1   : > { %v13409_v15 = vld [vmem:[%s14227_s8 + $0x19f4] sm:$0xf0] }
 0x5e2   : > { %v12309_v18 = vld [vmem:[%s14227_s8 + $0x1db8] sm:$0xf]  ;;  %v11798_v22 = vor.u32 %v13409_v15, %v11797_v12  ;;  %7982 = vmatpush.bf16.msrb.mxu1 %v11286_v37  ;;  %v8983_v37 = vld [vmem:[%s14227_s8 + $0x3f8] sm:$0xf0] }
 0x5e3   : > { %v13537_v33 = vld [vmem:[%s14227_s8 + $0x1df4] sm:$0xf0]  ;;  %v8986_v31 = vor.u32 %v12697_v38, %v8983_v37  ;;  %v9303_v38 = vld [vmem:[%s14227_s8 + $0x678] sm:$0xf0] }
 0x5e4   : > { %v10709_v23 = vld [vmem:[%s14227_s8 + $0x1138] sm:$0xf]  ;;  %v12310_v14 = vor.u32 %v13537_v33, %v12309_v18  ;;  %7995 = vmatpush.bf16.msrb.mxu2 %v11798_v22  ;;  %v7755_v33 = vpop.f32.mrf.mxu3  ;;  %v12825_v22 = vld [vmem:[%s14227_s8 + $0x7bc] sm:$0xf] }
 0x5e5   : > { %v13137_v47 = vld [vmem:[%s14227_s8 + $0x1174] sm:$0xf0]  ;;  %v12905_v37 = vld [vmem:[%s14227_s8 + $0xa3c] sm:$0xf] }
 0x5e6   : > { %v11221_v24 = vld [vmem:[%s14227_s8 + $0x1538] sm:$0xf]  ;;  %v10710_v42 = vor.u32 %v13137_v47, %v10709_v23  ;;  %8008 = vmatpush.bf16.msrb.mxu3 %v12310_v14  ;;  %v9495_v47 = vld [vmem:[%s14227_s8 + $0x7f8] sm:$0xf0] }
 0x5e7   : > { %v13265_v27 = vld [vmem:[%s14227_s8 + $0x1574] sm:$0xf0] }
 0x5e8   : > { %v11733_v28 = vld [vmem:[%s14227_s8 + $0x1938] sm:$0xf]  ;;  %v11222_v48 = vor.u32 %v13265_v27, %v11221_v24  ;;  %7970 = vmatpush.bf16.msrb.mxu0 %v10710_v42  ;;  %v12953_v24 = vld [vmem:[%s14227_s8 + $0xbbc] sm:$0xf] }
 0x5e9   : > { %v13393_v29 = vld [vmem:[%s14227_s8 + $0x1974] sm:$0xf0]  ;;  %v12681_v42 = vld [vmem:[%s14227_s8 + $0x33c] sm:$0xf] }
 0x5ea   : > { %v12245_v32 = vld [vmem:[%s14227_s8 + $0x1d38] sm:$0xf]  ;;  %v11734_v49 = vor.u32 %v13393_v29, %v11733_v28  ;;  %7983 = vmatpush.bf16.msrb.mxu1 %v11222_v48  ;;  %v13081_v28 = vld [vmem:[%s14227_s8 + $0xfbc] sm:$0xf] }
 0x5eb   : > { %v13521_v40 = vld [vmem:[%s14227_s8 + $0x1d74] sm:$0xf0]  ;;  %v10519_v29 = vld [vmem:[%s14227_s8 + $0xff8] sm:$0xf0] }
 0x5ec   : > { %v10645_v50 = vld [vmem:[%s14227_s8 + $0x10b8] sm:$0xf]  ;;  %v12246_v61 = vor.u32 %v13521_v40, %v12245_v32  ;;  %7996 = vmatpush.bf16.msrb.mxu2 %v11734_v49  ;;  %v9498_v32 = vor.u32 %v12825_v22, %v9495_v47  ;;  %v10010_v40 = vor.u32 %v12953_v24, %v10007_v25  ;;  %v12809_v48 = vld [vmem:[%s14227_s8 + $0x73c] sm:$0xf]  ;;  %v10522_v49 = vor.u32 %v13081_v28, %v10519_v29  ;;  %v7766_v25 = vpop.f32.mrf.mxu0 }
 0x5ed   : > { %v13121_v53 = vld [vmem:[%s14227_s8 + $0x10f4] sm:$0xf0]  ;;  %v9815_v22 = vld [vmem:[%s14227_s8 + $0xa78] sm:$0xf0] }
 0x5ee   : > { %v11157_v54 = vld [vmem:[%s14227_s8 + $0x14b8] sm:$0xf]  ;;  %v10646_v0 = vor.u32 %v13121_v53, %v10645_v50  ;;  %8009 = vmatpush.bf16.msrb.mxu3 %v12246_v61  ;;  %v9431_v50 = vld [vmem:[%s14227_s8 + $0x778] sm:$0xf0] }
 0x5ef   : > { %v13249_v58 = vld [vmem:[%s14227_s8 + $0x14f4] sm:$0xf0]  ;;  %v12937_v53 = vld [vmem:[%s14227_s8 + $0xb3c] sm:$0xf] }
 0x5f0   : > { %v11669_v60 = vld [vmem:[%s14227_s8 + $0x18b8] sm:$0xf]  ;;  %v11158_v3 = vor.u32 %v13249_v58, %v11157_v54  ;;  %7971 = vmatpush.bf16.msrb.mxu0 %v10646_v0  ;;  %v9943_v54 = vld [vmem:[%s14227_s8 + $0xb78] sm:$0xf0]  ;;  %v8922_v58 = vor.u32 %v12681_v42, %v8919_v46 }
 0x5f1   : > { %v13377_v55 = vld [vmem:[%s14227_s8 + $0x18f4] sm:$0xf0]  ;;  %v10455_v61 = vld [vmem:[%s14227_s8 + $0xf78] sm:$0xf0] }
 0x5f2   : > { %v12181_v62 = vld [vmem:[%s14227_s8 + $0x1cb8] sm:$0xf]  ;;  %v11670_v4 = vor.u32 %v13377_v55, %v11669_v60  ;;  %7984 = vmatpush.bf16.msrb.mxu1 %v11158_v3  ;;  %v9434_v60 = vor.u32 %v12809_v48, %v9431_v50  ;;  %v9946_v55 = vor.u32 %v12937_v53, %v9943_v54  ;;  %v12793_v0 = vld [vmem:[%s14227_s8 + $0x6bc] sm:$0xf] }
 0x5f3   : > { %v13505_v63 = vld [vmem:[%s14227_s8 + $0x1cf4] sm:$0xf0]  ;;  %v12921_v3 = vld [vmem:[%s14227_s8 + $0xabc] sm:$0xf] }
 0x5f4   : > { %v10581_v10 = vld [vmem:[%s14227_s8 + $0x1038] sm:$0xf]  ;;  %v12182_v12 = vor.u32 %v13505_v63, %v12181_v62  ;;  %7997 = vmatpush.bf16.msrb.mxu2 %v11670_v4  ;;  %v12665_v62 = vld [vmem:[%s14227_s8 + $0x2bc] sm:$0xf] }
 0x5f5   : > { %v13105_v2 = vld [vmem:[%s14227_s8 + $0x1074] sm:$0xf0]  ;;  %v8855_v63 = vld [vmem:[%s14227_s8 + $0x2f8] sm:$0xf0] }
 0x5f6   : > { %v11093_v8 = vld [vmem:[%s14227_s8 + $0x1438] sm:$0xf]  ;;  %v10582_v23 = vor.u32 %v13105_v2, %v10581_v10  ;;  %8010 = vmatpush.bf16.msrb.mxu3 %v12182_v12  ;;  %v10458_v10 = vor.u32 %v13065_v56, %v10455_v61  ;;  %v9367_v2 = vld [vmem:[%s14227_s8 + $0x6f8] sm:$0xf0] }
 0x5f7   : > { %v13233_v9 = vld [vmem:[%s14227_s8 + $0x1474] sm:$0xf0]  ;;  %v9879_v4 = vld [vmem:[%s14227_s8 + $0xaf8] sm:$0xf0]  ;;  %v9370_v11 = vor.u32 %v12793_v0, %v9367_v2 }
 0x5f8   : > { %v11605_v7 = vld [vmem:[%s14227_s8 + $0x1838] sm:$0xf]  ;;  %v11094_v14 = vor.u32 %v13233_v9, %v11093_v8  ;;  %7972 = vmatpush.bf16.msrb.mxu0 %v10582_v23  ;;  %v13049_v8 = vld [vmem:[%s14227_s8 + $0xebc] sm:$0xf]  ;;  %v9882_v12 = vor.u32 %v12921_v3, %v9879_v4  ;;  %v7805_v3 = vpop.f32.mrf.mxu3 }
 0x5f9   : > { %v13361_v15 = vld [vmem:[%s14227_s8 + $0x1874] sm:$0xf0]  ;;  %v10391_v9 = vld [vmem:[%s14227_s8 + $0xef8] sm:$0xf0] }
 0x5fa   : > { %v12117_v16 = vld [vmem:[%s14227_s8 + $0x1c38] sm:$0xf]  ;;  %v11606_v27 = vor.u32 %v13361_v15, %v11605_v7  ;;  %7985 = vmatpush.bf16.msrb.mxu1 %v11094_v14  ;;  %v8858_v7 = vor.u32 %v12665_v62, %v8855_v63  ;;  %v12649_v15 = vld [vmem:[%s14227_s8 + $0x23c] sm:$0xf]  ;;  %v10394_v33 = vor.u32 %v13049_v8, %v10391_v9 }
 0x5fb   : > { %v13489_v18 = vld [vmem:[%s14227_s8 + $0x1c74] sm:$0xf0]  ;;  %7973 = vmatmul.bf16.vlgmr.msrb.gmra.mxu0 %v14413_v59  ;;  %v13033_v23 = vld [vmem:[%s14227_s8 + $0xe3c] sm:$0xf] }
 0x5fc   : > { %v12118_v30 = vor.u32 %v13489_v18, %v12117_v16  ;;  %7998 = vmatpush.bf16.msrb.mxu2 %v11606_v27  ;;  %8017 = vmatpush.bf16.msra.mxu0 %v8986_v31  ;;  %v8791_v16 = vld [vmem:[%s14227_s8 + $0x278] sm:$0xf0]  ;;  %v9818_v27 = vor.u32 %v12905_v37, %v9815_v22  ;;  %v7767_v31 = vadd.f32 %v7766_v25, %v16351_v45 }
 0x5fd   : > { %7986 = vmatmul.bf16.vlgmr.msrb.gmra.mxu1 %v14417_v41  ;;  %v12777_v18 = vld [vmem:[%s14227_s8 + $0x63c] sm:$0xf]  ;;  %v8794_v24 = vor.u32 %v12649_v15, %v8791_v16 }
 0x5fe   : > { %8011 = vmatpush.bf16.msrb.mxu3 %v12118_v30  ;;  %8030 = vmatpush.bf16.msra.mxu1 %v9498_v32  ;;  %v10327_v47 = vld [vmem:[%s14227_s8 + $0xe78] sm:$0xf0]  ;;  %v9306_v14 = vor.u32 %v12777_v18, %v9303_v38  ;;  %v7779_v32 = vpop.f32.mrf.mxu1 }
 0x5ff   : > { %7999 = vmatmul.bf16.vlgmr.msrb.gmra.mxu2 %v14409_v36  ;;  %v12633_v28 = vld [vmem:[%s14227_s8 + $0x1bc] sm:$0xf]  ;;  %v7780_v53 = vadd.f32 %v7779_v32, %v7767_v31 }
 0x600   : > { %8043 = vmatpush.bf16.msra.mxu2 %v10010_v40  ;;  %8018 = vmatpush.bf16.msra.mxu0 %v8922_v58  ;;  %v8727_v29 = vld [vmem:[%s14227_s8 + $0x1f8] sm:$0xf0]  ;;  %v10330_v40 = vor.u32 %v13033_v23, %v10327_v47 }
 0x601   : > { %8012 = vmatmul.bf16.vlgmr.msrb.gmra.mxu3 %v14415_v39  ;;  %v12761_v30 = vld [vmem:[%s14227_s8 + $0x5bc] sm:$0xf]  ;;  %v8730_v54 = vor.u32 %v12633_v28, %v8727_v29 }
 0x602   : > { %8056 = vmatpush.bf16.msra.mxu3 %v10522_v49  ;;  %8031 = vmatpush.bf16.msra.mxu1 %v9434_v60  ;;  %v9239_v42 = vld [vmem:[%s14227_s8 + $0x5f8] sm:$0xf0] }
 0x603   : > { %v12889_v46 = vld [vmem:[%s14227_s8 + $0x9bc] sm:$0xf]  ;;  %v9242_v45 = vor.u32 %v12761_v30, %v9239_v42 }
 0x604   : > { %8044 = vmatpush.bf16.msra.mxu2 %v9946_v55  ;;  %8019 = vmatpush.bf16.msra.mxu0 %v8858_v7  ;;  %v9751_v48 = vld [vmem:[%s14227_s8 + $0x9f8] sm:$0xf0]  ;;  %v7792_v55 = vpop.f32.mrf.mxu2 }
 0x605   : > { %v13017_v49 = vld [vmem:[%s14227_s8 + $0xdbc] sm:$0xf]  ;;  %v9754_v56 = vor.u32 %v12889_v46, %v9751_v48  ;;  %v7793_v2 = vadd.f32 %v7792_v55, %v7780_v53  ;;  %v7807_v53 = vpop.f32.mrf.mxu3 }
 0x606   : > { %8057 = vmatpush.bf16.msra.mxu3 %v10458_v10  ;;  %8032 = vmatpush.bf16.msra.mxu1 %v9370_v11  ;;  %v10263_v50 = vld [vmem:[%s14227_s8 + $0xdf8] sm:$0xf0]  ;;  %v7768_v11 = vpop.f32.mrf.mxu0  ;;  %v7781_v38 = vpop.f32.mrf.mxu1 }
 0x607   : > { %v12617_v61 = vld [vmem:[%s14227_s8 + $0x13c] sm:$0xf]  ;;  %v10266_v62 = vor.u32 %v13017_v49, %v10263_v50  ;;  %v16422_v7 = vadd.f32 %v7805_v3, %v7793_v2 }
 0x608   : > { %8045 = vmatpush.bf16.msra.mxu2 %v9882_v12  ;;  %8020 = vmatpush.bf16.msra.mxu0 %v8794_v24  ;;  %v8663_v58 = vld [vmem:[%s14227_s8 + $0x178] sm:$0xf0] }
 0x609   : > { %v12745_v60 = vld [vmem:[%s14227_s8 + $0x53c] sm:$0xf]  ;;  %v8666_v9 = vor.u32 %v12617_v61, %v8663_v58 }
 0x60a   : > { %8058 = vmatpush.bf16.msra.mxu3 %v10394_v33  ;;  %8033 = vmatpush.bf16.msra.mxu1 %v9306_v14  ;;  %v9175_v63 = vld [vmem:[%s14227_s8 + $0x578] sm:$0xf0] }
 0x60b   : > { %v12873_v0 = vld [vmem:[%s14227_s8 + $0x93c] sm:$0xf]  ;;  %v9178_v12 = vor.u32 %v12745_v60, %v9175_v63 }
 0x60c   : > { %8046 = vmatpush.bf16.msra.mxu2 %v9818_v27  ;;  %v9687_v10 = vld [vmem:[%s14227_s8 + $0x978] sm:$0xf0]  ;;  %8021 = vmatpush.bf16.msra.mxu0 %v8730_v54  ;;  %v7794_v42 = vpop.f32.mrf.mxu2 }
 0x60d   : > { %v13001_v4 = vld [vmem:[%s14227_s8 + $0xd3c] sm:$0xf]  ;;  %v9690_v15 = vor.u32 %v12873_v0, %v9687_v10 }
 0x60e   : > { %8059 = vmatpush.bf16.msra.mxu3 %v10330_v40  ;;  %v10199_v8 = vld [vmem:[%s14227_s8 + $0xd78] sm:$0xf0]  ;;  %8034 = vmatpush.bf16.msra.mxu1 %v9242_v45 }
 0x60f   : > { %v12601_v16 = vld [vmem:[%s14227_s8 + $0xbc] sm:$0xf]  ;;  %v10202_v37 = vor.u32 %v13001_v4, %v10199_v8 }
 0x610   : > { %8047 = vmatpush.bf16.msra.mxu2 %v9754_v56  ;;  %v8599_v18 = vld [vmem:[%s14227_s8 + $0xf8] sm:$0xf0]  ;;  %8022 = vmatpush.bf16.msra.mxu0 %v8666_v9 }
 0x611   : > { %v12729_v33 = vld [vmem:[%s14227_s8 + $0x4bc] sm:$0xf]  ;;  %v8602_v14 = vor.u32 %v12601_v16, %v8599_v18 }
 0x612   : > { %8060 = vmatpush.bf16.msra.mxu3 %v10266_v62  ;;  %v9111_v22 = vld [vmem:[%s14227_s8 + $0x4f8] sm:$0xf0]  ;;  %8035 = vmatpush.bf16.msra.mxu1 %v9178_v12 }
 0x613   : > { %v12857_v23 = vld [vmem:[%s14227_s8 + $0x8bc] sm:$0xf]  ;;  %v9114_v29 = vor.u32 %v12729_v33, %v9111_v22 }
 0x614   : > { %v9623_v47 = vld [vmem:[%s14227_s8 + $0x8f8] sm:$0xf0]  ;;  %8048 = vmatpush.bf16.msra.mxu2 %v9690_v15  ;;  %8023 = vmatpush.bf16.msra.mxu0 %v8602_v14 }
 0x615   : > { %v12985_v24 = vld [vmem:[%s14227_s8 + $0xcbc] sm:$0xf]  ;;  %v9626_v30 = vor.u32 %v12857_v23, %v9623_v47 }
 0x616   : > { %v10135_v25 = vld [vmem:[%s14227_s8 + $0xcf8] sm:$0xf0]  ;;  %8061 = vmatpush.bf16.msra.mxu3 %v10202_v37  ;;  %8036 = vmatpush.bf16.msra.mxu1 %v9114_v29 }
 0x617   : > { %v12585_v27 = vld [vmem:[%s14227_s8 + $0x3c] sm:$0xf]  ;;  %v10138_v46 = vor.u32 %v12985_v24, %v10135_v25 }
 0x618   : > { %v8535_v28 = vld [vmem:[%s14227_s8 + $0x78] sm:$0xf0]  ;;  %8049 = vmatpush.bf16.msra.mxu2 %v9626_v30 }
 0x619   : > { %v12713_v31 = vld [vmem:[%s14227_s8 + $0x43c] sm:$0xf]  ;;  %v8538_v61 = vor.u32 %v12585_v27, %v8535_v28 }
 0x61a   : > { %v9047_v32 = vld [vmem:[%s14227_s8 + $0x478] sm:$0xf0]  ;;  %8062 = vmatpush.bf16.msra.mxu3 %v10138_v46 }
 0x61b   : > { %v12841_v40 = vld [vmem:[%s14227_s8 + $0x83c] sm:$0xf]  ;;  %v9050_v62 = vor.u32 %v12713_v31, %v9047_v32  ;;  %8024 = vmatpush.bf16.msra.mxu0 %v8538_v61 }
 0x61c   : > { %v9559_v48 = vld [vmem:[%s14227_s8 + $0x878] sm:$0xf0] }
 0x61d   : > { %v12969_v49 = vld [vmem:[%s14227_s8 + $0xc3c] sm:$0xf]  ;;  %v9562_v63 = vor.u32 %v12841_v40, %v9559_v48  ;;  %8037 = vmatpush.bf16.msra.mxu1 %v9050_v62 }
 0x61e   : > { %v10071_v50 = vld [vmem:[%s14227_s8 + $0xc78] sm:$0xf0]  ;;  %8025 = vmatmul.bf16.vlgmr.msra.gmra.mxu0 %v14340_v6 }
 0x61f   : > { %v13209_v54 = vld [vmem:[%s14227_s8 + $0x13bc] sm:$0xf]  ;;  %v10074_v2 = vor.u32 %v12969_v49, %v10071_v50  ;;  %8050 = vmatpush.bf16.msra.mxu2 %v9562_v63  ;;  %v7831_v63 = vpop.f32.mrf.mxu1 }
 0x620   : > { %v11031_v45 = vld [vmem:[%s14227_s8 + $0x13f8] sm:$0xf0]  ;;  %8038 = vmatmul.bf16.vlgmr.msra.gmra.mxu1 %v14355_v20 }
 0x621   : > { %v13337_v56 = vld [vmem:[%s14227_s8 + $0x17bc] sm:$0xf]  ;;  %v11034_v3 = vor.u32 %v13209_v54, %v11031_v45  ;;  %8063 = vmatpush.bf16.msra.mxu3 %v10074_v2 }
 0x622   : > { %v11543_v58 = vld [vmem:[%s14227_s8 + $0x17f8] sm:$0xf0]  ;;  %8051 = vmatmul.bf16.vlgmr.msra.gmra.mxu2 %v14338_v5 }
 0x623   : > { %v13465_v60 = vld [vmem:[%s14227_s8 + $0x1bbc] sm:$0xf]  ;;  %v11546_v4 = vor.u32 %v13337_v56, %v11543_v58  ;;  %8069 = vmatpush.bf16.msrb.mxu0 %v11034_v3  ;;  %v7818_v56 = vpop.f32.mrf.mxu0 }
 0x624   : > { %v12055_v55 = vld [vmem:[%s14227_s8 + $0x1bf8] sm:$0xf0]  ;;  %8064 = vmatmul.bf16.vlgmr.msra.gmra.mxu3 %v14353_v19 }
 0x625   : > { %v13593_v0 = vld [vmem:[%s14227_s8 + $0x1fbc] sm:$0xf]  ;;  %v12058_v8 = vor.u32 %v13465_v60, %v12055_v55  ;;  %8082 = vmatpush.bf16.msrb.mxu1 %v11546_v4  ;;  %v7832_v4 = vadd.f32 %v7831_v63, %v7818_v56 }
 0x626   : > { %v12567_v10 = vld [vmem:[%s14227_s8 + $0x1ff8] sm:$0xf0] }
 0x627   : > { %v13193_v9 = vld [vmem:[%s14227_s8 + $0x133c] sm:$0xf]  ;;  %v12570_v15 = vor.u32 %v13593_v0, %v12567_v10  ;;  %8095 = vmatpush.bf16.msrb.mxu2 %v12058_v8 }
 0x628   : > { %v10967_v11 = vld [vmem:[%s14227_s8 + $0x1378] sm:$0xf0] }
 0x629   : > { %v13321_v12 = vld [vmem:[%s14227_s8 + $0x173c] sm:$0xf]  ;;  %v10970_v22 = vor.u32 %v13193_v9, %v10967_v11  ;;  %8108 = vmatpush.bf16.msrb.mxu3 %v12570_v15 }
 0x62a   : > { %v11479_v16 = vld [vmem:[%s14227_s8 + $0x1778] sm:$0xf0] }
 0x62b   : > { %v13449_v18 = vld [vmem:[%s14227_s8 + $0x1b3c] sm:$0xf]  ;;  %v11482_v23 = vor.u32 %v13321_v12, %v11479_v16  ;;  %8070 = vmatpush.bf16.msrb.mxu0 %v10970_v22 }
 0x62c   : > { %v11991_v33 = vld [vmem:[%s14227_s8 + $0x1b78] sm:$0xf0] }
 0x62d   : > { %v13577_v38 = vld [vmem:[%s14227_s8 + $0x1f3c] sm:$0xf]  ;;  %v11994_v47 = vor.u32 %v13449_v18, %v11991_v33  ;;  %8083 = vmatpush.bf16.msrb.mxu1 %v11482_v23 }
 0x62e   : > { %v12503_v37 = vld [vmem:[%s14227_s8 + $0x1f78] sm:$0xf0] }
 0x62f   : > { %v13177_v24 = vld [vmem:[%s14227_s8 + $0x12bc] sm:$0xf]  ;;  %v12506_v27 = vor.u32 %v13577_v38, %v12503_v37  ;;  %8096 = vmatpush.bf16.msrb.mxu2 %v11994_v47  ;;  %v7844_v38 = vpop.f32.mrf.mxu2 }
 0x630   : > { %v10903_v25 = vld [vmem:[%s14227_s8 + $0x12f8] sm:$0xf0] }
 0x631   : > { %v13305_v14 = vld [vmem:[%s14227_s8 + $0x16bc] sm:$0xf]  ;;  %v10906_v40 = vor.u32 %v13177_v24, %v10903_v25  ;;  %8109 = vmatpush.bf16.msrb.mxu3 %v12506_v27  ;;  %v7845_v24 = vadd.f32 %v7844_v38, %v7832_v4  ;;  %v7857_v25 = vpop.f32.mrf.mxu3 }
 0x632   : > { %v11415_v28 = vld [vmem:[%s14227_s8 + $0x16f8] sm:$0xf0] }
 0x633   : > { %v13433_v29 = vld [vmem:[%s14227_s8 + $0x1abc] sm:$0xf]  ;;  %v11418_v5 = vor.u32 %v13305_v14, %v11415_v28  ;;  %8071 = vmatpush.bf16.msrb.mxu0 %v10906_v40 }
 0x634   : > { %v11927_v30 = vld [vmem:[%s14227_s8 + $0x1af8] sm:$0xf0] }
 0x635   : > { %v13561_v31 = vld [vmem:[%s14227_s8 + $0x1ebc] sm:$0xf]  ;;  %v11930_v42 = vor.u32 %v13433_v29, %v11927_v30  ;;  %8084 = vmatpush.bf16.msrb.mxu1 %v11418_v5  ;;  %v7858_v29 = vadd.f32 %v7857_v25, %v7845_v24  ;;  %v7820_v30 = vpop.f32.mrf.mxu0 }
 0x636   : > { %v12439_v32 = vld [vmem:[%s14227_s8 + $0x1ef8] sm:$0xf0] }
 0x637   : > { %v13161_v46 = vld [vmem:[%s14227_s8 + $0x123c] sm:$0xf]  ;;  %v12442_v49 = vor.u32 %v13561_v31, %v12439_v32  ;;  %8097 = vmatpush.bf16.msrb.mxu2 %v11930_v42 }
 0x638   : > { %v10839_v48 = vld [vmem:[%s14227_s8 + $0x1278] sm:$0xf0] }
 0x639   : > { %v13289_v19 = vld [vmem:[%s14227_s8 + $0x163c] sm:$0xf]  ;;  %v10842_v20 = vor.u32 %v13161_v46, %v10839_v48  ;;  %8110 = vmatpush.bf16.msrb.mxu3 %v12442_v49  ;;  %v7833_v46 = vpop.f32.mrf.mxu1 }
 0x63a   : > { %v11351_v50 = vld [vmem:[%s14227_s8 + $0x1678] sm:$0xf0] }
 0x63b   : > { %v13417_v6 = vld [vmem:[%s14227_s8 + $0x1a3c] sm:$0xf]  ;;  %v11354_v61 = vor.u32 %v13289_v19, %v11351_v50  ;;  %8072 = vmatpush.bf16.msrb.mxu0 %v10842_v20 }
 0x63c   : > { %v11863_v53 = vld [vmem:[%s14227_s8 + $0x1a78] sm:$0xf0] }
 0x63d   : > { %v13545_v54 = vld [vmem:[%s14227_s8 + $0x1e3c] sm:$0xf]  ;;  %v11866_v58 = vor.u32 %v13417_v6, %v11863_v53  ;;  %8085 = vmatpush.bf16.msrb.mxu1 %v11354_v61 }
 0x63e   : > { %v12375_v45 = vld [vmem:[%s14227_s8 + $0x1e78] sm:$0xf0] }
 0x63f   : > { %v13145_v60 = vld [vmem:[%s14227_s8 + $0x11bc] sm:$0xf]  ;;  %v12378_v0 = vor.u32 %v13545_v54, %v12375_v45  ;;  %8098 = vmatpush.bf16.msrb.mxu2 %v11866_v58 }
 0x640   : > { %v10775_v55 = vld [vmem:[%s14227_s8 + $0x11f8] sm:$0xf0] }
 0x641   : > { %v13273_v62 = vld [vmem:[%s14227_s8 + $0x15bc] sm:$0xf]  ;;  %v10778_v11 = vor.u32 %v13145_v60, %v10775_v55  ;;  %8111 = vmatpush.bf16.msrb.mxu3 %v12378_v0  ;;  %v7846_v60 = vpop.f32.mrf.mxu2 }
 0x642   : > { %v11287_v10 = vld [vmem:[%s14227_s8 + $0x15f8] sm:$0xf0] }
 0x643   : > { %v13401_v2 = vld [vmem:[%s14227_s8 + $0x19bc] sm:$0xf]  ;;  %v11290_v12 = vor.u32 %v13273_v62, %v11287_v10  ;;  %8073 = vmatpush.bf16.msrb.mxu0 %v10778_v11  ;;  %v7859_v10 = vpop.f32.mrf.mxu3 }
 0x644   : > { %v11799_v3 = vld [vmem:[%s14227_s8 + $0x19f8] sm:$0xf0] }
 0x645   : > { %v13529_v8 = vld [vmem:[%s14227_s8 + $0x1dbc] sm:$0xf]  ;;  %v11802_v15 = vor.u32 %v13401_v2, %v11799_v3  ;;  %8086 = vmatpush.bf16.msrb.mxu1 %v11290_v12  ;;  %v7870_v12 = vpop.f32.mrf.mxu0 }
 0x646   : > { %v12311_v9 = vld [vmem:[%s14227_s8 + $0x1df8] sm:$0xf0] }
 0x647   : > { %v13129_v16 = vld [vmem:[%s14227_s8 + $0x113c] sm:$0xf]  ;;  %v12314_v37 = vor.u32 %v13529_v8, %v12311_v9  ;;  %8099 = vmatpush.bf16.msrb.mxu2 %v11802_v15  ;;  %v7871_v15 = vadd.f32 %v7870_v12, %v7858_v29 }
 0x648   : > { %v10711_v18 = vld [vmem:[%s14227_s8 + $0x1178] sm:$0xf0] }
 0x649   : > { %v13257_v33 = vld [vmem:[%s14227_s8 + $0x153c] sm:$0xf]  ;;  %v10714_v28 = vor.u32 %v13129_v16, %v10711_v18  ;;  %8112 = vmatpush.bf16.msrb.mxu3 %v12314_v37  ;;  %v7883_v16 = vpop.f32.mrf.mxu1 }
 0x64a   : > { %v11223_v22 = vld [vmem:[%s14227_s8 + $0x1578] sm:$0xf0]  ;;  %v7884_v18 = vadd.f32 %v7883_v16, %v7871_v15 }
 0x64b   : > { %v13385_v23 = vld [vmem:[%s14227_s8 + $0x193c] sm:$0xf]  ;;  %v11226_v31 = vor.u32 %v13257_v33, %v11223_v22  ;;  %8074 = vmatpush.bf16.msrb.mxu0 %v10714_v28  ;;  %v7896_v33 = vpop.f32.mrf.mxu2  ;;  %v7909_v37 = vpop.f32.mrf.mxu3 }
 0x64c   : > { %v11735_v47 = vld [vmem:[%s14227_s8 + $0x1978] sm:$0xf0]  ;;  %v7897_v38 = vadd.f32 %v7896_v33, %v7884_v18 }
 0x64d   : > { %v13513_v14 = vld [vmem:[%s14227_s8 + $0x1d3c] sm:$0xf]  ;;  %v11738_v32 = vor.u32 %v13385_v23, %v11735_v47  ;;  %8087 = vmatpush.bf16.msrb.mxu1 %v11226_v31  ;;  %v7872_v23 = vpop.f32.mrf.mxu0 }
 0x64e   : > { %v12247_v27 = vld [vmem:[%s14227_s8 + $0x1d78] sm:$0xf0]  ;;  %v16512_v22 = vadd.f32 %v7909_v37, %v7897_v38 }
 0x64f   : > { %v13113_v40 = vld [vmem:[%s14227_s8 + $0x10bc] sm:$0xf]  ;;  %v12250_v48 = vor.u32 %v13513_v14, %v12247_v27  ;;  %8100 = vmatpush.bf16.msrb.mxu2 %v11738_v32 }
 0x650   : > { %v10647_v5 = vld [vmem:[%s14227_s8 + $0x10f8] sm:$0xf0] }
 0x651   : > { %v13241_v42 = vld [vmem:[%s14227_s8 + $0x14bc] sm:$0xf]  ;;  %v10650_v54 = vor.u32 %v13113_v40, %v10647_v5  ;;  %8113 = vmatpush.bf16.msrb.mxu3 %v12250_v48  ;;  %v7885_v47 = vpop.f32.mrf.mxu1 }
 0x652   : > { %v11159_v19 = vld [vmem:[%s14227_s8 + $0x14f8] sm:$0xf0] }
 0x653   : > { %v13369_v49 = vld [vmem:[%s14227_s8 + $0x18bc] sm:$0xf]  ;;  %v11162_v45 = vor.u32 %v13241_v42, %v11159_v19  ;;  %8075 = vmatpush.bf16.msrb.mxu0 %v10650_v54  ;;  %v7898_v24 = vpop.f32.mrf.mxu2  ;;  %v7911_v25 = vpop.f32.mrf.mxu3 }
 0x654   : > { %v11671_v50 = vld [vmem:[%s14227_s8 + $0x18f8] sm:$0xf0] }
 0x655   : > { %v13497_v6 = vld [vmem:[%s14227_s8 + $0x1cbc] sm:$0xf]  ;;  %v11674_v20 = vor.u32 %v13369_v49, %v11671_v50  ;;  %8088 = vmatpush.bf16.msrb.mxu1 %v11162_v45 }
 0x656   : > { %v12183_v53 = vld [vmem:[%s14227_s8 + $0x1cf8] sm:$0xf0] }
 0x657   : > { %v13097_v56 = vld [vmem:[%s14227_s8 + $0x103c] sm:$0xf]  ;;  %v12186_v55 = vor.u32 %v13497_v6, %v12183_v53  ;;  %8101 = vmatpush.bf16.msrb.mxu2 %v11674_v20 }
 0x658   : > { %v10583_v61 = vld [vmem:[%s14227_s8 + $0x1078] sm:$0xf0] }
 0x659   : > { %v13225_v58 = vld [vmem:[%s14227_s8 + $0x143c] sm:$0xf]  ;;  %v10586_v4 = vor.u32 %v13097_v56, %v10583_v61  ;;  %8114 = vmatpush.bf16.msrb.mxu3 %v12186_v55  ;;  %v7935_v14 = vpop.f32.mrf.mxu1 }
 0x65a   : > { %v11095_v62 = vld [vmem:[%s14227_s8 + $0x1478] sm:$0xf0] }
 0x65b   : > { %v13353_v63 = vld [vmem:[%s14227_s8 + $0x183c] sm:$0xf]  ;;  %v11098_v8 = vor.u32 %v13225_v58, %v11095_v62  ;;  %8076 = vmatpush.bf16.msrb.mxu0 %v10586_v4  ;;  %v7948_v27 = vpop.f32.mrf.mxu2  ;;  %v7961_v28 = vpop.f32.mrf.mxu3 }
 0x65c   : > { %v11607_v0 = vld [vmem:[%s14227_s8 + $0x1878] sm:$0xf0] }
 0x65d   : > { %v13481_v2 = vld [vmem:[%s14227_s8 + $0x1c3c] sm:$0xf]  ;;  %v11610_v9 = vor.u32 %v13353_v63, %v11607_v0  ;;  %8089 = vmatpush.bf16.msrb.mxu1 %v11098_v8 }
 0x65e   : > { %v12119_v3 = vld [vmem:[%s14227_s8 + $0x1c78] sm:$0xf0]  ;;  %8077 = vmatmul.bf16.vlgmr.msrb.gmra.mxu0 %v14413_v59  ;;  %v7922_v59 = vpop.f32.mrf.mxu0 }
 0x65f   : > { %v12122_v11 = vor.u32 %v13481_v2, %v12119_v3  ;;  %8102 = vmatpush.bf16.msrb.mxu2 %v11610_v9 }
 0x660   : > { %8090 = vmatmul.bf16.vlgmr.msrb.gmra.mxu1 %v14417_v41  ;;  %v7936_v41 = vadd.f32 %v7935_v14, %v7922_v59 }
 0x661   : > { %8115 = vmatpush.bf16.msrb.mxu3 %v12122_v11  ;;  %v7937_v29 = vpop.f32.mrf.mxu1 }
 0x662   : > { %8103 = vmatmul.bf16.vlgmr.msrb.gmra.mxu2 %v14409_v36  ;;  %v7949_v36 = vadd.f32 %v7948_v27, %v7936_v41 }
 0x663   : > { %v7950_v31 = vpop.f32.mrf.mxu2  ;;  %v7963_v32 = vpop.f32.mrf.mxu3 }
 0x664   : > { %8116 = vmatmul.bf16.vlgmr.msrb.gmra.mxu3 %v14415_v39  ;;  %v7962_v39 = vadd.f32 %v7961_v28, %v7949_v36 }
 0x666   : > { %v7924_v30 = vpop.f32.mrf.mxu0 }
 0x678   : > { %v7974_v40 = vpop.f32.mrf.mxu0 }
 0x679   : > { %v7975_v5 = vadd.f32 %v7974_v40, %v7962_v39 }
 0x67a   : > { %v7987_v42 = vpop.f32.mrf.mxu1 }
 0x67b   : > { %v7988_v46 = vadd.f32 %v7987_v42, %v7975_v5 }
 0x680   : > { %v7976_v6 = vpop.f32.mrf.mxu0 }
 0x682   : > { %v8000_v48 = vpop.f32.mrf.mxu2  ;;  %v7989_v53 = vpop.f32.mrf.mxu1 }
 0x683   : > { %v8001_v19 = vadd.f32 %v8000_v48, %v7988_v46 }
 0x684   : > { %v8013_v49 = vpop.f32.mrf.mxu3 }
 0x685   : > { %v16514_v50 = vadd.f32 %v8013_v49, %v8001_v19 }
 0x68a   : > { %v8002_v54 = vpop.f32.mrf.mxu2 }
 0x68c   : > { %v8015_v45 = vpop.f32.mrf.mxu3 }
 0x69b   : > { %v8026_v20 = vpop.f32.mrf.mxu0 }
 0x69d   : > { %v8039_v56 = vpop.f32.mrf.mxu1 }
 0x69e   : > { %v8040_v0 = vadd.f32 %v8039_v56, %v8026_v20 }
 0x6a3   : > { %v8028_v60 = vpop.f32.mrf.mxu0 }
 0x6a5   : > { %v8052_v61 = vpop.f32.mrf.mxu2  ;;  %v8041_v55 = vpop.f32.mrf.mxu1 }
 0x6a6   : > { %v8053_v10 = vadd.f32 %v8052_v61, %v8040_v0 }
 0x6a7   : > { %v8065_v58 = vpop.f32.mrf.mxu3 }
 0x6a8   : > { %v8066_v2 = vadd.f32 %v8065_v58, %v8053_v10 }
 0x6ad   : > { %v8054_v62 = vpop.f32.mrf.mxu2 }
 0x6af   : > { %v8067_v63 = vpop.f32.mrf.mxu3 }
 0x6db   : > { %v8078_v3 = vpop.f32.mrf.mxu0 }
 0x6dc   : > { %v8079_v8 = vadd.f32 %v8078_v3, %v8066_v2 }
 0x6dd   : > { %v8091_v4 = vpop.f32.mrf.mxu1 }
 0x6de   : > { %v8092_v9 = vadd.f32 %v8091_v4, %v8079_v8 }
 0x6e3   : > { %v8080_v16 = vpop.f32.mrf.mxu0 }
 0x6e5   : > { %v8104_v11 = vpop.f32.mrf.mxu2  ;;  %v8093_v18 = vpop.f32.mrf.mxu1 }
 0x6e6   : > { %v8105_v12 = vadd.f32 %v8104_v11, %v8092_v9 }
 0x6e7   : > { %v8117_v15 = vpop.f32.mrf.mxu3 }
 0x6e8   : > { %v16516_v33 = vadd.f32 %v8117_v15, %v8105_v12 }
 0x6eb   : > { %8124 = sbr.rel (%p12571_p6) target bundleno = 1788 (0x6fc), region = 48 }
 0x6ed   : > { %v8106_v38 = vpop.f32.mrf.mxu2 }
 0x6ef   : > { %v8119_v37 = vpop.f32.mrf.mxu3 }
 0x6f0   : > { %v8141_v23 = vrot.slane %v14871_v35, 7  ;;  %v8142_v47 = vrot.slane %v15012_v34, 6  ;;  %v8143_v24 = vrot.slane %v15153_v43, 5  ;;  %v8144_v25 = vrot.slane %v15294_v52, 4 }
 0x6f1   : > { %v8145_v59 = vrot.slane %v15435_v1, 3  ;;  %v8146_v14 = vrot.slane %v15576_v21, 2  ;;  %v8147_v41 = vrot.slane %v15717_v57, 1  ;;  %vm8155_vm0 = vcmask 1040384  }
 0x6f2   : > { %v8156_v27 = vsel %vm8155_vm0, %v14730_v44, %v8141_v23  ;;  %vm8157_vm1 = vcmask 1042434   ;;  %vm8159_vm2 = vcmask 1041408   ;;  %vm8161_vm3 = vcmask 1044484  }
 0x6f3   : > { %v8158_v36 = vsel %vm8157_vm1, %v8142_v47, %v8143_v24  ;;  %v8162_v28 = vsel %vm8161_vm3, %v8144_v25, %v8145_v59  ;;  %vm8163_vm4 = vcmask 1046534   ;;  %vm8165_vm5 = vcmask 1045508  }
 0x6f4   : > { %v8160_v39 = vsel %vm8159_vm2, %v8156_v27, %v8158_v36  ;;  %v8164_v30 = vsel %vm8163_vm4, %v8146_v14, %v8147_v41  ;;  %vm8167_vm6 = vcmask 1043456   ;;  %v8148_v29 = vrot.slane %v15999_v51, 7 }
 0x6f5   : > { %v8166_v31 = vsel %vm8165_vm5, %v8162_v28, %v8164_v30  ;;  %v8149_v32 = vrot.slane %v16140_v26, 6  ;;  %v8150_v40 = vrot.slane %v16281_v17, 5  ;;  %v8151_v5 = vrot.slane %v16422_v7, 4 }
 0x6f6   : > { %v8168_v42 = vsel %vm8167_vm6, %v8160_v39, %v8166_v31  ;;  %v8152_v46 = vrot.slane %v16512_v22, 3  ;;  %v8153_v48 = vrot.slane %v16514_v50, 2  ;;  %v8154_v19 = vrot.slane %v16516_v33, 1 }
 0x6f7   : > { %8178 = vst [vmem:[%s16519_s21] sm:$0xff] %v8168_v42  ;;  %v8169_v49 = vsel %vm8155_vm0, %v15858_v13, %v8148_v29  ;;  %v8170_v6 = vsel %vm8157_vm1, %v8149_v32, %v8150_v40 }
 0x6f8   : > { %v8171_v53 = vsel %vm8159_vm2, %v8169_v49, %v8170_v6  ;;  %v8172_v54 = vsel %vm8161_vm3, %v8151_v5, %v8152_v46  ;;  %v8173_v45 = vsel %vm8163_vm4, %v8153_v48, %v8154_v19 }
 0x6f9   : > { %v8174_v20 = vsel %vm8165_vm5, %v8172_v54, %v8173_v45 }
 0x6fa   : > { %v8175_v56 = vsel %vm8167_vm6, %v8171_v53, %v8174_v20 }
 0x6fb   : > { %8179 = vst [vmem:[%s16519_s21 + $0x8] sm:$0xff] %v8175_v56 }
 0x6fc PF: > { %s16730_s4 = sld [smem:[#allocation13_spill]] }
 0x702   : > { %p8180_p11 = scmp.gt.s32.totalorder %s16730_s4, 0  ;;  %p8181_p3 = scmp.lt.s32.totalorder %s16730_s4, 3 }
 0x704   : > { %p8182_p4 = pnand %p8181_p3, %p8180_p11 }
 0x706   : > { %8185 = sbr.rel (%p8182_p4) target bundleno = 1817 (0x719), region = 52 }
 0x70b   : > { %v8204_v61 = vrot.slane %v14871_v35, 7  ;;  %v8205_v58 = vrot.slane %v15012_v34, 6  ;;  %v8206_v60 = vrot.slane %v15153_v43, 5  ;;  %v8207_v55 = vrot.slane %v15294_v52, 4  ;;  %v8186_v4 = vld [vmem:[%s16519_s21] sm:$0xff]  ;;  %v8187_v14 = vld [vmem:[%s16519_s21 + $0x8] sm:$0xff] }
 0x70c   : > { %v8208_v62 = vrot.slane %v15435_v1, 3  ;;  %v8209_v63 = vrot.slane %v15576_v21, 2  ;;  %v8210_v0 = vrot.slane %v15717_v57, 1  ;;  %vm8218_vm7 = vcmask 1040384  }
 0x70d   : > { %v8219_v10 = vsel %vm8218_vm7, %v14730_v44, %v8204_v61  ;;  %vm8220_vm8 = vcmask 1042434   ;;  %vm8222_vm9 = vcmask 1041408   ;;  %vm8224_vm10 = vcmask 1044484  }
 0x70e   : > { %v8221_v2 = vsel %vm8220_vm8, %v8205_v58, %v8206_v60  ;;  %v8225_v3 = vsel %vm8224_vm10, %v8207_v55, %v8208_v62  ;;  %vm8226_vm11 = vcmask 1046534   ;;  %vm8228_vm12 = vcmask 1045508  }
 0x70f   : > { %v8223_v8 = vsel %vm8222_vm9, %v8219_v10, %v8221_v2  ;;  %v8227_v9 = vsel %vm8226_vm11, %v8209_v63, %v8210_v0  ;;  %vm8230_vm13 = vcmask 1043456   ;;  %v8211_v11 = vrot.slane %v15999_v51, 7 }
 0x710   : > { %v8229_v12 = vsel %vm8228_vm12, %v8225_v3, %v8227_v9  ;;  %v8212_v15 = vrot.slane %v16140_v26, 6  ;;  %v8213_v16 = vrot.slane %v16281_v17, 5  ;;  %v8214_v18 = vrot.slane %v16422_v7, 4 }
 0x711   : > { %v8231_v38 = vsel %vm8230_vm13, %v8223_v8, %v8229_v12  ;;  %v8215_v37 = vrot.slane %v16512_v22, 3  ;;  %v8216_v23 = vrot.slane %v16514_v50, 2  ;;  %v8217_v47 = vrot.slane %v16516_v33, 1 }
 0x712   : > { %v8241_v24 = vadd.f32 %v8231_v38, %v8186_v4  ;;  %v8232_v25 = vsel %vm8218_vm7, %v15858_v13, %v8211_v11  ;;  %v8233_v59 = vsel %vm8220_vm8, %v8212_v15, %v8213_v16 }
 0x713   : > { %v8234_v41 = vsel %vm8222_vm9, %v8232_v25, %v8233_v59  ;;  %v8235_v27 = vsel %vm8224_vm10, %v8214_v18, %v8215_v37  ;;  %v8236_v36 = vsel %vm8226_vm11, %v8216_v23, %v8217_v47 }
 0x714   : > { %8243 = vst [vmem:[%s16519_s21] sm:$0xff] %v8241_v24  ;;  %v8237_v28 = vsel %vm8228_vm12, %v8235_v27, %v8236_v36 }
 0x715   : > { %v8238_v39 = vsel %vm8230_vm13, %v8234_v41, %v8237_v28 }
 0x716   : > { %v8242_v30 = vadd.f32 %v8238_v39, %v8187_v14 }
 0x718   : > { %8244 = vst [vmem:[%s16519_s21 + $0x8] sm:$0xff] %v8242_v30 }
 0x719 PF: > { %s16731_s7 = sld [smem:[#allocation13_spill]] }
 0x71f   : > { %p12572_p7 = scmp.ne.s32.totalorder %s16731_s7, 3 }
 0x721   : > { %8248 = sbr.rel (%p12572_p7) target bundleno = 1848 (0x738), region = 56 }
 0x726   : > { %v8267_v29 = vrot.slane %v14871_v35, 7  ;;  %v8268_v31 = vrot.slane %v15012_v34, 6  ;;  %v8269_v32 = vrot.slane %v15153_v43, 5  ;;  %v8270_v40 = vrot.slane %v15294_v52, 4  ;;  %v8249_v43 = vld [vmem:[%s16519_s21] sm:$0xff] }
 0x727   : > { %v8271_v5 = vrot.slane %v15435_v1, 3  ;;  %v8272_v42 = vrot.slane %v15576_v21, 2  ;;  %v8273_v46 = vrot.slane %v15717_v57, 1  ;;  %vm8281_vm14 = vcmask 1040384   ;;  %v8306_v53 = vld [vmem:[%s249_s26] sm:$0xff] }
 0x728   : > { %v8282_v48 = vsel %vm8281_vm14, %v14730_v44, %v8267_v29  ;;  %vm8283_vm15 = vcmask 1042434   ;;  %vm8285_vm0 = vcmask 1041408   ;;  %vm8287_vm1 = vcmask 1044484  }
 0x729   : > { %v8284_v35 = vsel %vm8283_vm15, %v8268_v31, %v8269_v32  ;;  %v8288_v34 = vsel %vm8287_vm1, %v8270_v40, %v8271_v5  ;;  %vm8289_vm2 = vcmask 1046534   ;;  %vm8291_vm3 = vcmask 1045508  }
 0x72a   : > { %v8286_v52 = vsel %vm8285_vm0, %v8282_v48, %v8284_v35  ;;  %v8290_v1 = vsel %vm8289_vm2, %v8272_v42, %v8273_v46  ;;  %vm8293_vm4 = vcmask 1043456   ;;  %v8274_v21 = vrot.slane %v15999_v51, 7 }
 0x72b   : > { %v8292_v44 = vsel %vm8291_vm3, %v8288_v34, %v8290_v1  ;;  %v8275_v57 = vrot.slane %v16140_v26, 6  ;;  %v8276_v19 = vrot.slane %v16281_v17, 5  ;;  %v8277_v49 = vrot.slane %v16422_v7, 4  ;;  %v8250_v7 = vld [vmem:[%s16519_s21 + $0x8] sm:$0xff] }
 0x72c   : > { %v8294_v6 = vsel %vm8293_vm4, %v8286_v52, %v8292_v44  ;;  %v8278_v54 = vrot.slane %v16512_v22, 3  ;;  %v8279_v45 = vrot.slane %v16514_v50, 2  ;;  %v8280_v51 = vrot.slane %v16516_v33, 1  ;;  %v8307_v33 = vld [vmem:[%s249_s26 + $0x8] sm:$0xff] }
 0x72d   : > { %v8304_v20 = vadd.f32 %v8294_v6, %v8249_v43  ;;  %v8295_v26 = vsel %vm8281_vm14, %v15858_v13, %v8274_v21  ;;  %v8296_v17 = vsel %vm8283_vm15, %v8275_v57, %v8276_v19 }
 0x72e   : > { %v8297_v56 = vsel %vm8285_vm0, %v8295_v26, %v8296_v17  ;;  %v8298_v61 = vsel %vm8287_vm1, %v8277_v49, %v8278_v54  ;;  %v8299_v58 = vsel %vm8289_vm2, %v8279_v45, %v8280_v51 }
 0x72f   : > { %v8308_v22 = vadd.f32 %v8306_v53, %v8304_v20  ;;  %v8300_v60 = vsel %vm8291_vm3, %v8298_v61, %v8299_v58 }
 0x730   : > { %v8301_v50 = vsel %vm8293_vm4, %v8297_v56, %v8300_v60 }
 0x731   : > { %v8310_v55 = vmax.f32 %v8308_v22, 0.0  ;;  %v8305_v62 = vadd.f32 %v8301_v50, %v8250_v7 }
 0x733   : > { %8312 = vst [vmem:[%s16519_s21] sm:$0xff] %v8310_v55  ;;  %v8309_v13 = vadd.f32 %v8307_v33, %v8305_v62 }
 0x735   : > { %v8311_v63 = vmax.f32 %v8309_v13, 0.0 }
 0x737   : > { %8313 = vst [vmem:[%s16519_s21 + $0x8] sm:$0xff] %v8311_v63 }
 0x738 PF: > { %s16732_s27 = sld [smem:[#allocation14_spill]]  ;;  %s8327_s0 = sshll.u32 %s16519_s21, 4  ;;  %s8328_s0 = int_to_ptr.vmem [resolvable:$true] %s8327_s0 }
 0x739   : > { %s16733_s28 = sld [smem:[#allocation22_spill]]  ;;  %s8315_s2 = scalar_lea.sflag [#allocation4], %s247_s5 }
 0x73e   : > { %s12574_s15 = sshll.u32 %s16732_s27, 4 }
 0x73f   : > { %s8325_s22 = scalar_lea.hbm %s16733_s28, %s12574_s15  ;;  %s13850_s9 = scalar_lea.hbm %s16733_s28, 32 }
 0x740   : > { %s8329_s3 = sshll.u32 %s8325_s22, 4  ;;  %s8330_s3 = int_to_ptr.hbm [resolvable:$true] %s8329_s3 }
 0x741   : > { %s13844_s30 = sshra.s32 %s8330_s3, 4  ;;  %s13845_s30 = int_to_ptr.hbm [resolvable:$true] %s13844_s30 }
 0x742   : > { %s13846_s8 = scalar_lea.hbm %s13845_s30, 16  ;;  %p13851_p13 = scmp.lt.s32.totalorder %s13845_s30, %s16733_s28 }
 0x743   : > { %p13847_p9 = scmp.ne.s32.totalorder %s13845_s30, %s13846_s8  ;;  %p13852_p0 = scmp.lt.s32.totalorder %s13850_s9, %s13846_s8 }
 0x745   : > { %p13848_p10 = pnand %p13847_p9, %p14199_p5  ;;  %p13853_p2 = por %p13852_p0, %p13851_p13 }
 0x747   : > { %p13849_p12 = pneg %p13848_p10 }
 0x749   : > { %p13854_p1 = pnand %p13853_p2, %p13849_p12 }
 0x74b   : > { %13857 = shalt.err (!%p13854_p1)
}
 0x74c   : > { %13608 = dma.vmem_to_hbm [thread:$0]  (%p14199_p5), %s8328_s0, 256, %s8330_s3, %s8315_s2  }
 0x74d PF: > { %p13625_p6 = scmp.ge.s32.totalorder %s13984_s25, 2  ;;  %s8341_s5 = sand.u32 1, %s13932_s12  }
 0x74e   : > { %s8342_s21 = scalar_lea.sflag [#allocation4], %s8341_s5 }
 0x74f   : > { %p13621_p11 = pnand %p13625_p6, %p14203_p8 }
 0x751   : > { %p13622_p3 = pneg %p13621_p11 }
 0x753   : > { %13927 = dma.done.wait (%p13622_p3), %s8342_s21, 256  }
 0x754   : > { %13929 = vsyncadd (%p13622_p3), %s8342_s21, 4294967040  ;;  %s22_s25 = sadd.s32 1, %s13984_s25   ;;  %s16735_s23 = sld [smem:[#allocation18_spill]] }
 0x755   : > { %p16651_p4 = scmp.ge.s32.totalorder %s22_s25, 10   ;;  %s16736_s21 = sld [smem:[#allocation15_spill]] }
 0x756   : > { %s16737_s10 = sld [smem:[#allocation16_spill]]  ;;  %s16739_s12 = smov %s13936_s13 }
 0x757   : > { %s16738_s1 = sld [smem:[#allocation17_spill]]  ;;  %s16740_s13 = smov %s13940_s14 }
 0x758   : > { %s16741_s14 = smov %s14182_s18  ;;  %s16742_s15 = smov %s13948_s16 }
 0x759   : > { %s16743_s16 = smov %s13952_s17  ;;  %s16744_s17 = smov %s14113_s11 }
 0x75a   : > { %s16745_s18 = smov %s13960_s19  ;;  %s16746_s19 = smov %s13964_s20 }
 0x75b   : > { %s16747_s20 = smov %s16735_s23  ;;  %s16748_s22 = smov %s13980_s24 }
 0x75c   : > { %s16749_s23 = smov %s16737_s10  ;;  %21 = sbr.rel (!%p16651_p4) target bundleno = 17 (0x11), region = 113 }
 0x75d   : > { %s16750_s24 = smov %s16738_s1 }
 0x761   :  { %8348 = vsyncpa [#allocation3], 1 }
 0x762   :  { %8350 = vsyncpa [#allocation3 + $0x1], 1 }
 0x763   :  { %8351 = vsyncpa [#allocation6], 1 }
 0x764   :  { %8353 = vsyncpa [#allocation6 + $0x1], 1 }
 0x765   :  { %8354 = vsyncpa [#allocation4], 1 }
 0x766   :  { %8356 = vsyncpa [#allocation4 + $0x1], 1 }

</bundles_post_ra>
